<compile_context>
chip_gen: v7x
topology: tpu7x:2x2x1
jax: 0.10.0
libtpu: 0.0.40
codegen_flags: <defaults>
</compile_context>

<pallas_src>
import functools

import numpy as np

import jax
import jax.numpy as jnp
from jax.experimental import pallas as pl
from jax.experimental.pallas import tpu as pltpu


def _round_up(x, m):
    return ((x + m - 1) // m) * m


def _pick_tm(m):
    # Prefer tiles that divide M exactly; cap at 256 so big matmuls keep >=2
    # grid steps on the parallel M axis (v7x has 2 TensorCores).
    for tm in (256, 128):
        if m % tm == 0:
            return tm
    return min(256, _round_up(m, 8))


def _pick_tk(k):
    # Single full-K block for small K; otherwise a 128-aligned divisor so the
    # VMEM footprint is bounded independently of K (v7x has only 64 MiB VMEM).
    if k <= 1024 or k % 128 != 0:
        return k
    for tk in (512, 384, 256, 128):
        if k % tk == 0:
            return tk
    return k


# ---------------------------------------------------------------------------
# Pallas kernels
# ---------------------------------------------------------------------------
def _mm_kernel(x_ref, w_ref, s_ref, b_ref, o_ref, acc_ref, *, negative_slope):
    """K-tiled matmul with f32 VMEM accumulator + affine + optional LeakyReLU."""
    @pl.when(pl.program_id(2) == 0)
    def _():
        acc_ref[...] = jnp.zeros_like(acc_ref)

    acc_ref[...] += jnp.dot(x_ref[...], w_ref[...],
                            preferred_element_type=jnp.float32)

    @pl.when(pl.program_id(2) == pl.num_programs(2) - 1)
    def _():
        acc = acc_ref[...] * s_ref[...] + b_ref[...]
        if negative_slope is not None:
            acc = jnp.where(acc >= 0.0, acc, acc * negative_slope)
        o_ref[...] = acc.astype(o_ref.dtype)


def _mm2_kernel(x1_ref, w1_ref, x2_ref, w2_ref, s_ref, b_ref, o_ref, *,
                negative_slope):
    """Two-input fused matmul: act((x1@w1 + x2@w2) * scale + bias).
    Used for conv_2 so the channel concat never hits HBM."""
    acc = jnp.dot(x1_ref[...], w1_ref[...], preferred_element_type=jnp.float32)
    acc += jnp.dot(x2_ref[...], w2_ref[...], preferred_element_type=jnp.float32)
    acc = acc * s_ref[...] + b_ref[...]
    if negative_slope is not None:
        acc = jnp.where(acc >= 0.0, acc, acc * negative_slope)
    o_ref[...] = acc.astype(o_ref.dtype)


# ---------------------------------------------------------------------------
# Pallas wrappers
# ---------------------------------------------------------------------------
def fused_matmul(x, w, scale, bias, negative_slope=None, out_dtype=jnp.float32):
    """act((x @ w) * scale + bias).  x:(M,K)  w:(K,N)  scale,bias:(N,)."""
    M, K = x.shape
    Kw, N = w.shape
    assert K == Kw
    Np = _round_up(N, 128)                  # lane-dense output
    tn = 256 if Np % 256 == 0 else 128
    tm = _pick_tm(M)
    tk = _pick_tk(K)
    nk = K // tk

    x = x.astype(jnp.bfloat16)              # bf16 in, f32 accumulate
    w = w.astype(jnp.bfloat16)
    scale = scale.astype(jnp.float32)
    bias = bias.astype(jnp.float32)
    if Np != N:
        w = jnp.pad(w, ((0, 0), (0, Np - N)))
        scale = jnp.pad(scale, (0, Np - N))
        bias = jnp.pad(bias, (0, Np - N))

    out = pl.pallas_call(
        functools.partial(_mm_kernel, negative_slope=negative_slope),
        out_shape=jax.ShapeDtypeStruct((M, Np), out_dtype),
        grid_spec=pltpu.PrefetchScalarGridSpec(
            num_scalar_prefetch=0,
            grid=(pl.cdiv(M, tm), Np // tn, nk),
            in_specs=[
                pl.BlockSpec((tm, tk), lambda m, n, k: (m, k)),   # patches
                pl.BlockSpec((tk, tn), lambda m, n, k: (k, n)),   # weights
                pl.BlockSpec((1, tn), lambda m, n, k: (0, n)),    # scale
                pl.BlockSpec((1, tn), lambda m, n, k: (0, n)),    # bias
            ],
            out_specs=pl.BlockSpec((tm, tn), lambda m, n, k: (m, n)),
            scratch_shapes=[pltpu.VMEM((tm, tn), jnp.float32)],
        ),
        compiler_params=pltpu.CompilerParams(
            dimension_semantics=("parallel", "parallel", "arbitrary")),
    )(x, w, scale.reshape(1, Np), bias.reshape(1, Np))
    return out if Np == N else out[:, :N]


def fused_matmul2(x1, w1, x2, w2, scale, bias, negative_slope=None,
                  out_dtype=jnp.float32):
    """act((x1 @ w1 + x2 @ w2) * scale + bias) -- concat fused in-kernel."""
    M, K1 = x1.shape
    M2, K2 = x2.shape
    assert M == M2
    N = w1.shape[1]
    assert w2.shape[1] == N
    Np = _round_up(N, 128)
    tn = 256 if Np % 256 == 0 else 128
    tm = _pick_tm(M)

    x1 = x1.astype(jnp.bfloat16)
    x2 = x2.astype(jnp.bfloat16)
    w1 = w1.astype(jnp.bfloat16)
    w2 = w2.astype(jnp.bfloat16)
    scale = scale.astype(jnp.float32)
    bias = bias.astype(jnp.float32)
    if Np != N:
        w1 = jnp.pad(w1, ((0, 0), (0, Np - N)))
        w2 = jnp.pad(w2, ((0, 0), (0, Np - N)))
        scale = jnp.pad(scale, (0, Np - N))
        bias = jnp.pad(bias, (0, Np - N))

    out = pl.pallas_call(
        functools.partial(_mm2_kernel, negative_slope=negative_slope),
        out_shape=jax.ShapeDtypeStruct((M, Np), out_dtype),
        grid_spec=pltpu.PrefetchScalarGridSpec(
            num_scalar_prefetch=0,
            grid=(pl.cdiv(M, tm), Np // tn),
            in_specs=[
                pl.BlockSpec((tm, K1), lambda m, n: (m, 0)),
                pl.BlockSpec((K1, tn), lambda m, n: (0, n)),
                pl.BlockSpec((tm, K2), lambda m, n: (m, 0)),
                pl.BlockSpec((K2, tn), lambda m, n: (0, n)),
                pl.BlockSpec((1, tn), lambda m, n: (0, n)),
                pl.BlockSpec((1, tn), lambda m, n: (0, n)),
            ],
            out_specs=pl.BlockSpec((tm, tn), lambda m, n: (m, n)),
        ),
        compiler_params=pltpu.CompilerParams(
            dimension_semantics=("parallel", "parallel")),
    )(x1, w1, x2, w2, scale.reshape(1, Np), bias.reshape(1, Np))
    return out if Np == N else out[:, :N]


# ---------------------------------------------------------------------------
# im2col / upsample helpers (trace-time glue, fused by XLA under jit)
# ---------------------------------------------------------------------------
def _im2col_from_padded(xpad, H, W, C, ksize, dilation, pad_total):
    """Patches from an NHWC tensor pre-padded by `pad_total` on each spatial
    side; 'same' conv semantics (pad = dilation*(k//2)).  Column order is
    cin-major, tap-minor -- matches PyTorch's w.reshape(Cout, Cin*k*k)."""
    p = dilation * (ksize // 2)
    off = pad_total - p
    taps = []
    for ky in range(ksize):
        for kx in range(ksize):
            ys = off + ky * dilation
            xs = off + kx * dilation
            taps.append(xpad[:, ys:ys + H, xs:xs + W, :])
    pm = jnp.stack(taps, axis=-1)                        # (N, H, W, C, k*k)
    return pm.reshape(-1, C * ksize * ksize)


def _interp_idx(in_size, out_size):
    """align_corners=True index/fraction tables (static numpy)."""
    if in_size == 1:
        z = np.zeros(out_size, np.int32)
        return z, z, np.zeros(out_size, np.float32)
    pos = np.arange(out_size, dtype=np.float64) * (in_size - 1) / (out_size - 1)
    lo = np.clip(np.floor(pos).astype(np.int64), 0, in_size - 2)
    frac = (pos - lo).astype(np.float32)
    return lo.astype(np.int32), (lo + 1).astype(np.int32), frac


def upsample_bilinear_2x_nhwc(x):
    """nn.UpsamplingBilinear2d(scale_factor=2) on NHWC: channel-last lerp,
    lane-dense, pure VPU work (no lane-sparse matmuls, no transposes)."""
    N, H, W, C = x.shape
    lh, hh, fh = _interp_idx(H, 2 * H)
    lw, hw, fw = _interp_idx(W, 2 * W)
    xf = x.astype(jnp.float32)
    fw_ = jnp.asarray(fw)[None, None, :, None]
    fh_ = jnp.asarray(fh)[None, :, None, None]
    xw = xf[:, :, lw, :] * (1.0 - fw_) + xf[:, :, hw, :] * fw_
    return xw[:, lh, :, :] * (1.0 - fh_) + xw[:, hh, :, :] * fh_


# ---------------------------------------------------------------------------
# Parameter construction (deterministic, synthetic)
# ---------------------------------------------------------------------------
def make_darknet_conv_params(key, cin, cout, ksize):
    k1, k2, k3, k4, k5 = jax.random.split(key, 5)
    w = jax.random.normal(k1, (cout, cin, ksize, ksize), jnp.float32) * 0.05
    gamma = 1.0 + 0.1 * jax.random.normal(k2, (cout,), jnp.float32)
    beta = 0.1 * jax.random.normal(k3, (cout,), jnp.float32)
    mean = 0.1 * jax.random.normal(k4, (cout,), jnp.float32)
    var = jnp.abs(jax.random.normal(k5, (cout,), jnp.float32)) + 0.5
    eps = 1e-5
    scale = gamma / jnp.sqrt(var + eps)        # folded BatchNorm (eval mode)
    bias = beta - mean * scale
    return {"w": w, "scale": scale, "bias": bias}


def make_conv_params(key, cin, cout, ksize):
    k1, k2 = jax.random.split(key)
    w = jax.random.normal(k1, (cout, cin, ksize, ksize), jnp.float32) * 0.05
    b = 0.1 * jax.random.normal(k2, (cout,), jnp.float32)
    return {"w": w, "scale": jnp.ones((cout,), jnp.float32), "bias": b}


# ---------------------------------------------------------------------------
# aspp_decoder forward
# ---------------------------------------------------------------------------
def aspp_decoder_forward(params, mid, bot):
    slope = 0.1                           # LeakyReLU slope of darknet_conv
    p = params
    B, Cin, h, w = mid.shape
    Cb = bot.shape[1]
    H2, W2 = 2 * h, 2 * w
    hidden = p["conv0"]["w"].shape[0]
    c1_out = p["conv_1"]["w"].shape[0]
    low_out = p["low_feature"]["w"].shape[0]
    cout2 = p["conv_2"]["w"].shape[0]
    M = B * h * w

    mid_nhwc = jnp.transpose(mid, (0, 2, 3, 1)).astype(jnp.bfloat16)
    bot_nhwc = jnp.transpose(bot, (0, 2, 3, 1)).astype(jnp.bfloat16)

    # --- ASPP branches (Pallas fused matmuls, bf16 in / f32 accumulate) ------
    branch = [fused_matmul(mid_nhwc.reshape(M, Cin),
                           p["conv0"]["w"].reshape(hidden, Cin).T,
                           p["conv0"]["scale"], p["conv0"]["bias"],
                           slope, jnp.bfloat16)]
    pmax = 18                                     # pad once for all dilations
    mid_pad = jnp.pad(mid_nhwc, ((0, 0), (pmax, pmax), (pmax, pmax), (0, 0)))
    for name, dil in (("conv1", 6), ("conv2", 12), ("conv3", 18)):
        patches = _im2col_from_padded(mid_pad, h, w, Cin, 3, dil, pmax)
        branch.append(fused_matmul(patches,
                                   p[name]["w"].reshape(hidden, Cin * 9).T,
                                   p[name]["scale"], p[name]["bias"],
                                   slope, jnp.bfloat16))

    # --- pooled branch b4 folded into a per-image bias of conv_1 -------------
    # b4 = leaky(conv4(avgpool(mid))) is spatially constant and conv_1 is 1x1,
    # so its contribution is W1[:, 4h:5h] @ b4 -- a per-image bias vector.
    pooled = jnp.mean(mid.astype(jnp.float32), axis=(2, 3))          # (B, Cin)
    w4 = p["conv4"]["w"].reshape(hidden, Cin).astype(jnp.float32)
    z = (pooled @ w4.T) * p["conv4"]["scale"] + p["conv4"]["bias"]
    z = jnp.where(z >= 0.0, z, z * slope)                            # (B, hidden)
    w1 = p["conv_1"]["w"].reshape(c1_out, 5 * hidden).astype(jnp.float32)
    extra_bias = z @ w1[:, 4 * hidden:].T                            # (B, c1_out)

    # --- conv_1 (plain 1x1 conv, no activation) ------------------------------
    cat = jnp.concatenate(branch, axis=-1)                           # (M, 4*hidden)
    y1 = fused_matmul(cat, w1[:, :4 * hidden].T,
                      p["conv_1"]["scale"], p["conv_1"]["bias"],
                      None, jnp.float32)
    y1 = y1.reshape(B, h, w, c1_out) + extra_bias[:, None, None, :]

    # --- 2x bilinear upsample (align_corners) + low_feature ------------------
    mid_up = upsample_bilinear_2x_nhwc(y1).astype(jnp.bfloat16)      # (B,2h,2w,c1)
    low = fused_matmul(bot_nhwc.reshape(B * H2 * W2, Cb),
                       p["low_feature"]["w"].reshape(low_out, Cb).T,
                       p["low_feature"]["scale"], p["low_feature"]["bias"],
                       slope, jnp.bfloat16).reshape(B, H2, W2, low_out)

    # --- conv_2: 3x3 conv over concat(mid_up, low), concat fused in-kernel ---
    p1 = _im2col_from_padded(jnp.pad(mid_up, ((0, 0), (1, 1), (1, 1), (0, 0))),
                             H2, W2, c1_out, 3, 1, 1)
    p2 = _im2col_from_padded(jnp.pad(low, ((0, 0), (1, 1), (1, 1), (0, 0))),
                             H2, W2, low_out, 3, 1, 1)
    w2 = p["conv_2"]["w"].reshape(cout2, (c1_out + low_out) * 9)
    out = fused_matmul2(p1, w2[:, :c1_out * 9].T, p2, w2[:, c1_out * 9:].T,
                        p["conv_2"]["scale"], p["conv_2"]["bias"],
                        None, jnp.float32)
    return out.reshape(B, H2, W2, cout2).transpose(0, 3, 1, 2)


if __name__ == "__main__":
    key = jax.random.PRNGKey(0)
    planes, hidden_planes = 8, 4
    B, h, w = 2, 8, 8

    keys = jax.random.split(key, 10)
    params = {
        "conv0": make_darknet_conv_params(keys[0], planes, hidden_planes, 1),
        "conv1": make_darknet_conv_params(keys[1], planes, hidden_planes, 3),
        "conv2": make_darknet_conv_params(keys[2], planes, hidden_planes, 3),
        "conv3": make_darknet_conv_params(keys[3], planes, hidden_planes, 3),
        "conv4": make_darknet_conv_params(keys[4], planes, hidden_planes, 1),
        "low_feature": make_darknet_conv_params(keys[5], 512, 256, 1),
        "conv_1": make_conv_params(keys[6], hidden_planes * 5, 256, 1),
        "conv_2": make_conv_params(keys[7], 512, 1, 3),
    }

    mid = jax.random.normal(keys[8], (B, planes, h, w), jnp.float32)
    bot = jax.random.normal(keys[9], (B, 512, 2 * h, 2 * w), jnp.float32)

    forward = jax.jit(aspp_decoder_forward)
    out = jax.block_until_ready(forward(params, mid, bot))
    assert out.shape == (B, 1, 2 * h, 2 * w), out.shape
    assert bool(jnp.all(jnp.isfinite(out)))
    print("KERNEL_OK")
</pallas_src>

<mosaic_0001>
module attributes {stable_mosaic.version = 11 : i64} {
  func.func @_mm_kernel(%arg0: i32, %arg1: i32, %arg2: i32, %arg3: memref<128x72xbf16, #tpu.memory_space<vmem>>, %arg4: memref<72x128xbf16, #tpu.memory_space<vmem>>, %arg5: memref<1x128xf32, #tpu.memory_space<vmem>>, %arg6: memref<1x128xf32, #tpu.memory_space<vmem>>, %arg7: memref<128x128xbf16, #tpu.memory_space<vmem>>, %arg8: memref<128x128xf32, #tpu.memory_space<vmem>>) attributes {dimension_semantics = [#tpu.dimension_semantics<parallel>, #tpu.dimension_semantics<parallel>, #tpu.dimension_semantics<arbitrary>], iteration_bounds = array<i64: 1, 1, 1>, scalar_prefetch = 0 : i64, scratch_operands = 1 : i64, tpu.core_type = #tpu.core_type<tc>, window_params = [{transform_indices = @transform_0, window_bounds = array<i64: 128, 72>}, {transform_indices = @transform_1, window_bounds = array<i64: 72, 128>}, {transform_indices = @transform_2, window_bounds = array<i64: 1, 128>}, {transform_indices = @transform_3, window_bounds = array<i64: 1, 128>}, {transform_indices = @transform_4, window_bounds = array<i64: 128, 128>}]} {
    %c0_i32 = arith.constant 0 : i32
    %0 = arith.cmpi eq, %arg2, %c0_i32 : i32
    %1 = arith.extui %0 : i1 to i32
    %c0_i32_0 = arith.constant 0 : i32
    %2 = arith.cmpi ne, %1, %c0_i32_0 : i32
    scf.if %2 {
      %cst_10 = arith.constant 0.000000e+00 : f32
      %12 = vector.broadcast %cst_10 : f32 to vector<128x128xf32>
      %c0_11 = arith.constant 0 : index
      %c0_12 = arith.constant 0 : index
      %13 = vector.load %arg8[%c0_11, %c0_12] : memref<128x128xf32, #tpu.memory_space<vmem>>, vector<128x128xf32>
      tpu.vector_store %arg8[%c0_11, %c0_12], %12 {strides = array<i32>} : memref<128x128xf32, #tpu.memory_space<vmem>>, vector<128x128xf32>,
    } else {
    }
    %c0 = arith.constant 0 : index
    %c0_1 = arith.constant 0 : index
    %3 = vector.load %arg8[%c0, %c0_1] : memref<128x128xf32, #tpu.memory_space<vmem>>, vector<128x128xf32>
    %c0_2 = arith.constant 0 : index
    %c0_3 = arith.constant 0 : index
    %4 = vector.load %arg3[%c0_2, %c0_3] : memref<128x72xbf16, #tpu.memory_space<vmem>>, vector<128x72xbf16>
    %c0_4 = arith.constant 0 : index
    %c0_5 = arith.constant 0 : index
    %5 = vector.load %arg4[%c0_4, %c0_5] : memref<72x128xbf16, #tpu.memory_space<vmem>>, vector<72x128xbf16>
    %cst = arith.constant dense<0.000000e+00> : vector<128x128xf32>
    %6 = tpu.matmul %4, %5, %cst {dimension_numbers = #tpu.dot_dimension_numbers<[1], [0], [0], [1], [0, 0, 1, 1], [], []>} : vector<128x72xbf16>, vector<72x128xbf16>, vector<128x128xf32> -> vector<128x128xf32>
    %7 = arith.addf %3, %6 : vector<128x128xf32>
    %c0_6 = arith.constant 0 : index
    %c0_7 = arith.constant 0 : index
    %8 = vector.load %arg8[%c0_6, %c0_7] : memref<128x128xf32, #tpu.memory_space<vmem>>, vector<128x128xf32>
    tpu.vector_store %arg8[%c0_6, %c0_7], %7 {strides = array<i32>} : memref<128x128xf32, #tpu.memory_space<vmem>>, vector<128x128xf32>,
    %c0_i32_8 = arith.constant 0 : i32
    %9 = arith.cmpi eq, %arg2, %c0_i32_8 : i32
    %10 = arith.extui %9 : i1 to i32
    %c0_i32_9 = arith.constant 0 : i32
    %11 = arith.cmpi ne, %10, %c0_i32_9 : i32
    scf.if %11 {
      %c0_10 = arith.constant 0 : index
      %c0_11 = arith.constant 0 : index
      %12 = vector.load %arg8[%c0_10, %c0_11] : memref<128x128xf32, #tpu.memory_space<vmem>>, vector<128x128xf32>
      %c0_12 = arith.constant 0 : index
      %c0_13 = arith.constant 0 : index
      %13 = vector.load %arg5[%c0_12, %c0_13] : memref<1x128xf32, #tpu.memory_space<vmem>>, vector<1x128xf32>
      %14 = vector.broadcast %13 : vector<1x128xf32> to vector<128x128xf32>
      %15 = arith.mulf %12, %14 : vector<128x128xf32>
      %c0_14 = arith.constant 0 : index
      %c0_15 = arith.constant 0 : index
      %16 = vector.load %arg6[%c0_14, %c0_15] : memref<1x128xf32, #tpu.memory_space<vmem>>, vector<1x128xf32>
      %17 = vector.broadcast %16 : vector<1x128xf32> to vector<128x128xf32>
      %18 = arith.addf %15, %17 : vector<128x128xf32>
      %cst_16 = arith.constant 0.000000e+00 : f32
      %19 = vector.broadcast %cst_16 : f32 to vector<128x128xf32>
      %20 = arith.cmpf oge, %18, %19 : vector<128x128xf32>
      %cst_17 = arith.constant 1.000000e-01 : f32
      %21 = vector.broadcast %cst_17 : f32 to vector<128x128xf32>
      %22 = arith.mulf %18, %21 : vector<128x128xf32>
      %23 = arith.select %20, %18, %22 : vector<128x128xi1>, vector<128x128xf32>
      %24 = arith.truncf %23 : vector<128x128xf32> to vector<128x128xbf16>
      %c0_18 = arith.constant 0 : index
      %c0_19 = arith.constant 0 : index
      %25 = vector.load %arg7[%c0_18, %c0_19] : memref<128x128xbf16, #tpu.memory_space<vmem>>, vector<128x128xbf16>
      tpu.vector_store %arg7[%c0_18, %c0_19], %24 {strides = array<i32>} : memref<128x128xbf16, #tpu.memory_space<vmem>>, vector<128x128xbf16>,
    } else {
    }
    return
  }
  func.func @transform_0(%arg0: i32, %arg1: i32, %arg2: i32) -> (i32, i32) {
    %c0_i32 = arith.constant 0 : i32
    return %arg0, %arg2 : i32, i32
  }
  func.func @transform_1(%arg0: i32, %arg1: i32, %arg2: i32) -> (i32, i32) {
    %c0_i32 = arith.constant 0 : i32
    return %arg2, %arg1 : i32, i32
  }
  func.func @transform_2(%arg0: i32, %arg1: i32, %arg2: i32) -> (i32, i32) {
    %c0_i32 = arith.constant 0 : i32
    %c0_i32_0 = arith.constant 0 : i32
    return %c0_i32, %arg1 : i32, i32
  }
  func.func @transform_3(%arg0: i32, %arg1: i32, %arg2: i32) -> (i32, i32) {
    %c0_i32 = arith.constant 0 : i32
    %c0_i32_0 = arith.constant 0 : i32
    return %c0_i32, %arg1 : i32, i32
  }
  func.func @transform_4(%arg0: i32, %arg1: i32, %arg2: i32) -> (i32, i32) {
    %c0_i32 = arith.constant 0 : i32
    return %arg0, %arg1 : i32, i32
  }
}

module attributes {stable_mosaic.version = 11 : i64} {
  func.func @_mm_kernel(%arg0: i32, %arg1: i32, %arg2: i32, %arg3: memref<128x8xbf16, #tpu.memory_space<vmem>>, %arg4: memref<8x128xbf16, #tpu.memory_space<vmem>>, %arg5: memref<1x128xf32, #tpu.memory_space<vmem>>, %arg6: memref<1x128xf32, #tpu.memory_space<vmem>>, %arg7: memref<128x128xbf16, #tpu.memory_space<vmem>>, %arg8: memref<128x128xf32, #tpu.memory_space<vmem>>) attributes {dimension_semantics = [#tpu.dimension_semantics<parallel>, #tpu.dimension_semantics<parallel>, #tpu.dimension_semantics<arbitrary>], iteration_bounds = array<i64: 1, 1, 1>, scalar_prefetch = 0 : i64, scratch_operands = 1 : i64, tpu.core_type = #tpu.core_type<tc>, window_params = [{transform_indices = @transform_0, window_bounds = array<i64: 128, 8>}, {transform_indices = @transform_1, window_bounds = array<i64: 8, 128>}, {transform_indices = @transform_2, window_bounds = array<i64: 1, 128>}, {transform_indices = @transform_3, window_bounds = array<i64: 1, 128>}, {transform_indices = @transform_4, window_bounds = array<i64: 128, 128>}]} {
    %c0_i32 = arith.constant 0 : i32
    %0 = arith.cmpi eq, %arg2, %c0_i32 : i32
    %1 = arith.extui %0 : i1 to i32
    %c0_i32_0 = arith.constant 0 : i32
    %2 = arith.cmpi ne, %1, %c0_i32_0 : i32
    scf.if %2 {
      %cst_10 = arith.constant 0.000000e+00 : f32
      %12 = vector.broadcast %cst_10 : f32 to vector<128x128xf32>
      %c0_11 = arith.constant 0 : index
      %c0_12 = arith.constant 0 : index
      %13 = vector.load %arg8[%c0_11, %c0_12] : memref<128x128xf32, #tpu.memory_space<vmem>>, vector<128x128xf32>
      tpu.vector_store %arg8[%c0_11, %c0_12], %12 {strides = array<i32>} : memref<128x128xf32, #tpu.memory_space<vmem>>, vector<128x128xf32>,
    } else {
    }
    %c0 = arith.constant 0 : index
    %c0_1 = arith.constant 0 : index
    %3 = vector.load %arg8[%c0, %c0_1] : memref<128x128xf32, #tpu.memory_space<vmem>>, vector<128x128xf32>
    %c0_2 = arith.constant 0 : index
    %c0_3 = arith.constant 0 : index
    %4 = vector.load %arg3[%c0_2, %c0_3] : memref<128x8xbf16, #tpu.memory_space<vmem>>, vector<128x8xbf16>
    %c0_4 = arith.constant 0 : index
    %c0_5 = arith.constant 0 : index
    %5 = vector.load %arg4[%c0_4, %c0_5] : memref<8x128xbf16, #tpu.memory_space<vmem>>, vector<8x128xbf16>
    %cst = arith.constant dense<0.000000e+00> : vector<128x128xf32>
    %6 = tpu.matmul %4, %5, %cst {dimension_numbers = #tpu.dot_dimension_numbers<[1], [0], [0], [1], [0, 0, 1, 1], [], []>} : vector<128x8xbf16>, vector<8x128xbf16>, vector<128x128xf32> -> vector<128x128xf32>
    %7 = arith.addf %3, %6 : vector<128x128xf32>
    %c0_6 = arith.constant 0 : index
    %c0_7 = arith.constant 0 : index
    %8 = vector.load %arg8[%c0_6, %c0_7] : memref<128x128xf32, #tpu.memory_space<vmem>>, vector<128x128xf32>
    tpu.vector_store %arg8[%c0_6, %c0_7], %7 {strides = array<i32>} : memref<128x128xf32, #tpu.memory_space<vmem>>, vector<128x128xf32>,
    %c0_i32_8 = arith.constant 0 : i32
    %9 = arith.cmpi eq, %arg2, %c0_i32_8 : i32
    %10 = arith.extui %9 : i1 to i32
    %c0_i32_9 = arith.constant 0 : i32
    %11 = arith.cmpi ne, %10, %c0_i32_9 : i32
    scf.if %11 {
      %c0_10 = arith.constant 0 : index
      %c0_11 = arith.constant 0 : index
      %12 = vector.load %arg8[%c0_10, %c0_11] : memref<128x128xf32, #tpu.memory_space<vmem>>, vector<128x128xf32>
      %c0_12 = arith.constant 0 : index
      %c0_13 = arith.constant 0 : index
      %13 = vector.load %arg5[%c0_12, %c0_13] : memref<1x128xf32, #tpu.memory_space<vmem>>, vector<1x128xf32>
      %14 = vector.broadcast %13 : vector<1x128xf32> to vector<128x128xf32>
      %15 = arith.mulf %12, %14 : vector<128x128xf32>
      %c0_14 = arith.constant 0 : index
      %c0_15 = arith.constant 0 : index
      %16 = vector.load %arg6[%c0_14, %c0_15] : memref<1x128xf32, #tpu.memory_space<vmem>>, vector<1x128xf32>
      %17 = vector.broadcast %16 : vector<1x128xf32> to vector<128x128xf32>
      %18 = arith.addf %15, %17 : vector<128x128xf32>
      %cst_16 = arith.constant 0.000000e+00 : f32
      %19 = vector.broadcast %cst_16 : f32 to vector<128x128xf32>
      %20 = arith.cmpf oge, %18, %19 : vector<128x128xf32>
      %cst_17 = arith.constant 1.000000e-01 : f32
      %21 = vector.broadcast %cst_17 : f32 to vector<128x128xf32>
      %22 = arith.mulf %18, %21 : vector<128x128xf32>
      %23 = arith.select %20, %18, %22 : vector<128x128xi1>, vector<128x128xf32>
      %24 = arith.truncf %23 : vector<128x128xf32> to vector<128x128xbf16>
      %c0_18 = arith.constant 0 : index
      %c0_19 = arith.constant 0 : index
      %25 = vector.load %arg7[%c0_18, %c0_19] : memref<128x128xbf16, #tpu.memory_space<vmem>>, vector<128x128xbf16>
      tpu.vector_store %arg7[%c0_18, %c0_19], %24 {strides = array<i32>} : memref<128x128xbf16, #tpu.memory_space<vmem>>, vector<128x128xbf16>,
    } else {
    }
    return
  }
  func.func @transform_0(%arg0: i32, %arg1: i32, %arg2: i32) -> (i32, i32) {
    %c0_i32 = arith.constant 0 : i32
    return %arg0, %arg2 : i32, i32
  }
  func.func @transform_1(%arg0: i32, %arg1: i32, %arg2: i32) -> (i32, i32) {
    %c0_i32 = arith.constant 0 : i32
    return %arg2, %arg1 : i32, i32
  }
  func.func @transform_2(%arg0: i32, %arg1: i32, %arg2: i32) -> (i32, i32) {
    %c0_i32 = arith.constant 0 : i32
    %c0_i32_0 = arith.constant 0 : i32
    return %c0_i32, %arg1 : i32, i32
  }
  func.func @transform_3(%arg0: i32, %arg1: i32, %arg2: i32) -> (i32, i32) {
    %c0_i32 = arith.constant 0 : i32
    %c0_i32_0 = arith.constant 0 : i32
    return %c0_i32, %arg1 : i32, i32
  }
  func.func @transform_4(%arg0: i32, %arg1: i32, %arg2: i32) -> (i32, i32) {
    %c0_i32 = arith.constant 0 : i32
    return %arg0, %arg1 : i32, i32
  }
}

module attributes {stable_mosaic.version = 11 : i64} {
  func.func @_mm_kernel(%arg0: i32, %arg1: i32, %arg2: i32, %arg3: memref<128x16xbf16, #tpu.memory_space<vmem>>, %arg4: memref<16x256xbf16, #tpu.memory_space<vmem>>, %arg5: memref<1x256xf32, #tpu.memory_space<vmem>>, %arg6: memref<1x256xf32, #tpu.memory_space<vmem>>, %arg7: memref<128x256xf32, #tpu.memory_space<vmem>>, %arg8: memref<128x256xf32, #tpu.memory_space<vmem>>) attributes {dimension_semantics = [#tpu.dimension_semantics<parallel>, #tpu.dimension_semantics<parallel>, #tpu.dimension_semantics<arbitrary>], iteration_bounds = array<i64: 1, 1, 1>, scalar_prefetch = 0 : i64, scratch_operands = 1 : i64, tpu.core_type = #tpu.core_type<tc>, window_params = [{transform_indices = @transform_0, window_bounds = array<i64: 128, 16>}, {transform_indices = @transform_1, window_bounds = array<i64: 16, 256>}, {transform_indices = @transform_2, window_bounds = array<i64: 1, 256>}, {transform_indices = @transform_3, window_bounds = array<i64: 1, 256>}, {transform_indices = @transform_4, window_bounds = array<i64: 128, 256>}]} {
    %c0_i32 = arith.constant 0 : i32
    %0 = arith.cmpi eq, %arg2, %c0_i32 : i32
    %1 = arith.extui %0 : i1 to i32
    %c0_i32_0 = arith.constant 0 : i32
    %2 = arith.cmpi ne, %1, %c0_i32_0 : i32
    scf.if %2 {
      %cst_10 = arith.constant 0.000000e+00 : f32
      %12 = vector.broadcast %cst_10 : f32 to vector<128x256xf32>
      %c0_11 = arith.constant 0 : index
      %c0_12 = arith.constant 0 : index
      %13 = vector.load %arg8[%c0_11, %c0_12] : memref<128x256xf32, #tpu.memory_space<vmem>>, vector<128x256xf32>
      tpu.vector_store %arg8[%c0_11, %c0_12], %12 {strides = array<i32>} : memref<128x256xf32, #tpu.memory_space<vmem>>, vector<128x256xf32>,
    } else {
    }
    %c0 = arith.constant 0 : index
    %c0_1 = arith.constant 0 : index
    %3 = vector.load %arg8[%c0, %c0_1] : memref<128x256xf32, #tpu.memory_space<vmem>>, vector<128x256xf32>
    %c0_2 = arith.constant 0 : index
    %c0_3 = arith.constant 0 : index
    %4 = vector.load %arg3[%c0_2, %c0_3] : memref<128x16xbf16, #tpu.memory_space<vmem>>, vector<128x16xbf16>
    %c0_4 = arith.constant 0 : index
    %c0_5 = arith.constant 0 : index
    %5 = vector.load %arg4[%c0_4, %c0_5] : memref<16x256xbf16, #tpu.memory_space<vmem>>, vector<16x256xbf16>
    %cst = arith.constant dense<0.000000e+00> : vector<128x256xf32>
    %6 = tpu.matmul %4, %5, %cst {dimension_numbers = #tpu.dot_dimension_numbers<[1], [0], [0], [1], [0, 0, 1, 1], [], []>} : vector<128x16xbf16>, vector<16x256xbf16>, vector<128x256xf32> -> vector<128x256xf32>
    %7 = arith.addf %3, %6 : vector<128x256xf32>
    %c0_6 = arith.constant 0 : index
    %c0_7 = arith.constant 0 : index
    %8 = vector.load %arg8[%c0_6, %c0_7] : memref<128x256xf32, #tpu.memory_space<vmem>>, vector<128x256xf32>
    tpu.vector_store %arg8[%c0_6, %c0_7], %7 {strides = array<i32>} : memref<128x256xf32, #tpu.memory_space<vmem>>, vector<128x256xf32>,
    %c0_i32_8 = arith.constant 0 : i32
    %9 = arith.cmpi eq, %arg2, %c0_i32_8 : i32
    %10 = arith.extui %9 : i1 to i32
    %c0_i32_9 = arith.constant 0 : i32
    %11 = arith.cmpi ne, %10, %c0_i32_9 : i32
    scf.if %11 {
      %c0_10 = arith.constant 0 : index
      %c0_11 = arith.constant 0 : index
      %12 = vector.load %arg8[%c0_10, %c0_11] : memref<128x256xf32, #tpu.memory_space<vmem>>, vector<128x256xf32>
      %c0_12 = arith.constant 0 : index
      %c0_13 = arith.constant 0 : index
      %13 = vector.load %arg5[%c0_12, %c0_13] : memref<1x256xf32, #tpu.memory_space<vmem>>, vector<1x256xf32>
      %14 = vector.broadcast %13 : vector<1x256xf32> to vector<128x256xf32>
      %15 = arith.mulf %12, %14 : vector<128x256xf32>
      %c0_14 = arith.constant 0 : index
      %c0_15 = arith.constant 0 : index
      %16 = vector.load %arg6[%c0_14, %c0_15] : memref<1x256xf32, #tpu.memory_space<vmem>>, vector<1x256xf32>
      %17 = vector.broadcast %16 : vector<1x256xf32> to vector<128x256xf32>
      %18 = arith.addf %15, %17 : vector<128x256xf32>
      %c0_16 = arith.constant 0 : index
      %c0_17 = arith.constant 0 : index
      %19 = vector.load %arg7[%c0_16, %c0_17] : memref<128x256xf32, #tpu.memory_space<vmem>>, vector<128x256xf32>
      tpu.vector_store %arg7[%c0_16, %c0_17], %18 {strides = array<i32>} : memref<128x256xf32, #tpu.memory_space<vmem>>, vector<128x256xf32>,
    } else {
    }
    return
  }
  func.func @transform_0(%arg0: i32, %arg1: i32, %arg2: i32) -> (i32, i32) {
    %c0_i32 = arith.constant 0 : i32
    return %arg0, %arg2 : i32, i32
  }
  func.func @transform_1(%arg0: i32, %arg1: i32, %arg2: i32) -> (i32, i32) {
    %c0_i32 = arith.constant 0 : i32
    return %arg2, %arg1 : i32, i32
  }
  func.func @transform_2(%arg0: i32, %arg1: i32, %arg2: i32) -> (i32, i32) {
    %c0_i32 = arith.constant 0 : i32
    %c0_i32_0 = arith.constant 0 : i32
    return %c0_i32, %arg1 : i32, i32
  }
  func.func @transform_3(%arg0: i32, %arg1: i32, %arg2: i32) -> (i32, i32) {
    %c0_i32 = arith.constant 0 : i32
    %c0_i32_0 = arith.constant 0 : i32
    return %c0_i32, %arg1 : i32, i32
  }
  func.func @transform_4(%arg0: i32, %arg1: i32, %arg2: i32) -> (i32, i32) {
    %c0_i32 = arith.constant 0 : i32
    return %arg0, %arg1 : i32, i32
  }
}

module attributes {stable_mosaic.version = 11 : i64} {
  func.func @_mm_kernel(%arg0: i32, %arg1: i32, %arg2: i32, %arg3: memref<256x512xbf16, #tpu.memory_space<vmem>>, %arg4: memref<512x256xbf16, #tpu.memory_space<vmem>>, %arg5: memref<1x256xf32, #tpu.memory_space<vmem>>, %arg6: memref<1x256xf32, #tpu.memory_space<vmem>>, %arg7: memref<256x256xbf16, #tpu.memory_space<vmem>>, %arg8: memref<256x256xf32, #tpu.memory_space<vmem>>) attributes {dimension_semantics = [#tpu.dimension_semantics<parallel>, #tpu.dimension_semantics<parallel>, #tpu.dimension_semantics<arbitrary>], iteration_bounds = array<i64: 2, 1, 1>, scalar_prefetch = 0 : i64, scratch_operands = 1 : i64, tpu.core_type = #tpu.core_type<tc>, window_params = [{transform_indices = @transform_0, window_bounds = array<i64: 256, 512>}, {transform_indices = @transform_1, window_bounds = array<i64: 512, 256>}, {transform_indices = @transform_2, window_bounds = array<i64: 1, 256>}, {transform_indices = @transform_3, window_bounds = array<i64: 1, 256>}, {transform_indices = @transform_4, window_bounds = array<i64: 256, 256>}]} {
    %c0_i32 = arith.constant 0 : i32
    %0 = arith.cmpi eq, %arg2, %c0_i32 : i32
    %1 = arith.extui %0 : i1 to i32
    %c0_i32_0 = arith.constant 0 : i32
    %2 = arith.cmpi ne, %1, %c0_i32_0 : i32
    scf.if %2 {
      %cst_10 = arith.constant 0.000000e+00 : f32
      %12 = vector.broadcast %cst_10 : f32 to vector<256x256xf32>
      %c0_11 = arith.constant 0 : index
      %c0_12 = arith.constant 0 : index
      %13 = vector.load %arg8[%c0_11, %c0_12] : memref<256x256xf32, #tpu.memory_space<vmem>>, vector<256x256xf32>
      tpu.vector_store %arg8[%c0_11, %c0_12], %12 {strides = array<i32>} : memref<256x256xf32, #tpu.memory_space<vmem>>, vector<256x256xf32>,
    } else {
    }
    %c0 = arith.constant 0 : index
    %c0_1 = arith.constant 0 : index
    %3 = vector.load %arg8[%c0, %c0_1] : memref<256x256xf32, #tpu.memory_space<vmem>>, vector<256x256xf32>
    %c0_2 = arith.constant 0 : index
    %c0_3 = arith.constant 0 : index
    %4 = vector.load %arg3[%c0_2, %c0_3] : memref<256x512xbf16, #tpu.memory_space<vmem>>, vector<256x512xbf16>
    %c0_4 = arith.constant 0 : index
    %c0_5 = arith.constant 0 : index
    %5 = vector.load %arg4[%c0_4, %c0_5] : memref<512x256xbf16, #tpu.memory_space<vmem>>, vector<512x256xbf16>
    %cst = arith.constant dense<0.000000e+00> : vector<256x256xf32>
    %6 = tpu.matmul %4, %5, %cst {dimension_numbers = #tpu.dot_dimension_numbers<[1], [0], [0], [1], [0, 0, 1, 1], [], []>} : vector<256x512xbf16>, vector<512x256xbf16>, vector<256x256xf32> -> vector<256x256xf32>
    %7 = arith.addf %3, %6 : vector<256x256xf32>
    %c0_6 = arith.constant 0 : index
    %c0_7 = arith.constant 0 : index
    %8 = vector.load %arg8[%c0_6, %c0_7] : memref<256x256xf32, #tpu.memory_space<vmem>>, vector<256x256xf32>
    tpu.vector_store %arg8[%c0_6, %c0_7], %7 {strides = array<i32>} : memref<256x256xf32, #tpu.memory_space<vmem>>, vector<256x256xf32>,
    %c0_i32_8 = arith.constant 0 : i32
    %9 = arith.cmpi eq, %arg2, %c0_i32_8 : i32
    %10 = arith.extui %9 : i1 to i32
    %c0_i32_9 = arith.constant 0 : i32
    %11 = arith.cmpi ne, %10, %c0_i32_9 : i32
    scf.if %11 {
      %c0_10 = arith.constant 0 : index
      %c0_11 = arith.constant 0 : index
      %12 = vector.load %arg8[%c0_10, %c0_11] : memref<256x256xf32, #tpu.memory_space<vmem>>, vector<256x256xf32>
      %c0_12 = arith.constant 0 : index
      %c0_13 = arith.constant 0 : index
      %13 = vector.load %arg5[%c0_12, %c0_13] : memref<1x256xf32, #tpu.memory_space<vmem>>, vector<1x256xf32>
      %14 = vector.broadcast %13 : vector<1x256xf32> to vector<256x256xf32>
      %15 = arith.mulf %12, %14 : vector<256x256xf32>
      %c0_14 = arith.constant 0 : index
      %c0_15 = arith.constant 0 : index
      %16 = vector.load %arg6[%c0_14, %c0_15] : memref<1x256xf32, #tpu.memory_space<vmem>>, vector<1x256xf32>
      %17 = vector.broadcast %16 : vector<1x256xf32> to vector<256x256xf32>
      %18 = arith.addf %15, %17 : vector<256x256xf32>
      %cst_16 = arith.constant 0.000000e+00 : f32
      %19 = vector.broadcast %cst_16 : f32 to vector<256x256xf32>
      %20 = arith.cmpf oge, %18, %19 : vector<256x256xf32>
      %cst_17 = arith.constant 1.000000e-01 : f32
      %21 = vector.broadcast %cst_17 : f32 to vector<256x256xf32>
      %22 = arith.mulf %18, %21 : vector<256x256xf32>
      %23 = arith.select %20, %18, %22 : vector<256x256xi1>, vector<256x256xf32>
      %24 = arith.truncf %23 : vector<256x256xf32> to vector<256x256xbf16>
      %c0_18 = arith.constant 0 : index
      %c0_19 = arith.constant 0 : index
      %25 = vector.load %arg7[%c0_18, %c0_19] : memref<256x256xbf16, #tpu.memory_space<vmem>>, vector<256x256xbf16>
      tpu.vector_store %arg7[%c0_18, %c0_19], %24 {strides = array<i32>} : memref<256x256xbf16, #tpu.memory_space<vmem>>, vector<256x256xbf16>,
    } else {
    }
    return
  }
  func.func @transform_0(%arg0: i32, %arg1: i32, %arg2: i32) -> (i32, i32) {
    %c0_i32 = arith.constant 0 : i32
    return %arg0, %arg2 : i32, i32
  }
  func.func @transform_1(%arg0: i32, %arg1: i32, %arg2: i32) -> (i32, i32) {
    %c0_i32 = arith.constant 0 : i32
    return %arg2, %arg1 : i32, i32
  }
  func.func @transform_2(%arg0: i32, %arg1: i32, %arg2: i32) -> (i32, i32) {
    %c0_i32 = arith.constant 0 : i32
    %c0_i32_0 = arith.constant 0 : i32
    return %c0_i32, %arg1 : i32, i32
  }
  func.func @transform_3(%arg0: i32, %arg1: i32, %arg2: i32) -> (i32, i32) {
    %c0_i32 = arith.constant 0 : i32
    %c0_i32_0 = arith.constant 0 : i32
    return %c0_i32, %arg1 : i32, i32
  }
  func.func @transform_4(%arg0: i32, %arg1: i32, %arg2: i32) -> (i32, i32) {
    %c0_i32 = arith.constant 0 : i32
    return %arg0, %arg1 : i32, i32
  }
}

module attributes {stable_mosaic.version = 11 : i64} {
  func.func @_mm2_kernel(%arg0: i32, %arg1: i32, %arg2: memref<256x2304xbf16, #tpu.memory_space<vmem>>, %arg3: memref<2304x128xbf16, #tpu.memory_space<vmem>>, %arg4: memref<256x2304xbf16, #tpu.memory_space<vmem>>, %arg5: memref<2304x128xbf16, #tpu.memory_space<vmem>>, %arg6: memref<1x128xf32, #tpu.memory_space<vmem>>, %arg7: memref<1x128xf32, #tpu.memory_space<vmem>>, %arg8: memref<256x128xf32, #tpu.memory_space<vmem>>) attributes {dimension_semantics = [#tpu.dimension_semantics<parallel>, #tpu.dimension_semantics<parallel>], iteration_bounds = array<i64: 2, 1>, scalar_prefetch = 0 : i64, scratch_operands = 0 : i64, tpu.core_type = #tpu.core_type<tc>, window_params = [{transform_indices = @transform_0, window_bounds = array<i64: 256, 2304>}, {transform_indices = @transform_1, window_bounds = array<i64: 2304, 128>}, {transform_indices = @transform_2, window_bounds = array<i64: 256, 2304>}, {transform_indices = @transform_3, window_bounds = array<i64: 2304, 128>}, {transform_indices = @transform_4, window_bounds = array<i64: 1, 128>}, {transform_indices = @transform_5, window_bounds = array<i64: 1, 128>}, {transform_indices = @transform_6, window_bounds = array<i64: 256, 128>}]} {
    %c0 = arith.constant 0 : index
    %c0_0 = arith.constant 0 : index
    %0 = vector.load %arg2[%c0, %c0_0] : memref<256x2304xbf16, #tpu.memory_space<vmem>>, vector<256x2304xbf16>
    %c0_1 = arith.constant 0 : index
    %c0_2 = arith.constant 0 : index
    %1 = vector.load %arg3[%c0_1, %c0_2] : memref<2304x128xbf16, #tpu.memory_space<vmem>>, vector<2304x128xbf16>
    %cst = arith.constant dense<0.000000e+00> : vector<256x128xf32>
    %2 = tpu.matmul %0, %1, %cst {dimension_numbers = #tpu.dot_dimension_numbers<[1], [0], [0], [1], [0, 0, 1, 1], [], []>} : vector<256x2304xbf16>, vector<2304x128xbf16>, vector<256x128xf32> -> vector<256x128xf32>
    %c0_3 = arith.constant 0 : index
    %c0_4 = arith.constant 0 : index
    %3 = vector.load %arg4[%c0_3, %c0_4] : memref<256x2304xbf16, #tpu.memory_space<vmem>>, vector<256x2304xbf16>
    %c0_5 = arith.constant 0 : index
    %c0_6 = arith.constant 0 : index
    %4 = vector.load %arg5[%c0_5, %c0_6] : memref<2304x128xbf16, #tpu.memory_space<vmem>>, vector<2304x128xbf16>
    %cst_7 = arith.constant dense<0.000000e+00> : vector<256x128xf32>
    %5 = tpu.matmul %3, %4, %cst_7 {dimension_numbers = #tpu.dot_dimension_numbers<[1], [0], [0], [1], [0, 0, 1, 1], [], []>} : vector<256x2304xbf16>, vector<2304x128xbf16>, vector<256x128xf32> -> vector<256x128xf32>
    %6 = arith.addf %2, %5 : vector<256x128xf32>
    %c0_8 = arith.constant 0 : index
    %c0_9 = arith.constant 0 : index
    %7 = vector.load %arg6[%c0_8, %c0_9] : memref<1x128xf32, #tpu.memory_space<vmem>>, vector<1x128xf32>
    %8 = vector.broadcast %7 : vector<1x128xf32> to vector<256x128xf32>
    %9 = arith.mulf %6, %8 : vector<256x128xf32>
    %c0_10 = arith.constant 0 : index
    %c0_11 = arith.constant 0 : index
    %10 = vector.load %arg7[%c0_10, %c0_11] : memref<1x128xf32, #tpu.memory_space<vmem>>, vector<1x128xf32>
    %11 = vector.broadcast %10 : vector<1x128xf32> to vector<256x128xf32>
    %12 = arith.addf %9, %11 : vector<256x128xf32>
    %c0_12 = arith.constant 0 : index
    %c0_13 = arith.constant 0 : index
    %13 = vector.load %arg8[%c0_12, %c0_13] : memref<256x128xf32, #tpu.memory_space<vmem>>, vector<256x128xf32>
    tpu.vector_store %arg8[%c0_12, %c0_13], %12 {strides = array<i32>} : memref<256x128xf32, #tpu.memory_space<vmem>>, vector<256x128xf32>,
    return
  }
  func.func @transform_0(%arg0: i32, %arg1: i32) -> (i32, i32) {
    %c0_i32 = arith.constant 0 : i32
    %c0_i32_0 = arith.constant 0 : i32
    return %arg0, %c0_i32 : i32, i32
  }
  func.func @transform_1(%arg0: i32, %arg1: i32) -> (i32, i32) {
    %c0_i32 = arith.constant 0 : i32
    %c0_i32_0 = arith.constant 0 : i32
    return %c0_i32, %arg1 : i32, i32
  }
  func.func @transform_2(%arg0: i32, %arg1: i32) -> (i32, i32) {
    %c0_i32 = arith.constant 0 : i32
    %c0_i32_0 = arith.constant 0 : i32
    return %arg0, %c0_i32 : i32, i32
  }
  func.func @transform_3(%arg0: i32, %arg1: i32) -> (i32, i32) {
    %c0_i32 = arith.constant 0 : i32
    %c0_i32_0 = arith.constant 0 : i32
    return %c0_i32, %arg1 : i32, i32
  }
  func.func @transform_4(%arg0: i32, %arg1: i32) -> (i32, i32) {
    %c0_i32 = arith.constant 0 : i32
    %c0_i32_0 = arith.constant 0 : i32
    return %c0_i32, %arg1 : i32, i32
  }
  func.func @transform_5(%arg0: i32, %arg1: i32) -> (i32, i32) {
    %c0_i32 = arith.constant 0 : i32
    %c0_i32_0 = arith.constant 0 : i32
    return %c0_i32, %arg1 : i32, i32
  }
  func.func @transform_6(%arg0: i32, %arg1: i32) -> (i32, i32) {
    %c0_i32 = arith.constant 0 : i32
    return %arg0, %arg1 : i32, i32
  }
}

</mosaic_0001>

<bundles_post_ra>
// kernel: aspp_decoder_forward.8
= control target key start
LH: loop header
LB: loop body
LE: loop exit
PB: predicated region body
PF: predicated region fallthrough
CT: control target
= control target key end

     0   :  { %vm146_vm0 = vcmask 588800   ;;  %vm171_vm1 = vcmask 1043456   ;;  %s805_s1 = inlined_call_operand.vmem [shape: bf16[72,128], index: 1, kind: input, shape index: {}]   ;;  %s806_s0 = inlined_call_operand.vmem [shape: bf16[128,72], index: 0, kind: input, shape index: {}]   ;;  %s807_s2 = inlined_call_operand.vmem [shape: f32[1,128], index: 2, kind: input, shape index: {}]   ;;  %s808_s3 = inlined_call_operand.vmem [shape: f32[1,128], index: 3, kind: input, shape index: {}]   ;;  %s809_s4 = inlined_call_operand.vmem [shape: bf16[128,128], index: 4, kind: output, shape index: {}]  }
   0x1   :  { %v654_v0 = vld [vmem:[%s805_s1] sm:$0xff]   ;;  %v655_v1 = vld [vmem:[%s805_s1 + $0x8] sm:$0xff]   ;;  %v656_v2 = vld [vmem:[%s805_s1 + $0x10] sm:$0xff]  }
   0x2   :  { %616 = vmatprep.subr.bf16.mxu0 %v654_v0  ;;  %642 = vmatprep.subr.bf16.mxu1 %v654_v0  ;;  %v659_v3 = vld [vmem:[%s806_s0] sm:$0xff]   ;;  %v657_v5 = vld [vmem:[%s805_s1 + $0x18] sm:$0xff]   ;;  %v661_v8 = vld [vmem:[%s806_s0 + $0x8] sm:$0xff]  }
   0x3   :  { %617 = vmatpush3.bf16.msra.mxu0 %v654_v0  ;;  %647 = vmatpush3.bf16.msra.mxu1 %v654_v0  ;;  %v660_v4 = vld [vmem:[%s806_s0 + $0x20] sm:$0xff]   ;;  %v662_v9 = vld [vmem:[%s806_s0 + $0x28] sm:$0xff]   ;;  %v663_v10 = vld [vmem:[%s806_s0 + $0x10] sm:$0xff]  }
   0x4   :  { %618 = vmatprep.subr.bf16.mxu0 %v655_v1  ;;  %643 = vmatprep.subr.bf16.mxu1 %v655_v1  ;;  %v658_v6 = vld [vmem:[%s805_s1 + $0x20] ss:$0 sps:$4 sm:$0xff]   ;;  %v664_v11 = vld [vmem:[%s806_s0 + $0x30] sm:$0xff]   ;;  %v665_v12 = vld [vmem:[%s806_s0 + $0x18] sm:$0xff]  }
   0x5   :  { %626 = vmatprep.mubr.msk.bf16.mxu0 %vm146_vm0, %v659_v3  ;;  %634 = vmatprep.mubr.msk.bf16.mxu1 %vm146_vm0, %v660_v4  ;;  %v173_v7 = vsel %vm171_vm1, %v658_v6, 0  ;;  %v666_v13 = vld [vmem:[%s806_s0 + $0x38] sm:$0xff]   ;;  %v742_v14 = vld [vmem:[%s807_s2] ss:$0 sm:$0xff] }
   0x6   :  { %v747_v16 = vld [vmem:[%s808_s3] ss:$0 sm:$0xff] }
   0x7   :  { %619 = vmatpush3.bf16.msra.mxu0 %v655_v1  ;;  %648 = vmatpush3.bf16.msra.mxu1 %v655_v1 }
   0x8   :  { %620 = vmatprep.subr.bf16.mxu0 %v656_v2  ;;  %644 = vmatprep.subr.bf16.mxu1 %v656_v2 }
   0xb   :  { %621 = vmatpush3.bf16.msra.mxu0 %v656_v2  ;;  %649 = vmatpush3.bf16.msra.mxu1 %v656_v2 }
   0xc   :  { %622 = vmatprep.subr.bf16.mxu0 %v657_v5  ;;  %645 = vmatprep.subr.bf16.mxu1 %v657_v5 }
   0xf   :  { %623 = vmatpush3.bf16.msra.mxu0 %v657_v5  ;;  %650 = vmatpush3.bf16.msra.mxu1 %v657_v5 }
  0x10   :  { %652 = vmatprep.subr.msk.bf16.mxu0 %vm171_vm1, %v658_v6  ;;  %653 = vmatprep.subr.msk.bf16.mxu1 %vm171_vm1, %v658_v6 }
  0x13   :  { %625 = vmatpush3.bf16.msra.mxu0 %v173_v7  ;;  %651 = vmatpush3.bf16.msra.mxu1 %v173_v7 }
  0x16   :  { %627 = vmatmul.mubr.msk.bf16.vlgmr.msra.gmra.mrb[0].mxu0 %vm146_vm0, %v661_v8  ;;  %635 = vmatmul.mubr.msk.bf16.vlgmr.msra.gmra.mrb[0].mxu1 %vm146_vm0, %v662_v9 }
  0x17   :  { %630 = vmatprep.mubr.msk.bf16.mxu0 %vm146_vm0, %v663_v10  ;;  %638 = vmatprep.mubr.msk.bf16.mxu1 %vm146_vm0, %v664_v11 }
  0x1e   :  { %631 = vmatmul.mubr.msk.bf16.gmra.mrb[4].mxu0 %vm146_vm0, %v665_v12  ;;  %639 = vmatmul.mubr.msk.bf16.gmra.mrb[4].mxu1 %vm146_vm0, %v666_v13 }
  0xe9   :  { %v628_v15 = vpop.f32.mrb[0].mxu0  ;;  %v636_v17 = vpop.f32.mrb[0].mxu1 }
  0xea   :  { %v332_v18 = vmul.f32 %v628_v15, %v742_v14  ;;  %v340_v19 = vmul.f32 %v636_v17, %v742_v14  ;;  %v209_v20 = vpop.f32.mrb[1].mxu0  ;;  %v241_v21 = vpop.f32.mrb[1].mxu1 }
  0xeb   :  { %v330_v22 = vmul.f32 %v742_v14, %v209_v20  ;;  %v338_v23 = vmul.f32 %v742_v14, %v241_v21  ;;  %v629_v24 = vpop.f32.mrb[2].mxu0  ;;  %v637_v25 = vpop.f32.mrb[2].mxu1 }
  0xec   :  { %v355_v26 = vadd.f32 %v747_v16, %v332_v18  ;;  %v363_v27 = vadd.f32 %v747_v16, %v340_v19  ;;  %v333_v28 = vmul.f32 %v629_v24, %v742_v14  ;;  %v341_v29 = vmul.f32 %v637_v25, %v742_v14  ;;  %v212_v30 = vpop.f32.mrb[3].mxu0  ;;  %v244_v31 = vpop.f32.mrb[3].mxu1 }
  0xed   :  { %v353_v32 = vadd.f32 %v747_v16, %v330_v22  ;;  %v361_v33 = vadd.f32 %v747_v16, %v338_v23  ;;  %v331_v34 = vmul.f32 %v742_v14, %v212_v30  ;;  %v339_v35 = vmul.f32 %v742_v14, %v244_v31 }
  0xee   :  { %vm371_vm2 = vcmp.ge.f32.partialorder %v355_v26, 0.0  ;;  %v387_v36 = vmul.f32 0.1, %v355_v26  ;;  %vm379_vm3 = vcmp.ge.f32.partialorder %v363_v27, 0.0  ;;  %v395_v37 = vmul.f32 0.1, %v363_v27 }
  0xef   :  { %vm369_vm4 = vcmp.ge.f32.partialorder %v353_v32, 0.0  ;;  %v385_v38 = vmul.f32 0.1, %v353_v32  ;;  %vm377_vm5 = vcmp.ge.f32.partialorder %v361_v33, 0.0  ;;  %v393_v39 = vmul.f32 0.1, %v361_v33 }
  0xf0   :  { %v403_v40 = vsel %vm371_vm2, %v355_v26, %v387_v36  ;;  %v411_v41 = vsel %vm379_vm3, %v363_v27, %v395_v37  ;;  %v356_v42 = vadd.f32 %v747_v16, %v333_v28  ;;  %v364_v43 = vadd.f32 %v747_v16, %v341_v29 }
  0xf1   :  { %v401_v44 = vsel %vm369_vm4, %v353_v32, %v385_v38  ;;  %v409_v45 = vsel %vm377_vm5, %v361_v33, %v393_v39  ;;  %v354_v46 = vadd.f32 %v747_v16, %v331_v34  ;;  %v362_v47 = vadd.f32 %v747_v16, %v339_v35  ;;  %v632_v48 = vpop.f32.mrb[4].mxu0  ;;  %v640_v49 = vpop.f32.mrb[4].mxu1 }
  0xf2   :  { %vm372_vm6 = vcmp.ge.f32.partialorder %v356_v42, 0.0  ;;  %v388_v50 = vmul.f32 0.1, %v356_v42  ;;  %vm380_vm7 = vcmp.ge.f32.partialorder %v364_v43, 0.0  ;;  %v396_v51 = vmul.f32 0.1, %v364_v43 }
  0xf3   :  { %vm370_vm8 = vcmp.ge.f32.partialorder %v354_v46, 0.0  ;;  %v386_v52 = vmul.f32 0.1, %v354_v46  ;;  %vm378_vm9 = vcmp.ge.f32.partialorder %v362_v47, 0.0  ;;  %v394_v53 = vmul.f32 0.1, %v362_v47 }
  0xf4   :  { %v404_v54 = vsel %vm372_vm6, %v356_v42, %v388_v50  ;;  %v412_v55 = vsel %vm380_vm7, %v364_v43, %v396_v51  ;;  %v336_v56 = vmul.f32 %v632_v48, %v742_v14  ;;  %v344_v57 = vmul.f32 %v640_v49, %v742_v14  ;;  %v225_v58 = vpop.f32.mrb[5].mxu0  ;;  %v257_v59 = vpop.f32.mrb[5].mxu1 }
  0xf5   :  { %v564_v60 = vpack.c.bf16 %v404_v54, %v403_v40  ;;  %v584_v61 = vpack.c.bf16 %v412_v55, %v411_v41  ;;  %v402_v62 = vsel %vm370_vm8, %v354_v46, %v386_v52  ;;  %v410_v63 = vsel %vm378_vm9, %v362_v47, %v394_v53  ;;  %v633_v0 = vpop.f32.mrb[6].mxu0  ;;  %v641_v1 = vpop.f32.mrb[6].mxu1 }
  0xf6   :  { %v559_v2 = vpack.c.bf16 %v402_v62, %v401_v44  ;;  %v579_v3 = vpack.c.bf16 %v410_v63, %v409_v45  ;;  %v359_v4 = vadd.f32 %v747_v16, %v336_v56  ;;  %v367_v5 = vadd.f32 %v747_v16, %v344_v57  ;;  %v228_v6 = vpop.f32.mrb[7].mxu0  ;;  %v260_v7 = vpop.f32.mrb[7].mxu1 }
  0xf7   :  { %596 = vst [vmem:[%s809_s4 + $0x8] sm:$0xff] %v564_v60   ;;  %600 = vst [vmem:[%s809_s4 + $0x28] sm:$0xff] %v584_v61   ;;  %v334_v8 = vmul.f32 %v742_v14, %v225_v58  ;;  %v342_v9 = vmul.f32 %v742_v14, %v257_v59  ;;  %v337_v10 = vmul.f32 %v633_v0, %v742_v14 }
  0xf8   :  { %v345_v11 = vmul.f32 %v641_v1, %v742_v14  ;;  %560 = vst [vmem:[%s809_s4] sm:$0xff] %v559_v2   ;;  %599 = vst [vmem:[%s809_s4 + $0x20] sm:$0xff] %v579_v3   ;;  %vm375_vm10 = vcmp.ge.f32.partialorder %v359_v4, 0.0  ;;  %v391_v12 = vmul.f32 0.1, %v359_v4  ;;  %vm383_vm11 = vcmp.ge.f32.partialorder %v367_v5, 0.0 }
  0xf9   :  { %v399_v13 = vmul.f32 0.1, %v367_v5  ;;  %v357_v15 = vadd.f32 %v747_v16, %v334_v8  ;;  %v360_v17 = vadd.f32 %v747_v16, %v337_v10  ;;  %v365_v19 = vadd.f32 %v747_v16, %v342_v9 }
  0xfa   :  { %v368_v18 = vadd.f32 %v747_v16, %v345_v11  ;;  %v335_v20 = vmul.f32 %v742_v14, %v228_v6  ;;  %v343_v21 = vmul.f32 %v742_v14, %v260_v7  ;;  %v407_v22 = vsel %vm375_vm10, %v359_v4, %v391_v12 }
  0xfb   :  { %v415_v23 = vsel %vm383_vm11, %v367_v5, %v399_v13  ;;  %vm376_vm12 = vcmp.ge.f32.partialorder %v360_v17, 0.0  ;;  %v392_v24 = vmul.f32 0.1, %v360_v17  ;;  %vm373_vm14 = vcmp.ge.f32.partialorder %v357_v15, 0.0 }
  0xfc   :  { %vm384_vm13 = vcmp.ge.f32.partialorder %v368_v18, 0.0  ;;  %v400_v25 = vmul.f32 0.1, %v368_v18  ;;  %v389_v26 = vmul.f32 0.1, %v357_v15  ;;  %v358_v27 = vadd.f32 %v747_v16, %v335_v20 }
  0xfd   :  { %v366_v28 = vadd.f32 %v747_v16, %v343_v21  ;;  %vm381_vm15 = vcmp.ge.f32.partialorder %v365_v19, 0.0  ;;  %v397_v29 = vmul.f32 0.1, %v365_v19  ;;  %v408_v30 = vsel %vm376_vm12, %v360_v17, %v392_v24 }
  0xfe   :  { %v416_v31 = vsel %vm384_vm13, %v368_v18, %v400_v25  ;;  %v574_v32 = vpack.c.bf16 %v408_v30, %v407_v22  ;;  %vm374_vm0 = vcmp.ge.f32.partialorder %v358_v27, 0.0  ;;  %v390_v14 = vmul.f32 0.1, %v358_v27 }
  0xff   :  { %v594_v33 = vpack.c.bf16 %v416_v31, %v415_v23  ;;  %vm382_vm1 = vcmp.ge.f32.partialorder %v366_v28, 0.0  ;;  %v398_v34 = vmul.f32 0.1, %v366_v28  ;;  %v405_v35 = vsel %vm373_vm14, %v357_v15, %v389_v26 }
 0x100   :  { %598 = vst [vmem:[%s809_s4 + $0x18] sm:$0xff] %v574_v32   ;;  %v406_v16 = vsel %vm374_vm0, %v358_v27, %v390_v14  ;;  %v413_v36 = vsel %vm381_vm15, %v365_v19, %v397_v29 }
 0x101   :  { %602 = vst [vmem:[%s809_s4 + $0x38] sm:$0xff] %v594_v33   ;;  %v569_v37 = vpack.c.bf16 %v406_v16, %v405_v35  ;;  %v414_v38 = vsel %vm382_vm1, %v366_v28, %v398_v34 }
 0x102   :  { %v589_v39 = vpack.c.bf16 %v414_v38, %v413_v36 }
 0x103   :  { %597 = vst [vmem:[%s809_s4 + $0x10] sm:$0xff] %v569_v37  }
 0x104   :  { %601 = vst [vmem:[%s809_s4 + $0x30] sm:$0xff] %v589_v39  }

// kernel: aspp_decoder_forward.7
= control target key start
LH: loop header
LB: loop body
LE: loop exit
PB: predicated region body
PF: predicated region fallthrough
CT: control target
= control target key end

     0   :  { %vm136_vm0 = vcmask 1043456   ;;  %vm111_vm1 = vcmask 64512   ;;  %s730_s1 = inlined_call_operand.vmem [shape: bf16[8,128], index: 1, kind: input, shape index: {}]   ;;  %s731_s0 = inlined_call_operand.vmem [shape: bf16[128,8], index: 0, kind: input, shape index: {}]   ;;  %s732_s2 = inlined_call_operand.vmem [shape: f32[1,128], index: 2, kind: input, shape index: {}]   ;;  %s733_s3 = inlined_call_operand.vmem [shape: f32[1,128], index: 3, kind: input, shape index: {}]   ;;  %s734_s4 = inlined_call_operand.vmem [shape: bf16[128,128], index: 4, kind: output, shape index: {}]  }
   0x1   :  { %v70_v0 = vld [vmem:[%s730_s1] sm:$0xf]  ;;  %v596_v4 = vld [vmem:[%s731_s0 + $0x8] sm:$0xff]   ;;  %v598_v6 = vld [vmem:[%s731_s0 + $0x10] sm:$0xff]  }
   0x2   :  { %592 = vmatprep.subr.msk.bf16.mxu0 %vm136_vm0, %v70_v0  ;;  %593 = vmatprep.subr.msk.bf16.mxu1 %vm136_vm0, %v70_v0  ;;  %v138_v1 = vsel %vm136_vm0, %v70_v0, 0  ;;  %v594_v2 = vld [vmem:[%s731_s0] sm:$0xff]   ;;  %v597_v5 = vld [vmem:[%s731_s0 + $0x28] sm:$0xff]   ;;  %v599_v7 = vld [vmem:[%s731_s0 + $0x30] sm:$0xff]  }
   0x3   :  { %573 = vmatpush3.bf16.msra.mxu0 %v138_v1  ;;  %591 = vmatpush3.bf16.msra.mxu1 %v138_v1  ;;  %v595_v3 = vld [vmem:[%s731_s0 + $0x20] sm:$0xff]   ;;  %v600_v8 = vld [vmem:[%s731_s0 + $0x18] sm:$0xff]  }
   0x4   :  { %574 = vmatprep.mubr.msk.bf16.mxu0 %vm111_vm1, %v594_v2  ;;  %582 = vmatprep.mubr.msk.bf16.mxu1 %vm111_vm1, %v595_v3  ;;  %v601_v9 = vld [vmem:[%s731_s0 + $0x38] sm:$0xff]   ;;  %v665_v10 = vld [vmem:[%s732_s2] ss:$0 sm:$0xff] }
   0x5   :  { %v670_v12 = vld [vmem:[%s733_s3] ss:$0 sm:$0xff] }
   0x6   :  { %575 = vmatmul.mubr.msk.bf16.vlgmr.msra.gmra.mrb[0].mxu0 %vm111_vm1, %v596_v4  ;;  %583 = vmatmul.mubr.msk.bf16.vlgmr.msra.gmra.mrb[0].mxu1 %vm111_vm1, %v597_v5 }
   0x7   :  { %578 = vmatprep.mubr.msk.bf16.mxu0 %vm111_vm1, %v598_v6  ;;  %586 = vmatprep.mubr.msk.bf16.mxu1 %vm111_vm1, %v599_v7 }
   0xe   :  { %579 = vmatmul.mubr.msk.bf16.gmra.mrb[4].mxu0 %vm111_vm1, %v600_v8  ;;  %587 = vmatmul.mubr.msk.bf16.gmra.mrb[4].mxu1 %vm111_vm1, %v601_v9 }
  0xd9   :  { %v576_v11 = vpop.f32.mrb[0].mxu0  ;;  %v584_v14 = vpop.f32.mrb[0].mxu1 }
  0xda   :  { %v297_v13 = vmul.f32 %v576_v11, %v665_v10  ;;  %v174_v15 = vpop.f32.mrb[1].mxu0  ;;  %v305_v16 = vmul.f32 %v584_v14, %v665_v10  ;;  %v206_v18 = vpop.f32.mrb[1].mxu1 }
  0xdb   :  { %v295_v17 = vmul.f32 %v665_v10, %v174_v15  ;;  %v577_v19 = vpop.f32.mrb[2].mxu0  ;;  %v303_v21 = vmul.f32 %v665_v10, %v206_v18  ;;  %v585_v23 = vpop.f32.mrb[2].mxu1 }
  0xdc   :  { %v320_v20 = vadd.f32 %v670_v12, %v297_v13  ;;  %v298_v22 = vmul.f32 %v577_v19, %v665_v10  ;;  %v177_v24 = vpop.f32.mrb[3].mxu0  ;;  %v328_v25 = vadd.f32 %v670_v12, %v305_v16  ;;  %v306_v27 = vmul.f32 %v585_v23, %v665_v10  ;;  %v209_v29 = vpop.f32.mrb[3].mxu1 }
  0xdd   :  { %v318_v26 = vadd.f32 %v670_v12, %v295_v17  ;;  %v296_v28 = vmul.f32 %v665_v10, %v177_v24  ;;  %v326_v31 = vadd.f32 %v670_v12, %v303_v21  ;;  %v304_v43 = vmul.f32 %v665_v10, %v209_v29 }
  0xde   :  { %vm336_vm2 = vcmp.ge.f32.partialorder %v320_v20, 0.0  ;;  %v352_v30 = vmul.f32 0.1, %v320_v20  ;;  %v321_v32 = vadd.f32 %v670_v12, %v298_v22  ;;  %vm344_vm3 = vcmp.ge.f32.partialorder %v328_v25, 0.0 }
  0xdf   :  { %v360_v33 = vmul.f32 0.1, %v328_v25  ;;  %vm334_vm4 = vcmp.ge.f32.partialorder %v318_v26, 0.0  ;;  %v350_v34 = vmul.f32 0.1, %v318_v26  ;;  %vm342_vm5 = vcmp.ge.f32.partialorder %v326_v31, 0.0 }
  0xe0   :  { %v368_v35 = vsel %vm336_vm2, %v320_v20, %v352_v30  ;;  %vm337_vm6 = vcmp.ge.f32.partialorder %v321_v32, 0.0  ;;  %v358_v37 = vmul.f32 0.1, %v326_v31  ;;  %v353_v38 = vmul.f32 0.1, %v321_v32 }
  0xe1   :  { %v376_v36 = vsel %vm344_vm3, %v328_v25, %v360_v33  ;;  %v329_v39 = vadd.f32 %v670_v12, %v306_v27  ;;  %v580_v40 = vpop.f32.mrb[4].mxu0  ;;  %v366_v41 = vsel %vm334_vm4, %v318_v26, %v350_v34  ;;  %v319_v42 = vadd.f32 %v670_v12, %v296_v28  ;;  %v588_v45 = vpop.f32.mrb[4].mxu1 }
  0xe2   :  { %v301_v44 = vmul.f32 %v580_v40, %v665_v10  ;;  %v190_v46 = vpop.f32.mrb[5].mxu0  ;;  %v369_v47 = vsel %vm337_vm6, %v321_v32, %v353_v38  ;;  %v309_v49 = vmul.f32 %v588_v45, %v665_v10  ;;  %v222_v50 = vpop.f32.mrb[5].mxu1  ;;  %v327_v54 = vadd.f32 %v670_v12, %v304_v43 }
  0xe3   :  { %vm345_vm7 = vcmp.ge.f32.partialorder %v329_v39, 0.0  ;;  %v361_v48 = vmul.f32 0.1, %v329_v39  ;;  %v581_v51 = vpop.f32.mrb[6].mxu0  ;;  %v524_v52 = vpack.c.bf16 %v369_v47, %v368_v35  ;;  %vm335_vm8 = vcmp.ge.f32.partialorder %v319_v42, 0.0  ;;  %v589_v55 = vpop.f32.mrb[6].mxu1 }
  0xe4   :  { %v351_v53 = vmul.f32 0.1, %v319_v42  ;;  %v193_v56 = vpop.f32.mrb[7].mxu0  ;;  %v324_v58 = vadd.f32 %v670_v12, %v301_v44  ;;  %v332_v59 = vadd.f32 %v670_v12, %v309_v49  ;;  %v299_v60 = vmul.f32 %v665_v10, %v190_v46  ;;  %v225_v61 = vpop.f32.mrb[7].mxu1 }
  0xe5   :  { %v377_v57 = vsel %vm345_vm7, %v329_v39, %v361_v48  ;;  %556 = vst [vmem:[%s734_s4 + $0x8] sm:$0xff] %v524_v52   ;;  %vm343_vm9 = vcmp.ge.f32.partialorder %v327_v54, 0.0  ;;  %v359_v0 = vmul.f32 0.1, %v327_v54  ;;  %v374_v1 = vsel %vm342_vm5, %v326_v31, %v358_v37 }
  0xe6   :  { %v544_v62 = vpack.c.bf16 %v377_v57, %v376_v36  ;;  %v367_v63 = vsel %vm335_vm8, %v319_v42, %v351_v53  ;;  %vm340_vm10 = vcmp.ge.f32.partialorder %v324_v58, 0.0  ;;  %v356_v4 = vmul.f32 0.1, %v324_v58 }
  0xe7   :  { %v519_v2 = vpack.c.bf16 %v367_v63, %v366_v41  ;;  %v375_v3 = vsel %vm343_vm9, %v327_v54, %v359_v0  ;;  %v364_v5 = vmul.f32 0.1, %v332_v59  ;;  %v307_v6 = vmul.f32 %v665_v10, %v222_v50 }
  0xe8   :  { %560 = vst [vmem:[%s734_s4 + $0x28] sm:$0xff] %v544_v62   ;;  %v539_v7 = vpack.c.bf16 %v375_v3, %v374_v1  ;;  %vm348_vm11 = vcmp.ge.f32.partialorder %v332_v59, 0.0  ;;  %v302_v8 = vmul.f32 %v581_v51, %v665_v10  ;;  %v310_v9 = vmul.f32 %v589_v55, %v665_v10 }
  0xe9   :  { %520 = vst [vmem:[%s734_s4] sm:$0xff] %v519_v2   ;;  %v322_v11 = vadd.f32 %v670_v12, %v299_v60  ;;  %v330_v13 = vadd.f32 %v670_v12, %v307_v6  ;;  %v300_v16 = vmul.f32 %v665_v10, %v193_v56  ;;  %v308_v17 = vmul.f32 %v665_v10, %v225_v61 }
  0xea   :  { %559 = vst [vmem:[%s734_s4 + $0x20] sm:$0xff] %v539_v7   ;;  %v325_v14 = vadd.f32 %v670_v12, %v302_v8  ;;  %v333_v15 = vadd.f32 %v670_v12, %v310_v9  ;;  %v372_v18 = vsel %vm340_vm10, %v324_v58, %v356_v4  ;;  %v380_v19 = vsel %vm348_vm11, %v332_v59, %v364_v5 }
  0xeb   :  { %vm338_vm14 = vcmp.ge.f32.partialorder %v322_v11, 0.0  ;;  %v354_v22 = vmul.f32 0.1, %v322_v11  ;;  %v323_v23 = vadd.f32 %v670_v12, %v300_v16  ;;  %v331_v24 = vadd.f32 %v670_v12, %v308_v17 }
  0xec   :  { %vm341_vm12 = vcmp.ge.f32.partialorder %v325_v14, 0.0  ;;  %v357_v20 = vmul.f32 0.1, %v325_v14  ;;  %vm349_vm13 = vcmp.ge.f32.partialorder %v333_v15, 0.0  ;;  %v365_v21 = vmul.f32 0.1, %v333_v15 }
  0xed   :  { %vm346_vm15 = vcmp.ge.f32.partialorder %v330_v13, 0.0  ;;  %v362_v25 = vmul.f32 0.1, %v330_v13  ;;  %vm339_vm0 = vcmp.ge.f32.partialorder %v323_v23, 0.0  ;;  %v355_v10 = vmul.f32 0.1, %v323_v23 }
  0xee   :  { %v373_v26 = vsel %vm341_vm12, %v325_v14, %v357_v20  ;;  %v381_v27 = vsel %vm349_vm13, %v333_v15, %v365_v21  ;;  %vm347_vm1 = vcmp.ge.f32.partialorder %v331_v24, 0.0  ;;  %v363_v30 = vmul.f32 0.1, %v331_v24 }
  0xef   :  { %v534_v28 = vpack.c.bf16 %v373_v26, %v372_v18  ;;  %v554_v29 = vpack.c.bf16 %v381_v27, %v380_v19  ;;  %v370_v31 = vsel %vm338_vm14, %v322_v11, %v354_v22  ;;  %v371_v12 = vsel %vm339_vm0, %v323_v23, %v355_v10 }
  0xf0   :  { %v378_v32 = vsel %vm346_vm15, %v330_v13, %v362_v25  ;;  %v529_v33 = vpack.c.bf16 %v371_v12, %v370_v31  ;;  %v379_v34 = vsel %vm347_vm1, %v331_v24, %v363_v30 }
  0xf1   :  { %558 = vst [vmem:[%s734_s4 + $0x18] sm:$0xff] %v534_v28   ;;  %562 = vst [vmem:[%s734_s4 + $0x38] sm:$0xff] %v554_v29   ;;  %v549_v35 = vpack.c.bf16 %v379_v34, %v378_v32 }
  0xf2   :  { %557 = vst [vmem:[%s734_s4 + $0x10] sm:$0xff] %v529_v33  }
  0xf3   :  { %561 = vst [vmem:[%s734_s4 + $0x30] sm:$0xff] %v549_v35  }

// kernel: aspp_decoder_forward.11
= control target key start
LH: loop header
LB: loop body
LE: loop exit
PB: predicated region body
PF: predicated region fallthrough
CT: control target
= control target key end

     0   :  { %v547_v1 = vmov 0   ;;  %vm154_vm0 = vcmask 130048   ;;  %v393_v11 = vlaneseq  ;;  %s785_s1 = inlined_call_operand.vmem [shape: bf16[16,256], index: 1, kind: input, shape index: {}]   ;;  %s786_s0 = inlined_call_operand.vmem [shape: bf16[128,16], index: 0, kind: input, shape index: {}]   ;;  %s787_s2 = inlined_call_operand.vmem [shape: f32[1,256], index: 2, kind: input, shape index: {}]   ;;  %s788_s3 = inlined_call_operand.vmem [shape: f32[1,256], index: 3, kind: input, shape index: {}]   ;;  %s789_s4 = inlined_call_operand.vmem [shape: f32[128,256], index: 4, kind: output, shape index: {}]  }
   0x1   :  { %v536_v0 = vld [vmem:[%s785_s1 + $0x4] ss:$8 sps:$4 sm:$0xff]   ;;  %211 = vmatprep.mubr.bf16.mxu0 %v547_v1  ;;  %251 = vmatprep.mubr.bf16.mxu1 %v547_v1  ;;  %v538_v2 = vld [vmem:[%s785_s1] ss:$8 sps:$4 sm:$0xff]   ;;  %v543_v7 = vld [vmem:[%s786_s0 + $0x10] sm:$0xff]  }
   0x2   :  { %179 = vmatprep.subr.bf16.mxu0 %v536_v0  ;;  %533 = vmatprep.subr.bf16.mxu1 %v536_v0  ;;  %v539_v3 = vld [vmem:[%s786_s0] sm:$0xff]   ;;  %v541_v5 = vld [vmem:[%s786_s0 + $0x8] sm:$0xff]   ;;  %v544_v8 = vld [vmem:[%s786_s0 + $0x30] sm:$0xff]   ;;  %v394_v12 = vshrl.u32 %v393_v11, 7 }
   0x3   :  { %180 = vmatpush1.bf16.msra.mxu0 %v538_v2  ;;  %534 = vmatpush1.bf16.msra.mxu1 %v538_v2  ;;  %v540_v4 = vld [vmem:[%s786_s0 + $0x20] sm:$0xff]   ;;  %v542_v6 = vld [vmem:[%s786_s0 + $0x28] sm:$0xff]   ;;  %v545_v9 = vld [vmem:[%s786_s0 + $0x18] sm:$0xff]  }
   0x4   :  { %v546_v10 = vld [vmem:[%s786_s0 + $0x38] sm:$0xff]   ;;  %v395_v13 = vsub.s32 0, %v394_v12  ;;  %v391_v14 = vld [vmem:[%s787_s2] sm:$0x3]  ;;  %v399_v15 = vsub.s32 1, %v394_v12 }
   0x5   :  { %v435_v16 = vld [vmem:[%s788_s3] sm:$0x3] }
   0x6   :  { %525 = vmatmul.mubr.msk.bf16.vlgmr.msra.gmra.mrb[0].mxu0 %vm154_vm0, %v539_v3  ;;  %529 = vmatmul.mubr.msk.bf16.vlgmr.msra.gmra.mrb[0].mxu1 %vm154_vm0, %v540_v4  ;;  %v617_v17 = vrot.slane %v391_v14, %v395_v13  ;;  %v619_v18 = vrot.slane %v391_v14, %v399_v15  ;;  %v621_v19 = vrot.slane %v435_v16, %v395_v13 }
   0x7   :  { %221 = vmatprep.mubr.bf16.mxu0 %v547_v1  ;;  %261 = vmatprep.mubr.bf16.mxu1 %v547_v1  ;;  %v623_v22 = vrot.slane %v435_v16, %v399_v15 }
   0xe   :  { %526 = vmatmul.mubr.msk.bf16.gmra.mrb[4].mxu0 %vm154_vm0, %v541_v5  ;;  %530 = vmatmul.mubr.msk.bf16.gmra.mrb[4].mxu1 %vm154_vm0, %v542_v6 }
   0xf   :  { %231 = vmatprep.mubr.bf16.mxu0 %v547_v1  ;;  %271 = vmatprep.mubr.bf16.mxu1 %v547_v1 }
  0x16   :  { %527 = vmatmul.mubr.msk.bf16.gmra.mrb[8].mxu0 %vm154_vm0, %v543_v7  ;;  %531 = vmatmul.mubr.msk.bf16.gmra.mrb[8].mxu1 %vm154_vm0, %v544_v8 }
  0x17   :  { %241 = vmatprep.mubr.bf16.mxu0 %v547_v1  ;;  %281 = vmatprep.mubr.bf16.mxu1 %v547_v1 }
  0x1e   :  { %528 = vmatmul.mubr.msk.bf16.gmra.mrb[12].mxu0 %vm154_vm0, %v545_v9  ;;  %532 = vmatmul.mubr.msk.bf16.gmra.mrb[12].mxu1 %vm154_vm0, %v546_v10 }
  0xd9   :  { %v213_v20 = vpop.f32.mrb[0].mxu0  ;;  %v253_v21 = vpop.f32.mrb[0].mxu1 }
  0xda   :  { %v403_v23 = vmul.f32 %v617_v17, %v213_v20  ;;  %v419_v24 = vmul.f32 %v617_v17, %v253_v21  ;;  %v215_v25 = vpop.f32.mrb[1].mxu0  ;;  %v255_v26 = vpop.f32.mrb[1].mxu1 }
  0xdb   :  { %v404_v27 = vmul.f32 %v619_v18, %v215_v25  ;;  %v420_v28 = vmul.f32 %v619_v18, %v255_v26  ;;  %v217_v29 = vpop.f32.mrb[2].mxu0  ;;  %v257_v30 = vpop.f32.mrb[2].mxu1 }
  0xdc   :  { %v447_v31 = vadd.f32 %v621_v19, %v403_v23  ;;  %v463_v32 = vadd.f32 %v621_v19, %v419_v24  ;;  %v405_v33 = vmul.f32 %v617_v17, %v217_v29  ;;  %v421_v34 = vmul.f32 %v617_v17, %v257_v30  ;;  %v219_v35 = vpop.f32.mrb[3].mxu0  ;;  %v259_v36 = vpop.f32.mrb[3].mxu1 }
  0xdd   :  { %v448_v37 = vadd.f32 %v623_v22, %v404_v27  ;;  %v464_v38 = vadd.f32 %v623_v22, %v420_v28  ;;  %v406_v39 = vmul.f32 %v619_v18, %v219_v35  ;;  %v422_v40 = vmul.f32 %v619_v18, %v259_v36 }
  0xde   :  { %479 = vst [vmem:[%s789_s4] sm:$0xff] %v447_v31  ;;  %495 = vst [vmem:[%s789_s4 + $0x80] sm:$0xff] %v463_v32  ;;  %v449_v41 = vadd.f32 %v621_v19, %v405_v33  ;;  %v465_v42 = vadd.f32 %v621_v19, %v421_v34 }
  0xdf   :  { %480 = vst [vmem:[%s789_s4 + $0x8] sm:$0xff] %v448_v37  ;;  %496 = vst [vmem:[%s789_s4 + $0x88] sm:$0xff] %v464_v38  ;;  %v450_v43 = vadd.f32 %v623_v22, %v406_v39  ;;  %v466_v44 = vadd.f32 %v623_v22, %v422_v40 }
  0xe0   :  { %481 = vst [vmem:[%s789_s4 + $0x10] sm:$0xff] %v449_v41  ;;  %497 = vst [vmem:[%s789_s4 + $0x90] sm:$0xff] %v465_v42 }
  0xe1   :  { %482 = vst [vmem:[%s789_s4 + $0x18] sm:$0xff] %v450_v43  ;;  %498 = vst [vmem:[%s789_s4 + $0x98] sm:$0xff] %v466_v44  ;;  %v223_v45 = vpop.f32.mrb[4].mxu0  ;;  %v263_v46 = vpop.f32.mrb[4].mxu1 }
  0xe2   :  { %v407_v47 = vmul.f32 %v617_v17, %v223_v45  ;;  %v423_v48 = vmul.f32 %v617_v17, %v263_v46  ;;  %v225_v49 = vpop.f32.mrb[5].mxu0  ;;  %v265_v50 = vpop.f32.mrb[5].mxu1 }
  0xe3   :  { %v408_v51 = vmul.f32 %v619_v18, %v225_v49  ;;  %v424_v52 = vmul.f32 %v619_v18, %v265_v50  ;;  %v227_v53 = vpop.f32.mrb[6].mxu0  ;;  %v267_v54 = vpop.f32.mrb[6].mxu1 }
  0xe4   :  { %v451_v55 = vadd.f32 %v621_v19, %v407_v47  ;;  %v467_v56 = vadd.f32 %v621_v19, %v423_v48  ;;  %v409_v57 = vmul.f32 %v617_v17, %v227_v53  ;;  %v425_v58 = vmul.f32 %v617_v17, %v267_v54  ;;  %v229_v59 = vpop.f32.mrb[7].mxu0  ;;  %v269_v60 = vpop.f32.mrb[7].mxu1 }
  0xe5   :  { %v452_v61 = vadd.f32 %v623_v22, %v408_v51  ;;  %v468_v62 = vadd.f32 %v623_v22, %v424_v52  ;;  %v410_v63 = vmul.f32 %v619_v18, %v229_v59  ;;  %v426_v0 = vmul.f32 %v619_v18, %v269_v60 }
  0xe6   :  { %483 = vst [vmem:[%s789_s4 + $0x20] sm:$0xff] %v451_v55  ;;  %499 = vst [vmem:[%s789_s4 + $0xa0] sm:$0xff] %v467_v56  ;;  %v453_v1 = vadd.f32 %v621_v19, %v409_v57  ;;  %v469_v2 = vadd.f32 %v621_v19, %v425_v58 }
  0xe7   :  { %484 = vst [vmem:[%s789_s4 + $0x28] sm:$0xff] %v452_v61  ;;  %500 = vst [vmem:[%s789_s4 + $0xa8] sm:$0xff] %v468_v62  ;;  %v454_v3 = vadd.f32 %v623_v22, %v410_v63  ;;  %v470_v4 = vadd.f32 %v623_v22, %v426_v0 }
  0xe8   :  { %485 = vst [vmem:[%s789_s4 + $0x30] sm:$0xff] %v453_v1  ;;  %501 = vst [vmem:[%s789_s4 + $0xb0] sm:$0xff] %v469_v2 }
  0xe9   :  { %486 = vst [vmem:[%s789_s4 + $0x38] sm:$0xff] %v454_v3  ;;  %502 = vst [vmem:[%s789_s4 + $0xb8] sm:$0xff] %v470_v4  ;;  %v233_v5 = vpop.f32.mrb[8].mxu0  ;;  %v273_v6 = vpop.f32.mrb[8].mxu1 }
  0xea   :  { %v411_v7 = vmul.f32 %v617_v17, %v233_v5  ;;  %v427_v8 = vmul.f32 %v617_v17, %v273_v6  ;;  %v235_v9 = vpop.f32.mrb[9].mxu0  ;;  %v275_v10 = vpop.f32.mrb[9].mxu1 }
  0xeb   :  { %v412_v11 = vmul.f32 %v619_v18, %v235_v9  ;;  %v428_v12 = vmul.f32 %v619_v18, %v275_v10  ;;  %v237_v13 = vpop.f32.mrb[10].mxu0  ;;  %v277_v14 = vpop.f32.mrb[10].mxu1 }
  0xec   :  { %v455_v15 = vadd.f32 %v621_v19, %v411_v7  ;;  %v471_v16 = vadd.f32 %v621_v19, %v427_v8  ;;  %v413_v20 = vmul.f32 %v617_v17, %v237_v13  ;;  %v429_v21 = vmul.f32 %v617_v17, %v277_v14  ;;  %v239_v23 = vpop.f32.mrb[11].mxu0  ;;  %v279_v24 = vpop.f32.mrb[11].mxu1 }
  0xed   :  { %v456_v25 = vadd.f32 %v623_v22, %v412_v11  ;;  %v472_v26 = vadd.f32 %v623_v22, %v428_v12  ;;  %v414_v27 = vmul.f32 %v619_v18, %v239_v23  ;;  %v430_v28 = vmul.f32 %v619_v18, %v279_v24 }
  0xee   :  { %487 = vst [vmem:[%s789_s4 + $0x40] sm:$0xff] %v455_v15  ;;  %503 = vst [vmem:[%s789_s4 + $0xc0] sm:$0xff] %v471_v16  ;;  %v457_v29 = vadd.f32 %v621_v19, %v413_v20  ;;  %v473_v30 = vadd.f32 %v621_v19, %v429_v21 }
  0xef   :  { %488 = vst [vmem:[%s789_s4 + $0x48] sm:$0xff] %v456_v25  ;;  %504 = vst [vmem:[%s789_s4 + $0xc8] sm:$0xff] %v472_v26  ;;  %v458_v31 = vadd.f32 %v623_v22, %v414_v27  ;;  %v474_v32 = vadd.f32 %v623_v22, %v430_v28 }
  0xf0   :  { %489 = vst [vmem:[%s789_s4 + $0x50] sm:$0xff] %v457_v29  ;;  %505 = vst [vmem:[%s789_s4 + $0xd0] sm:$0xff] %v473_v30 }
  0xf1   :  { %490 = vst [vmem:[%s789_s4 + $0x58] sm:$0xff] %v458_v31  ;;  %506 = vst [vmem:[%s789_s4 + $0xd8] sm:$0xff] %v474_v32  ;;  %v243_v33 = vpop.f32.mrb[12].mxu0  ;;  %v283_v34 = vpop.f32.mrb[12].mxu1 }
  0xf2   :  { %v415_v35 = vmul.f32 %v617_v17, %v243_v33  ;;  %v431_v36 = vmul.f32 %v617_v17, %v283_v34  ;;  %v245_v37 = vpop.f32.mrb[13].mxu0  ;;  %v285_v38 = vpop.f32.mrb[13].mxu1 }
  0xf3   :  { %v416_v39 = vmul.f32 %v619_v18, %v245_v37  ;;  %v432_v40 = vmul.f32 %v619_v18, %v285_v38  ;;  %v247_v41 = vpop.f32.mrb[14].mxu0  ;;  %v287_v42 = vpop.f32.mrb[14].mxu1 }
  0xf4   :  { %v459_v43 = vadd.f32 %v621_v19, %v415_v35  ;;  %v475_v44 = vadd.f32 %v621_v19, %v431_v36  ;;  %v417_v45 = vmul.f32 %v617_v17, %v247_v41  ;;  %v433_v46 = vmul.f32 %v617_v17, %v287_v42  ;;  %v249_v47 = vpop.f32.mrb[15].mxu0  ;;  %v289_v48 = vpop.f32.mrb[15].mxu1 }
  0xf5   :  { %v460_v49 = vadd.f32 %v623_v22, %v416_v39  ;;  %v476_v50 = vadd.f32 %v623_v22, %v432_v40  ;;  %v418_v51 = vmul.f32 %v619_v18, %v249_v47  ;;  %v434_v52 = vmul.f32 %v619_v18, %v289_v48 }
  0xf6   :  { %491 = vst [vmem:[%s789_s4 + $0x60] sm:$0xff] %v459_v43  ;;  %507 = vst [vmem:[%s789_s4 + $0xe0] sm:$0xff] %v475_v44  ;;  %v461_v17 = vadd.f32 %v621_v19, %v417_v45  ;;  %v477_v53 = vadd.f32 %v621_v19, %v433_v46 }
  0xf7   :  { %492 = vst [vmem:[%s789_s4 + $0x68] sm:$0xff] %v460_v49  ;;  %508 = vst [vmem:[%s789_s4 + $0xe8] sm:$0xff] %v476_v50  ;;  %v462_v18 = vadd.f32 %v623_v22, %v418_v51  ;;  %v478_v54 = vadd.f32 %v623_v22, %v434_v52 }
  0xf8   :  { %493 = vst [vmem:[%s789_s4 + $0x70] sm:$0xff] %v461_v17  ;;  %509 = vst [vmem:[%s789_s4 + $0xf0] sm:$0xff] %v477_v53 }
  0xf9   :  { %494 = vst [vmem:[%s789_s4 + $0x78] sm:$0xff] %v462_v18  ;;  %510 = vst [vmem:[%s789_s4 + $0xf8] sm:$0xff] %v478_v54 }

// kernel: aspp_decoder_forward.12
= control target key start
LH: loop header
LB: loop body
LE: loop exit
PB: predicated region body
PF: predicated region fallthrough
CT: control target
= control target key end

     0   :  { %s3057_s15 = smov 0   ;;  %s3059_s16 = smov 0   ;;  %s3531_s0 = inlined_call_operand.vmem [shape: bf16[512,512], index: 0, kind: input, shape index: {}]   ;;  %s3532_s1 = inlined_call_operand.vmem [shape: bf16[512,256], index: 1, kind: input, shape index: {}]   ;;  %s3533_s2 = inlined_call_operand.vmem [shape: f32[1,256], index: 2, kind: input, shape index: {}]   ;;  %s3534_s3 = inlined_call_operand.vmem [shape: f32[1,256], index: 3, kind: input, shape index: {}]   ;;  %s3535_s4 = inlined_call_operand.vmem [shape: bf16[512,256], index: 4, kind: output, shape index: {}]  }
   0x1   :  { %s3061_s17 = smov 0  }
   0x2 LB: > { %s33_s18 = sadd.s32 1, %s3026_s16  ;;  %p2525_p0 = scmp.ge.s32.totalorder %s3030_s17, 1  ;;  %s3030_s17 = sphi %s3061_s17, %s14_s17   ;;  %s3026_s16 = sphi %s3059_s16, %s3537_s16   ;;  %s3022_s15 = sphi %s3057_s15, %s3536_s15  }
   0x3   : > { %p35_p1 = scmp.ge.s32.totalorder %s33_s18, 2  ;;  %p231_p2 = scmp.lt.s32.totalorder %s3030_s17, 3 }
   0x5   : > { %s3539_s18 = smov (%p35_p1, %s33_s18), 0  ;;  %p232_p3 = pnand %p2525_p0, %p231_p2 }
   0x6   : > { %v2816_v0 = vld [vmem:[%s3532_s1 + $0x4] ss:$8 sps:$4 sm:$0xff] (!%p232_p3)   ;;  %v2820_v2 = vld [vmem:[%s3532_s1] ss:$8 sps:$4 sm:$0xff] (!%p232_p3)   ;;  %v2822_v4 = vld [vmem:[%s3532_s1 + $0x14] ss:$8 sps:$4 sm:$0xff] (!%p232_p3)  }
   0x7   : > { %235 = sbr.rel (%p232_p3) target bundleno = 419 (0x1a3), region = 36  ;;  %v2818_v1 = vld [vmem:[%s3532_s1 + $0x104] ss:$8 sps:$4 sm:$0xff] (!%p232_p3)   ;;  %1231 = vmatprep.subr.bf16.mxu1 (!%p232_p3), %v2816_v0  ;;  %v2821_v3 = vld [vmem:[%s3532_s1 + $0x100] ss:$8 sps:$4 sm:$0xff] (!%p232_p3)   ;;  %s2526_s9 = sshll.u32 (!%p232_p3), %s3022_s15, 5 }
   0x8   : > { %1424 = vmatprep.subr.bf16.mxu0 (!%p232_p3), %v2818_v1  ;;  %1232 = vmatpush1.bf16.msra.mxu1 (!%p232_p3), %v2820_v2  ;;  %v2824_v5 = vld [vmem:[%s3532_s1 + $0x114] ss:$8 sps:$4 sm:$0xff] (!%p232_p3)   ;;  %v2826_v6 = vld [vmem:[%s3532_s1 + $0x10] ss:$8 sps:$4 sm:$0xff] (!%p232_p3)   ;;  %v2828_v8 = vld [vmem:[%s3532_s1 + $0x24] ss:$8 sps:$4 sm:$0xff] (!%p232_p3)  }
   0x9   : > { %1425 = vmatpush1.bf16.msra.mxu0 (!%p232_p3), %v2821_v3  ;;  %1233 = vmatprep.subr.bf16.mxu1 (!%p232_p3), %v2822_v4  ;;  %v2827_v7 = vld [vmem:[%s3532_s1 + $0x110] ss:$8 sps:$4 sm:$0xff] (!%p232_p3)   ;;  %v2830_v9 = vld [vmem:[%s3532_s1 + $0x124] ss:$8 sps:$4 sm:$0xff] (!%p232_p3)   ;;  %v2832_v10 = vld [vmem:[%s3532_s1 + $0x20] ss:$8 sps:$4 sm:$0xff] (!%p232_p3)  }
   0xa   : > { %1426 = vmatprep.subr.bf16.mxu0 (!%p232_p3), %v2824_v5  ;;  %v2833_v11 = vld [vmem:[%s3532_s1 + $0x120] ss:$8 sps:$4 sm:$0xff] (!%p232_p3)   ;;  %v2834_v12 = vld [vmem:[%s3532_s1 + $0x34] ss:$8 sps:$4 sm:$0xff] (!%p232_p3)   ;;  %v2838_v14 = vld [vmem:[%s3532_s1 + $0x30] ss:$8 sps:$4 sm:$0xff] (!%p232_p3)  }
   0xb   : > { %v2836_v13 = vld [vmem:[%s3532_s1 + $0x134] ss:$8 sps:$4 sm:$0xff] (!%p232_p3)   ;;  %v2839_v15 = vld [vmem:[%s3532_s1 + $0x130] ss:$8 sps:$4 sm:$0xff] (!%p232_p3)   ;;  %v2840_v16 = vld [vmem:[%s3532_s1 + $0x44] ss:$8 sps:$4 sm:$0xff] (!%p232_p3)  }
   0xc   : > { %1234 = vmatpush1.bf16.msra.mxu1 (!%p232_p3), %v2826_v6  ;;  %v2842_v17 = vld [vmem:[%s3532_s1 + $0x144] ss:$8 sps:$4 sm:$0xff] (!%p232_p3)   ;;  %v2844_v18 = vld [vmem:[%s3532_s1 + $0x40] ss:$8 sps:$4 sm:$0xff] (!%p232_p3)   ;;  %v2846_v20 = vld [vmem:[%s3532_s1 + $0x54] ss:$8 sps:$4 sm:$0xff] (!%p232_p3)  }
   0xd   : > { %1427 = vmatpush1.bf16.msra.mxu0 (!%p232_p3), %v2827_v7  ;;  %1235 = vmatprep.subr.bf16.mxu1 (!%p232_p3), %v2828_v8  ;;  %v2845_v19 = vld [vmem:[%s3532_s1 + $0x140] ss:$8 sps:$4 sm:$0xff] (!%p232_p3)   ;;  %v2848_v21 = vld [vmem:[%s3532_s1 + $0x154] ss:$8 sps:$4 sm:$0xff] (!%p232_p3)   ;;  %v2850_v22 = vld [vmem:[%s3532_s1 + $0x50] ss:$8 sps:$4 sm:$0xff] (!%p232_p3)  }
   0xe   : > { %1428 = vmatprep.subr.bf16.mxu0 %v2830_v9  ;;  %v2851_v23 = vld [vmem:[%s3532_s1 + $0x150] ss:$8 sps:$4 sm:$0xff]   ;;  %v2852_v24 = vld [vmem:[%s3532_s1 + $0x64] ss:$8 sps:$4 sm:$0xff]   ;;  %v2856_v26 = vld [vmem:[%s3532_s1 + $0x60] ss:$8 sps:$4 sm:$0xff]  }
   0xf   : > { %v2854_v25 = vld [vmem:[%s3532_s1 + $0x164] ss:$8 sps:$4 sm:$0xff]   ;;  %v2857_v27 = vld [vmem:[%s3532_s1 + $0x160] ss:$8 sps:$4 sm:$0xff]   ;;  %v2858_v28 = vld [vmem:[%s3532_s1 + $0x74] ss:$8 sps:$4 sm:$0xff]  }
  0x10   : > { %1236 = vmatpush1.bf16.msra.mxu1 %v2832_v10  ;;  %v2860_v29 = vld [vmem:[%s3532_s1 + $0x174] ss:$8 sps:$4 sm:$0xff]   ;;  %v2862_v30 = vld [vmem:[%s3532_s1 + $0x70] ss:$8 sps:$4 sm:$0xff]   ;;  %v2864_v32 = vld [vmem:[%s3532_s1 + $0x84] ss:$8 sps:$4 sm:$0xff]  }
  0x11   : > { %1429 = vmatpush1.bf16.msra.mxu0 %v2833_v11  ;;  %1237 = vmatprep.subr.bf16.mxu1 %v2834_v12  ;;  %v2863_v31 = vld [vmem:[%s3532_s1 + $0x170] ss:$8 sps:$4 sm:$0xff]   ;;  %v2866_v33 = vld [vmem:[%s3532_s1 + $0x184] ss:$8 sps:$4 sm:$0xff]   ;;  %p287_p4 = scmp.lt.s32.totalorder %s2526_s9, 63 }
  0x12   : > { %1430 = vmatprep.subr.bf16.mxu0 %v2836_v13  ;;  %v2868_v34 = vld [vmem:[%s3532_s1 + $0x80] ss:$8 sps:$4 sm:$0xff]   ;;  %v2870_v36 = vld [vmem:[%s3532_s1 + $0x94] ss:$8 sps:$4 sm:$0xff]   ;;  %v2874_v38 = vld [vmem:[%s3532_s1 + $0x90] ss:$8 sps:$4 sm:$0xff]  }
  0x13   : > { %v2869_v35 = vld [vmem:[%s3532_s1 + $0x180] ss:$8 sps:$4 sm:$0xff]   ;;  %v2872_v37 = vld [vmem:[%s3532_s1 + $0x194] ss:$8 sps:$4 sm:$0xff]   ;;  %s3541_s9 = smov (!%p287_p4, %s2526_s9), 63 }
  0x14   : > { %1238 = vmatpush1.bf16.msra.mxu1 %v2838_v14  ;;  %v2875_v39 = vld [vmem:[%s3532_s1 + $0x190] ss:$8 sps:$4 sm:$0xff]   ;;  %v2876_v40 = vld [vmem:[%s3532_s1 + $0xa4] ss:$8 sps:$4 sm:$0xff]   ;;  %s2694_s12 = sshll.u32 %s3541_s9, 4 }
  0x15   : > { %1431 = vmatpush1.bf16.msra.mxu0 %v2839_v15  ;;  %1239 = vmatprep.subr.bf16.mxu1 %v2840_v16  ;;  %v2878_v41 = vld [vmem:[%s3532_s1 + $0x1a4] ss:$8 sps:$4 sm:$0xff]   ;;  %v2880_v42 = vld [vmem:[%s3532_s1 + $0xa0] ss:$8 sps:$4 sm:$0xff]   ;;  %v2882_v44 = vld [vmem:[%s3532_s1 + $0xb4] ss:$8 sps:$4 sm:$0xff]   ;;  %s3219_s24 = scalar_lea.vmem %s3531_s0, %s2694_s12 }
  0x16   : > { %1432 = vmatprep.subr.bf16.mxu0 %v2842_v17  ;;  %v2881_v43 = vld [vmem:[%s3532_s1 + $0x1a0] ss:$8 sps:$4 sm:$0xff]   ;;  %v2884_v45 = vld [vmem:[%s3532_s1 + $0x1b4] ss:$8 sps:$4 sm:$0xff]   ;;  %v2886_v46 = vld [vmem:[%s3532_s1 + $0xb0] ss:$8 sps:$4 sm:$0xff]  }
  0x17   : > { %v2887_v47 = vld [vmem:[%s3532_s1 + $0x1b0] ss:$8 sps:$4 sm:$0xff]   ;;  %v2888_v48 = vld [vmem:[%s3532_s1 + $0xc4] ss:$8 sps:$4 sm:$0xff]   ;;  %v2892_v52 = vld [vmem:[%s3532_s1 + $0xc0] ss:$8 sps:$4 sm:$0xff]  }
  0x18   : > { %1240 = vmatpush1.bf16.msra.mxu1 %v2844_v18  ;;  %v2914_v49 = vld [vmem:[%s3219_s24 + $0x4] ss:$16 sps:$4 sm:$0xff]   ;;  %v2917_v51 = vld [vmem:[%s3219_s24 + $0xc] ss:$16 sps:$4 sm:$0xff]   ;;  %v2893_v53 = vld [vmem:[%s3532_s1 + $0x1c0] ss:$8 sps:$4 sm:$0xff]  }
  0x19   : > { %1433 = vmatpush1.bf16.msra.mxu0 %v2845_v19  ;;  %1241 = vmatprep.subr.bf16.mxu1 %v2846_v20  ;;  %v2890_v50 = vld [vmem:[%s3532_s1 + $0x1c4] ss:$8 sps:$4 sm:$0xff]   ;;  %v2894_v54 = vld [vmem:[%s3532_s1 + $0xd4] ss:$8 sps:$4 sm:$0xff]   ;;  %v2898_v56 = vld [vmem:[%s3532_s1 + $0xd0] ss:$8 sps:$4 sm:$0xff]  }
  0x1a   : > { %1434 = vmatprep.subr.bf16.mxu0 %v2848_v21  ;;  %1263 = vmatprep.mubr.bf16.mxu1 %v2914_v49  ;;  %v2896_v55 = vld [vmem:[%s3532_s1 + $0x1d4] ss:$8 sps:$4 sm:$0xff]   ;;  %v2899_v57 = vld [vmem:[%s3532_s1 + $0x1d0] ss:$8 sps:$4 sm:$0xff]   ;;  %v2900_v58 = vld [vmem:[%s3532_s1 + $0xe4] ss:$8 sps:$4 sm:$0xff]  }
  0x1b   : > { %1456 = vmatprep.mubr.bf16.mxu0 %v2917_v51  ;;  %v2902_v59 = vld [vmem:[%s3532_s1 + $0x1e4] ss:$8 sps:$4 sm:$0xff]   ;;  %v2904_v60 = vld [vmem:[%s3532_s1 + $0xe0] ss:$8 sps:$4 sm:$0xff]   ;;  %v2906_v62 = vld [vmem:[%s3532_s1 + $0xf4] ss:$8 sps:$4 sm:$0xff]  }
  0x1c   : > { %1242 = vmatpush1.bf16.msra.mxu1 %v2850_v22  ;;  %v2905_v61 = vld [vmem:[%s3532_s1 + $0x1e0] ss:$8 sps:$4 sm:$0xff]   ;;  %v2908_v63 = vld [vmem:[%s3532_s1 + $0x1f4] ss:$8 sps:$4 sm:$0xff]   ;;  %v2910_v0 = vld [vmem:[%s3532_s1 + $0xf0] ss:$8 sps:$4 sm:$0xff]  }
  0x1d   : > { %1435 = vmatpush1.bf16.msra.mxu0 %v2851_v23  ;;  %1243 = vmatprep.subr.bf16.mxu1 %v2852_v24  ;;  %v2911_v1 = vld [vmem:[%s3532_s1 + $0x1f0] ss:$8 sps:$4 sm:$0xff]   ;;  %v2918_v4 = vld [vmem:[%s3219_s24 + $0x24] ss:$16 sps:$4 sm:$0xff]   ;;  %v2920_v5 = vld [vmem:[%s3219_s24 + $0x2c] ss:$16 sps:$4 sm:$0xff]  }
  0x1e   : > { %1436 = vmatprep.subr.bf16.mxu0 %v2854_v25  ;;  %v2912_v2 = vld [vmem:[%s3219_s24] ss:$16 sps:$4 sm:$0xff]   ;;  %v2915_v3 = vld [vmem:[%s3219_s24 + $0x8] ss:$16 sps:$4 sm:$0xff]   ;;  %v2924_v8 = vld [vmem:[%s3219_s24 + $0x44] ss:$16 sps:$4 sm:$0xff]  }
  0x1f   : > { %v2922_v6 = vld [vmem:[%s3219_s24 + $0x20] ss:$16 sps:$4 sm:$0xff]   ;;  %v2923_v7 = vld [vmem:[%s3219_s24 + $0x28] ss:$16 sps:$4 sm:$0xff]   ;;  %v2926_v9 = vld [vmem:[%s3219_s24 + $0x4c] ss:$16 sps:$4 sm:$0xff]  }
  0x20   : > { %1244 = vmatpush1.bf16.msra.mxu1 %v2856_v26  ;;  %v2928_v10 = vld [vmem:[%s3219_s24 + $0x40] ss:$16 sps:$4 sm:$0xff]   ;;  %v2929_v11 = vld [vmem:[%s3219_s24 + $0x48] ss:$16 sps:$4 sm:$0xff]   ;;  %v2930_v12 = vld [vmem:[%s3219_s24 + $0x64] ss:$16 sps:$4 sm:$0xff]  }
  0x21   : > { %1437 = vmatpush1.bf16.msra.mxu0 %v2857_v27  ;;  %1245 = vmatprep.subr.bf16.mxu1 %v2858_v28  ;;  %v2932_v13 = vld [vmem:[%s3219_s24 + $0x6c] ss:$16 sps:$4 sm:$0xff]   ;;  %v2934_v14 = vld [vmem:[%s3219_s24 + $0x60] ss:$16 sps:$4 sm:$0xff]   ;;  %v2935_v15 = vld [vmem:[%s3219_s24 + $0x68] ss:$16 sps:$4 sm:$0xff]  }
  0x22   : > { %1438 = vmatprep.subr.bf16.mxu0 %v2860_v29  ;;  %v2936_v16 = vld [vmem:[%s3219_s24 + $0x84] ss:$16 sps:$4 sm:$0xff]   ;;  %v2938_v17 = vld [vmem:[%s3219_s24 + $0x8c] ss:$16 sps:$4 sm:$0xff]   ;;  %v2940_v18 = vld [vmem:[%s3219_s24 + $0x80] ss:$16 sps:$4 sm:$0xff]  }
  0x23   : > { %v2941_v19 = vld [vmem:[%s3219_s24 + $0x88] ss:$16 sps:$4 sm:$0xff]   ;;  %v2942_v20 = vld [vmem:[%s3219_s24 + $0xa4] ss:$16 sps:$4 sm:$0xff]   ;;  %v2944_v21 = vld [vmem:[%s3219_s24 + $0xac] ss:$16 sps:$4 sm:$0xff]  }
  0x24   : > { %1246 = vmatpush1.bf16.msra.mxu1 %v2862_v30  ;;  %v2946_v22 = vld [vmem:[%s3219_s24 + $0xa0] ss:$16 sps:$4 sm:$0xff]   ;;  %v2947_v23 = vld [vmem:[%s3219_s24 + $0xa8] ss:$16 sps:$4 sm:$0xff]   ;;  %v2948_v24 = vld [vmem:[%s3219_s24 + $0xc4] ss:$16 sps:$4 sm:$0xff]  }
  0x25   : > { %1439 = vmatpush1.bf16.msra.mxu0 %v2863_v31  ;;  %1247 = vmatprep.subr.bf16.mxu1 %v2864_v32  ;;  %v2950_v25 = vld [vmem:[%s3219_s24 + $0xcc] ss:$16 sps:$4 sm:$0xff]   ;;  %v2952_v26 = vld [vmem:[%s3219_s24 + $0xc0] ss:$16 sps:$4 sm:$0xff]   ;;  %v2953_v27 = vld [vmem:[%s3219_s24 + $0xc8] ss:$16 sps:$4 sm:$0xff]  }
  0x26   : > { %1440 = vmatprep.subr.bf16.mxu0 %v2866_v33  ;;  %v2954_v28 = vld [vmem:[%s3219_s24 + $0xe4] ss:$16 sps:$4 sm:$0xff]   ;;  %v2956_v29 = vld [vmem:[%s3219_s24 + $0xec] ss:$16 sps:$4 sm:$0xff]   ;;  %v2958_v30 = vld [vmem:[%s3219_s24 + $0xe0] ss:$16 sps:$4 sm:$0xff]  }
  0x27   : > { %v2959_v31 = vld [vmem:[%s3219_s24 + $0xe8] ss:$16 sps:$4 sm:$0xff]   ;;  %v2960_v32 = vld [vmem:[%s3219_s24 + $0x104] ss:$16 sps:$4 sm:$0xff]   ;;  %v2962_v33 = vld [vmem:[%s3219_s24 + $0x10c] ss:$16 sps:$4 sm:$0xff]  }
  0x28   : > { %1248 = vmatpush1.bf16.msra.mxu1 %v2868_v34  ;;  %v2964_v34 = vld [vmem:[%s3219_s24 + $0x100] ss:$16 sps:$4 sm:$0xff]   ;;  %v2986_v49 = vld [vmem:[%s3219_s24 + $0x18c] ss:$16 sps:$4 sm:$0xff]   ;;  %v2989_v51 = vld [vmem:[%s3219_s24 + $0x188] ss:$16 sps:$4 sm:$0xff]  }
  0x29   : > { %1441 = vmatpush1.bf16.msra.mxu0 %v2869_v35  ;;  %1249 = vmatprep.subr.bf16.mxu1 %v2870_v36  ;;  %v2965_v35 = vld [vmem:[%s3219_s24 + $0x108] ss:$16 sps:$4 sm:$0xff]   ;;  %v2966_v36 = vld [vmem:[%s3219_s24 + $0x124] ss:$16 sps:$4 sm:$0xff]  }
  0x2a   : > { %1442 = vmatprep.subr.bf16.mxu0 %v2872_v37  ;;  %v2968_v37 = vld [vmem:[%s3219_s24 + $0x12c] ss:$16 sps:$4 sm:$0xff]  }
  0x2c   : > { %1250 = vmatpush1.bf16.msra.mxu1 %v2874_v38  ;;  %v2970_v38 = vld [vmem:[%s3219_s24 + $0x120] ss:$16 sps:$4 sm:$0xff]  }
  0x2d   : > { %1443 = vmatpush1.bf16.msra.mxu0 %v2875_v39  ;;  %1251 = vmatprep.subr.bf16.mxu1 %v2876_v40  ;;  %v2971_v39 = vld [vmem:[%s3219_s24 + $0x128] ss:$16 sps:$4 sm:$0xff]   ;;  %v2972_v40 = vld [vmem:[%s3219_s24 + $0x144] ss:$16 sps:$4 sm:$0xff]  }
  0x2e   : > { %1444 = vmatprep.subr.bf16.mxu0 %v2878_v41  ;;  %v2974_v41 = vld [vmem:[%s3219_s24 + $0x14c] ss:$16 sps:$4 sm:$0xff]  }
  0x30   : > { %1252 = vmatpush1.bf16.msra.mxu1 %v2880_v42  ;;  %v2976_v42 = vld [vmem:[%s3219_s24 + $0x140] ss:$16 sps:$4 sm:$0xff]  }
  0x31   : > { %1445 = vmatpush1.bf16.msra.mxu0 %v2881_v43  ;;  %1253 = vmatprep.subr.bf16.mxu1 %v2882_v44  ;;  %v2977_v43 = vld [vmem:[%s3219_s24 + $0x148] ss:$16 sps:$4 sm:$0xff]   ;;  %v2978_v44 = vld [vmem:[%s3219_s24 + $0x164] ss:$16 sps:$4 sm:$0xff]  }
  0x32   : > { %1446 = vmatprep.subr.bf16.mxu0 %v2884_v45  ;;  %v2980_v45 = vld [vmem:[%s3219_s24 + $0x16c] ss:$16 sps:$4 sm:$0xff]  }
  0x34   : > { %1254 = vmatpush1.bf16.msra.mxu1 %v2886_v46  ;;  %v2982_v46 = vld [vmem:[%s3219_s24 + $0x160] ss:$16 sps:$4 sm:$0xff]  }
  0x35   : > { %1447 = vmatpush1.bf16.msra.mxu0 %v2887_v47  ;;  %1255 = vmatprep.subr.bf16.mxu1 %v2888_v48  ;;  %v2983_v47 = vld [vmem:[%s3219_s24 + $0x168] ss:$16 sps:$4 sm:$0xff]   ;;  %v2984_v48 = vld [vmem:[%s3219_s24 + $0x184] ss:$16 sps:$4 sm:$0xff]  }
  0x36   : > { %1448 = vmatprep.subr.bf16.mxu0 %v2890_v50  ;;  %v2988_v50 = vld [vmem:[%s3219_s24 + $0x180] ss:$16 sps:$4 sm:$0xff]  }
  0x38   : > { %1256 = vmatpush1.bf16.msra.mxu1 %v2892_v52  ;;  %v2990_v52 = vld [vmem:[%s3219_s24 + $0x1a4] ss:$16 sps:$4 sm:$0xff]  }
  0x39   : > { %1449 = vmatpush1.bf16.msra.mxu0 %v2893_v53  ;;  %1257 = vmatprep.subr.bf16.mxu1 %v2894_v54  ;;  %v2992_v53 = vld [vmem:[%s3219_s24 + $0x1ac] ss:$16 sps:$4 sm:$0xff]   ;;  %v2994_v54 = vld [vmem:[%s3219_s24 + $0x1a0] ss:$16 sps:$4 sm:$0xff]  }
  0x3a   : > { %1450 = vmatprep.subr.bf16.mxu0 %v2896_v55  ;;  %v2995_v55 = vld [vmem:[%s3219_s24 + $0x1a8] ss:$16 sps:$4 sm:$0xff]  }
  0x3c   : > { %1258 = vmatpush1.bf16.msra.mxu1 %v2898_v56  ;;  %v2996_v56 = vld [vmem:[%s3219_s24 + $0x1c4] ss:$16 sps:$4 sm:$0xff]  }
  0x3d   : > { %1451 = vmatpush1.bf16.msra.mxu0 %v2899_v57  ;;  %1259 = vmatprep.subr.bf16.mxu1 %v2900_v58  ;;  %v2998_v57 = vld [vmem:[%s3219_s24 + $0x1cc] ss:$16 sps:$4 sm:$0xff]   ;;  %v3000_v58 = vld [vmem:[%s3219_s24 + $0x1c0] ss:$16 sps:$4 sm:$0xff]  }
  0x3e   : > { %1452 = vmatprep.subr.bf16.mxu0 %v2902_v59  ;;  %v3001_v59 = vld [vmem:[%s3219_s24 + $0x1c8] ss:$16 sps:$4 sm:$0xff]  }
  0x40   : > { %1260 = vmatpush1.bf16.msra.mxu1 %v2904_v60  ;;  %v3002_v60 = vld [vmem:[%s3219_s24 + $0x1e4] ss:$16 sps:$4 sm:$0xff]  }
  0x41   : > { %1453 = vmatpush1.bf16.msra.mxu0 %v2905_v61  ;;  %1261 = vmatprep.subr.bf16.mxu1 %v2906_v62  ;;  %v3004_v61 = vld [vmem:[%s3219_s24 + $0x1ec] ss:$16 sps:$4 sm:$0xff]   ;;  %v3006_v62 = vld [vmem:[%s3219_s24 + $0x1e0] ss:$16 sps:$4 sm:$0xff]  }
  0x42   : > { %1454 = vmatprep.subr.bf16.mxu0 %v2908_v63  ;;  %v3007_v63 = vld [vmem:[%s3219_s24 + $0x1e8] ss:$16 sps:$4 sm:$0xff]   ;;  %s2695_s24 = sshll.u32 %s3541_s9, 3 }
  0x43   : > { %s3368_s27 = scalar_lea.vmem %s3535_s4, %s2695_s24 }
  0x44   : > { %1262 = vmatpush1.bf16.msra.mxu1 %v2910_v0  ;;  %v1814_v0 = vlaneseq }
  0x45   : > { %1455 = vmatpush1.bf16.msra.mxu0 %v2911_v1 }
  0x46   : > { %v1815_v1 = vshrl.u32 %v1814_v0, 7 }
  0x47   : > { %1264 = vmatmul.mubr.bf16.vlgmr.msra.gmra.mrb[0].mxu1 %v2912_v2 }
  0x48   : > { %1457 = vmatmul.mubr.bf16.vlgmr.msra.gmra.mrb[0].mxu0 %v2915_v3  ;;  %1273 = vmatprep.mubr.bf16.mxu1 %v2918_v4  ;;  %v1816_v2 = vsub.s32 0, %v1815_v1  ;;  %v1812_v3 = vld [vmem:[%s3533_s2] sm:$0x3]  ;;  %v1820_v4 = vsub.s32 1, %v1815_v1 }
  0x49   : > { %1466 = vmatprep.mubr.bf16.mxu0 %v2920_v5  ;;  %v1888_v5 = vld [vmem:[%s3534_s3] sm:$0x3] }
  0x4f   : > { %1274 = vmatmul.mubr.bf16.gmra.mrb[4].mxu1 %v2922_v6  ;;  %v3348_v6 = vrot.slane %v1812_v3, %v1816_v2 }
  0x50   : > { %1467 = vmatmul.mubr.bf16.gmra.mrb[4].mxu0 %v2923_v7  ;;  %1283 = vmatprep.mubr.bf16.mxu1 %v2924_v8 }
  0x51   : > { %1476 = vmatprep.mubr.bf16.mxu0 %v2926_v9  ;;  %v3350_v9 = vrot.slane %v1812_v3, %v1820_v4 }
  0x57   : > { %1284 = vmatmul.mubr.bf16.gmra.mrb[8].mxu1 %v2928_v10 }
  0x58   : > { %1477 = vmatmul.mubr.bf16.gmra.mrb[8].mxu0 %v2929_v11  ;;  %1293 = vmatprep.mubr.bf16.mxu1 %v2930_v12  ;;  %v3352_v11 = vrot.slane %v1888_v5, %v1816_v2 }
  0x59   : > { %1486 = vmatprep.mubr.bf16.mxu0 %v2932_v13 }
  0x5f   : > { %1294 = vmatmul.mubr.bf16.gmra.mrb[12].mxu1 %v2934_v14 }
  0x60   : > { %1487 = vmatmul.mubr.bf16.gmra.mrb[12].mxu0 %v2935_v15  ;;  %1303 = vmatprep.mubr.bf16.mxu1 %v2936_v16  ;;  %v3354_v15 = vrot.slane %v1888_v5, %v1820_v4 }
  0x61   : > { %1496 = vmatprep.mubr.bf16.mxu0 %v2938_v17 }
  0x67   : > { %1304 = vmatmul.mubr.bf16.gmra.mrb[16].mxu1 %v2940_v18 }
  0x68   : > { %1497 = vmatmul.mubr.bf16.gmra.mrb[16].mxu0 %v2941_v19  ;;  %1313 = vmatprep.mubr.bf16.mxu1 %v2942_v20 }
  0x69   : > { %1506 = vmatprep.mubr.bf16.mxu0 %v2944_v21 }
  0x6f   : > { %1314 = vmatmul.mubr.bf16.gmra.mrb[20].mxu1 %v2946_v22 }
  0x70   : > { %1507 = vmatmul.mubr.bf16.gmra.mrb[20].mxu0 %v2947_v23  ;;  %1323 = vmatprep.mubr.bf16.mxu1 %v2948_v24 }
  0x71   : > { %1516 = vmatprep.mubr.bf16.mxu0 %v2950_v25 }
  0x77   : > { %1324 = vmatmul.mubr.bf16.gmra.mrb[24].mxu1 %v2952_v26 }
  0x78   : > { %1517 = vmatmul.mubr.bf16.gmra.mrb[24].mxu0 %v2953_v27  ;;  %1333 = vmatprep.mubr.bf16.mxu1 %v2954_v28 }
  0x79   : > { %1526 = vmatprep.mubr.bf16.mxu0 %v2956_v29 }
  0x7f   : > { %1334 = vmatmul.mubr.bf16.gmra.mrb[28].mxu1 %v2958_v30 }
  0x80   : > { %1527 = vmatmul.mubr.bf16.gmra.mrb[28].mxu0 %v2959_v31  ;;  %1343 = vmatprep.mubr.bf16.mxu1 %v2960_v32 }
  0x81   : > { %1536 = vmatprep.mubr.bf16.mxu0 %v2962_v33 }
  0x87   : > { %1344 = vmatmul.mubr.bf16.gmra.mrb[32].mxu1 %v2964_v34 }
  0x88   : > { %1537 = vmatmul.mubr.bf16.gmra.mrb[32].mxu0 %v2965_v35  ;;  %1353 = vmatprep.mubr.bf16.mxu1 %v2966_v36 }
  0x89   : > { %1546 = vmatprep.mubr.bf16.mxu0 %v2968_v37 }
  0x8f   : > { %1354 = vmatmul.mubr.bf16.gmra.mrb[36].mxu1 %v2970_v38 }
  0x90   : > { %1547 = vmatmul.mubr.bf16.gmra.mrb[36].mxu0 %v2971_v39  ;;  %1363 = vmatprep.mubr.bf16.mxu1 %v2972_v40 }
  0x91   : > { %1556 = vmatprep.mubr.bf16.mxu0 %v2974_v41 }
  0x97   : > { %1364 = vmatmul.mubr.bf16.gmra.mrb[40].mxu1 %v2976_v42 }
  0x98   : > { %1557 = vmatmul.mubr.bf16.gmra.mrb[40].mxu0 %v2977_v43  ;;  %1373 = vmatprep.mubr.bf16.mxu1 %v2978_v44 }
  0x99   : > { %1566 = vmatprep.mubr.bf16.mxu0 %v2980_v45 }
  0x9f   : > { %1374 = vmatmul.mubr.bf16.gmra.mrb[44].mxu1 %v2982_v46 }
  0xa0   : > { %1567 = vmatmul.mubr.bf16.gmra.mrb[44].mxu0 %v2983_v47  ;;  %1383 = vmatprep.mubr.bf16.mxu1 %v2984_v48 }
  0xa1   : > { %1576 = vmatprep.mubr.bf16.mxu0 %v2986_v49 }
  0xa7   : > { %1384 = vmatmul.mubr.bf16.gmra.mrb[48].mxu1 %v2988_v50 }
  0xa8   : > { %1577 = vmatmul.mubr.bf16.gmra.mrb[48].mxu0 %v2989_v51  ;;  %1393 = vmatprep.mubr.bf16.mxu1 %v2990_v52 }
  0xa9   : > { %1586 = vmatprep.mubr.bf16.mxu0 %v2992_v53 }
  0xaf   : > { %1394 = vmatmul.mubr.bf16.gmra.mrb[52].mxu1 %v2994_v54 }
  0xb0   : > { %1587 = vmatmul.mubr.bf16.gmra.mrb[52].mxu0 %v2995_v55  ;;  %1403 = vmatprep.mubr.bf16.mxu1 %v2996_v56 }
  0xb1   : > { %1596 = vmatprep.mubr.bf16.mxu0 %v2998_v57 }
  0xb7   : > { %1404 = vmatmul.mubr.bf16.gmra.mrb[56].mxu1 %v3000_v58 }
  0xb8   : > { %1597 = vmatmul.mubr.bf16.gmra.mrb[56].mxu0 %v3001_v59  ;;  %1413 = vmatprep.mubr.bf16.mxu1 %v3002_v60 }
  0xb9   : > { %1606 = vmatprep.mubr.bf16.mxu0 %v3004_v61 }
  0xbf   : > { %1414 = vmatmul.mubr.bf16.gmra.mrb[60].mxu1 %v3006_v62 }
  0xc0   : > { %1607 = vmatmul.mubr.bf16.gmra.mrb[60].mxu0 %v3007_v63 }
 0x11a   : > { %v1265_v7 = vpop.f32.mrb[0].mxu1 }
 0x11b   : > { %v1458_v8 = vpop.f32.mrb[0].mxu0  ;;  %v1267_v12 = vpop.f32.mrb[1].mxu1 }
 0x11c   : > { %v1459_v10 = vadd.f32 %v1458_v8, %v1265_v7  ;;  %v1460_v13 = vpop.f32.mrb[1].mxu0  ;;  %v1269_v16 = vpop.f32.mrb[2].mxu1 }
 0x11d   : > { %v1461_v14 = vadd.f32 %v1460_v13, %v1267_v12  ;;  %v1462_v17 = vpop.f32.mrb[2].mxu0  ;;  %v1271_v20 = vpop.f32.mrb[3].mxu1 }
 0x11e   : > { %v1824_v18 = vmul.f32 %v3348_v6, %v1459_v10  ;;  %v1463_v19 = vadd.f32 %v1462_v17, %v1269_v16  ;;  %v1464_v21 = vpop.f32.mrb[3].mxu0 }
 0x11f   : > { %v1825_v22 = vmul.f32 %v3350_v9, %v1461_v14  ;;  %v1465_v23 = vadd.f32 %v1464_v21, %v1271_v20 }
 0x120   : > { %v1900_v24 = vadd.f32 %v3352_v11, %v1824_v18  ;;  %v1826_v25 = vmul.f32 %v3348_v6, %v1463_v19 }
 0x121   : > { %v1901_v26 = vadd.f32 %v3354_v15, %v1825_v22  ;;  %v1827_v27 = vmul.f32 %v3350_v9, %v1465_v23 }
 0x122   : > { %vm1964_vm0 = vcmp.ge.f32.partialorder %v1900_v24, 0.0  ;;  %v2028_v28 = vmul.f32 0.1, %v1900_v24  ;;  %v1902_v29 = vadd.f32 %v3352_v11, %v1826_v25  ;;  %v1275_v32 = vpop.f32.mrb[4].mxu1 }
 0x123   : > { %vm1965_vm1 = vcmp.ge.f32.partialorder %v1901_v26, 0.0  ;;  %v2029_v30 = vmul.f32 0.1, %v1901_v26  ;;  %v1903_v31 = vadd.f32 %v3354_v15, %v1827_v27  ;;  %v1468_v33 = vpop.f32.mrb[4].mxu0  ;;  %v1277_v37 = vpop.f32.mrb[5].mxu1 }
 0x124   : > { %v2092_v34 = vsel %vm1964_vm0, %v1900_v24, %v2028_v28  ;;  %vm1966_vm2 = vcmp.ge.f32.partialorder %v1902_v29, 0.0  ;;  %v2030_v35 = vmul.f32 0.1, %v1902_v29  ;;  %v1469_v36 = vadd.f32 %v1468_v33, %v1275_v32  ;;  %v1470_v38 = vpop.f32.mrb[5].mxu0  ;;  %v1279_v42 = vpop.f32.mrb[6].mxu1 }
 0x125   : > { %v2093_v39 = vsel %vm1965_vm1, %v1901_v26, %v2029_v30  ;;  %vm1967_vm3 = vcmp.ge.f32.partialorder %v1903_v31, 0.0  ;;  %v2031_v40 = vmul.f32 0.1, %v1903_v31  ;;  %v1471_v41 = vadd.f32 %v1470_v38, %v1277_v37  ;;  %v1472_v43 = vpop.f32.mrb[6].mxu0  ;;  %v1281_v48 = vpop.f32.mrb[7].mxu1 }
 0x126   : > { %v2696_v44 = vpack.c.bf16 %v2093_v39, %v2092_v34  ;;  %v2094_v45 = vsel %vm1966_vm2, %v1902_v29, %v2030_v35  ;;  %v1828_v46 = vmul.f32 %v3348_v6, %v1469_v36  ;;  %v1473_v47 = vadd.f32 %v1472_v43, %v1279_v42  ;;  %v1474_v49 = vpop.f32.mrb[7].mxu0 }
 0x127   : > { %v2095_v50 = vsel %vm1967_vm3, %v1903_v31, %v2031_v40  ;;  %v1829_v51 = vmul.f32 %v3350_v9, %v1471_v41  ;;  %v1475_v52 = vadd.f32 %v1474_v49, %v1281_v48 }
 0x128   : > { %2348 = vst [vmem:[%s3368_s27] sm:$0xff] %v2696_v44  ;;  %v2697_v53 = vpack.c.bf16 %v2095_v50, %v2094_v45  ;;  %v1904_v54 = vadd.f32 %v3352_v11, %v1828_v46  ;;  %v1830_v55 = vmul.f32 %v3348_v6, %v1473_v47 }
 0x129   : > { %v1905_v56 = vadd.f32 %v3354_v15, %v1829_v51  ;;  %v1831_v57 = vmul.f32 %v3350_v9, %v1475_v52 }
 0x12a   : > { %2349 = vst [vmem:[%s3368_s27 + $0x8] sm:$0xff] %v2697_v53  ;;  %vm1968_vm4 = vcmp.ge.f32.partialorder %v1904_v54, 0.0  ;;  %v2032_v58 = vmul.f32 0.1, %v1904_v54  ;;  %v1906_v59 = vadd.f32 %v3352_v11, %v1830_v55  ;;  %v1285_v62 = vpop.f32.mrb[8].mxu1 }
 0x12b   : > { %vm1969_vm5 = vcmp.ge.f32.partialorder %v1905_v56, 0.0  ;;  %v2033_v60 = vmul.f32 0.1, %v1905_v56  ;;  %v1907_v61 = vadd.f32 %v3354_v15, %v1831_v57  ;;  %v1478_v63 = vpop.f32.mrb[8].mxu0  ;;  %v1287_v3 = vpop.f32.mrb[9].mxu1 }
 0x12c   : > { %v2096_v0 = vsel %vm1968_vm4, %v1904_v54, %v2032_v58  ;;  %vm1970_vm6 = vcmp.ge.f32.partialorder %v1906_v59, 0.0  ;;  %v2034_v1 = vmul.f32 0.1, %v1906_v59  ;;  %v1479_v2 = vadd.f32 %v1478_v63, %v1285_v62  ;;  %v1480_v4 = vpop.f32.mrb[9].mxu0  ;;  %v1289_v10 = vpop.f32.mrb[10].mxu1 }
 0x12d   : > { %v2097_v5 = vsel %vm1969_vm5, %v1905_v56, %v2033_v60  ;;  %vm1971_vm7 = vcmp.ge.f32.partialorder %v1907_v61, 0.0  ;;  %v2035_v7 = vmul.f32 0.1, %v1907_v61  ;;  %v1481_v8 = vadd.f32 %v1480_v4, %v1287_v3  ;;  %v1482_v12 = vpop.f32.mrb[10].mxu0  ;;  %v1291_v18 = vpop.f32.mrb[11].mxu1 }
 0x12e   : > { %v2698_v13 = vpack.c.bf16 %v2097_v5, %v2096_v0  ;;  %v2098_v14 = vsel %vm1970_vm6, %v1906_v59, %v2034_v1  ;;  %v1832_v16 = vmul.f32 %v3348_v6, %v1479_v2  ;;  %v1483_v17 = vadd.f32 %v1482_v12, %v1289_v10  ;;  %v1484_v19 = vpop.f32.mrb[11].mxu0 }
 0x12f   : > { %v2099_v20 = vsel %vm1971_vm7, %v1907_v61, %v2035_v7  ;;  %v1833_v21 = vmul.f32 %v3350_v9, %v1481_v8  ;;  %v1485_v22 = vadd.f32 %v1484_v19, %v1291_v18 }
 0x130   : > { %2350 = vst [vmem:[%s3368_s27 + $0x10] sm:$0xff] %v2698_v13  ;;  %v2699_v23 = vpack.c.bf16 %v2099_v20, %v2098_v14  ;;  %v1908_v24 = vadd.f32 %v3352_v11, %v1832_v16  ;;  %v1834_v25 = vmul.f32 %v3348_v6, %v1483_v17 }
 0x131   : > { %v1909_v26 = vadd.f32 %v3354_v15, %v1833_v21  ;;  %v1835_v27 = vmul.f32 %v3350_v9, %v1485_v22 }
 0x132   : > { %2351 = vst [vmem:[%s3368_s27 + $0x18] sm:$0xff] %v2699_v23  ;;  %vm1972_vm8 = vcmp.ge.f32.partialorder %v1908_v24, 0.0  ;;  %v2036_v28 = vmul.f32 0.1, %v1908_v24  ;;  %v1910_v29 = vadd.f32 %v3352_v11, %v1834_v25  ;;  %v1295_v32 = vpop.f32.mrb[12].mxu1 }
 0x133   : > { %vm1973_vm9 = vcmp.ge.f32.partialorder %v1909_v26, 0.0  ;;  %v2037_v30 = vmul.f32 0.1, %v1909_v26  ;;  %v1911_v31 = vadd.f32 %v3354_v15, %v1835_v27  ;;  %v1488_v33 = vpop.f32.mrb[12].mxu0  ;;  %v1297_v37 = vpop.f32.mrb[13].mxu1 }
 0x134   : > { %v2100_v34 = vsel %vm1972_vm8, %v1908_v24, %v2036_v28  ;;  %vm1974_vm10 = vcmp.ge.f32.partialorder %v1910_v29, 0.0  ;;  %v2038_v35 = vmul.f32 0.1, %v1910_v29  ;;  %v1489_v36 = vadd.f32 %v1488_v33, %v1295_v32  ;;  %v1490_v38 = vpop.f32.mrb[13].mxu0  ;;  %v1299_v42 = vpop.f32.mrb[14].mxu1 }
 0x135   : > { %v2101_v39 = vsel %vm1973_vm9, %v1909_v26, %v2037_v30  ;;  %vm1975_vm11 = vcmp.ge.f32.partialorder %v1911_v31, 0.0  ;;  %v2039_v40 = vmul.f32 0.1, %v1911_v31  ;;  %v1491_v41 = vadd.f32 %v1490_v38, %v1297_v37  ;;  %v1492_v43 = vpop.f32.mrb[14].mxu0  ;;  %v1301_v48 = vpop.f32.mrb[15].mxu1 }
 0x136   : > { %v2700_v44 = vpack.c.bf16 %v2101_v39, %v2100_v34  ;;  %v2102_v45 = vsel %vm1974_vm10, %v1910_v29, %v2038_v35  ;;  %v1836_v46 = vmul.f32 %v3348_v6, %v1489_v36  ;;  %v1493_v47 = vadd.f32 %v1492_v43, %v1299_v42  ;;  %v1494_v49 = vpop.f32.mrb[15].mxu0 }
 0x137   : > { %v2103_v50 = vsel %vm1975_vm11, %v1911_v31, %v2039_v40  ;;  %v1837_v51 = vmul.f32 %v3350_v9, %v1491_v41  ;;  %v1495_v52 = vadd.f32 %v1494_v49, %v1301_v48 }
 0x138   : > { %2352 = vst [vmem:[%s3368_s27 + $0x20] sm:$0xff] %v2700_v44  ;;  %v2701_v53 = vpack.c.bf16 %v2103_v50, %v2102_v45  ;;  %v1912_v54 = vadd.f32 %v3352_v11, %v1836_v46  ;;  %v1838_v55 = vmul.f32 %v3348_v6, %v1493_v47 }
 0x139   : > { %v1913_v56 = vadd.f32 %v3354_v15, %v1837_v51  ;;  %v1839_v57 = vmul.f32 %v3350_v9, %v1495_v52 }
 0x13a   : > { %2353 = vst [vmem:[%s3368_s27 + $0x28] sm:$0xff] %v2701_v53  ;;  %vm1976_vm12 = vcmp.ge.f32.partialorder %v1912_v54, 0.0  ;;  %v2040_v58 = vmul.f32 0.1, %v1912_v54  ;;  %v1914_v59 = vadd.f32 %v3352_v11, %v1838_v55  ;;  %v1305_v62 = vpop.f32.mrb[16].mxu1 }
 0x13b   : > { %vm1977_vm13 = vcmp.ge.f32.partialorder %v1913_v56, 0.0  ;;  %v2041_v60 = vmul.f32 0.1, %v1913_v56  ;;  %v1915_v61 = vadd.f32 %v3354_v15, %v1839_v57  ;;  %v1498_v63 = vpop.f32.mrb[16].mxu0  ;;  %v1307_v3 = vpop.f32.mrb[17].mxu1 }
 0x13c   : > { %v2104_v0 = vsel %vm1976_vm12, %v1912_v54, %v2040_v58  ;;  %vm1978_vm14 = vcmp.ge.f32.partialorder %v1914_v59, 0.0  ;;  %v2042_v1 = vmul.f32 0.1, %v1914_v59  ;;  %v1499_v2 = vadd.f32 %v1498_v63, %v1305_v62  ;;  %v1500_v4 = vpop.f32.mrb[17].mxu0  ;;  %v1309_v10 = vpop.f32.mrb[18].mxu1 }
 0x13d   : > { %v2105_v5 = vsel %vm1977_vm13, %v1913_v56, %v2041_v60  ;;  %vm1979_vm15 = vcmp.ge.f32.partialorder %v1915_v61, 0.0  ;;  %v2043_v7 = vmul.f32 0.1, %v1915_v61  ;;  %v1501_v8 = vadd.f32 %v1500_v4, %v1307_v3  ;;  %v1502_v12 = vpop.f32.mrb[18].mxu0  ;;  %v1311_v18 = vpop.f32.mrb[19].mxu1 }
 0x13e   : > { %v2702_v13 = vpack.c.bf16 %v2105_v5, %v2104_v0  ;;  %v2106_v14 = vsel %vm1978_vm14, %v1914_v59, %v2042_v1  ;;  %v1840_v16 = vmul.f32 %v3348_v6, %v1499_v2  ;;  %v1503_v17 = vadd.f32 %v1502_v12, %v1309_v10  ;;  %v1504_v19 = vpop.f32.mrb[19].mxu0 }
 0x13f   : > { %v2107_v20 = vsel %vm1979_vm15, %v1915_v61, %v2043_v7  ;;  %v1841_v21 = vmul.f32 %v3350_v9, %v1501_v8  ;;  %v1505_v22 = vadd.f32 %v1504_v19, %v1311_v18 }
 0x140   : > { %2354 = vst [vmem:[%s3368_s27 + $0x30] sm:$0xff] %v2702_v13  ;;  %v2703_v23 = vpack.c.bf16 %v2107_v20, %v2106_v14  ;;  %v1916_v24 = vadd.f32 %v3352_v11, %v1840_v16  ;;  %v1842_v25 = vmul.f32 %v3348_v6, %v1503_v17 }
 0x141   : > { %v1917_v26 = vadd.f32 %v3354_v15, %v1841_v21  ;;  %v1843_v27 = vmul.f32 %v3350_v9, %v1505_v22 }
 0x142   : > { %2355 = vst [vmem:[%s3368_s27 + $0x38] sm:$0xff] %v2703_v23  ;;  %vm1980_vm0 = vcmp.ge.f32.partialorder %v1916_v24, 0.0  ;;  %v2044_v28 = vmul.f32 0.1, %v1916_v24  ;;  %v1918_v29 = vadd.f32 %v3352_v11, %v1842_v25  ;;  %v1315_v32 = vpop.f32.mrb[20].mxu1 }
 0x143   : > { %vm1981_vm1 = vcmp.ge.f32.partialorder %v1917_v26, 0.0  ;;  %v2045_v30 = vmul.f32 0.1, %v1917_v26  ;;  %v1919_v31 = vadd.f32 %v3354_v15, %v1843_v27  ;;  %v1508_v33 = vpop.f32.mrb[20].mxu0  ;;  %v1317_v37 = vpop.f32.mrb[21].mxu1 }
 0x144   : > { %v2108_v34 = vsel %vm1980_vm0, %v1916_v24, %v2044_v28  ;;  %vm1982_vm2 = vcmp.ge.f32.partialorder %v1918_v29, 0.0  ;;  %v2046_v35 = vmul.f32 0.1, %v1918_v29  ;;  %v1509_v36 = vadd.f32 %v1508_v33, %v1315_v32  ;;  %v1510_v38 = vpop.f32.mrb[21].mxu0  ;;  %v1319_v42 = vpop.f32.mrb[22].mxu1 }
 0x145   : > { %v2109_v39 = vsel %vm1981_vm1, %v1917_v26, %v2045_v30  ;;  %vm1983_vm3 = vcmp.ge.f32.partialorder %v1919_v31, 0.0  ;;  %v2047_v40 = vmul.f32 0.1, %v1919_v31  ;;  %v1511_v41 = vadd.f32 %v1510_v38, %v1317_v37  ;;  %v1512_v43 = vpop.f32.mrb[22].mxu0  ;;  %v1321_v48 = vpop.f32.mrb[23].mxu1 }
 0x146   : > { %v2704_v44 = vpack.c.bf16 %v2109_v39, %v2108_v34  ;;  %v2110_v45 = vsel %vm1982_vm2, %v1918_v29, %v2046_v35  ;;  %v1844_v46 = vmul.f32 %v3348_v6, %v1509_v36  ;;  %v1513_v47 = vadd.f32 %v1512_v43, %v1319_v42  ;;  %v1514_v49 = vpop.f32.mrb[23].mxu0 }
 0x147   : > { %v2111_v50 = vsel %vm1983_vm3, %v1919_v31, %v2047_v40  ;;  %v1845_v51 = vmul.f32 %v3350_v9, %v1511_v41  ;;  %v1515_v52 = vadd.f32 %v1514_v49, %v1321_v48 }
 0x148   : > { %2356 = vst [vmem:[%s3368_s27 + $0x40] sm:$0xff] %v2704_v44  ;;  %v2705_v53 = vpack.c.bf16 %v2111_v50, %v2110_v45  ;;  %v1920_v54 = vadd.f32 %v3352_v11, %v1844_v46  ;;  %v1846_v55 = vmul.f32 %v3348_v6, %v1513_v47 }
 0x149   : > { %v1921_v56 = vadd.f32 %v3354_v15, %v1845_v51  ;;  %v1847_v57 = vmul.f32 %v3350_v9, %v1515_v52 }
 0x14a   : > { %2357 = vst [vmem:[%s3368_s27 + $0x48] sm:$0xff] %v2705_v53  ;;  %vm1984_vm4 = vcmp.ge.f32.partialorder %v1920_v54, 0.0  ;;  %v2048_v58 = vmul.f32 0.1, %v1920_v54  ;;  %v1922_v59 = vadd.f32 %v3352_v11, %v1846_v55  ;;  %v1325_v62 = vpop.f32.mrb[24].mxu1 }
 0x14b   : > { %vm1985_vm5 = vcmp.ge.f32.partialorder %v1921_v56, 0.0  ;;  %v2049_v60 = vmul.f32 0.1, %v1921_v56  ;;  %v1923_v61 = vadd.f32 %v3354_v15, %v1847_v57  ;;  %v1518_v63 = vpop.f32.mrb[24].mxu0  ;;  %v1327_v3 = vpop.f32.mrb[25].mxu1 }
 0x14c   : > { %v2112_v0 = vsel %vm1984_vm4, %v1920_v54, %v2048_v58  ;;  %vm1986_vm6 = vcmp.ge.f32.partialorder %v1922_v59, 0.0  ;;  %v2050_v1 = vmul.f32 0.1, %v1922_v59  ;;  %v1519_v2 = vadd.f32 %v1518_v63, %v1325_v62  ;;  %v1520_v4 = vpop.f32.mrb[25].mxu0  ;;  %v1329_v10 = vpop.f32.mrb[26].mxu1 }
 0x14d   : > { %v2113_v5 = vsel %vm1985_vm5, %v1921_v56, %v2049_v60  ;;  %vm1987_vm7 = vcmp.ge.f32.partialorder %v1923_v61, 0.0  ;;  %v2051_v7 = vmul.f32 0.1, %v1923_v61  ;;  %v1521_v8 = vadd.f32 %v1520_v4, %v1327_v3  ;;  %v1522_v12 = vpop.f32.mrb[26].mxu0  ;;  %v1331_v18 = vpop.f32.mrb[27].mxu1 }
 0x14e   : > { %v2706_v13 = vpack.c.bf16 %v2113_v5, %v2112_v0  ;;  %v2114_v14 = vsel %vm1986_vm6, %v1922_v59, %v2050_v1  ;;  %v1848_v16 = vmul.f32 %v3348_v6, %v1519_v2  ;;  %v1523_v17 = vadd.f32 %v1522_v12, %v1329_v10  ;;  %v1524_v19 = vpop.f32.mrb[27].mxu0 }
 0x14f   : > { %v2115_v20 = vsel %vm1987_vm7, %v1923_v61, %v2051_v7  ;;  %v1849_v21 = vmul.f32 %v3350_v9, %v1521_v8  ;;  %v1525_v22 = vadd.f32 %v1524_v19, %v1331_v18 }
 0x150   : > { %2358 = vst [vmem:[%s3368_s27 + $0x50] sm:$0xff] %v2706_v13  ;;  %v2707_v23 = vpack.c.bf16 %v2115_v20, %v2114_v14  ;;  %v1924_v24 = vadd.f32 %v3352_v11, %v1848_v16  ;;  %v1850_v25 = vmul.f32 %v3348_v6, %v1523_v17 }
 0x151   : > { %v1925_v26 = vadd.f32 %v3354_v15, %v1849_v21  ;;  %v1851_v27 = vmul.f32 %v3350_v9, %v1525_v22 }
 0x152   : > { %2359 = vst [vmem:[%s3368_s27 + $0x58] sm:$0xff] %v2707_v23  ;;  %vm1988_vm8 = vcmp.ge.f32.partialorder %v1924_v24, 0.0  ;;  %v2052_v28 = vmul.f32 0.1, %v1924_v24  ;;  %v1926_v29 = vadd.f32 %v3352_v11, %v1850_v25  ;;  %v1335_v32 = vpop.f32.mrb[28].mxu1 }
 0x153   : > { %vm1989_vm9 = vcmp.ge.f32.partialorder %v1925_v26, 0.0  ;;  %v2053_v30 = vmul.f32 0.1, %v1925_v26  ;;  %v1927_v31 = vadd.f32 %v3354_v15, %v1851_v27  ;;  %v1528_v33 = vpop.f32.mrb[28].mxu0  ;;  %v1337_v37 = vpop.f32.mrb[29].mxu1 }
 0x154   : > { %v2116_v34 = vsel %vm1988_vm8, %v1924_v24, %v2052_v28  ;;  %vm1990_vm10 = vcmp.ge.f32.partialorder %v1926_v29, 0.0  ;;  %v2054_v35 = vmul.f32 0.1, %v1926_v29  ;;  %v1529_v36 = vadd.f32 %v1528_v33, %v1335_v32  ;;  %v1530_v38 = vpop.f32.mrb[29].mxu0  ;;  %v1339_v42 = vpop.f32.mrb[30].mxu1 }
 0x155   : > { %v2117_v39 = vsel %vm1989_vm9, %v1925_v26, %v2053_v30  ;;  %vm1991_vm11 = vcmp.ge.f32.partialorder %v1927_v31, 0.0  ;;  %v2055_v40 = vmul.f32 0.1, %v1927_v31  ;;  %v1531_v41 = vadd.f32 %v1530_v38, %v1337_v37  ;;  %v1532_v43 = vpop.f32.mrb[30].mxu0  ;;  %v1341_v48 = vpop.f32.mrb[31].mxu1 }
 0x156   : > { %v2708_v44 = vpack.c.bf16 %v2117_v39, %v2116_v34  ;;  %v2118_v45 = vsel %vm1990_vm10, %v1926_v29, %v2054_v35  ;;  %v1852_v46 = vmul.f32 %v3348_v6, %v1529_v36  ;;  %v1533_v47 = vadd.f32 %v1532_v43, %v1339_v42  ;;  %v1534_v49 = vpop.f32.mrb[31].mxu0 }
 0x157   : > { %v2119_v50 = vsel %vm1991_vm11, %v1927_v31, %v2055_v40  ;;  %v1853_v51 = vmul.f32 %v3350_v9, %v1531_v41  ;;  %v1535_v52 = vadd.f32 %v1534_v49, %v1341_v48 }
 0x158   : > { %2360 = vst [vmem:[%s3368_s27 + $0x60] sm:$0xff] %v2708_v44  ;;  %v2709_v53 = vpack.c.bf16 %v2119_v50, %v2118_v45  ;;  %v1928_v54 = vadd.f32 %v3352_v11, %v1852_v46  ;;  %v1854_v55 = vmul.f32 %v3348_v6, %v1533_v47 }
 0x159   : > { %v1929_v56 = vadd.f32 %v3354_v15, %v1853_v51  ;;  %v1855_v57 = vmul.f32 %v3350_v9, %v1535_v52 }
 0x15a   : > { %2361 = vst [vmem:[%s3368_s27 + $0x68] sm:$0xff] %v2709_v53  ;;  %vm1992_vm12 = vcmp.ge.f32.partialorder %v1928_v54, 0.0  ;;  %v2056_v58 = vmul.f32 0.1, %v1928_v54  ;;  %v1930_v59 = vadd.f32 %v3352_v11, %v1854_v55  ;;  %v1345_v62 = vpop.f32.mrb[32].mxu1 }
 0x15b   : > { %vm1993_vm13 = vcmp.ge.f32.partialorder %v1929_v56, 0.0  ;;  %v2057_v60 = vmul.f32 0.1, %v1929_v56  ;;  %v1931_v61 = vadd.f32 %v3354_v15, %v1855_v57  ;;  %v1538_v63 = vpop.f32.mrb[32].mxu0  ;;  %v1347_v3 = vpop.f32.mrb[33].mxu1 }
 0x15c   : > { %v2120_v0 = vsel %vm1992_vm12, %v1928_v54, %v2056_v58  ;;  %vm1994_vm14 = vcmp.ge.f32.partialorder %v1930_v59, 0.0  ;;  %v2058_v1 = vmul.f32 0.1, %v1930_v59  ;;  %v1539_v2 = vadd.f32 %v1538_v63, %v1345_v62  ;;  %v1540_v4 = vpop.f32.mrb[33].mxu0  ;;  %v1349_v10 = vpop.f32.mrb[34].mxu1 }
 0x15d   : > { %v2121_v5 = vsel %vm1993_vm13, %v1929_v56, %v2057_v60  ;;  %vm1995_vm15 = vcmp.ge.f32.partialorder %v1931_v61, 0.0  ;;  %v2059_v7 = vmul.f32 0.1, %v1931_v61  ;;  %v1541_v8 = vadd.f32 %v1540_v4, %v1347_v3  ;;  %v1542_v12 = vpop.f32.mrb[34].mxu0  ;;  %v1351_v18 = vpop.f32.mrb[35].mxu1 }
 0x15e   : > { %v2710_v13 = vpack.c.bf16 %v2121_v5, %v2120_v0  ;;  %v2122_v14 = vsel %vm1994_vm14, %v1930_v59, %v2058_v1  ;;  %v1856_v16 = vmul.f32 %v3348_v6, %v1539_v2  ;;  %v1543_v17 = vadd.f32 %v1542_v12, %v1349_v10  ;;  %v1544_v19 = vpop.f32.mrb[35].mxu0 }
 0x15f   : > { %v2123_v20 = vsel %vm1995_vm15, %v1931_v61, %v2059_v7  ;;  %v1857_v21 = vmul.f32 %v3350_v9, %v1541_v8  ;;  %v1545_v22 = vadd.f32 %v1544_v19, %v1351_v18 }
 0x160   : > { %2362 = vst [vmem:[%s3368_s27 + $0x70] sm:$0xff] %v2710_v13  ;;  %v2711_v23 = vpack.c.bf16 %v2123_v20, %v2122_v14  ;;  %v1932_v24 = vadd.f32 %v3352_v11, %v1856_v16  ;;  %v1858_v25 = vmul.f32 %v3348_v6, %v1543_v17 }
 0x161   : > { %v1933_v26 = vadd.f32 %v3354_v15, %v1857_v21  ;;  %v1859_v27 = vmul.f32 %v3350_v9, %v1545_v22 }
 0x162   : > { %2363 = vst [vmem:[%s3368_s27 + $0x78] sm:$0xff] %v2711_v23  ;;  %vm1996_vm0 = vcmp.ge.f32.partialorder %v1932_v24, 0.0  ;;  %v2060_v28 = vmul.f32 0.1, %v1932_v24  ;;  %v1934_v29 = vadd.f32 %v3352_v11, %v1858_v25  ;;  %v1355_v32 = vpop.f32.mrb[36].mxu1 }
 0x163   : > { %vm1997_vm1 = vcmp.ge.f32.partialorder %v1933_v26, 0.0  ;;  %v2061_v30 = vmul.f32 0.1, %v1933_v26  ;;  %v1935_v31 = vadd.f32 %v3354_v15, %v1859_v27  ;;  %v1548_v33 = vpop.f32.mrb[36].mxu0  ;;  %v1357_v37 = vpop.f32.mrb[37].mxu1 }
 0x164   : > { %v2124_v34 = vsel %vm1996_vm0, %v1932_v24, %v2060_v28  ;;  %vm1998_vm2 = vcmp.ge.f32.partialorder %v1934_v29, 0.0  ;;  %v2062_v35 = vmul.f32 0.1, %v1934_v29  ;;  %v1549_v36 = vadd.f32 %v1548_v33, %v1355_v32  ;;  %v1550_v38 = vpop.f32.mrb[37].mxu0  ;;  %v1359_v42 = vpop.f32.mrb[38].mxu1 }
 0x165   : > { %v2125_v39 = vsel %vm1997_vm1, %v1933_v26, %v2061_v30  ;;  %vm1999_vm3 = vcmp.ge.f32.partialorder %v1935_v31, 0.0  ;;  %v2063_v40 = vmul.f32 0.1, %v1935_v31  ;;  %v1551_v41 = vadd.f32 %v1550_v38, %v1357_v37  ;;  %v1552_v43 = vpop.f32.mrb[38].mxu0  ;;  %v1361_v48 = vpop.f32.mrb[39].mxu1 }
 0x166   : > { %v2712_v44 = vpack.c.bf16 %v2125_v39, %v2124_v34  ;;  %v2126_v45 = vsel %vm1998_vm2, %v1934_v29, %v2062_v35  ;;  %v1860_v46 = vmul.f32 %v3348_v6, %v1549_v36  ;;  %v1553_v47 = vadd.f32 %v1552_v43, %v1359_v42  ;;  %v1554_v49 = vpop.f32.mrb[39].mxu0 }
 0x167   : > { %v2127_v50 = vsel %vm1999_vm3, %v1935_v31, %v2063_v40  ;;  %v1861_v51 = vmul.f32 %v3350_v9, %v1551_v41  ;;  %v1555_v52 = vadd.f32 %v1554_v49, %v1361_v48 }
 0x168   : > { %2364 = vst [vmem:[%s3368_s27 + $0x80] sm:$0xff] %v2712_v44  ;;  %v2713_v53 = vpack.c.bf16 %v2127_v50, %v2126_v45  ;;  %v1936_v54 = vadd.f32 %v3352_v11, %v1860_v46  ;;  %v1862_v55 = vmul.f32 %v3348_v6, %v1553_v47 }
 0x169   : > { %v1937_v56 = vadd.f32 %v3354_v15, %v1861_v51  ;;  %v1863_v57 = vmul.f32 %v3350_v9, %v1555_v52 }
 0x16a   : > { %2365 = vst [vmem:[%s3368_s27 + $0x88] sm:$0xff] %v2713_v53  ;;  %vm2000_vm4 = vcmp.ge.f32.partialorder %v1936_v54, 0.0  ;;  %v2064_v58 = vmul.f32 0.1, %v1936_v54  ;;  %v1938_v59 = vadd.f32 %v3352_v11, %v1862_v55  ;;  %v1365_v62 = vpop.f32.mrb[40].mxu1 }
 0x16b   : > { %vm2001_vm5 = vcmp.ge.f32.partialorder %v1937_v56, 0.0  ;;  %v2065_v60 = vmul.f32 0.1, %v1937_v56  ;;  %v1939_v61 = vadd.f32 %v3354_v15, %v1863_v57  ;;  %v1558_v63 = vpop.f32.mrb[40].mxu0  ;;  %v1367_v3 = vpop.f32.mrb[41].mxu1 }
 0x16c   : > { %v2128_v0 = vsel %vm2000_vm4, %v1936_v54, %v2064_v58  ;;  %vm2002_vm6 = vcmp.ge.f32.partialorder %v1938_v59, 0.0  ;;  %v2066_v1 = vmul.f32 0.1, %v1938_v59  ;;  %v1559_v2 = vadd.f32 %v1558_v63, %v1365_v62  ;;  %v1560_v4 = vpop.f32.mrb[41].mxu0  ;;  %v1369_v10 = vpop.f32.mrb[42].mxu1 }
 0x16d   : > { %v2129_v5 = vsel %vm2001_vm5, %v1937_v56, %v2065_v60  ;;  %vm2003_vm7 = vcmp.ge.f32.partialorder %v1939_v61, 0.0  ;;  %v2067_v7 = vmul.f32 0.1, %v1939_v61  ;;  %v1561_v8 = vadd.f32 %v1560_v4, %v1367_v3  ;;  %v1562_v12 = vpop.f32.mrb[42].mxu0  ;;  %v1371_v18 = vpop.f32.mrb[43].mxu1 }
 0x16e   : > { %v2714_v13 = vpack.c.bf16 %v2129_v5, %v2128_v0  ;;  %v2130_v14 = vsel %vm2002_vm6, %v1938_v59, %v2066_v1  ;;  %v1864_v16 = vmul.f32 %v3348_v6, %v1559_v2  ;;  %v1563_v17 = vadd.f32 %v1562_v12, %v1369_v10  ;;  %v1564_v19 = vpop.f32.mrb[43].mxu0 }
 0x16f   : > { %v2131_v20 = vsel %vm2003_vm7, %v1939_v61, %v2067_v7  ;;  %v1865_v21 = vmul.f32 %v3350_v9, %v1561_v8  ;;  %v1565_v22 = vadd.f32 %v1564_v19, %v1371_v18 }
 0x170   : > { %2366 = vst [vmem:[%s3368_s27 + $0x90] sm:$0xff] %v2714_v13  ;;  %v2715_v23 = vpack.c.bf16 %v2131_v20, %v2130_v14  ;;  %v1940_v24 = vadd.f32 %v3352_v11, %v1864_v16  ;;  %v1866_v25 = vmul.f32 %v3348_v6, %v1563_v17 }
 0x171   : > { %v1941_v26 = vadd.f32 %v3354_v15, %v1865_v21  ;;  %v1867_v27 = vmul.f32 %v3350_v9, %v1565_v22 }
 0x172   : > { %2367 = vst [vmem:[%s3368_s27 + $0x98] sm:$0xff] %v2715_v23  ;;  %vm2004_vm8 = vcmp.ge.f32.partialorder %v1940_v24, 0.0  ;;  %v2068_v28 = vmul.f32 0.1, %v1940_v24  ;;  %v1942_v29 = vadd.f32 %v3352_v11, %v1866_v25  ;;  %v1375_v32 = vpop.f32.mrb[44].mxu1 }
 0x173   : > { %vm2005_vm9 = vcmp.ge.f32.partialorder %v1941_v26, 0.0  ;;  %v2069_v30 = vmul.f32 0.1, %v1941_v26  ;;  %v1943_v31 = vadd.f32 %v3354_v15, %v1867_v27  ;;  %v1568_v33 = vpop.f32.mrb[44].mxu0  ;;  %v1377_v37 = vpop.f32.mrb[45].mxu1 }
 0x174   : > { %v2132_v34 = vsel %vm2004_vm8, %v1940_v24, %v2068_v28  ;;  %vm2006_vm10 = vcmp.ge.f32.partialorder %v1942_v29, 0.0  ;;  %v2070_v35 = vmul.f32 0.1, %v1942_v29  ;;  %v1569_v36 = vadd.f32 %v1568_v33, %v1375_v32  ;;  %v1570_v38 = vpop.f32.mrb[45].mxu0  ;;  %v1379_v42 = vpop.f32.mrb[46].mxu1 }
 0x175   : > { %v2133_v39 = vsel %vm2005_vm9, %v1941_v26, %v2069_v30  ;;  %vm2007_vm11 = vcmp.ge.f32.partialorder %v1943_v31, 0.0  ;;  %v2071_v40 = vmul.f32 0.1, %v1943_v31  ;;  %v1571_v41 = vadd.f32 %v1570_v38, %v1377_v37  ;;  %v1572_v43 = vpop.f32.mrb[46].mxu0  ;;  %v1381_v48 = vpop.f32.mrb[47].mxu1 }
 0x176   : > { %v2716_v44 = vpack.c.bf16 %v2133_v39, %v2132_v34  ;;  %v2134_v45 = vsel %vm2006_vm10, %v1942_v29, %v2070_v35  ;;  %v1868_v46 = vmul.f32 %v3348_v6, %v1569_v36  ;;  %v1573_v47 = vadd.f32 %v1572_v43, %v1379_v42  ;;  %v1574_v49 = vpop.f32.mrb[47].mxu0 }
 0x177   : > { %v2135_v50 = vsel %vm2007_vm11, %v1943_v31, %v2071_v40  ;;  %v1869_v51 = vmul.f32 %v3350_v9, %v1571_v41  ;;  %v1575_v52 = vadd.f32 %v1574_v49, %v1381_v48 }
 0x178   : > { %2368 = vst [vmem:[%s3368_s27 + $0xa0] sm:$0xff] %v2716_v44  ;;  %v2717_v53 = vpack.c.bf16 %v2135_v50, %v2134_v45  ;;  %v1944_v54 = vadd.f32 %v3352_v11, %v1868_v46  ;;  %v1870_v55 = vmul.f32 %v3348_v6, %v1573_v47 }
 0x179   : > { %v1945_v56 = vadd.f32 %v3354_v15, %v1869_v51  ;;  %v1871_v57 = vmul.f32 %v3350_v9, %v1575_v52 }
 0x17a   : > { %2369 = vst [vmem:[%s3368_s27 + $0xa8] sm:$0xff] %v2717_v53  ;;  %vm2008_vm12 = vcmp.ge.f32.partialorder %v1944_v54, 0.0  ;;  %v2072_v58 = vmul.f32 0.1, %v1944_v54  ;;  %v1946_v59 = vadd.f32 %v3352_v11, %v1870_v55  ;;  %v1385_v62 = vpop.f32.mrb[48].mxu1 }
 0x17b   : > { %vm2009_vm13 = vcmp.ge.f32.partialorder %v1945_v56, 0.0  ;;  %v2073_v60 = vmul.f32 0.1, %v1945_v56  ;;  %v1947_v61 = vadd.f32 %v3354_v15, %v1871_v57  ;;  %v1578_v63 = vpop.f32.mrb[48].mxu0  ;;  %v1387_v3 = vpop.f32.mrb[49].mxu1 }
 0x17c   : > { %v2136_v0 = vsel %vm2008_vm12, %v1944_v54, %v2072_v58  ;;  %vm2010_vm14 = vcmp.ge.f32.partialorder %v1946_v59, 0.0  ;;  %v2074_v1 = vmul.f32 0.1, %v1946_v59  ;;  %v1579_v2 = vadd.f32 %v1578_v63, %v1385_v62  ;;  %v1580_v4 = vpop.f32.mrb[49].mxu0  ;;  %v1389_v10 = vpop.f32.mrb[50].mxu1 }
 0x17d   : > { %v2137_v5 = vsel %vm2009_vm13, %v1945_v56, %v2073_v60  ;;  %vm2011_vm15 = vcmp.ge.f32.partialorder %v1947_v61, 0.0  ;;  %v2075_v7 = vmul.f32 0.1, %v1947_v61  ;;  %v1581_v8 = vadd.f32 %v1580_v4, %v1387_v3  ;;  %v1582_v12 = vpop.f32.mrb[50].mxu0  ;;  %v1391_v18 = vpop.f32.mrb[51].mxu1 }
 0x17e   : > { %v2718_v13 = vpack.c.bf16 %v2137_v5, %v2136_v0  ;;  %v2138_v14 = vsel %vm2010_vm14, %v1946_v59, %v2074_v1  ;;  %v1872_v16 = vmul.f32 %v3348_v6, %v1579_v2  ;;  %v1583_v17 = vadd.f32 %v1582_v12, %v1389_v10  ;;  %v1584_v19 = vpop.f32.mrb[51].mxu0 }
 0x17f   : > { %v2139_v20 = vsel %vm2011_vm15, %v1947_v61, %v2075_v7  ;;  %v1873_v21 = vmul.f32 %v3350_v9, %v1581_v8  ;;  %v1585_v22 = vadd.f32 %v1584_v19, %v1391_v18 }
 0x180   : > { %2370 = vst [vmem:[%s3368_s27 + $0xb0] sm:$0xff] %v2718_v13  ;;  %v2719_v23 = vpack.c.bf16 %v2139_v20, %v2138_v14  ;;  %v1948_v24 = vadd.f32 %v3352_v11, %v1872_v16  ;;  %v1874_v25 = vmul.f32 %v3348_v6, %v1583_v17 }
 0x181   : > { %v1949_v26 = vadd.f32 %v3354_v15, %v1873_v21  ;;  %v1875_v27 = vmul.f32 %v3350_v9, %v1585_v22 }
 0x182   : > { %2371 = vst [vmem:[%s3368_s27 + $0xb8] sm:$0xff] %v2719_v23  ;;  %vm2012_vm0 = vcmp.ge.f32.partialorder %v1948_v24, 0.0  ;;  %v2076_v28 = vmul.f32 0.1, %v1948_v24  ;;  %v1950_v29 = vadd.f32 %v3352_v11, %v1874_v25  ;;  %v1395_v32 = vpop.f32.mrb[52].mxu1 }
 0x183   : > { %vm2013_vm1 = vcmp.ge.f32.partialorder %v1949_v26, 0.0  ;;  %v2077_v30 = vmul.f32 0.1, %v1949_v26  ;;  %v1951_v31 = vadd.f32 %v3354_v15, %v1875_v27  ;;  %v1588_v33 = vpop.f32.mrb[52].mxu0  ;;  %v1397_v37 = vpop.f32.mrb[53].mxu1 }
 0x184   : > { %v2140_v34 = vsel %vm2012_vm0, %v1948_v24, %v2076_v28  ;;  %vm2014_vm2 = vcmp.ge.f32.partialorder %v1950_v29, 0.0  ;;  %v2078_v35 = vmul.f32 0.1, %v1950_v29  ;;  %v1589_v36 = vadd.f32 %v1588_v33, %v1395_v32  ;;  %v1590_v38 = vpop.f32.mrb[53].mxu0  ;;  %v1399_v42 = vpop.f32.mrb[54].mxu1 }
 0x185   : > { %v2141_v39 = vsel %vm2013_vm1, %v1949_v26, %v2077_v30  ;;  %vm2015_vm3 = vcmp.ge.f32.partialorder %v1951_v31, 0.0  ;;  %v2079_v40 = vmul.f32 0.1, %v1951_v31  ;;  %v1591_v41 = vadd.f32 %v1590_v38, %v1397_v37  ;;  %v1592_v43 = vpop.f32.mrb[54].mxu0  ;;  %v1401_v48 = vpop.f32.mrb[55].mxu1 }
 0x186   : > { %v2720_v44 = vpack.c.bf16 %v2141_v39, %v2140_v34  ;;  %v2142_v45 = vsel %vm2014_vm2, %v1950_v29, %v2078_v35  ;;  %v1876_v46 = vmul.f32 %v3348_v6, %v1589_v36  ;;  %v1593_v47 = vadd.f32 %v1592_v43, %v1399_v42  ;;  %v1594_v49 = vpop.f32.mrb[55].mxu0 }
 0x187   : > { %v2143_v50 = vsel %vm2015_vm3, %v1951_v31, %v2079_v40  ;;  %v1877_v51 = vmul.f32 %v3350_v9, %v1591_v41  ;;  %v1595_v52 = vadd.f32 %v1594_v49, %v1401_v48 }
 0x188   : > { %2372 = vst [vmem:[%s3368_s27 + $0xc0] sm:$0xff] %v2720_v44  ;;  %v2721_v53 = vpack.c.bf16 %v2143_v50, %v2142_v45  ;;  %v1952_v54 = vadd.f32 %v3352_v11, %v1876_v46  ;;  %v1878_v55 = vmul.f32 %v3348_v6, %v1593_v47 }
 0x189   : > { %v1953_v56 = vadd.f32 %v3354_v15, %v1877_v51  ;;  %v1879_v57 = vmul.f32 %v3350_v9, %v1595_v52 }
 0x18a   : > { %2373 = vst [vmem:[%s3368_s27 + $0xc8] sm:$0xff] %v2721_v53  ;;  %vm2016_vm4 = vcmp.ge.f32.partialorder %v1952_v54, 0.0  ;;  %v2080_v58 = vmul.f32 0.1, %v1952_v54  ;;  %v1954_v59 = vadd.f32 %v3352_v11, %v1878_v55  ;;  %v1405_v62 = vpop.f32.mrb[56].mxu1 }
 0x18b   : > { %vm2017_vm5 = vcmp.ge.f32.partialorder %v1953_v56, 0.0  ;;  %v2081_v60 = vmul.f32 0.1, %v1953_v56  ;;  %v1955_v61 = vadd.f32 %v3354_v15, %v1879_v57  ;;  %v1598_v63 = vpop.f32.mrb[56].mxu0  ;;  %v1407_v3 = vpop.f32.mrb[57].mxu1 }
 0x18c   : > { %v2144_v0 = vsel %vm2016_vm4, %v1952_v54, %v2080_v58  ;;  %vm2018_vm6 = vcmp.ge.f32.partialorder %v1954_v59, 0.0  ;;  %v2082_v1 = vmul.f32 0.1, %v1954_v59  ;;  %v1599_v2 = vadd.f32 %v1598_v63, %v1405_v62  ;;  %v1600_v4 = vpop.f32.mrb[57].mxu0  ;;  %v1409_v10 = vpop.f32.mrb[58].mxu1 }
 0x18d   : > { %v2145_v5 = vsel %vm2017_vm5, %v1953_v56, %v2081_v60  ;;  %vm2019_vm7 = vcmp.ge.f32.partialorder %v1955_v61, 0.0  ;;  %v2083_v7 = vmul.f32 0.1, %v1955_v61  ;;  %v1601_v8 = vadd.f32 %v1600_v4, %v1407_v3  ;;  %v1602_v12 = vpop.f32.mrb[58].mxu0  ;;  %v1411_v18 = vpop.f32.mrb[59].mxu1 }
 0x18e   : > { %v2722_v13 = vpack.c.bf16 %v2145_v5, %v2144_v0  ;;  %v2146_v14 = vsel %vm2018_vm6, %v1954_v59, %v2082_v1  ;;  %v1880_v16 = vmul.f32 %v3348_v6, %v1599_v2  ;;  %v1603_v17 = vadd.f32 %v1602_v12, %v1409_v10  ;;  %v1604_v19 = vpop.f32.mrb[59].mxu0 }
 0x18f   : > { %v2147_v20 = vsel %vm2019_vm7, %v1955_v61, %v2083_v7  ;;  %v1881_v21 = vmul.f32 %v3350_v9, %v1601_v8  ;;  %v1605_v22 = vadd.f32 %v1604_v19, %v1411_v18 }
 0x190   : > { %2374 = vst [vmem:[%s3368_s27 + $0xd0] sm:$0xff] %v2722_v13  ;;  %v2723_v23 = vpack.c.bf16 %v2147_v20, %v2146_v14  ;;  %v1956_v24 = vadd.f32 %v3352_v11, %v1880_v16  ;;  %v1882_v25 = vmul.f32 %v3348_v6, %v1603_v17 }
 0x191   : > { %v1957_v26 = vadd.f32 %v3354_v15, %v1881_v21  ;;  %v1883_v27 = vmul.f32 %v3350_v9, %v1605_v22 }
 0x192   : > { %2375 = vst [vmem:[%s3368_s27 + $0xd8] sm:$0xff] %v2723_v23  ;;  %vm2020_vm8 = vcmp.ge.f32.partialorder %v1956_v24, 0.0  ;;  %v2084_v28 = vmul.f32 0.1, %v1956_v24  ;;  %v1958_v29 = vadd.f32 %v3352_v11, %v1882_v25  ;;  %v1415_v32 = vpop.f32.mrb[60].mxu1 }
 0x193   : > { %vm2021_vm9 = vcmp.ge.f32.partialorder %v1957_v26, 0.0  ;;  %v2085_v30 = vmul.f32 0.1, %v1957_v26  ;;  %v1959_v31 = vadd.f32 %v3354_v15, %v1883_v27  ;;  %v1608_v33 = vpop.f32.mrb[60].mxu0  ;;  %v1417_v37 = vpop.f32.mrb[61].mxu1 }
 0x194   : > { %v2148_v34 = vsel %vm2020_vm8, %v1956_v24, %v2084_v28  ;;  %vm2022_vm10 = vcmp.ge.f32.partialorder %v1958_v29, 0.0  ;;  %v2086_v35 = vmul.f32 0.1, %v1958_v29  ;;  %v1609_v36 = vadd.f32 %v1608_v33, %v1415_v32  ;;  %v1610_v38 = vpop.f32.mrb[61].mxu0  ;;  %v1419_v42 = vpop.f32.mrb[62].mxu1 }
 0x195   : > { %v2149_v39 = vsel %vm2021_vm9, %v1957_v26, %v2085_v30  ;;  %vm2023_vm11 = vcmp.ge.f32.partialorder %v1959_v31, 0.0  ;;  %v2087_v40 = vmul.f32 0.1, %v1959_v31  ;;  %v1611_v41 = vadd.f32 %v1610_v38, %v1417_v37  ;;  %v1612_v43 = vpop.f32.mrb[62].mxu0  ;;  %v1421_v48 = vpop.f32.mrb[63].mxu1 }
 0x196   : > { %v2724_v44 = vpack.c.bf16 %v2149_v39, %v2148_v34  ;;  %v2150_v45 = vsel %vm2022_vm10, %v1958_v29, %v2086_v35  ;;  %v1884_v46 = vmul.f32 %v3348_v6, %v1609_v36  ;;  %v1613_v47 = vadd.f32 %v1612_v43, %v1419_v42  ;;  %v1614_v49 = vpop.f32.mrb[63].mxu0 }
 0x197   : > { %v2151_v50 = vsel %vm2023_vm11, %v1959_v31, %v2087_v40  ;;  %v1885_v51 = vmul.f32 %v3350_v9, %v1611_v41  ;;  %v1615_v52 = vadd.f32 %v1614_v49, %v1421_v48 }
 0x198   : > { %2376 = vst [vmem:[%s3368_s27 + $0xe0] sm:$0xff] %v2724_v44  ;;  %v2725_v53 = vpack.c.bf16 %v2151_v50, %v2150_v45  ;;  %v1960_v54 = vadd.f32 %v3352_v11, %v1884_v46  ;;  %v1886_v55 = vmul.f32 %v3348_v6, %v1613_v47 }
 0x199   : > { %v1961_v56 = vadd.f32 %v3354_v15, %v1885_v51  ;;  %v1887_v57 = vmul.f32 %v3350_v9, %v1615_v52 }
 0x19a   : > { %2377 = vst [vmem:[%s3368_s27 + $0xe8] sm:$0xff] %v2725_v53  ;;  %vm2024_vm12 = vcmp.ge.f32.partialorder %v1960_v54, 0.0  ;;  %v2088_v58 = vmul.f32 0.1, %v1960_v54  ;;  %v1962_v59 = vadd.f32 %v3352_v11, %v1886_v55 }
 0x19b   : > { %vm2025_vm13 = vcmp.ge.f32.partialorder %v1961_v56, 0.0  ;;  %v2089_v60 = vmul.f32 0.1, %v1961_v56  ;;  %v1963_v61 = vadd.f32 %v3354_v15, %v1887_v57 }
 0x19c   : > { %v2152_v62 = vsel %vm2024_vm12, %v1960_v54, %v2088_v58  ;;  %vm2026_vm14 = vcmp.ge.f32.partialorder %v1962_v59, 0.0  ;;  %v2090_v63 = vmul.f32 0.1, %v1962_v59 }
 0x19d   : > { %v2153_v0 = vsel %vm2025_vm13, %v1961_v56, %v2089_v60  ;;  %vm2027_vm15 = vcmp.ge.f32.partialorder %v1963_v61, 0.0  ;;  %v2091_v6 = vmul.f32 0.1, %v1963_v61 }
 0x19e   : > { %v2726_v1 = vpack.c.bf16 %v2153_v0, %v2152_v62  ;;  %v2154_v2 = vsel %vm2026_vm14, %v1962_v59, %v2090_v63 }
 0x19f   : > { %v2155_v9 = vsel %vm2027_vm15, %v1963_v61, %v2091_v6 }
 0x1a0   : > { %2378 = vst [vmem:[%s3368_s27 + $0xf0] sm:$0xff] %v2726_v1  ;;  %v2727_v3 = vpack.c.bf16 %v2155_v9, %v2154_v2 }
 0x1a2   : > { %2379 = vst [vmem:[%s3368_s27 + $0xf8] sm:$0xff] %v2727_v3 }
 0x1a3 PF: > { %s14_s17 = sadd.s32 1, %s3030_s17   ;;  %s3536_s15 = smov %s3026_s16 }
 0x1a4   : > { %p11_p5 = scmp.ge.s32.totalorder %s14_s17, 4   ;;  %s3537_s16 = smov %s3539_s18 }
 0x1a6   :  { %13 = sbr.rel (!%p11_p5) target bundleno = 2 (0x2), region = 83 }

// kernel: aspp_decoder_forward.13
= control target key start
LH: loop header
LB: loop body
LE: loop exit
PB: predicated region body
PF: predicated region fallthrough
CT: control target
= control target key end

     0   :  { %s13410_s21 = smov 0   ;;  %s13412_s22 = smov 0   ;;  %s15777_s0 = inlined_call_operand.vmem [shape: bf16[512,2304], index: 0, kind: input, shape index: {}]   ;;  %s15778_s1 = inlined_call_operand.vmem [shape: bf16[2304,128], index: 1, kind: input, shape index: {}]   ;;  %s15779_s2 = inlined_call_operand.vmem [shape: bf16[512,2304], index: 2, kind: input, shape index: {}]   ;;  %s15780_s3 = inlined_call_operand.vmem [shape: bf16[2304,128], index: 3, kind: input, shape index: {}]   ;;  %s15781_s4 = inlined_call_operand.vmem [shape: f32[1,128], index: 4, kind: input, shape index: {}]   ;;  %s15782_s5 = inlined_call_operand.vmem [shape: f32[1,128], index: 5, kind: input, shape index: {}]   ;;  %s15783_s6 = inlined_call_operand.vmem [shape: f32[512,128], index: 6, kind: output, shape index: {}]  }
   0x1   :  { %s13414_s23 = smov 0  }
   0x2 LB: > { %s28_s24 = sadd.s32 1, %s13369_s22  ;;  %p9283_p0 = scmp.ge.s32.totalorder %s13373_s23, 1  ;;  %s13373_s23 = sphi %s13414_s23, %s16_s23   ;;  %s13369_s22 = sphi %s13412_s22, %s15785_s22   ;;  %s13365_s21 = sphi %s13410_s21, %s15784_s21  }
   0x3   : > { %p30_p1 = scmp.ge.s32.totalorder %s28_s24, 2  ;;  %p274_p2 = scmp.lt.s32.totalorder %s13373_s23, 3 }
   0x5   : > { %s15787_s24 = smov (%p30_p1, %s28_s24), 0  ;;  %p275_p3 = pnand %p9283_p0, %p274_p2 }
   0x6   : > { %v12199_v0 = vld [vmem:[%s15780_s3 + $0x40] sm:$0xff] (!%p275_p3)   ;;  %v12203_v4 = vld [vmem:[%s15780_s3 + $0x48] sm:$0xff] (!%p275_p3)   ;;  %v12207_v8 = vld [vmem:[%s15780_s3 + $0x50] sm:$0xff] (!%p275_p3)   ;;  %s9284_s11 = sshll.u32 (!%p275_p3), %s13365_s21, 5 }
   0x7   : > { %278 = sbr.rel (%p275_p3) target bundleno = 1410 (0x582), region = 44  ;;  %v12200_v1 = vld [vmem:[%s15780_s3 + $0xc0] sm:$0xff] (!%p275_p3)   ;;  %10158 = vmatprep.subr.bf16.mxu0 (!%p275_p3), %v12199_v0  ;;  %v12204_v5 = vld [vmem:[%s15780_s3 + $0xc8] sm:$0xff] (!%p275_p3)   ;;  %v12208_v9 = vld [vmem:[%s15780_s3 + $0xd0] sm:$0xff] (!%p275_p3)   ;;  %p329_p4 = scmp.lt.s32.totalorder (!%p275_p3), %s9284_s11, 63 }
   0x8   : > { %v12201_v2 = vld [vmem:[%s15780_s3] sm:$0xff] (!%p275_p3)   ;;  %10270 = vmatprep.subr.bf16.mxu1 (!%p275_p3), %v12200_v1  ;;  %v12205_v6 = vld [vmem:[%s15780_s3 + $0x8] sm:$0xff] (!%p275_p3)   ;;  %v12209_v10 = vld [vmem:[%s15780_s3 + $0x10] sm:$0xff] (!%p275_p3)  }
   0x9   : > { %v12202_v3 = vld [vmem:[%s15780_s3 + $0x80] sm:$0xff] (!%p275_p3)   ;;  %10159 = vmatpush3.bf16.msra.mxu0 (!%p275_p3), %v12201_v2  ;;  %v12206_v7 = vld [vmem:[%s15780_s3 + $0x88] sm:$0xff] (!%p275_p3)   ;;  %v12210_v11 = vld [vmem:[%s15780_s3 + $0x90] sm:$0xff] (!%p275_p3)  }
   0xa   : > { %10271 = vmatpush3.bf16.msra.mxu1 (!%p275_p3), %v12202_v3  ;;  %10160 = vmatprep.subr.bf16.mxu0 (!%p275_p3), %v12203_v4  ;;  %v12211_v12 = vld [vmem:[%s15780_s3 + $0x58] sm:$0xff] (!%p275_p3)   ;;  %v12215_v16 = vld [vmem:[%s15780_s3 + $0x60] sm:$0xff] (!%p275_p3)   ;;  %v12219_v20 = vld [vmem:[%s15780_s3 + $0x68] sm:$0xff] (!%p275_p3)  }
   0xb   : > { %10272 = vmatprep.subr.bf16.mxu1 (!%p275_p3), %v12204_v5  ;;  %v12212_v13 = vld [vmem:[%s15780_s3 + $0xd8] sm:$0xff] (!%p275_p3)   ;;  %v12216_v17 = vld [vmem:[%s15780_s3 + $0xe0] sm:$0xff] (!%p275_p3)   ;;  %v12220_v21 = vld [vmem:[%s15780_s3 + $0xe8] sm:$0xff] (!%p275_p3)  }
   0xc   : > { %v12213_v14 = vld [vmem:[%s15780_s3 + $0x18] sm:$0xff] (!%p275_p3)   ;;  %v12217_v18 = vld [vmem:[%s15780_s3 + $0x20] sm:$0xff] (!%p275_p3)   ;;  %v12221_v22 = vld [vmem:[%s15780_s3 + $0x28] sm:$0xff] (!%p275_p3)  }
   0xd   : > { %10161 = vmatpush3.bf16.msra.mxu0 (!%p275_p3), %v12205_v6  ;;  %v12214_v15 = vld [vmem:[%s15780_s3 + $0x98] sm:$0xff] (!%p275_p3)   ;;  %v12218_v19 = vld [vmem:[%s15780_s3 + $0xa0] sm:$0xff] (!%p275_p3)   ;;  %v12222_v23 = vld [vmem:[%s15780_s3 + $0xa8] sm:$0xff] (!%p275_p3)  }
   0xe   : > { %10273 = vmatpush3.bf16.msra.mxu1 %v12206_v7  ;;  %10162 = vmatprep.subr.bf16.mxu0 %v12207_v8  ;;  %s15789_s11 = smov (!%p329_p4, %s9284_s11), 63  ;;  %v12223_v24 = vld [vmem:[%s15780_s3 + $0x70] sm:$0xff]   ;;  %v12227_v28 = vld [vmem:[%s15780_s3 + $0x78] sm:$0xff]   ;;  %v12237_v36 = vld [vmem:[%s15780_s3 + $0x140] sm:$0xff]  }
   0xf   : > { %10274 = vmatprep.subr.bf16.mxu1 %v12208_v9  ;;  %v12224_v25 = vld [vmem:[%s15780_s3 + $0xf0] sm:$0xff]   ;;  %s12174_s14 = smul.u32 72, %s15789_s11  ;;  %v12228_v29 = vld [vmem:[%s15780_s3 + $0xf8] sm:$0xff]   ;;  %v12238_v37 = vld [vmem:[%s15780_s3 + $0x100] sm:$0xff]   ;;  %s9289_s10 = sshll.u32 %s15789_s11, 3 }
  0x10   : > { %v12225_v26 = vld [vmem:[%s15780_s3 + $0x30] sm:$0xff]   ;;  %v12229_v30 = vld [vmem:[%s15780_s3 + $0x38] sm:$0xff]   ;;  %v12239_v38 = vld [vmem:[%s15780_s3 + $0x1c0] sm:$0xff]   ;;  %s15641_s17 = scalar_lea.vmem %s15783_s6, %s9289_s10 }
  0x11   : > { %10163 = vmatpush3.bf16.msra.mxu0 %v12209_v10  ;;  %v12226_v27 = vld [vmem:[%s15780_s3 + $0xb0] sm:$0xff]   ;;  %s13529_s28 = scalar_lea.vmem %s15779_s2, %s12174_s14  ;;  %v12230_v31 = vld [vmem:[%s15780_s3 + $0xb8] sm:$0xff]   ;;  %v12240_v39 = vld [vmem:[%s15780_s3 + $0x180] sm:$0xff]   ;;  %s14134_s15 = scalar_lea.vmem %s15777_s0, %s12174_s14 }
  0x12   : > { %10275 = vmatpush3.bf16.msra.mxu1 %v12210_v11  ;;  %10164 = vmatprep.subr.bf16.mxu0 %v12211_v12  ;;  %v12231_v32 = vld [vmem:[%s13529_s28] ss:$72 sps:$4 sm:$0xff]   ;;  %v12233_v33 = vld [vmem:[%s13529_s28 + $0x4] ss:$72 sps:$4 sm:$0xff]   ;;  %v12241_v40 = vld [vmem:[%s13529_s28 + $0x94] ss:$72 sps:$4 sm:$0xff]  }
  0x13   : > { %10276 = vmatprep.subr.bf16.mxu1 %v12212_v13  ;;  %v12234_v34 = vld [vmem:[%s13529_s28 + $0x8] ss:$72 sps:$4 sm:$0xff]   ;;  %v12236_v35 = vld [vmem:[%s13529_s28 + $0xc] ss:$72 sps:$4 sm:$0xff]   ;;  %3854 = vmatprep.mubr.bf16.mxu0 %v12233_v33  ;;  %v12243_v41 = vld [vmem:[%s13529_s28 + $0x9c] ss:$72 sps:$4 sm:$0xff]  }
  0x14   : > { %4015 = vmatprep.mubr.bf16.mxu1 %v12236_v35  ;;  %v12245_v42 = vld [vmem:[%s13529_s28 + $0x90] ss:$72 sps:$4 sm:$0xff]   ;;  %v12247_v44 = vld [vmem:[%s13529_s28 + $0x124] ss:$72 sps:$4 sm:$0xff]   ;;  %v12251_v48 = vld [vmem:[%s13529_s28 + $0x120] ss:$72 sps:$4 sm:$0xff]  }
  0x15   : > { %10165 = vmatpush3.bf16.msra.mxu0 %v12213_v14  ;;  %v12246_v43 = vld [vmem:[%s13529_s28 + $0x98] ss:$72 sps:$4 sm:$0xff]   ;;  %v12249_v45 = vld [vmem:[%s13529_s28 + $0x12c] ss:$72 sps:$4 sm:$0xff]   ;;  %v12252_v51 = vld [vmem:[%s13529_s28 + $0x128] ss:$72 sps:$4 sm:$0xff]  }
  0x16   : > { %10277 = vmatpush3.bf16.msra.mxu1 %v12214_v15  ;;  %10166 = vmatprep.subr.bf16.mxu0 %v12215_v16  ;;  %v12253_v46 = vld [vmem:[%s15780_s3 + $0x148] sm:$0xff]   ;;  %v12257_v52 = vld [vmem:[%s13529_s28 + $0x1b4] ss:$72 sps:$4 sm:$0xff]   ;;  %v12261_v54 = vld [vmem:[%s13529_s28 + $0x1b0] ss:$72 sps:$4 sm:$0xff]  }
  0x17   : > { %10278 = vmatprep.subr.bf16.mxu1 %v12216_v17  ;;  %v12254_v47 = vld [vmem:[%s15780_s3 + $0x108] sm:$0xff]   ;;  %v12259_v53 = vld [vmem:[%s13529_s28 + $0x1bc] ss:$72 sps:$4 sm:$0xff]   ;;  %v12269_v55 = vld [vmem:[%s15780_s3 + $0x150] sm:$0xff]  }
  0x18   : > { %v12255_v49 = vld [vmem:[%s15780_s3 + $0x1c8] sm:$0xff]   ;;  %v12262_v56 = vld [vmem:[%s13529_s28 + $0x1b8] ss:$72 sps:$4 sm:$0xff]   ;;  %v12270_v58 = vld [vmem:[%s15780_s3 + $0x110] sm:$0xff]  }
  0x19   : > { %10167 = vmatpush3.bf16.msra.mxu0 %v12217_v18  ;;  %v12256_v50 = vld [vmem:[%s15780_s3 + $0x188] sm:$0xff]   ;;  %v12271_v59 = vld [vmem:[%s15780_s3 + $0x1d0] sm:$0xff]   ;;  %v12285_v1 = vld [vmem:[%s15780_s3 + $0x158] sm:$0xff]  }
  0x1a   : > { %10279 = vmatpush3.bf16.msra.mxu1 %v12218_v19  ;;  %10168 = vmatprep.subr.bf16.mxu0 %v12219_v20  ;;  %v12263_v57 = vld [vmem:[%s13529_s28 + $0x244] ss:$72 sps:$4 sm:$0xff]   ;;  %v12272_v60 = vld [vmem:[%s15780_s3 + $0x190] sm:$0xff]   ;;  %v12267_v62 = vld [vmem:[%s13529_s28 + $0x240] ss:$72 sps:$4 sm:$0xff]  }
  0x1b   : > { %10280 = vmatprep.subr.bf16.mxu1 %v12220_v21  ;;  %v12265_v61 = vld [vmem:[%s13529_s28 + $0x24c] ss:$72 sps:$4 sm:$0xff]   ;;  %v12268_v63 = vld [vmem:[%s13529_s28 + $0x248] ss:$72 sps:$4 sm:$0xff]   ;;  %v12275_v2 = vld [vmem:[%s13529_s28 + $0x2dc] ss:$72 sps:$4 sm:$0xff]  }
  0x1c   : > { %v12273_v0 = vld [vmem:[%s13529_s28 + $0x2d4] ss:$72 sps:$4 sm:$0xff]   ;;  %v12277_v6 = vld [vmem:[%s13529_s28 + $0x2d0] ss:$72 sps:$4 sm:$0xff]   ;;  %v12279_v8 = vld [vmem:[%s13529_s28 + $0x364] ss:$72 sps:$4 sm:$0xff]  }
  0x1d   : > { %10169 = vmatpush3.bf16.msra.mxu0 %v12221_v22  ;;  %v12286_v3 = vld [vmem:[%s15780_s3 + $0x118] sm:$0xff]   ;;  %v12281_v9 = vld [vmem:[%s13529_s28 + $0x36c] ss:$72 sps:$4 sm:$0xff]   ;;  %v12301_v10 = vld [vmem:[%s15780_s3 + $0x160] sm:$0xff]  }
  0x1e   : > { %10281 = vmatpush3.bf16.msra.mxu1 %v12222_v23  ;;  %10170 = vmatprep.subr.bf16.mxu0 %v12223_v24  ;;  %v12287_v4 = vld [vmem:[%s15780_s3 + $0x1d8] sm:$0xff]   ;;  %v12302_v11 = vld [vmem:[%s15780_s3 + $0x120] sm:$0xff]   ;;  %v12284_v15 = vld [vmem:[%s13529_s28 + $0x368] ss:$72 sps:$4 sm:$0xff]  }
  0x1f   : > { %10282 = vmatprep.subr.bf16.mxu1 %v12224_v25  ;;  %v12288_v5 = vld [vmem:[%s15780_s3 + $0x198] sm:$0xff]   ;;  %v12303_v12 = vld [vmem:[%s15780_s3 + $0x1e0] sm:$0xff]   ;;  %v12317_v18 = vld [vmem:[%s15780_s3 + $0x168] sm:$0xff]  }
  0x20   : > { %v12278_v7 = vld [vmem:[%s13529_s28 + $0x2d8] ss:$72 sps:$4 sm:$0xff]   ;;  %v12289_v16 = vld [vmem:[%s13529_s28 + $0x3f4] ss:$72 sps:$4 sm:$0xff]   ;;  %v12318_v19 = vld [vmem:[%s15780_s3 + $0x128] sm:$0xff]  }
  0x21   : > { %10171 = vmatpush3.bf16.msra.mxu0 %v12225_v26  ;;  %v12304_v13 = vld [vmem:[%s15780_s3 + $0x1a0] sm:$0xff]   ;;  %v12319_v20 = vld [vmem:[%s15780_s3 + $0x1e8] sm:$0xff]   ;;  %v12293_v22 = vld [vmem:[%s13529_s28 + $0x3f0] ss:$72 sps:$4 sm:$0xff]  }
  0x22   : > { %10283 = vmatpush3.bf16.msra.mxu1 %v12226_v27  ;;  %10172 = vmatprep.subr.bf16.mxu0 %v12227_v28  ;;  %v12283_v14 = vld [vmem:[%s13529_s28 + $0x360] ss:$72 sps:$4 sm:$0xff]   ;;  %v12291_v17 = vld [vmem:[%s13529_s28 + $0x3fc] ss:$72 sps:$4 sm:$0xff]   ;;  %v12297_v25 = vld [vmem:[%s13529_s28 + $0x48c] ss:$72 sps:$4 sm:$0xff]  }
  0x23   : > { %10284 = vmatprep.subr.bf16.mxu1 %v12228_v29  ;;  %v12320_v21 = vld [vmem:[%s15780_s3 + $0x1a8] sm:$0xff]   ;;  %v12294_v23 = vld [vmem:[%s13529_s28 + $0x3f8] ss:$72 sps:$4 sm:$0xff]   ;;  %v12333_v26 = vld [vmem:[%s15780_s3 + $0x170] sm:$0xff]  }
  0x24   : > { %v12295_v24 = vld [vmem:[%s13529_s28 + $0x484] ss:$72 sps:$4 sm:$0xff]   ;;  %v12334_v27 = vld [vmem:[%s15780_s3 + $0x130] sm:$0xff]   ;;  %v12350_v35 = vld [vmem:[%s15780_s3 + $0x138] sm:$0xff]  }
  0x25   : > { %10173 = vmatpush3.bf16.msra.mxu0 %v12229_v30  ;;  %v12335_v28 = vld [vmem:[%s15780_s3 + $0x1f0] sm:$0xff]   ;;  %v12299_v30 = vld [vmem:[%s13529_s28 + $0x480] ss:$72 sps:$4 sm:$0xff]   ;;  %v12307_v33 = vld [vmem:[%s13529_s28 + $0x51c] ss:$72 sps:$4 sm:$0xff]  }
  0x26   : > { %10285 = vmatpush3.bf16.msra.mxu1 %v12230_v31  ;;  %10382 = vmatprep.subr.bf16.mxu0 %v12237_v36  ;;  %v12336_v29 = vld [vmem:[%s15780_s3 + $0x1b0] sm:$0xff]  }
  0x27   : > { %10494 = vmatprep.subr.bf16.mxu1 %v12239_v38  ;;  %v12300_v31 = vld [vmem:[%s13529_s28 + $0x488] ss:$72 sps:$4 sm:$0xff]   ;;  %v12352_v38 = vld [vmem:[%s15780_s3 + $0x1b8] sm:$0xff]  }
  0x28   : > { %3855 = vmatmul.mubr.bf16.vlgmr.msra.gmra.mrb[0].mxu0 %v12231_v32  ;;  %v12305_v32 = vld [vmem:[%s13529_s28 + $0x514] ss:$72 sps:$4 sm:$0xff]   ;;  %v12309_v36 = vld [vmem:[%s13529_s28 + $0x510] ss:$72 sps:$4 sm:$0xff]  }
  0x29   : > { %4016 = vmatmul.mubr.bf16.vlgmr.msra.gmra.mrb[0].mxu1 %v12234_v34  ;;  %10383 = vmatpush3.bf16.msra.mxu0 %v12238_v37  ;;  %v12349_v34 = vld [vmem:[%s15780_s3 + $0x178] sm:$0xff]  }
  0x2a   : > { %10495 = vmatpush3.bf16.msra.mxu1 %v12240_v39  ;;  %3862 = vmatprep.mubr.bf16.mxu0 %v12241_v40  ;;  %v12351_v37 = vld [vmem:[%s15780_s3 + $0x1f8] sm:$0xff]   ;;  %v12311_v40 = vld [vmem:[%s13529_s28 + $0x5a4] ss:$72 sps:$4 sm:$0xff]  }
  0x2b   : > { %4023 = vmatprep.mubr.bf16.mxu1 %v12243_v41  ;;  %10384 = vmatprep.subr.bf16.mxu0 %v12253_v46  ;;  %v12310_v39 = vld [vmem:[%s13529_s28 + $0x518] ss:$72 sps:$4 sm:$0xff]   ;;  %v12313_v41 = vld [vmem:[%s13529_s28 + $0x5ac] ss:$72 sps:$4 sm:$0xff]  }
  0x2c   : > { %10496 = vmatprep.subr.bf16.mxu1 %v12255_v49  ;;  %v12321_v46 = vld [vmem:[%s13529_s28 + $0x634] ss:$72 sps:$4 sm:$0xff]   ;;  %v12326_v49 = vld [vmem:[%s13529_s28 + $0x638] ss:$72 sps:$4 sm:$0xff]  }
  0x2d   : > { %10385 = vmatpush3.bf16.msra.mxu0 %v12254_v47  ;;  %v12323_v47 = vld [vmem:[%s13529_s28 + $0x63c] ss:$72 sps:$4 sm:$0xff]  }
  0x2e   : > { %10497 = vmatpush3.bf16.msra.mxu1 %v12256_v50  ;;  %10386 = vmatprep.subr.bf16.mxu0 %v12269_v55  ;;  %v12327_v50 = vld [vmem:[%s13529_s28 + $0x6c4] ss:$72 sps:$4 sm:$0xff]  }
  0x2f   : > { %10498 = vmatprep.subr.bf16.mxu1 %v12271_v59  ;;  %v12339_v55 = vld [vmem:[%s13529_s28 + $0x75c] ss:$72 sps:$4 sm:$0xff]   ;;  %v12345_v59 = vld [vmem:[%s13529_s28 + $0x7ec] ss:$72 sps:$4 sm:$0xff]  }
  0x30   : > { %3863 = vmatmul.mubr.bf16.gmra.mrb[4].mxu0 %v12245_v42  ;;  %v12315_v42 = vld [vmem:[%s13529_s28 + $0x5a0] ss:$72 sps:$4 sm:$0xff]  }
  0x31   : > { %4024 = vmatmul.mubr.bf16.gmra.mrb[4].mxu1 %v12246_v43  ;;  %3870 = vmatprep.mubr.bf16.mxu0 %v12247_v44  ;;  %v12365_v43 = vld [vmem:[%s15780_s3 + $0x240] sm:$0xff]   ;;  %v12316_v44 = vld [vmem:[%s13529_s28 + $0x5a8] ss:$72 sps:$4 sm:$0xff]  }
  0x32   : > { %4031 = vmatprep.mubr.bf16.mxu1 %v12249_v45  ;;  %10387 = vmatpush3.bf16.msra.mxu0 %v12270_v58  ;;  %v12367_v45 = vld [vmem:[%s15780_s3 + $0x2c0] sm:$0xff]  }
  0x33   : > { %10499 = vmatpush3.bf16.msra.mxu1 %v12272_v60  ;;  %10388 = vmatprep.subr.bf16.mxu0 %v12285_v1  ;;  %v12343_v58 = vld [vmem:[%s13529_s28 + $0x7e4] ss:$72 sps:$4 sm:$0xff]   ;;  %v12347_v60 = vld [vmem:[%s13529_s28 + $0x7e0] ss:$72 sps:$4 sm:$0xff]  }
  0x34   : > { %10500 = vmatprep.subr.bf16.mxu1 %v12287_v4  ;;  %v12358_v1 = vld [vmem:[%s13529_s28 + $0x878] ss:$72 sps:$4 sm:$0xff]  }
  0x35   : > { %v12359_v4 = vld [vmem:[%s13529_s28 + $0x10] ss:$72 sps:$4 sm:$0xff]  }
  0x36   : > { %10389 = vmatpush3.bf16.msra.mxu0 %v12286_v3  ;;  %v12364_v3 = vld [vmem:[%s13529_s28 + $0x1c] ss:$72 sps:$4 sm:$0xff]  }
  0x37   : > { %10501 = vmatpush3.bf16.msra.mxu1 %v12288_v5  ;;  %10390 = vmatprep.subr.bf16.mxu0 %v12301_v10  ;;  %v12362_v5 = vld [vmem:[%s13529_s28 + $0x18] ss:$72 sps:$4 sm:$0xff]   ;;  %v12381_v10 = vld [vmem:[%s15780_s3 + $0x248] sm:$0xff]  }
  0x38   : > { %3871 = vmatmul.mubr.bf16.gmra.mrb[8].mxu0 %v12251_v48  ;;  %10502 = vmatprep.subr.bf16.mxu1 %v12303_v12  ;;  %v12325_v48 = vld [vmem:[%s13529_s28 + $0x630] ss:$72 sps:$4 sm:$0xff]   ;;  %v12383_v12 = vld [vmem:[%s15780_s3 + $0x2c8] sm:$0xff]  }
  0x39   : > { %4032 = vmatmul.mubr.bf16.gmra.mrb[8].mxu1 %v12252_v51  ;;  %3878 = vmatprep.mubr.bf16.mxu0 %v12257_v52  ;;  %v12329_v51 = vld [vmem:[%s13529_s28 + $0x6cc] ss:$72 sps:$4 sm:$0xff]   ;;  %v12331_v52 = vld [vmem:[%s13529_s28 + $0x6c0] ss:$72 sps:$4 sm:$0xff]  }
  0x3a   : > { %4039 = vmatprep.mubr.bf16.mxu1 %v12259_v53  ;;  %10391 = vmatpush3.bf16.msra.mxu0 %v12302_v11  ;;  %v12332_v53 = vld [vmem:[%s13529_s28 + $0x6c8] ss:$72 sps:$4 sm:$0xff]  }
  0x3b   : > { %10503 = vmatpush3.bf16.msra.mxu1 %v12304_v13  ;;  %10392 = vmatprep.subr.bf16.mxu0 %v12317_v18  ;;  %v12382_v11 = vld [vmem:[%s15780_s3 + $0x208] sm:$0xff]   ;;  %v12375_v18 = vld [vmem:[%s13529_s28 + $0x134] ss:$72 sps:$4 sm:$0xff]  }
  0x3c   : > { %10504 = vmatprep.subr.bf16.mxu1 %v12319_v20  ;;  %v12384_v13 = vld [vmem:[%s15780_s3 + $0x288] sm:$0xff]   ;;  %v12398_v20 = vld [vmem:[%s15780_s3 + $0x210] sm:$0xff]  }
  0x3e   : > { %10393 = vmatpush3.bf16.msra.mxu0 %v12318_v19  ;;  %v12377_v19 = vld [vmem:[%s13529_s28 + $0x13c] ss:$72 sps:$4 sm:$0xff]  }
  0x3f   : > { %10505 = vmatpush3.bf16.msra.mxu1 %v12320_v21  ;;  %10394 = vmatprep.subr.bf16.mxu0 %v12333_v26  ;;  %v12400_v21 = vld [vmem:[%s15780_s3 + $0x290] sm:$0xff]   ;;  %v12416_v26 = vld [vmem:[%s15780_s3 + $0x298] sm:$0xff]  }
  0x40   : > { %3879 = vmatmul.mubr.bf16.gmra.mrb[12].mxu0 %v12261_v54  ;;  %10506 = vmatprep.subr.bf16.mxu1 %v12335_v28  ;;  %v12337_v54 = vld [vmem:[%s13529_s28 + $0x754] ss:$72 sps:$4 sm:$0xff]   ;;  %v12385_v28 = vld [vmem:[%s13529_s28 + $0x1c4] ss:$72 sps:$4 sm:$0xff]  }
  0x41   : > { %4040 = vmatmul.mubr.bf16.gmra.mrb[12].mxu1 %v12262_v56  ;;  %3886 = vmatprep.mubr.bf16.mxu0 %v12263_v57  ;;  %v12341_v56 = vld [vmem:[%s13529_s28 + $0x750] ss:$72 sps:$4 sm:$0xff]  }
  0x42   : > { %4047 = vmatprep.mubr.bf16.mxu1 %v12265_v61  ;;  %10395 = vmatpush3.bf16.msra.mxu0 %v12334_v27  ;;  %v12342_v57 = vld [vmem:[%s13529_s28 + $0x758] ss:$72 sps:$4 sm:$0xff]   ;;  %v12348_v61 = vld [vmem:[%s13529_s28 + $0x7e8] ss:$72 sps:$4 sm:$0xff]  }
  0x43   : > { %10507 = vmatpush3.bf16.msra.mxu1 %v12336_v29  ;;  %10396 = vmatprep.subr.bf16.mxu0 %v12349_v34  ;;  %v12380_v27 = vld [vmem:[%s13529_s28 + $0x138] ss:$72 sps:$4 sm:$0xff]   ;;  %v12445_v34 = vld [vmem:[%s15780_s3 + $0x268] sm:$0xff]  }
  0x44   : > { %10508 = vmatprep.subr.bf16.mxu1 %v12351_v37  ;;  %v12429_v29 = vld [vmem:[%s15780_s3 + $0x260] sm:$0xff]   ;;  %v12446_v37 = vld [vmem:[%s15780_s3 + $0x228] sm:$0xff]  }
  0x46   : > { %10397 = vmatpush3.bf16.msra.mxu0 %v12350_v35  ;;  %v12447_v35 = vld [vmem:[%s15780_s3 + $0x2e8] sm:$0xff]  }
  0x47   : > { %10509 = vmatpush3.bf16.msra.mxu1 %v12352_v38  ;;  %10606 = vmatprep.subr.bf16.mxu0 %v12365_v43  ;;  %v12390_v38 = vld [vmem:[%s13529_s28 + $0x1c8] ss:$72 sps:$4 sm:$0xff]  }
  0x48   : > { %3887 = vmatmul.mubr.bf16.gmra.mrb[16].mxu0 %v12267_v62  ;;  %10718 = vmatprep.subr.bf16.mxu1 %v12367_v45  ;;  %v12353_v62 = vld [vmem:[%s13529_s28 + $0x874] ss:$72 sps:$4 sm:$0xff]  }
  0x49   : > { %4048 = vmatmul.mubr.bf16.gmra.mrb[16].mxu1 %v12268_v63  ;;  %3894 = vmatprep.mubr.bf16.mxu0 %v12273_v0  ;;  %v12355_v63 = vld [vmem:[%s13529_s28 + $0x87c] ss:$72 sps:$4 sm:$0xff]   ;;  %v12357_v0 = vld [vmem:[%s13529_s28 + $0x870] ss:$72 sps:$4 sm:$0xff]  }
  0x4a   : > { %4055 = vmatprep.mubr.bf16.mxu1 %v12275_v2  ;;  %v12361_v2 = vld [vmem:[%s13529_s28 + $0x14] ss:$72 sps:$4 sm:$0xff]  }
  0x4b   : > { %v12463_v43 = vld [vmem:[%s15780_s3 + $0x2f0] sm:$0xff]  }
  0x4c   : > { %v12464_v45 = vld [vmem:[%s15780_s3 + $0x2b0] sm:$0xff]  }
  0x50   : > { %3895 = vmatmul.mubr.bf16.gmra.mrb[20].mxu0 %v12277_v6  ;;  %v12366_v6 = vld [vmem:[%s15780_s3 + $0x200] sm:$0xff]  }
  0x51   : > { %4056 = vmatmul.mubr.bf16.gmra.mrb[20].mxu1 %v12278_v7  ;;  %3902 = vmatprep.mubr.bf16.mxu0 %v12279_v8  ;;  %v12368_v7 = vld [vmem:[%s15780_s3 + $0x280] sm:$0xff]  }
  0x52   : > { %4063 = vmatprep.mubr.bf16.mxu1 %v12281_v9  ;;  %v12369_v8 = vld [vmem:[%s13529_s28 + $0xa4] ss:$72 sps:$4 sm:$0xff]  }
  0x53   : > { %v12371_v9 = vld [vmem:[%s13529_s28 + $0xac] ss:$72 sps:$4 sm:$0xff]  }
  0x58   : > { %3903 = vmatmul.mubr.bf16.gmra.mrb[24].mxu0 %v12283_v14  ;;  %v12373_v14 = vld [vmem:[%s13529_s28 + $0xa0] ss:$72 sps:$4 sm:$0xff]  }
  0x59   : > { %4064 = vmatmul.mubr.bf16.gmra.mrb[24].mxu1 %v12284_v15  ;;  %3910 = vmatprep.mubr.bf16.mxu0 %v12289_v16  ;;  %v12397_v15 = vld [vmem:[%s15780_s3 + $0x250] sm:$0xff]  }
  0x5a   : > { %4071 = vmatprep.mubr.bf16.mxu1 %v12291_v17  ;;  %v12374_v16 = vld [vmem:[%s13529_s28 + $0xa8] ss:$72 sps:$4 sm:$0xff]  }
  0x5b   : > { %v12399_v17 = vld [vmem:[%s15780_s3 + $0x2d0] sm:$0xff]  }
  0x60   : > { %3911 = vmatmul.mubr.bf16.gmra.mrb[28].mxu0 %v12293_v22  ;;  %v12413_v22 = vld [vmem:[%s15780_s3 + $0x258] sm:$0xff]  }
  0x61   : > { %4072 = vmatmul.mubr.bf16.gmra.mrb[28].mxu1 %v12294_v23  ;;  %3918 = vmatprep.mubr.bf16.mxu0 %v12295_v24  ;;  %v12415_v23 = vld [vmem:[%s15780_s3 + $0x2d8] sm:$0xff]  }
  0x62   : > { %4079 = vmatprep.mubr.bf16.mxu1 %v12297_v25  ;;  %v12379_v24 = vld [vmem:[%s13529_s28 + $0x130] ss:$72 sps:$4 sm:$0xff]  }
  0x63   : > { %v12414_v25 = vld [vmem:[%s15780_s3 + $0x218] sm:$0xff]  }
  0x68   : > { %3919 = vmatmul.mubr.bf16.gmra.mrb[32].mxu0 %v12299_v30  ;;  %v12387_v30 = vld [vmem:[%s13529_s28 + $0x1cc] ss:$72 sps:$4 sm:$0xff]  }
  0x69   : > { %4080 = vmatmul.mubr.bf16.gmra.mrb[32].mxu1 %v12300_v31  ;;  %3926 = vmatprep.mubr.bf16.mxu0 %v12305_v32  ;;  %v12431_v31 = vld [vmem:[%s15780_s3 + $0x2e0] sm:$0xff]  }
  0x6a   : > { %4087 = vmatprep.mubr.bf16.mxu1 %v12307_v33  ;;  %v12430_v32 = vld [vmem:[%s15780_s3 + $0x220] sm:$0xff]  }
  0x6b   : > { %v12432_v33 = vld [vmem:[%s15780_s3 + $0x2a0] sm:$0xff]  }
  0x70   : > { %3927 = vmatmul.mubr.bf16.gmra.mrb[36].mxu0 %v12309_v36  ;;  %v12389_v36 = vld [vmem:[%s13529_s28 + $0x1c0] ss:$72 sps:$4 sm:$0xff]  }
  0x71   : > { %4088 = vmatmul.mubr.bf16.gmra.mrb[36].mxu1 %v12310_v39  ;;  %3934 = vmatprep.mubr.bf16.mxu0 %v12311_v40  ;;  %v12391_v39 = vld [vmem:[%s13529_s28 + $0x254] ss:$72 sps:$4 sm:$0xff]   ;;  %v12448_v40 = vld [vmem:[%s15780_s3 + $0x2a8] sm:$0xff]  }
  0x72   : > { %4095 = vmatprep.mubr.bf16.mxu1 %v12313_v41  ;;  %v12461_v41 = vld [vmem:[%s15780_s3 + $0x270] sm:$0xff]  }
  0x78   : > { %3935 = vmatmul.mubr.bf16.gmra.mrb[40].mxu0 %v12315_v42  ;;  %v12393_v42 = vld [vmem:[%s13529_s28 + $0x25c] ss:$72 sps:$4 sm:$0xff]  }
  0x79   : > { %4096 = vmatmul.mubr.bf16.gmra.mrb[40].mxu1 %v12316_v44  ;;  %3942 = vmatprep.mubr.bf16.mxu0 %v12321_v46  ;;  %v12462_v44 = vld [vmem:[%s15780_s3 + $0x230] sm:$0xff]   ;;  %v12477_v46 = vld [vmem:[%s15780_s3 + $0x278] sm:$0xff]  }
  0x7a   : > { %4103 = vmatprep.mubr.bf16.mxu1 %v12323_v47  ;;  %v12479_v47 = vld [vmem:[%s15780_s3 + $0x2f8] sm:$0xff]  }
  0x80   : > { %3943 = vmatmul.mubr.bf16.gmra.mrb[44].mxu0 %v12325_v48  ;;  %v12395_v48 = vld [vmem:[%s13529_s28 + $0x250] ss:$72 sps:$4 sm:$0xff]  }
  0x81   : > { %4104 = vmatmul.mubr.bf16.gmra.mrb[44].mxu1 %v12326_v49  ;;  %3950 = vmatprep.mubr.bf16.mxu0 %v12327_v50  ;;  %v12478_v49 = vld [vmem:[%s15780_s3 + $0x238] sm:$0xff]  }
  0x82   : > { %4111 = vmatprep.mubr.bf16.mxu1 %v12329_v51  ;;  %v12480_v50 = vld [vmem:[%s15780_s3 + $0x2b8] sm:$0xff]   ;;  %v12493_v51 = vld [vmem:[%s15780_s3 + $0x340] sm:$0xff]  }
  0x88   : > { %3951 = vmatmul.mubr.bf16.gmra.mrb[48].mxu0 %v12331_v52  ;;  %v12396_v52 = vld [vmem:[%s13529_s28 + $0x258] ss:$72 sps:$4 sm:$0xff]  }
  0x89   : > { %4112 = vmatmul.mubr.bf16.gmra.mrb[48].mxu1 %v12332_v53  ;;  %3958 = vmatprep.mubr.bf16.mxu0 %v12337_v54  ;;  %v12495_v53 = vld [vmem:[%s15780_s3 + $0x3c0] sm:$0xff]  }
  0x8a   : > { %4119 = vmatprep.mubr.bf16.mxu1 %v12339_v55  ;;  %v12401_v54 = vld [vmem:[%s13529_s28 + $0x2e4] ss:$72 sps:$4 sm:$0xff]  }
  0x8b   : > { %v12403_v55 = vld [vmem:[%s13529_s28 + $0x2ec] ss:$72 sps:$4 sm:$0xff]  }
  0x90   : > { %3959 = vmatmul.mubr.bf16.gmra.mrb[52].mxu0 %v12341_v56  ;;  %v12405_v56 = vld [vmem:[%s13529_s28 + $0x2e0] ss:$72 sps:$4 sm:$0xff]  }
  0x91   : > { %4120 = vmatmul.mubr.bf16.gmra.mrb[52].mxu1 %v12342_v57  ;;  %3966 = vmatprep.mubr.bf16.mxu0 %v12343_v58  ;;  %v12406_v57 = vld [vmem:[%s13529_s28 + $0x2e8] ss:$72 sps:$4 sm:$0xff]   ;;  %v12407_v58 = vld [vmem:[%s13529_s28 + $0x374] ss:$72 sps:$4 sm:$0xff]  }
  0x92   : > { %4127 = vmatprep.mubr.bf16.mxu1 %v12345_v59  ;;  %v12409_v59 = vld [vmem:[%s13529_s28 + $0x37c] ss:$72 sps:$4 sm:$0xff]  }
  0x98   : > { %3967 = vmatmul.mubr.bf16.gmra.mrb[56].mxu0 %v12347_v60  ;;  %v12411_v60 = vld [vmem:[%s13529_s28 + $0x370] ss:$72 sps:$4 sm:$0xff]  }
  0x99   : > { %4128 = vmatmul.mubr.bf16.gmra.mrb[56].mxu1 %v12348_v61  ;;  %3974 = vmatprep.mubr.bf16.mxu0 %v12353_v62  ;;  %v12412_v61 = vld [vmem:[%s13529_s28 + $0x378] ss:$72 sps:$4 sm:$0xff]   ;;  %v12417_v62 = vld [vmem:[%s13529_s28 + $0x404] ss:$72 sps:$4 sm:$0xff]  }
  0x9a   : > { %4135 = vmatprep.mubr.bf16.mxu1 %v12355_v63  ;;  %v12419_v63 = vld [vmem:[%s13529_s28 + $0x40c] ss:$72 sps:$4 sm:$0xff]  }
  0xa0   : > { %3975 = vmatmul.mubr.bf16.gmra.mrb[60].mxu0 %v12357_v0  ;;  %v12421_v0 = vld [vmem:[%s13529_s28 + $0x400] ss:$72 sps:$4 sm:$0xff]  }
  0xa1   : > { %4136 = vmatmul.mubr.bf16.gmra.mrb[60].mxu1 %v12358_v1  ;;  %4176 = vmatprep.mubr.bf16.mxu0 %v12361_v2  ;;  %v12422_v1 = vld [vmem:[%s13529_s28 + $0x408] ss:$72 sps:$4 sm:$0xff]   ;;  %v12423_v2 = vld [vmem:[%s13529_s28 + $0x494] ss:$72 sps:$4 sm:$0xff]  }
  0xa2   : > { %4337 = vmatprep.mubr.bf16.mxu1 %v12364_v3  ;;  %v12425_v3 = vld [vmem:[%s13529_s28 + $0x49c] ss:$72 sps:$4 sm:$0xff]  }
  0xa8   : > { %4177 = vmatmul.mubr.bf16.vlgmr.msra.gmra.mrb[64].mxu0 %v12359_v4  ;;  %v12427_v4 = vld [vmem:[%s13529_s28 + $0x490] ss:$72 sps:$4 sm:$0xff]  }
  0xa9   : > { %4338 = vmatmul.mubr.bf16.vlgmr.msra.gmra.mrb[64].mxu1 %v12362_v5  ;;  %10607 = vmatpush3.bf16.msra.mxu0 %v12366_v6  ;;  %v12428_v5 = vld [vmem:[%s13529_s28 + $0x498] ss:$72 sps:$4 sm:$0xff]   ;;  %v12433_v6 = vld [vmem:[%s13529_s28 + $0x524] ss:$72 sps:$4 sm:$0xff]  }
  0xaa   : > { %10719 = vmatpush3.bf16.msra.mxu1 %v12368_v7  ;;  %4184 = vmatprep.mubr.bf16.mxu0 %v12369_v8  ;;  %v12435_v7 = vld [vmem:[%s13529_s28 + $0x52c] ss:$72 sps:$4 sm:$0xff]   ;;  %v12437_v8 = vld [vmem:[%s13529_s28 + $0x520] ss:$72 sps:$4 sm:$0xff]  }
  0xab   : > { %4345 = vmatprep.mubr.bf16.mxu1 %v12371_v9  ;;  %10608 = vmatprep.subr.bf16.mxu0 %v12381_v10  ;;  %v12438_v9 = vld [vmem:[%s13529_s28 + $0x528] ss:$72 sps:$4 sm:$0xff]   ;;  %v12439_v10 = vld [vmem:[%s13529_s28 + $0x5b4] ss:$72 sps:$4 sm:$0xff]  }
  0xac   : > { %10720 = vmatprep.subr.bf16.mxu1 %v12383_v12  ;;  %v12443_v12 = vld [vmem:[%s13529_s28 + $0x5b0] ss:$72 sps:$4 sm:$0xff]  }
  0xad   : > { %10609 = vmatpush3.bf16.msra.mxu0 %v12382_v11  ;;  %v12441_v11 = vld [vmem:[%s13529_s28 + $0x5bc] ss:$72 sps:$4 sm:$0xff]  }
  0xae   : > { %10721 = vmatpush3.bf16.msra.mxu1 %v12384_v13  ;;  %10610 = vmatprep.subr.bf16.mxu0 %v12397_v15  ;;  %v12444_v13 = vld [vmem:[%s13529_s28 + $0x5b8] ss:$72 sps:$4 sm:$0xff]   ;;  %v12451_v15 = vld [vmem:[%s13529_s28 + $0x64c] ss:$72 sps:$4 sm:$0xff]  }
  0xaf   : > { %10722 = vmatprep.subr.bf16.mxu1 %v12399_v17 }
  0xb0   : > { %4185 = vmatmul.mubr.bf16.gmra.mrb[68].mxu0 %v12373_v14  ;;  %v12449_v14 = vld [vmem:[%s13529_s28 + $0x644] ss:$72 sps:$4 sm:$0xff]  }
  0xb1   : > { %4346 = vmatmul.mubr.bf16.gmra.mrb[68].mxu1 %v12374_v16  ;;  %4192 = vmatprep.mubr.bf16.mxu0 %v12375_v18  ;;  %v12453_v16 = vld [vmem:[%s13529_s28 + $0x640] ss:$72 sps:$4 sm:$0xff]  }
  0xb2   : > { %4353 = vmatprep.mubr.bf16.mxu1 %v12377_v19  ;;  %10611 = vmatpush3.bf16.msra.mxu0 %v12398_v20  ;;  %v12454_v18 = vld [vmem:[%s13529_s28 + $0x648] ss:$72 sps:$4 sm:$0xff]   ;;  %v12455_v19 = vld [vmem:[%s13529_s28 + $0x6d4] ss:$72 sps:$4 sm:$0xff]  }
  0xb3   : > { %10723 = vmatpush3.bf16.msra.mxu1 %v12400_v21  ;;  %10612 = vmatprep.subr.bf16.mxu0 %v12413_v22 }
  0xb4   : > { %10724 = vmatprep.subr.bf16.mxu1 %v12415_v23 }
  0xb6   : > { %10613 = vmatpush3.bf16.msra.mxu0 %v12414_v25 }
  0xb7   : > { %10725 = vmatpush3.bf16.msra.mxu1 %v12416_v26  ;;  %10614 = vmatprep.subr.bf16.mxu0 %v12429_v29 }
  0xb8   : > { %4193 = vmatmul.mubr.bf16.gmra.mrb[72].mxu0 %v12379_v24  ;;  %10726 = vmatprep.subr.bf16.mxu1 %v12431_v31 }
  0xb9   : > { %4354 = vmatmul.mubr.bf16.gmra.mrb[72].mxu1 %v12380_v27  ;;  %4200 = vmatprep.mubr.bf16.mxu0 %v12385_v28  ;;  %v12457_v28 = vld [vmem:[%s13529_s28 + $0x6dc] ss:$72 sps:$4 sm:$0xff]  }
  0xba   : > { %4361 = vmatprep.mubr.bf16.mxu1 %v12387_v30  ;;  %10615 = vmatpush3.bf16.msra.mxu0 %v12430_v32 }
  0xbb   : > { %10727 = vmatpush3.bf16.msra.mxu1 %v12432_v33  ;;  %10616 = vmatprep.subr.bf16.mxu0 %v12445_v34  ;;  %v12459_v34 = vld [vmem:[%s13529_s28 + $0x6d0] ss:$72 sps:$4 sm:$0xff]  }
  0xbc   : > { %10728 = vmatprep.subr.bf16.mxu1 %v12447_v35 }
  0xbe   : > { %10617 = vmatpush3.bf16.msra.mxu0 %v12446_v37  ;;  %v12465_v37 = vld [vmem:[%s13529_s28 + $0x764] ss:$72 sps:$4 sm:$0xff]  }
  0xbf   : > { %10729 = vmatpush3.bf16.msra.mxu1 %v12448_v40  ;;  %10618 = vmatprep.subr.bf16.mxu0 %v12461_v41 }
  0xc0   : > { %4201 = vmatmul.mubr.bf16.gmra.mrb[76].mxu0 %v12389_v36  ;;  %10730 = vmatprep.subr.bf16.mxu1 %v12463_v43  ;;  %v12460_v36 = vld [vmem:[%s13529_s28 + $0x6d8] ss:$72 sps:$4 sm:$0xff]  }
  0xc1   : > { %4362 = vmatmul.mubr.bf16.gmra.mrb[76].mxu1 %v12390_v38  ;;  %4208 = vmatprep.mubr.bf16.mxu0 %v12391_v39 }
  0xc2   : > { %4369 = vmatprep.mubr.bf16.mxu1 %v12393_v42  ;;  %10619 = vmatpush3.bf16.msra.mxu0 %v12462_v44 }
  0xc3   : > { %10731 = vmatpush3.bf16.msra.mxu1 %v12464_v45  ;;  %10620 = vmatprep.subr.bf16.mxu0 %v12477_v46  ;;  %v12467_v46 = vld [vmem:[%s13529_s28 + $0x76c] ss:$72 sps:$4 sm:$0xff]  }
  0xc4   : > { %10732 = vmatprep.subr.bf16.mxu1 %v12479_v47 }
  0xc6   : > { %10621 = vmatpush3.bf16.msra.mxu0 %v12478_v49 }
  0xc7   : > { %10733 = vmatpush3.bf16.msra.mxu1 %v12480_v50  ;;  %10830 = vmatprep.subr.bf16.mxu0 %v12493_v51 }
  0xc8   : > { %4209 = vmatmul.mubr.bf16.gmra.mrb[80].mxu0 %v12395_v48  ;;  %10942 = vmatprep.subr.bf16.mxu1 %v12495_v53 }
  0xc9   : > { %4370 = vmatmul.mubr.bf16.gmra.mrb[80].mxu1 %v12396_v52  ;;  %4216 = vmatprep.mubr.bf16.mxu0 %v12401_v54  ;;  %v12469_v52 = vld [vmem:[%s13529_s28 + $0x760] ss:$72 sps:$4 sm:$0xff]  }
  0xca   : > { %4377 = vmatprep.mubr.bf16.mxu1 %v12403_v55  ;;  %v12470_v54 = vld [vmem:[%s13529_s28 + $0x768] ss:$72 sps:$4 sm:$0xff]   ;;  %v12471_v55 = vld [vmem:[%s13529_s28 + $0x7f4] ss:$72 sps:$4 sm:$0xff]  }
  0xd0   : > { %4217 = vmatmul.mubr.bf16.gmra.mrb[84].mxu0 %v12405_v56 }
  0xd1   : > { %4378 = vmatmul.mubr.bf16.gmra.mrb[84].mxu1 %v12406_v57  ;;  %4224 = vmatprep.mubr.bf16.mxu0 %v12407_v58 }
  0xd2   : > { %4385 = vmatprep.mubr.bf16.mxu1 %v12409_v59 }
  0xd8   : > { %4225 = vmatmul.mubr.bf16.gmra.mrb[88].mxu0 %v12411_v60 }
  0xd9   : > { %4386 = vmatmul.mubr.bf16.gmra.mrb[88].mxu1 %v12412_v61  ;;  %4232 = vmatprep.mubr.bf16.mxu0 %v12417_v62 }
  0xda   : > { %4393 = vmatprep.mubr.bf16.mxu1 %v12419_v63 }
  0xe0   : > { %4233 = vmatmul.mubr.bf16.gmra.mrb[92].mxu0 %v12421_v0  ;;  %v12473_v0 = vld [vmem:[%s13529_s28 + $0x7fc] ss:$72 sps:$4 sm:$0xff]  }
  0xe1   : > { %4394 = vmatmul.mubr.bf16.gmra.mrb[92].mxu1 %v12422_v1  ;;  %4240 = vmatprep.mubr.bf16.mxu0 %v12423_v2 }
  0xe2   : > { %4401 = vmatprep.mubr.bf16.mxu1 %v12425_v3 }
  0xe8   : > { %4241 = vmatmul.mubr.bf16.gmra.mrb[96].mxu0 %v12427_v4 }
  0xe9   : > { %4402 = vmatmul.mubr.bf16.gmra.mrb[96].mxu1 %v12428_v5  ;;  %4248 = vmatprep.mubr.bf16.mxu0 %v12433_v6  ;;  %v12475_v6 = vld [vmem:[%s13529_s28 + $0x7f0] ss:$72 sps:$4 sm:$0xff]  }
  0xea   : > { %4409 = vmatprep.mubr.bf16.mxu1 %v12435_v7 }
  0xf0   : > { %4249 = vmatmul.mubr.bf16.gmra.mrb[100].mxu0 %v12437_v8  ;;  %v12476_v8 = vld [vmem:[%s13529_s28 + $0x7f8] ss:$72 sps:$4 sm:$0xff]  }
  0xf1   : > { %4410 = vmatmul.mubr.bf16.gmra.mrb[100].mxu1 %v12438_v9  ;;  %4256 = vmatprep.mubr.bf16.mxu0 %v12439_v10  ;;  %v12481_v9 = vld [vmem:[%s13529_s28 + $0x884] ss:$72 sps:$4 sm:$0xff]  }
  0xf2   : > { %4417 = vmatprep.mubr.bf16.mxu1 %v12441_v11 }
  0xf8   : > { %4257 = vmatmul.mubr.bf16.gmra.mrb[104].mxu0 %v12443_v12 }
  0xf9   : > { %4418 = vmatmul.mubr.bf16.gmra.mrb[104].mxu1 %v12444_v13  ;;  %4264 = vmatprep.mubr.bf16.mxu0 %v12449_v14 }
  0xfa   : > { %4425 = vmatprep.mubr.bf16.mxu1 %v12451_v15 }
  0xfb   : > { %v10174_v17 = vpop.f32.mrb[0].mxu0 }
  0xfc   : > { %v10286_v20 = vpop.f32.mrb[0].mxu1  ;;  %v10175_v21 = vpop.f32.mrb[1].mxu0 }
  0xfd   : > { %v10176_v22 = vadd.f32 %v10175_v21, %v10174_v17  ;;  %v10287_v23 = vpop.f32.mrb[1].mxu1  ;;  %v10177_v24 = vpop.f32.mrb[2].mxu0 }
  0xfe   : > { %v10288_v25 = vadd.f32 %v10287_v23, %v10286_v20  ;;  %v10289_v26 = vpop.f32.mrb[2].mxu1  ;;  %v10178_v27 = vpop.f32.mrb[3].mxu0 }
  0xff   : > { %v10179_v29 = vadd.f32 %v10178_v27, %v10177_v24  ;;  %v10290_v30 = vpop.f32.mrb[3].mxu1  ;;  %v12485_v24 = vld [vmem:[%s13529_s28 + $0x880] ss:$72 sps:$4 sm:$0xff]   ;;  %v12489_v27 = vld [vmem:[%s13529_s28 + $0x24] ss:$72 sps:$4 sm:$0xff]  }
 0x100   : > { %v13849_v31 = vadd.f32 %v10288_v25, %v10176_v22  ;;  %v10291_v32 = vadd.f32 %v10290_v30, %v10289_v26  ;;  %4265 = vmatmul.mubr.bf16.gmra.mrb[108].mxu0 %v12453_v16  ;;  %v12486_v26 = vld [vmem:[%s13529_s28 + $0x888] ss:$72 sps:$4 sm:$0xff]  }
 0x101   : > { %4426 = vmatmul.mubr.bf16.gmra.mrb[108].mxu1 %v12454_v18  ;;  %4272 = vmatprep.mubr.bf16.mxu0 %v12455_v19  ;;  %v12483_v18 = vld [vmem:[%s13529_s28 + $0x88c] ss:$72 sps:$4 sm:$0xff]  }
 0x102   : > { %v13851_v33 = vadd.f32 %v10291_v32, %v10179_v29  ;;  %4433 = vmatprep.mubr.bf16.mxu1 %v12457_v28 }
 0x103   : > { %v10180_v35 = vpop.f32.mrb[4].mxu0 }
 0x104   : > { %v10292_v38 = vpop.f32.mrb[4].mxu1  ;;  %v10181_v39 = vpop.f32.mrb[5].mxu0 }
 0x105   : > { %v10182_v40 = vadd.f32 %v10181_v39, %v10180_v35  ;;  %v10293_v41 = vpop.f32.mrb[5].mxu1  ;;  %v10183_v42 = vpop.f32.mrb[6].mxu0 }
 0x106   : > { %v10294_v43 = vadd.f32 %v10293_v41, %v10292_v38  ;;  %v10295_v44 = vpop.f32.mrb[6].mxu1  ;;  %v10184_v45 = vpop.f32.mrb[7].mxu0  ;;  %v12492_v38 = vld [vmem:[%s13529_s28 + $0x2c] ss:$72 sps:$4 sm:$0xff]  }
 0x107   : > { %v10185_v47 = vadd.f32 %v10184_v45, %v10183_v42  ;;  %v10296_v48 = vpop.f32.mrb[7].mxu1 }
 0x108   : > { %v13857_v49 = vadd.f32 %v10294_v43, %v10182_v40  ;;  %v10297_v50 = vadd.f32 %v10296_v48, %v10295_v44  ;;  %4273 = vmatmul.mubr.bf16.gmra.mrb[112].mxu0 %v12459_v34  ;;  %v12487_v44 = vld [vmem:[%s13529_s28 + $0x20] ss:$72 sps:$4 sm:$0xff]  }
 0x109   : > { %4434 = vmatmul.mubr.bf16.gmra.mrb[112].mxu1 %v12460_v36  ;;  %4280 = vmatprep.mubr.bf16.mxu0 %v12465_v37 }
 0x10a   : > { %v13859_v51 = vadd.f32 %v10297_v50, %v10185_v47  ;;  %4441 = vmatprep.mubr.bf16.mxu1 %v12467_v46  ;;  %v12490_v46 = vld [vmem:[%s13529_s28 + $0x28] ss:$72 sps:$4 sm:$0xff]   ;;  %v12494_v47 = vld [vmem:[%s15780_s3 + $0x300] sm:$0xff]  }
 0x10b   : > { %v10186_v53 = vpop.f32.mrb[8].mxu0 }
 0x10c   : > { %v10298_v56 = vpop.f32.mrb[8].mxu1  ;;  %v10187_v57 = vpop.f32.mrb[9].mxu0 }
 0x10d   : > { %v10188_v58 = vadd.f32 %v10187_v57, %v10186_v53  ;;  %v10299_v59 = vpop.f32.mrb[9].mxu1  ;;  %v10189_v60 = vpop.f32.mrb[10].mxu0 }
 0x10e   : > { %v10300_v61 = vadd.f32 %v10299_v59, %v10298_v56  ;;  %v10301_v62 = vpop.f32.mrb[10].mxu1  ;;  %v10190_v63 = vpop.f32.mrb[11].mxu0  ;;  %v12496_v59 = vld [vmem:[%s15780_s3 + $0x380] sm:$0xff]  }
 0x10f   : > { %v10191_v1 = vadd.f32 %v10190_v63, %v10189_v60  ;;  %v10302_v2 = vpop.f32.mrb[11].mxu1  ;;  %v12499_v60 = vld [vmem:[%s13529_s28 + $0xbc] ss:$72 sps:$4 sm:$0xff]  }
 0x110   : > { %v13865_v3 = vadd.f32 %v10300_v61, %v10188_v58  ;;  %v10303_v4 = vadd.f32 %v10302_v2, %v10301_v62  ;;  %4281 = vmatmul.mubr.bf16.gmra.mrb[116].mxu0 %v12469_v52  ;;  %v12497_v52 = vld [vmem:[%s13529_s28 + $0xb4] ss:$72 sps:$4 sm:$0xff]   ;;  %v12509_v61 = vld [vmem:[%s15780_s3 + $0x348] sm:$0xff]  }
 0x111   : > { %4442 = vmatmul.mubr.bf16.gmra.mrb[116].mxu1 %v12470_v54  ;;  %4288 = vmatprep.mubr.bf16.mxu0 %v12471_v55 }
 0x112   : > { %v13867_v5 = vadd.f32 %v10303_v4, %v10191_v1  ;;  %4449 = vmatprep.mubr.bf16.mxu1 %v12473_v0  ;;  %v12510_v0 = vld [vmem:[%s15780_s3 + $0x308] sm:$0xff]  }
 0x113   : > { %v10192_v7 = vpop.f32.mrb[12].mxu0  ;;  %v12511_v1 = vld [vmem:[%s15780_s3 + $0x3c8] sm:$0xff]  }
 0x114   : > { %v10304_v10 = vpop.f32.mrb[12].mxu1  ;;  %v10193_v11 = vpop.f32.mrb[13].mxu0 }
 0x115   : > { %v10194_v12 = vadd.f32 %v10193_v11, %v10192_v7  ;;  %v10305_v13 = vpop.f32.mrb[13].mxu1  ;;  %v10195_v14 = vpop.f32.mrb[14].mxu0  ;;  %v12525_v7 = vld [vmem:[%s15780_s3 + $0x350] sm:$0xff]   ;;  %v12502_v11 = vld [vmem:[%s13529_s28 + $0xb8] ss:$72 sps:$4 sm:$0xff]  }
 0x116   : > { %v10306_v15 = vadd.f32 %v10305_v13, %v10304_v10  ;;  %v10307_v16 = vpop.f32.mrb[14].mxu1  ;;  %v10196_v17 = vpop.f32.mrb[15].mxu0  ;;  %v12501_v10 = vld [vmem:[%s13529_s28 + $0xb0] ss:$72 sps:$4 sm:$0xff]  }
 0x117   : > { %v10197_v19 = vadd.f32 %v10196_v17, %v10195_v14  ;;  %v10308_v20 = vpop.f32.mrb[15].mxu1 }
 0x118   : > { %v13873_v21 = vadd.f32 %v10306_v15, %v10194_v12  ;;  %v10309_v22 = vadd.f32 %v10308_v20, %v10307_v16  ;;  %4289 = vmatmul.mubr.bf16.gmra.mrb[120].mxu0 %v12475_v6  ;;  %v12512_v6 = vld [vmem:[%s15780_s3 + $0x388] sm:$0xff]   ;;  %v12527_v12 = vld [vmem:[%s15780_s3 + $0x3d0] sm:$0xff]  }
 0x119   : > { %4450 = vmatmul.mubr.bf16.gmra.mrb[120].mxu1 %v12476_v8  ;;  %4296 = vmatprep.mubr.bf16.mxu0 %v12481_v9  ;;  %v12503_v15 = vld [vmem:[%s13529_s28 + $0x144] ss:$72 sps:$4 sm:$0xff]  }
 0x11a   : > { %v13875_v23 = vadd.f32 %v10309_v22, %v10197_v19  ;;  %4457 = vmatprep.mubr.bf16.mxu1 %v12483_v18 }
 0x11b   : > { %v10198_v25 = vpop.f32.mrb[16].mxu0 }
 0x11c   : > { %v10310_v28 = vpop.f32.mrb[16].mxu1  ;;  %v10199_v29 = vpop.f32.mrb[17].mxu0 }
 0x11d   : > { %v10200_v30 = vadd.f32 %v10199_v29, %v10198_v25  ;;  %v10311_v32 = vpop.f32.mrb[17].mxu1  ;;  %v10201_v34 = vpop.f32.mrb[18].mxu0  ;;  %v12526_v25 = vld [vmem:[%s15780_s3 + $0x310] sm:$0xff]   ;;  %v12541_v29 = vld [vmem:[%s15780_s3 + $0x358] sm:$0xff]  }
 0x11e   : > { %v10312_v35 = vadd.f32 %v10311_v32, %v10310_v28  ;;  %v10313_v36 = vpop.f32.mrb[18].mxu1  ;;  %v10202_v37 = vpop.f32.mrb[19].mxu0 }
 0x11f   : > { %v10203_v39 = vadd.f32 %v10202_v37, %v10201_v34  ;;  %v10314_v40 = vpop.f32.mrb[19].mxu1  ;;  %v12557_v37 = vld [vmem:[%s15780_s3 + $0x360] sm:$0xff]  }
 0x120   : > { %v13881_v41 = vadd.f32 %v10312_v35, %v10200_v30  ;;  %v10315_v42 = vadd.f32 %v10314_v40, %v10313_v36  ;;  %4297 = vmatmul.mubr.bf16.gmra.mrb[124].mxu0 %v12485_v24  ;;  %v12505_v24 = vld [vmem:[%s13529_s28 + $0x14c] ss:$72 sps:$4 sm:$0xff]   ;;  %v12543_v30 = vld [vmem:[%s15780_s3 + $0x3d8] sm:$0xff]   ;;  %v12559_v40 = vld [vmem:[%s15780_s3 + $0x3e0] sm:$0xff]  }
 0x121   : > { %4458 = vmatmul.mubr.bf16.gmra.mrb[124].mxu1 %v12486_v26  ;;  %4498 = vmatprep.mubr.bf16.mxu0 %v12489_v27  ;;  %v12528_v26 = vld [vmem:[%s15780_s3 + $0x390] sm:$0xff]   ;;  %v12542_v35 = vld [vmem:[%s15780_s3 + $0x318] sm:$0xff]  }
 0x122   : > { %v13883_v43 = vadd.f32 %v10315_v42, %v10203_v39  ;;  %4659 = vmatprep.mubr.bf16.mxu1 %v12492_v38  ;;  %v12544_v36 = vld [vmem:[%s15780_s3 + $0x398] sm:$0xff]   ;;  %v12507_v39 = vld [vmem:[%s13529_s28 + $0x140] ss:$72 sps:$4 sm:$0xff]  }
 0x123   : > { %v10204_v45 = vpop.f32.mrb[20].mxu0 }
 0x124   : > { %v10316_v48 = vpop.f32.mrb[20].mxu1  ;;  %v10205_v50 = vpop.f32.mrb[21].mxu0 }
 0x125   : > { %v10206_v53 = vadd.f32 %v10205_v50, %v10204_v45  ;;  %v10317_v54 = vpop.f32.mrb[21].mxu1  ;;  %v10207_v55 = vpop.f32.mrb[22].mxu0  ;;  %v12513_v45 = vld [vmem:[%s13529_s28 + $0x1d4] ss:$72 sps:$4 sm:$0xff]  }
 0x126   : > { %v10318_v56 = vadd.f32 %v10317_v54, %v10316_v48  ;;  %v10319_v57 = vpop.f32.mrb[22].mxu1  ;;  %v10208_v58 = vpop.f32.mrb[23].mxu0 }
 0x127   : > { %v10209_v62 = vadd.f32 %v10208_v58, %v10207_v55  ;;  %v10320_v63 = vpop.f32.mrb[23].mxu1  ;;  %v12560_v58 = vld [vmem:[%s15780_s3 + $0x3a0] sm:$0xff]  }
 0x128   : > { %v13904_v2 = vadd.f32 %v10318_v56, %v10206_v53  ;;  %v10321_v4 = vadd.f32 %v10320_v63, %v10319_v57  ;;  %4499 = vmatmul.mubr.bf16.vlgmr.msra.gmra.mrb[128].mxu0 %v12487_v44  ;;  %v12508_v44 = vld [vmem:[%s13529_s28 + $0x148] ss:$72 sps:$4 sm:$0xff]   ;;  %v12515_v56 = vld [vmem:[%s13529_s28 + $0x1dc] ss:$72 sps:$4 sm:$0xff]  }
 0x129   : > { %4660 = vmatmul.mubr.bf16.vlgmr.msra.gmra.mrb[128].mxu1 %v12490_v46  ;;  %10831 = vmatpush3.bf16.msra.mxu0 %v12494_v47  ;;  %v12558_v57 = vld [vmem:[%s15780_s3 + $0x320] sm:$0xff]  }
 0x12a   : > { %v13912_v8 = vadd.f32 %v10321_v4, %v10209_v62  ;;  %10943 = vmatpush3.bf16.msra.mxu1 %v12496_v59  ;;  %4506 = vmatprep.mubr.bf16.mxu0 %v12497_v52  ;;  %v12575_v62 = vld [vmem:[%s15780_s3 + $0x3e8] sm:$0xff]  }
 0x12b   : > { %v10210_v9 = vpop.f32.mrb[24].mxu0  ;;  %4667 = vmatprep.mubr.bf16.mxu1 %v12499_v60  ;;  %10832 = vmatprep.subr.bf16.mxu0 %v12509_v61  ;;  %v12573_v61 = vld [vmem:[%s15780_s3 + $0x368] sm:$0xff]  }
 0x12c   : > { %v10322_v13 = vpop.f32.mrb[24].mxu1  ;;  %v10211_v14 = vpop.f32.mrb[25].mxu0  ;;  %10944 = vmatprep.subr.bf16.mxu1 %v12511_v1  ;;  %v12574_v1 = vld [vmem:[%s15780_s3 + $0x328] sm:$0xff]  }
 0x12d   : > { %v10212_v16 = vadd.f32 %v10211_v14, %v10210_v9  ;;  %v10323_v17 = vpop.f32.mrb[25].mxu1  ;;  %v10213_v18 = vpop.f32.mrb[26].mxu0  ;;  %10833 = vmatpush3.bf16.msra.mxu0 %v12510_v0  ;;  %v12518_v9 = vld [vmem:[%s13529_s28 + $0x1d8] ss:$72 sps:$4 sm:$0xff]  }
 0x12e   : > { %v10324_v19 = vadd.f32 %v10323_v17, %v10322_v13  ;;  %v10325_v20 = vpop.f32.mrb[26].mxu1  ;;  %v10214_v22 = vpop.f32.mrb[27].mxu0  ;;  %10945 = vmatpush3.bf16.msra.mxu1 %v12512_v6  ;;  %10834 = vmatprep.subr.bf16.mxu0 %v12525_v7  ;;  %v12517_v6 = vld [vmem:[%s13529_s28 + $0x1d0] ss:$72 sps:$4 sm:$0xff]  }
 0x12f   : > { %v10215_v27 = vadd.f32 %v10214_v22, %v10213_v18  ;;  %v10326_v28 = vpop.f32.mrb[27].mxu1  ;;  %10946 = vmatprep.subr.bf16.mxu1 %v12527_v12  ;;  %v12589_v12 = vld [vmem:[%s15780_s3 + $0x370] sm:$0xff]  }
 0x130   : > { %v13933_v32 = vadd.f32 %v10324_v19, %v10212_v16  ;;  %v10327_v34 = vadd.f32 %v10326_v28, %v10325_v20  ;;  %4507 = vmatmul.mubr.bf16.gmra.mrb[132].mxu0 %v12501_v10  ;;  %v12519_v10 = vld [vmem:[%s13529_s28 + $0x264] ss:$72 sps:$4 sm:$0xff]  }
 0x131   : > { %4668 = vmatmul.mubr.bf16.gmra.mrb[132].mxu1 %v12502_v11  ;;  %4514 = vmatprep.mubr.bf16.mxu0 %v12503_v15  ;;  %v12576_v11 = vld [vmem:[%s15780_s3 + $0x3a8] sm:$0xff]   ;;  %v12591_v15 = vld [vmem:[%s15780_s3 + $0x3f0] sm:$0xff]  }
 0x132   : > { %v13944_v38 = vadd.f32 %v10327_v34, %v10215_v27  ;;  %4675 = vmatprep.mubr.bf16.mxu1 %v12505_v24  ;;  %10835 = vmatpush3.bf16.msra.mxu0 %v12526_v25  ;;  %v12521_v24 = vld [vmem:[%s13529_s28 + $0x26c] ss:$72 sps:$4 sm:$0xff]  }
 0x133   : > { %v10216_v42 = vpop.f32.mrb[28].mxu0  ;;  %10947 = vmatpush3.bf16.msra.mxu1 %v12528_v26  ;;  %10836 = vmatprep.subr.bf16.mxu0 %v12541_v29  ;;  %v12590_v25 = vld [vmem:[%s15780_s3 + $0x330] sm:$0xff]   ;;  %v12605_v29 = vld [vmem:[%s15780_s3 + $0x378] sm:$0xff]  }
 0x134   : > { %v10328_v46 = vpop.f32.mrb[28].mxu1  ;;  %v10217_v47 = vpop.f32.mrb[29].mxu0  ;;  %10948 = vmatprep.subr.bf16.mxu1 %v12543_v30  ;;  %v12592_v26 = vld [vmem:[%s15780_s3 + $0x3b0] sm:$0xff]   ;;  %v12607_v30 = vld [vmem:[%s15780_s3 + $0x3f8] sm:$0xff]  }
 0x135   : > { %v10218_v48 = vadd.f32 %v10217_v47, %v10216_v42  ;;  %v10329_v50 = vpop.f32.mrb[29].mxu1  ;;  %v10219_v52 = vpop.f32.mrb[30].mxu0  ;;  %v12523_v42 = vld [vmem:[%s13529_s28 + $0x260] ss:$72 sps:$4 sm:$0xff]   ;;  %v12529_v47 = vld [vmem:[%s13529_s28 + $0x2f4] ss:$72 sps:$4 sm:$0xff]  }
 0x136   : > { %v10330_v53 = vadd.f32 %v10329_v50, %v10328_v46  ;;  %v10331_v54 = vpop.f32.mrb[30].mxu1  ;;  %v10220_v55 = vpop.f32.mrb[31].mxu0  ;;  %10837 = vmatpush3.bf16.msra.mxu0 %v12542_v35  ;;  %v12524_v46 = vld [vmem:[%s13529_s28 + $0x268] ss:$72 sps:$4 sm:$0xff]  }
 0x137   : > { %v10221_v59 = vadd.f32 %v10220_v55, %v10219_v52  ;;  %v10332_v60 = vpop.f32.mrb[31].mxu1  ;;  %10949 = vmatpush3.bf16.msra.mxu1 %v12544_v36  ;;  %10838 = vmatprep.subr.bf16.mxu0 %v12557_v37  ;;  %v12606_v36 = vld [vmem:[%s15780_s3 + $0x338] sm:$0xff]  }
 0x138   : > { %v13965_v63 = vadd.f32 %v10330_v53, %v10218_v48  ;;  %v10333_v0 = vadd.f32 %v10332_v60, %v10331_v54  ;;  %4515 = vmatmul.mubr.bf16.gmra.mrb[136].mxu0 %v12507_v39  ;;  %10950 = vmatprep.subr.bf16.mxu1 %v12559_v40  ;;  %v12608_v37 = vld [vmem:[%s15780_s3 + $0x3b8] sm:$0xff]   ;;  %v12621_v39 = vld [vmem:[%s15780_s3 + $0x440] sm:$0xff]  }
 0x139   : > { %4676 = vmatmul.mubr.bf16.gmra.mrb[136].mxu1 %v12508_v44  ;;  %4522 = vmatprep.mubr.bf16.mxu0 %v12513_v45  ;;  %v12623_v44 = vld [vmem:[%s15778_s1 + $0x40] sm:$0xff]  }
 0x13a   : > { %v13970_v4 = vadd.f32 %v10333_v0, %v10221_v59  ;;  %4683 = vmatprep.mubr.bf16.mxu1 %v12515_v56  ;;  %10839 = vmatpush3.bf16.msra.mxu0 %v12558_v57 }
 0x13b   : > { %v10222_v7 = vpop.f32.mrb[32].mxu0  ;;  %10951 = vmatpush3.bf16.msra.mxu1 %v12560_v58  ;;  %10840 = vmatprep.subr.bf16.mxu0 %v12573_v61  ;;  %v12531_v58 = vld [vmem:[%s13529_s28 + $0x2fc] ss:$72 sps:$4 sm:$0xff]  }
 0x13c   : > { %v10334_v13 = vpop.f32.mrb[32].mxu1  ;;  %v10223_v14 = vpop.f32.mrb[33].mxu0  ;;  %10952 = vmatprep.subr.bf16.mxu1 %v12575_v62 }
 0x13d   : > { %v10224_v16 = vadd.f32 %v10223_v14, %v10222_v7  ;;  %v10335_v17 = vpop.f32.mrb[33].mxu1  ;;  %v10225_v18 = vpop.f32.mrb[34].mxu0  ;;  %v12534_v7 = vld [vmem:[%s13529_s28 + $0x2f8] ss:$72 sps:$4 sm:$0xff]  }
 0x13e   : > { %v10336_v19 = vadd.f32 %v10335_v17, %v10334_v13  ;;  %v10337_v20 = vpop.f32.mrb[34].mxu1  ;;  %v10226_v22 = vpop.f32.mrb[35].mxu0  ;;  %10841 = vmatpush3.bf16.msra.mxu0 %v12574_v1  ;;  %v12533_v1 = vld [vmem:[%s13529_s28 + $0x2f0] ss:$72 sps:$4 sm:$0xff]  }
 0x13f   : > { %v10227_v27 = vadd.f32 %v10226_v22, %v10225_v18  ;;  %v10338_v28 = vpop.f32.mrb[35].mxu1  ;;  %10953 = vmatpush3.bf16.msra.mxu1 %v12576_v11  ;;  %10842 = vmatprep.subr.bf16.mxu0 %v12589_v12  ;;  %v12537_v18 = vld [vmem:[%s13529_s28 + $0x38c] ss:$72 sps:$4 sm:$0xff]  }
 0x140   : > { %v13997_v34 = vadd.f32 %v10336_v19, %v10224_v16  ;;  %v10339_v35 = vadd.f32 %v10338_v28, %v10337_v20  ;;  %4523 = vmatmul.mubr.bf16.gmra.mrb[140].mxu0 %v12517_v6  ;;  %10954 = vmatprep.subr.bf16.mxu1 %v12591_v15  ;;  %v12540_v28 = vld [vmem:[%s13529_s28 + $0x388] ss:$72 sps:$4 sm:$0xff]  }
 0x141   : > { %4684 = vmatmul.mubr.bf16.gmra.mrb[140].mxu1 %v12518_v9  ;;  %4530 = vmatprep.mubr.bf16.mxu0 %v12519_v10  ;;  %v12535_v9 = vld [vmem:[%s13529_s28 + $0x384] ss:$72 sps:$4 sm:$0xff]  }
 0x142   : > { %v14008_v40 = vadd.f32 %v10339_v35, %v10227_v27  ;;  %4691 = vmatprep.mubr.bf16.mxu1 %v12521_v24  ;;  %10843 = vmatpush3.bf16.msra.mxu0 %v12590_v25 }
 0x143   : > { %v10228_v45 = vpop.f32.mrb[36].mxu0  ;;  %10955 = vmatpush3.bf16.msra.mxu1 %v12592_v26  ;;  %10844 = vmatprep.subr.bf16.mxu0 %v12605_v29  ;;  %v12539_v26 = vld [vmem:[%s13529_s28 + $0x380] ss:$72 sps:$4 sm:$0xff]   ;;  %v12545_v29 = vld [vmem:[%s13529_s28 + $0x414] ss:$72 sps:$4 sm:$0xff]  }
 0x144   : > { %v10340_v48 = vpop.f32.mrb[36].mxu1  ;;  %v10229_v50 = vpop.f32.mrb[37].mxu0  ;;  %10956 = vmatprep.subr.bf16.mxu1 %v12607_v30 }
 0x145   : > { %v10230_v52 = vadd.f32 %v10229_v50, %v10228_v45  ;;  %v10341_v53 = vpop.f32.mrb[37].mxu1  ;;  %v10231_v54 = vpop.f32.mrb[38].mxu0 }
 0x146   : > { %v10342_v55 = vadd.f32 %v10341_v53, %v10340_v48  ;;  %v10343_v56 = vpop.f32.mrb[38].mxu1  ;;  %v10232_v57 = vpop.f32.mrb[39].mxu0  ;;  %10845 = vmatpush3.bf16.msra.mxu0 %v12606_v36 }
 0x147   : > { %v10233_v59 = vadd.f32 %v10232_v57, %v10231_v54  ;;  %v10344_v60 = vpop.f32.mrb[39].mxu1  ;;  %10957 = vmatpush3.bf16.msra.mxu1 %v12608_v37  ;;  %11054 = vmatprep.subr.bf16.mxu0 %v12621_v39  ;;  %v12549_v54 = vld [vmem:[%s13529_s28 + $0x410] ss:$72 sps:$4 sm:$0xff]   ;;  %v12551_v57 = vld [vmem:[%s13529_s28 + $0x4a4] ss:$72 sps:$4 sm:$0xff]  }
 0x148   : > { %v14017_v61 = vadd.f32 %v10342_v55, %v10230_v52  ;;  %v10345_v62 = vadd.f32 %v10344_v60, %v10343_v56  ;;  %4531 = vmatmul.mubr.bf16.gmra.mrb[144].mxu0 %v12523_v42  ;;  %11166 = vmatprep.subr.bf16.mxu1 %v12623_v44  ;;  %v12550_v56 = vld [vmem:[%s13529_s28 + $0x418] ss:$72 sps:$4 sm:$0xff]  }
 0x149   : > { %4692 = vmatmul.mubr.bf16.gmra.mrb[144].mxu1 %v12524_v46  ;;  %4538 = vmatprep.mubr.bf16.mxu0 %v12529_v47  ;;  %v12547_v46 = vld [vmem:[%s13529_s28 + $0x41c] ss:$72 sps:$4 sm:$0xff]  }
 0x14a   : > { %v14019_v0 = vadd.f32 %v10345_v62, %v10233_v59  ;;  %4699 = vmatprep.mubr.bf16.mxu1 %v12531_v58 }
 0x14b   : > { %v10234_v6 = vpop.f32.mrb[40].mxu0 }
 0x14c   : > { %v10346_v10 = vpop.f32.mrb[40].mxu1  ;;  %v10235_v11 = vpop.f32.mrb[41].mxu0 }
 0x14d   : > { %v10236_v12 = vadd.f32 %v10235_v11, %v10234_v6  ;;  %v10347_v13 = vpop.f32.mrb[41].mxu1  ;;  %v10237_v14 = vpop.f32.mrb[42].mxu0 }
 0x14e   : > { %v10348_v15 = vadd.f32 %v10347_v13, %v10346_v10  ;;  %v10349_v16 = vpop.f32.mrb[42].mxu1  ;;  %v10238_v17 = vpop.f32.mrb[43].mxu0  ;;  %v12553_v10 = vld [vmem:[%s13529_s28 + $0x4ac] ss:$72 sps:$4 sm:$0xff]  }
 0x14f   : > { %v10239_v19 = vadd.f32 %v10238_v17, %v10237_v14  ;;  %v10350_v20 = vpop.f32.mrb[43].mxu1 }
 0x150   : > { %v14025_v22 = vadd.f32 %v10348_v15, %v10236_v12  ;;  %v10351_v24 = vadd.f32 %v10350_v20, %v10349_v16  ;;  %4539 = vmatmul.mubr.bf16.gmra.mrb[148].mxu0 %v12533_v1  ;;  %v12555_v16 = vld [vmem:[%s13529_s28 + $0x4a0] ss:$72 sps:$4 sm:$0xff]  }
 0x151   : > { %4700 = vmatmul.mubr.bf16.gmra.mrb[148].mxu1 %v12534_v7  ;;  %4546 = vmatprep.mubr.bf16.mxu0 %v12535_v9 }
 0x152   : > { %v14027_v25 = vadd.f32 %v10351_v24, %v10239_v19  ;;  %4707 = vmatprep.mubr.bf16.mxu1 %v12537_v18  ;;  %v12556_v18 = vld [vmem:[%s13529_s28 + $0x4a8] ss:$72 sps:$4 sm:$0xff]   ;;  %v12561_v19 = vld [vmem:[%s13529_s28 + $0x534] ss:$72 sps:$4 sm:$0xff]  }
 0x153   : > { %v10240_v27 = vpop.f32.mrb[44].mxu0 }
 0x154   : > { %v10352_v30 = vpop.f32.mrb[44].mxu1  ;;  %v10241_v35 = vpop.f32.mrb[45].mxu0 }
 0x155   : > { %v10242_v36 = vadd.f32 %v10241_v35, %v10240_v27  ;;  %v10353_v37 = vpop.f32.mrb[45].mxu1  ;;  %v10243_v39 = vpop.f32.mrb[46].mxu0 }
 0x156   : > { %v10354_v42 = vadd.f32 %v10353_v37, %v10352_v30  ;;  %v10355_v44 = vpop.f32.mrb[46].mxu1  ;;  %v10244_v45 = vpop.f32.mrb[47].mxu0 }
 0x157   : > { %v10245_v47 = vadd.f32 %v10244_v45, %v10243_v39  ;;  %v10356_v48 = vpop.f32.mrb[47].mxu1 }
 0x158   : > { %v14033_v50 = vadd.f32 %v10354_v42, %v10242_v36  ;;  %v10357_v52 = vadd.f32 %v10356_v48, %v10355_v44  ;;  %4547 = vmatmul.mubr.bf16.gmra.mrb[152].mxu0 %v12539_v26  ;;  %v12563_v36 = vld [vmem:[%s13529_s28 + $0x53c] ss:$72 sps:$4 sm:$0xff]   ;;  %v12566_v48 = vld [vmem:[%s13529_s28 + $0x538] ss:$72 sps:$4 sm:$0xff]  }
 0x159   : > { %4708 = vmatmul.mubr.bf16.gmra.mrb[152].mxu1 %v12540_v28  ;;  %4554 = vmatprep.mubr.bf16.mxu0 %v12545_v29 }
 0x15a   : > { %v14035_v53 = vadd.f32 %v10357_v52, %v10245_v47  ;;  %4715 = vmatprep.mubr.bf16.mxu1 %v12547_v46  ;;  %v12565_v47 = vld [vmem:[%s13529_s28 + $0x530] ss:$72 sps:$4 sm:$0xff]  }
 0x15b   : > { %v10246_v55 = vpop.f32.mrb[48].mxu0 }
 0x15c   : > { %v10358_v58 = vpop.f32.mrb[48].mxu1  ;;  %v10247_v59 = vpop.f32.mrb[49].mxu0 }
 0x15d   : > { %v10248_v60 = vadd.f32 %v10247_v59, %v10246_v55  ;;  %v10359_v62 = vpop.f32.mrb[49].mxu1  ;;  %v10249_v1 = vpop.f32.mrb[50].mxu0  ;;  %v12567_v55 = vld [vmem:[%s13529_s28 + $0x5c4] ss:$72 sps:$4 sm:$0xff]  }
 0x15e   : > { %v10360_v6 = vadd.f32 %v10359_v62, %v10358_v58  ;;  %v10361_v7 = vpop.f32.mrb[50].mxu1  ;;  %v10250_v9 = vpop.f32.mrb[51].mxu0 }
 0x15f   : > { %v10251_v11 = vadd.f32 %v10250_v9, %v10249_v1  ;;  %v10362_v12 = vpop.f32.mrb[51].mxu1  ;;  %v12569_v1 = vld [vmem:[%s13529_s28 + $0x5cc] ss:$72 sps:$4 sm:$0xff]  }
 0x160   : > { %v14041_v13 = vadd.f32 %v10360_v6, %v10248_v60  ;;  %v10363_v14 = vadd.f32 %v10362_v12, %v10361_v7  ;;  %4555 = vmatmul.mubr.bf16.gmra.mrb[156].mxu0 %v12549_v54  ;;  %v12571_v12 = vld [vmem:[%s13529_s28 + $0x5c0] ss:$72 sps:$4 sm:$0xff]  }
 0x161   : > { %4716 = vmatmul.mubr.bf16.gmra.mrb[156].mxu1 %v12550_v56  ;;  %4562 = vmatprep.mubr.bf16.mxu0 %v12551_v57 }
 0x162   : > { %v14043_v15 = vadd.f32 %v10363_v14, %v10251_v11  ;;  %4723 = vmatprep.mubr.bf16.mxu1 %v12553_v10 }
 0x163   : > { %v10252_v17 = vpop.f32.mrb[52].mxu0 }
 0x164   : > { %v10364_v20 = vpop.f32.mrb[52].mxu1  ;;  %v10253_v24 = vpop.f32.mrb[53].mxu0 }
 0x165   : > { %v10254_v26 = vadd.f32 %v10253_v24, %v10252_v17  ;;  %v10365_v27 = vpop.f32.mrb[53].mxu1  ;;  %v10255_v28 = vpop.f32.mrb[54].mxu0  ;;  %v12577_v17 = vld [vmem:[%s13529_s28 + $0x654] ss:$72 sps:$4 sm:$0xff]  }
 0x166   : > { %v10366_v29 = vadd.f32 %v10365_v27, %v10364_v20  ;;  %v10367_v30 = vpop.f32.mrb[54].mxu1  ;;  %v10256_v35 = vpop.f32.mrb[55].mxu0 }
 0x167   : > { %v10257_v37 = vadd.f32 %v10256_v35, %v10255_v28  ;;  %v10368_v39 = vpop.f32.mrb[55].mxu1 }
 0x168   : > { %v14049_v42 = vadd.f32 %v10366_v29, %v10254_v26  ;;  %v10369_v44 = vadd.f32 %v10368_v39, %v10367_v30  ;;  %4563 = vmatmul.mubr.bf16.gmra.mrb[160].mxu0 %v12555_v16  ;;  %v12572_v16 = vld [vmem:[%s13529_s28 + $0x5c8] ss:$72 sps:$4 sm:$0xff]   ;;  %v12579_v30 = vld [vmem:[%s13529_s28 + $0x65c] ss:$72 sps:$4 sm:$0xff]  }
 0x169   : > { %4724 = vmatmul.mubr.bf16.gmra.mrb[160].mxu1 %v12556_v18  ;;  %4570 = vmatprep.mubr.bf16.mxu0 %v12561_v19 }
 0x16a   : > { %v14051_v45 = vadd.f32 %v10369_v44, %v10257_v37  ;;  %4731 = vmatprep.mubr.bf16.mxu1 %v12563_v36 }
 0x16b   : > { %v10258_v46 = vpop.f32.mrb[56].mxu0 }
 0x16c   : > { %v10370_v52 = vpop.f32.mrb[56].mxu1  ;;  %v10259_v54 = vpop.f32.mrb[57].mxu0 }
 0x16d   : > { %v10260_v56 = vadd.f32 %v10259_v54, %v10258_v46  ;;  %v10371_v57 = vpop.f32.mrb[57].mxu1  ;;  %v10261_v58 = vpop.f32.mrb[58].mxu0 }
 0x16e   : > { %v10372_v59 = vadd.f32 %v10371_v57, %v10370_v52  ;;  %v10373_v60 = vpop.f32.mrb[58].mxu1  ;;  %v10262_v62 = vpop.f32.mrb[59].mxu0 }
 0x16f   : > { %v10263_v6 = vadd.f32 %v10262_v62, %v10261_v58  ;;  %v10374_v7 = vpop.f32.mrb[59].mxu1 }
 0x170   : > { %v14057_v9 = vadd.f32 %v10372_v59, %v10260_v56  ;;  %v10375_v10 = vadd.f32 %v10374_v7, %v10373_v60  ;;  %4571 = vmatmul.mubr.bf16.gmra.mrb[164].mxu0 %v12565_v47  ;;  %v12581_v47 = vld [vmem:[%s13529_s28 + $0x650] ss:$72 sps:$4 sm:$0xff]  }
 0x171   : > { %4732 = vmatmul.mubr.bf16.gmra.mrb[164].mxu1 %v12566_v48  ;;  %4578 = vmatprep.mubr.bf16.mxu0 %v12567_v55  ;;  %v12582_v48 = vld [vmem:[%s13529_s28 + $0x658] ss:$72 sps:$4 sm:$0xff]   ;;  %v12583_v55 = vld [vmem:[%s13529_s28 + $0x6e4] ss:$72 sps:$4 sm:$0xff]  }
 0x172   : > { %v14059_v11 = vadd.f32 %v10375_v10, %v10263_v6  ;;  %4739 = vmatprep.mubr.bf16.mxu1 %v12569_v1  ;;  %v12585_v1 = vld [vmem:[%s13529_s28 + $0x6ec] ss:$72 sps:$4 sm:$0xff]  }
 0x173   : > { %v10264_v14 = vpop.f32.mrb[60].mxu0 }
 0x174   : > { %v10376_v18 = vpop.f32.mrb[60].mxu1  ;;  %v10265_v19 = vpop.f32.mrb[61].mxu0 }
 0x175   : > { %v10266_v20 = vadd.f32 %v10265_v19, %v10264_v14  ;;  %v10377_v24 = vpop.f32.mrb[61].mxu1  ;;  %v10267_v26 = vpop.f32.mrb[62].mxu0 }
 0x176   : > { %v10378_v27 = vadd.f32 %v10377_v24, %v10376_v18  ;;  %v10379_v28 = vpop.f32.mrb[62].mxu1  ;;  %v10268_v29 = vpop.f32.mrb[63].mxu0  ;;  %v12593_v24 = vld [vmem:[%s13529_s28 + $0x774] ss:$72 sps:$4 sm:$0xff]  }
 0x177   : > { %v10269_v35 = vadd.f32 %v10268_v29, %v10267_v26  ;;  %v10380_v36 = vpop.f32.mrb[63].mxu1 }
 0x178   : > { %v14065_v37 = vadd.f32 %v10378_v27, %v10266_v20  ;;  %v10381_v39 = vadd.f32 %v10380_v36, %v10379_v28  ;;  %4579 = vmatmul.mubr.bf16.gmra.mrb[168].mxu0 %v12571_v12  ;;  %v12588_v20 = vld [vmem:[%s13529_s28 + $0x6e8] ss:$72 sps:$4 sm:$0xff]   ;;  %v12595_v36 = vld [vmem:[%s13529_s28 + $0x77c] ss:$72 sps:$4 sm:$0xff]  }
 0x179   : > { %4740 = vmatmul.mubr.bf16.gmra.mrb[168].mxu1 %v12572_v16  ;;  %4586 = vmatprep.mubr.bf16.mxu0 %v12577_v17  ;;  %v12587_v17 = vld [vmem:[%s13529_s28 + $0x6e0] ss:$72 sps:$4 sm:$0xff]  }
 0x17a   : > { %v14067_v44 = vadd.f32 %v10381_v39, %v10269_v35  ;;  %4747 = vmatprep.mubr.bf16.mxu1 %v12579_v30 }
 0x17b   : > { %v10398_v46 = vpop.f32.mrb[64].mxu0 }
 0x17c   : > { %v10510_v52 = vpop.f32.mrb[64].mxu1  ;;  %v10399_v54 = vpop.f32.mrb[65].mxu0 }
 0x17d   : > { %v10400_v56 = vadd.f32 %v10399_v54, %v10398_v46  ;;  %v10511_v57 = vpop.f32.mrb[65].mxu1  ;;  %v10401_v58 = vpop.f32.mrb[66].mxu0 }
 0x17e   : > { %v10512_v59 = vadd.f32 %v10511_v57, %v10510_v52  ;;  %v10513_v60 = vpop.f32.mrb[66].mxu1  ;;  %v10402_v62 = vpop.f32.mrb[67].mxu0  ;;  %v12597_v57 = vld [vmem:[%s13529_s28 + $0x770] ss:$72 sps:$4 sm:$0xff]  }
 0x17f   : > { %v4179_v6 = vadd.f32 %v10400_v56, %v13849_v31  ;;  %v10403_v7 = vadd.f32 %v10402_v62, %v10401_v58  ;;  %v10514_v10 = vpop.f32.mrb[67].mxu1  ;;  %v12598_v58 = vld [vmem:[%s13529_s28 + $0x778] ss:$72 sps:$4 sm:$0xff]  }
 0x180   : > { %v10515_v12 = vadd.f32 %v10514_v10, %v10513_v60  ;;  %4587 = vmatmul.mubr.bf16.gmra.mrb[172].mxu0 %v12581_v47  ;;  %v12599_v60 = vld [vmem:[%s13529_s28 + $0x804] ss:$72 sps:$4 sm:$0xff]  }
 0x181   : > { %v14074_v14 = vadd.f32 %v10512_v59, %v4179_v6  ;;  %v4182_v16 = vadd.f32 %v10403_v7, %v13851_v33  ;;  %4748 = vmatmul.mubr.bf16.gmra.mrb[172].mxu1 %v12582_v48  ;;  %4594 = vmatprep.mubr.bf16.mxu0 %v12583_v55 }
 0x182   : > { %4755 = vmatprep.mubr.bf16.mxu1 %v12585_v1 }
 0x183   : > { %v14078_v18 = vadd.f32 %v10515_v12, %v4182_v16  ;;  %v10404_v19 = vpop.f32.mrb[68].mxu0  ;;  %v12601_v12 = vld [vmem:[%s13529_s28 + $0x80c] ss:$72 sps:$4 sm:$0xff]  }
 0x184   : > { %v10516_v26 = vpop.f32.mrb[68].mxu1  ;;  %v10405_v31 = vpop.f32.mrb[69].mxu0 }
 0x185   : > { %v10406_v27 = vadd.f32 %v10405_v31, %v10404_v19  ;;  %v10517_v28 = vpop.f32.mrb[69].mxu1  ;;  %v10407_v29 = vpop.f32.mrb[70].mxu0  ;;  %v12603_v31 = vld [vmem:[%s13529_s28 + $0x800] ss:$72 sps:$4 sm:$0xff]  }
 0x186   : > { %v10518_v30 = vadd.f32 %v10517_v28, %v10516_v26  ;;  %v10519_v35 = vpop.f32.mrb[70].mxu1  ;;  %v10408_v33 = vpop.f32.mrb[71].mxu0 }
 0x187   : > { %v4187_v39 = vadd.f32 %v10406_v27, %v13857_v49  ;;  %v10409_v46 = vadd.f32 %v10408_v33, %v10407_v29  ;;  %v10520_v47 = vpop.f32.mrb[71].mxu1  ;;  %v12604_v29 = vld [vmem:[%s13529_s28 + $0x808] ss:$72 sps:$4 sm:$0xff]  }
 0x188   : > { %v10521_v48 = vadd.f32 %v10520_v47, %v10519_v35  ;;  %4595 = vmatmul.mubr.bf16.gmra.mrb[176].mxu0 %v12587_v17 }
 0x189   : > { %v14084_v52 = vadd.f32 %v10518_v30, %v4187_v39  ;;  %v4190_v54 = vadd.f32 %v10409_v46, %v13859_v51  ;;  %4756 = vmatmul.mubr.bf16.gmra.mrb[176].mxu1 %v12588_v20  ;;  %4602 = vmatprep.mubr.bf16.mxu0 %v12593_v24  ;;  %v12609_v30 = vld [vmem:[%s13529_s28 + $0x894] ss:$72 sps:$4 sm:$0xff]  }
 0x18a   : > { %4763 = vmatprep.mubr.bf16.mxu1 %v12595_v36 }
 0x18b   : > { %v14087_v55 = vadd.f32 %v10521_v48, %v4190_v54  ;;  %v10410_v56 = vpop.f32.mrb[72].mxu0  ;;  %v12611_v48 = vld [vmem:[%s13529_s28 + $0x89c] ss:$72 sps:$4 sm:$0xff]  }
 0x18c   : > { %v10522_v59 = vpop.f32.mrb[72].mxu1  ;;  %v10411_v49 = vpop.f32.mrb[73].mxu0 }
 0x18d   : > { %v10412_v62 = vadd.f32 %v10411_v49, %v10410_v56  ;;  %v10523_v1 = vpop.f32.mrb[73].mxu1  ;;  %v10413_v6 = vpop.f32.mrb[74].mxu0 }
 0x18e   : > { %v10524_v7 = vadd.f32 %v10523_v1, %v10522_v59  ;;  %v10525_v10 = vpop.f32.mrb[74].mxu1  ;;  %v10414_v51 = vpop.f32.mrb[75].mxu0  ;;  %v12613_v1 = vld [vmem:[%s13529_s28 + $0x890] ss:$72 sps:$4 sm:$0xff]  }
 0x18f   : > { %v4195_v16 = vadd.f32 %v10412_v62, %v13865_v3  ;;  %v10415_v17 = vadd.f32 %v10414_v51, %v10413_v6  ;;  %v10526_v19 = vpop.f32.mrb[75].mxu1  ;;  %v12614_v6 = vld [vmem:[%s13529_s28 + $0x898] ss:$72 sps:$4 sm:$0xff]  }
 0x190   : > { %v10527_v20 = vadd.f32 %v10526_v19, %v10525_v10  ;;  %4603 = vmatmul.mubr.bf16.gmra.mrb[180].mxu0 %v12597_v57  ;;  %v12617_v10 = vld [vmem:[%s13529_s28 + $0x34] ss:$72 sps:$4 sm:$0xff]  }
 0x191   : > { %v14094_v24 = vadd.f32 %v10524_v7, %v4195_v16  ;;  %v4198_v26 = vadd.f32 %v10415_v17, %v13867_v5  ;;  %4764 = vmatmul.mubr.bf16.gmra.mrb[180].mxu1 %v12598_v58  ;;  %4610 = vmatprep.mubr.bf16.mxu0 %v12599_v60 }
 0x192   : > { %4771 = vmatprep.mubr.bf16.mxu1 %v12601_v12 }
 0x193   : > { %v14098_v27 = vadd.f32 %v10527_v20, %v4198_v26  ;;  %v10416_v28 = vpop.f32.mrb[76].mxu0  ;;  %v12620_v20 = vld [vmem:[%s13529_s28 + $0x3c] ss:$72 sps:$4 sm:$0xff]  }
 0x194   : > { %v10528_v35 = vpop.f32.mrb[76].mxu1  ;;  %v10417_v3 = vpop.f32.mrb[77].mxu0 }
 0x195   : > { %v10418_v33 = vadd.f32 %v10417_v3, %v10416_v28  ;;  %v10529_v36 = vpop.f32.mrb[77].mxu1  ;;  %v10419_v39 = vpop.f32.mrb[78].mxu0  ;;  %v12615_v3 = vld [vmem:[%s13529_s28 + $0x30] ss:$72 sps:$4 sm:$0xff]  }
 0x196   : > { %v10530_v46 = vadd.f32 %v10529_v36, %v10528_v35  ;;  %v10531_v47 = vpop.f32.mrb[78].mxu1  ;;  %v10420_v5 = vpop.f32.mrb[79].mxu0 }
 0x197   : > { %v4203_v54 = vadd.f32 %v10418_v33, %v13873_v21  ;;  %v10421_v56 = vadd.f32 %v10420_v5, %v10419_v39  ;;  %v10532_v57 = vpop.f32.mrb[79].mxu1  ;;  %v12618_v39 = vld [vmem:[%s13529_s28 + $0x38] ss:$72 sps:$4 sm:$0xff]   ;;  %v12625_v5 = vld [vmem:[%s13529_s28 + $0xc4] ss:$72 sps:$4 sm:$0xff]  }
 0x198   : > { %v10533_v58 = vadd.f32 %v10532_v57, %v10531_v47  ;;  %4611 = vmatmul.mubr.bf16.gmra.mrb[184].mxu0 %v12603_v31  ;;  %v12627_v57 = vld [vmem:[%s13529_s28 + $0xcc] ss:$72 sps:$4 sm:$0xff]  }
 0x199   : > { %v14104_v59 = vadd.f32 %v10530_v46, %v4203_v54  ;;  %v4206_v49 = vadd.f32 %v10421_v56, %v13875_v23  ;;  %4772 = vmatmul.mubr.bf16.gmra.mrb[184].mxu1 %v12604_v29  ;;  %4618 = vmatprep.mubr.bf16.mxu0 %v12609_v30 }
 0x19a   : > { %4779 = vmatprep.mubr.bf16.mxu1 %v12611_v48 }
 0x19b   : > { %v14107_v60 = vadd.f32 %v10533_v58, %v4206_v49  ;;  %v10422_v62 = vpop.f32.mrb[80].mxu0 }
 0x19c   : > { %v10534_v7 = vpop.f32.mrb[80].mxu1  ;;  %v10423_v21 = vpop.f32.mrb[81].mxu0 }
 0x19d   : > { %v10424_v51 = vadd.f32 %v10423_v21, %v10422_v62  ;;  %v10535_v12 = vpop.f32.mrb[81].mxu1  ;;  %v10425_v16 = vpop.f32.mrb[82].mxu0 }
 0x19e   : > { %v10536_v17 = vadd.f32 %v10535_v12, %v10534_v7  ;;  %v10537_v19 = vpop.f32.mrb[82].mxu1  ;;  %v10426_v23 = vpop.f32.mrb[83].mxu0 }
 0x19f   : > { %v4211_v26 = vadd.f32 %v10424_v51, %v13881_v41  ;;  %v10427_v31 = vadd.f32 %v10426_v23, %v10425_v16  ;;  %v10538_v28 = vpop.f32.mrb[83].mxu1  ;;  %v12622_v41 = vld [vmem:[%s15780_s3 + $0x400] sm:$0xff]   ;;  %v12639_v51 = vld [vmem:[%s15778_s1 + $0x48] sm:$0xff]  }
 0x1a0   : > { %v10539_v29 = vadd.f32 %v10538_v28, %v10537_v19  ;;  %4619 = vmatmul.mubr.bf16.gmra.mrb[188].mxu0 %v12613_v1  ;;  %v12637_v1 = vld [vmem:[%s15780_s3 + $0x448] sm:$0xff]   ;;  %v12655_v28 = vld [vmem:[%s15778_s1 + $0x50] sm:$0xff]  }
 0x1a1   : > { %v14114_v30 = vadd.f32 %v10536_v17, %v4211_v26  ;;  %v4214_v35 = vadd.f32 %v10427_v31, %v13883_v43  ;;  %4780 = vmatmul.mubr.bf16.gmra.mrb[188].mxu1 %v12614_v6  ;;  %4820 = vmatprep.mubr.bf16.mxu0 %v12617_v10  ;;  %v12624_v43 = vld [vmem:[%s15778_s1] sm:$0xff]   ;;  %v12638_v10 = vld [vmem:[%s15780_s3 + $0x408] sm:$0xff]  }
 0x1a2   : > { %4981 = vmatprep.mubr.bf16.mxu1 %v12620_v20  ;;  %v12640_v16 = vld [vmem:[%s15778_s1 + $0x8] sm:$0xff]  }
 0x1a3   : > { %v14118_v33 = vadd.f32 %v10539_v29, %v4214_v35  ;;  %v10428_v36 = vpop.f32.mrb[84].mxu0  ;;  %v12629_v26 = vld [vmem:[%s13529_s28 + $0xc0] ss:$72 sps:$4 sm:$0xff]  }
 0x1a4   : > { %v10540_v46 = vpop.f32.mrb[84].mxu1  ;;  %v10429_v47 = vpop.f32.mrb[85].mxu0  ;;  %v12630_v31 = vld [vmem:[%s13529_s28 + $0xc8] ss:$72 sps:$4 sm:$0xff]  }
 0x1a5   : > { %v10430_v48 = vadd.f32 %v10429_v47, %v10428_v36  ;;  %v10541_v54 = vpop.f32.mrb[85].mxu1  ;;  %v10431_v56 = vpop.f32.mrb[86].mxu0 }
 0x1a6   : > { %v10542_v58 = vadd.f32 %v10541_v54, %v10540_v46  ;;  %v10543_v49 = vpop.f32.mrb[86].mxu1  ;;  %v10432_v62 = vpop.f32.mrb[87].mxu0 }
 0x1a7   : > { %v4219_v6 = vadd.f32 %v10430_v48, %v13904_v2  ;;  %v10433_v7 = vadd.f32 %v10432_v62, %v10431_v56  ;;  %v10544_v21 = vpop.f32.mrb[87].mxu1  ;;  %v12653_v2 = vld [vmem:[%s15780_s3 + $0x450] sm:$0xff]  }
 0x1a8   : > { %v10545_v12 = vadd.f32 %v10544_v21, %v10543_v49  ;;  %4821 = vmatmul.mubr.bf16.vlgmr.msra.gmra.mrb[192].mxu0 %v12615_v3  ;;  %v12631_v3 = vld [vmem:[%s13529_s28 + $0x154] ss:$72 sps:$4 sm:$0xff]   ;;  %v12685_v21 = vld [vmem:[%s15780_s3 + $0x460] sm:$0xff]  }
 0x1a9   : > { %v14152_v17 = vadd.f32 %v10542_v58, %v4219_v6  ;;  %v4222_v19 = vadd.f32 %v10433_v7, %v13912_v8  ;;  %4982 = vmatmul.mubr.bf16.vlgmr.msra.gmra.mrb[192].mxu1 %v12618_v39  ;;  %11055 = vmatpush3.bf16.msra.mxu0 %v12622_v41  ;;  %v12656_v48 = vld [vmem:[%s15778_s1 + $0x10] sm:$0xff]   ;;  %v12669_v58 = vld [vmem:[%s15780_s3 + $0x458] sm:$0xff]  }
 0x1aa   : > { %11167 = vmatpush3.bf16.msra.mxu1 %v12624_v43  ;;  %4828 = vmatprep.mubr.bf16.mxu0 %v12625_v5  ;;  %v12633_v43 = vld [vmem:[%s13529_s28 + $0x15c] ss:$72 sps:$4 sm:$0xff]   ;;  %v12654_v5 = vld [vmem:[%s15780_s3 + $0x410] sm:$0xff]  }
 0x1ab   : > { %v14155_v23 = vadd.f32 %v10545_v12, %v4222_v19  ;;  %v10434_v20 = vpop.f32.mrb[88].mxu0  ;;  %4989 = vmatprep.mubr.bf16.mxu1 %v12627_v57  ;;  %11056 = vmatprep.subr.bf16.mxu0 %v12637_v1  ;;  %v12671_v49 = vld [vmem:[%s15778_s1 + $0x58] sm:$0xff]  }
 0x1ac   : > { %v10546_v29 = vpop.f32.mrb[88].mxu1  ;;  %v10435_v35 = vpop.f32.mrb[89].mxu0  ;;  %11168 = vmatprep.subr.bf16.mxu1 %v12639_v51  ;;  %v12672_v7 = vld [vmem:[%s15778_s1 + $0x18] sm:$0xff]   ;;  %v12687_v51 = vld [vmem:[%s15778_s1 + $0x60] sm:$0xff]  }
 0x1ad   : > { %v10436_v8 = vadd.f32 %v10435_v35, %v10434_v20  ;;  %v10547_v36 = vpop.f32.mrb[89].mxu1  ;;  %v10437_v39 = vpop.f32.mrb[90].mxu0  ;;  %11057 = vmatpush3.bf16.msra.mxu0 %v12638_v10  ;;  %v12635_v10 = vld [vmem:[%s13529_s28 + $0x150] ss:$72 sps:$4 sm:$0xff]  }
 0x1ae   : > { %v10548_v41 = vadd.f32 %v10547_v36, %v10546_v29  ;;  %v10549_v46 = vpop.f32.mrb[90].mxu1  ;;  %v10438_v47 = vpop.f32.mrb[91].mxu0  ;;  %11169 = vmatpush3.bf16.msra.mxu1 %v12640_v16  ;;  %11058 = vmatprep.subr.bf16.mxu0 %v12653_v2  ;;  %v12636_v16 = vld [vmem:[%s13529_s28 + $0x158] ss:$72 sps:$4 sm:$0xff]   ;;  %v12641_v2 = vld [vmem:[%s13529_s28 + $0x1e4] ss:$72 sps:$4 sm:$0xff]  }
 0x1af   : > { %v4227_v54 = vadd.f32 %v10436_v8, %v13933_v32  ;;  %v10439_v56 = vadd.f32 %v10438_v47, %v10437_v39  ;;  %v10550_v57 = vpop.f32.mrb[91].mxu1  ;;  %11170 = vmatprep.subr.bf16.mxu1 %v12655_v28  ;;  %v12670_v32 = vld [vmem:[%s15780_s3 + $0x418] sm:$0xff]   ;;  %v12643_v8 = vld [vmem:[%s13529_s28 + $0x1ec] ss:$72 sps:$4 sm:$0xff]   ;;  %v12686_v36 = vld [vmem:[%s15780_s3 + $0x420] sm:$0xff]  }
 0x1b0   : > { %v10551_v62 = vadd.f32 %v10550_v57, %v10549_v46  ;;  %4829 = vmatmul.mubr.bf16.gmra.mrb[196].mxu0 %v12629_v26  ;;  %v12688_v39 = vld [vmem:[%s15778_s1 + $0x20] sm:$0xff]  }
 0x1b1   : > { %v14180_v1 = vadd.f32 %v10548_v41, %v4227_v54  ;;  %v4230_v6 = vadd.f32 %v10439_v56, %v13944_v38  ;;  %4990 = vmatmul.mubr.bf16.gmra.mrb[196].mxu1 %v12630_v31  ;;  %4836 = vmatprep.mubr.bf16.mxu0 %v12631_v3  ;;  %v12645_v57 = vld [vmem:[%s13529_s28 + $0x1e0] ss:$72 sps:$4 sm:$0xff]  }
 0x1b2   : > { %4997 = vmatprep.mubr.bf16.mxu1 %v12633_v43  ;;  %11059 = vmatpush3.bf16.msra.mxu0 %v12654_v5  ;;  %v12701_v43 = vld [vmem:[%s15780_s3 + $0x468] sm:$0xff]  }
 0x1b3   : > { %v14193_v12 = vadd.f32 %v10551_v62, %v4230_v6  ;;  %v10440_v38 = vpop.f32.mrb[92].mxu0  ;;  %11171 = vmatpush3.bf16.msra.mxu1 %v12656_v48  ;;  %11060 = vmatprep.subr.bf16.mxu0 %v12669_v58  ;;  %v12703_v5 = vld [vmem:[%s15778_s1 + $0x68] sm:$0xff]  }
 0x1b4   : > { %v10552_v19 = vpop.f32.mrb[92].mxu1  ;;  %v10441_v20 = vpop.f32.mrb[93].mxu0  ;;  %11172 = vmatprep.subr.bf16.mxu1 %v12671_v49  ;;  %v12646_v62 = vld [vmem:[%s13529_s28 + $0x1e8] ss:$72 sps:$4 sm:$0xff]  }
 0x1b5   : > { %v10442_v26 = vadd.f32 %v10441_v20, %v10440_v38  ;;  %v10553_v31 = vpop.f32.mrb[93].mxu1  ;;  %v10443_v28 = vpop.f32.mrb[94].mxu0  ;;  %v12704_v6 = vld [vmem:[%s15778_s1 + $0x28] sm:$0xff]  }
 0x1b6   : > { %v10554_v29 = vadd.f32 %v10553_v31, %v10552_v19  ;;  %v10555_v35 = vpop.f32.mrb[94].mxu1  ;;  %v10444_v3 = vpop.f32.mrb[95].mxu0  ;;  %11061 = vmatpush3.bf16.msra.mxu0 %v12670_v32  ;;  %v12647_v32 = vld [vmem:[%s13529_s28 + $0x274] ss:$72 sps:$4 sm:$0xff]  }
 0x1b7   : > { %v4235_v41 = vadd.f32 %v10442_v26, %v13965_v63  ;;  %v10445_v46 = vadd.f32 %v10444_v3, %v10443_v28  ;;  %v10556_v47 = vpop.f32.mrb[95].mxu1  ;;  %11173 = vmatpush3.bf16.msra.mxu1 %v12672_v7  ;;  %11062 = vmatprep.subr.bf16.mxu0 %v12685_v21  ;;  %v12702_v63 = vld [vmem:[%s15780_s3 + $0x428] sm:$0xff]   ;;  %v12649_v26 = vld [vmem:[%s13529_s28 + $0x27c] ss:$72 sps:$4 sm:$0xff]   ;;  %v12718_v31 = vld [vmem:[%s15780_s3 + $0x430] sm:$0xff]  }
 0x1b8   : > { %v10557_v48 = vadd.f32 %v10556_v47, %v10555_v35  ;;  %4837 = vmatmul.mubr.bf16.gmra.mrb[200].mxu0 %v12635_v10  ;;  %11174 = vmatprep.subr.bf16.mxu1 %v12687_v51  ;;  %v12719_v10 = vld [vmem:[%s15778_s1 + $0x70] sm:$0xff]   ;;  %v12736_v47 = vld [vmem:[%s15778_s1 + $0x38] sm:$0xff]  }
 0x1b9   : > { %v14214_v54 = vadd.f32 %v10554_v29, %v4235_v41  ;;  %v4238_v56 = vadd.f32 %v10445_v46, %v13970_v4  ;;  %4998 = vmatmul.mubr.bf16.gmra.mrb[200].mxu1 %v12636_v16  ;;  %4844 = vmatprep.mubr.bf16.mxu0 %v12641_v2  ;;  %v12717_v4 = vld [vmem:[%s15780_s3 + $0x470] sm:$0xff]  }
 0x1ba   : > { %5005 = vmatprep.mubr.bf16.mxu1 %v12643_v8  ;;  %11063 = vmatpush3.bf16.msra.mxu0 %v12686_v36  ;;  %v12720_v28 = vld [vmem:[%s15778_s1 + $0x30] sm:$0xff]   ;;  %v12733_v8 = vld [vmem:[%s15780_s3 + $0x478] sm:$0xff]  }
 0x1bb   : > { %v14218_v58 = vadd.f32 %v10557_v48, %v4238_v56  ;;  %v10446_v49 = vpop.f32.mrb[96].mxu0  ;;  %11175 = vmatpush3.bf16.msra.mxu1 %v12688_v39  ;;  %11064 = vmatprep.subr.bf16.mxu0 %v12701_v43  ;;  %v12735_v36 = vld [vmem:[%s15778_s1 + $0x78] sm:$0xff]   ;;  %v12749_v43 = vld [vmem:[%s15778_s1 + $0xc0] sm:$0xff]  }
 0x1bc   : > { %v10558_v7 = vpop.f32.mrb[96].mxu1  ;;  %v10447_v21 = vpop.f32.mrb[97].mxu0  ;;  %11176 = vmatprep.subr.bf16.mxu1 %v12703_v5  ;;  %v12651_v5 = vld [vmem:[%s13529_s28 + $0x270] ss:$72 sps:$4 sm:$0xff]   ;;  %v12751_v48 = vld [vmem:[%s15778_s1 + $0x140] sm:$0xff]  }
 0x1bd   : > { %v10448_v51 = vadd.f32 %v10447_v21, %v10446_v49  ;;  %v10559_v38 = vpop.f32.mrb[97].mxu1  ;;  %v10449_v16 = vpop.f32.mrb[98].mxu0  ;;  %v12652_v56 = vld [vmem:[%s13529_s28 + $0x278] ss:$72 sps:$4 sm:$0xff]  }
 0x1be   : > { %v10560_v2 = vadd.f32 %v10559_v38, %v10558_v7  ;;  %v10561_v19 = vpop.f32.mrb[98].mxu1  ;;  %v10450_v20 = vpop.f32.mrb[99].mxu0  ;;  %11065 = vmatpush3.bf16.msra.mxu0 %v12702_v63 }
 0x1bf   : > { %v4243_v29 = vadd.f32 %v10448_v51, %v13997_v34  ;;  %v10451_v35 = vadd.f32 %v10450_v20, %v10449_v16  ;;  %v10562_v3 = vpop.f32.mrb[99].mxu1  ;;  %11177 = vmatpush3.bf16.msra.mxu1 %v12704_v6  ;;  %11066 = vmatprep.subr.bf16.mxu0 %v12717_v4  ;;  %v12734_v34 = vld [vmem:[%s15780_s3 + $0x438] sm:$0xff]   ;;  %v12659_v51 = vld [vmem:[%s13529_s28 + $0x30c] ss:$72 sps:$4 sm:$0xff]  }
 0x1c0   : > { %v10563_v39 = vadd.f32 %v10562_v3, %v10561_v19  ;;  %4845 = vmatmul.mubr.bf16.gmra.mrb[204].mxu0 %v12645_v57  ;;  %11178 = vmatprep.subr.bf16.mxu1 %v12719_v10  ;;  %v12657_v57 = vld [vmem:[%s13529_s28 + $0x304] ss:$72 sps:$4 sm:$0xff]  }
 0x1c1   : > { %v14248_v41 = vadd.f32 %v10560_v2, %v4243_v29  ;;  %v4246_v46 = vadd.f32 %v10451_v35, %v14008_v40  ;;  %5006 = vmatmul.mubr.bf16.gmra.mrb[204].mxu1 %v12646_v62  ;;  %4852 = vmatprep.mubr.bf16.mxu0 %v12647_v32  ;;  %v12662_v29 = vld [vmem:[%s13529_s28 + $0x308] ss:$72 sps:$4 sm:$0xff]  }
 0x1c2   : > { %5013 = vmatprep.mubr.bf16.mxu1 %v12649_v26  ;;  %11067 = vmatpush3.bf16.msra.mxu0 %v12718_v31 }
 0x1c3   : > { %v14261_v63 = vadd.f32 %v10563_v39, %v4246_v46  ;;  %v10452_v40 = vpop.f32.mrb[100].mxu0  ;;  %11179 = vmatpush3.bf16.msra.mxu1 %v12720_v28  ;;  %11068 = vmatprep.subr.bf16.mxu0 %v12733_v8  ;;  %v12661_v28 = vld [vmem:[%s13529_s28 + $0x300] ss:$72 sps:$4 sm:$0xff]   ;;  %v12663_v8 = vld [vmem:[%s13529_s28 + $0x394] ss:$72 sps:$4 sm:$0xff]  }
 0x1c4   : > { %v10564_v49 = vpop.f32.mrb[100].mxu1  ;;  %v10453_v62 = vpop.f32.mrb[101].mxu0  ;;  %11180 = vmatprep.subr.bf16.mxu1 %v12735_v36 }
 0x1c5   : > { %v10454_v32 = vadd.f32 %v10453_v62, %v10452_v40  ;;  %v10565_v6 = vpop.f32.mrb[101].mxu1  ;;  %v10455_v4 = vpop.f32.mrb[102].mxu0  ;;  %v12667_v62 = vld [vmem:[%s13529_s28 + $0x390] ss:$72 sps:$4 sm:$0xff]  }
 0x1c6   : > { %v10566_v7 = vadd.f32 %v10565_v6, %v10564_v49  ;;  %v10567_v21 = vpop.f32.mrb[102].mxu1  ;;  %v10456_v10 = vpop.f32.mrb[103].mxu0  ;;  %11069 = vmatpush3.bf16.msra.mxu0 %v12734_v34 }
 0x1c7   : > { %v4251_v38 = vadd.f32 %v10454_v32, %v14017_v61  ;;  %v10457_v16 = vadd.f32 %v10456_v10, %v10455_v4  ;;  %v10568_v2 = vpop.f32.mrb[103].mxu1  ;;  %11181 = vmatpush3.bf16.msra.mxu1 %v12736_v47  ;;  %11278 = vmatprep.subr.bf16.mxu0 %v12749_v43  ;;  %v12665_v43 = vld [vmem:[%s13529_s28 + $0x39c] ss:$72 sps:$4 sm:$0xff]   ;;  %v12668_v4 = vld [vmem:[%s13529_s28 + $0x398] ss:$72 sps:$4 sm:$0xff]  }
 0x1c8   : > { %v10569_v19 = vadd.f32 %v10568_v2, %v10567_v21  ;;  %4853 = vmatmul.mubr.bf16.gmra.mrb[208].mxu0 %v12651_v5  ;;  %11390 = vmatprep.subr.bf16.mxu1 %v12751_v48 }
 0x1c9   : > { %v14267_v20 = vadd.f32 %v10566_v7, %v4251_v38  ;;  %v4254_v26 = vadd.f32 %v10457_v16, %v14019_v0  ;;  %5014 = vmatmul.mubr.bf16.gmra.mrb[208].mxu1 %v12652_v56  ;;  %4860 = vmatprep.mubr.bf16.mxu0 %v12657_v57  ;;  %v12673_v7 = vld [vmem:[%s13529_s28 + $0x424] ss:$72 sps:$4 sm:$0xff]  }
 0x1ca   : > { %5021 = vmatprep.mubr.bf16.mxu1 %v12659_v51 }
 0x1cb   : > { %v14270_v31 = vadd.f32 %v10569_v19, %v4254_v26  ;;  %v10458_v61 = vpop.f32.mrb[104].mxu0  ;;  %v12675_v19 = vld [vmem:[%s13529_s28 + $0x42c] ss:$72 sps:$4 sm:$0xff]  }
 0x1cc   : > { %v10570_v35 = vpop.f32.mrb[104].mxu1  ;;  %v10459_v3 = vpop.f32.mrb[105].mxu0 }
 0x1cd   : > { %v10460_v36 = vadd.f32 %v10459_v3, %v10458_v61  ;;  %v10571_v39 = vpop.f32.mrb[105].mxu1  ;;  %v10461_v34 = vpop.f32.mrb[106].mxu0 }
 0x1ce   : > { %v10572_v46 = vadd.f32 %v10571_v39, %v10570_v35  ;;  %v10573_v47 = vpop.f32.mrb[106].mxu1  ;;  %v10462_v0 = vpop.f32.mrb[107].mxu0  ;;  %v12677_v39 = vld [vmem:[%s13529_s28 + $0x420] ss:$72 sps:$4 sm:$0xff]  }
 0x1cf   : > { %v4259_v5 = vadd.f32 %v10460_v36, %v14025_v22  ;;  %v10463_v48 = vadd.f32 %v10462_v0, %v10461_v34  ;;  %v10574_v40 = vpop.f32.mrb[107].mxu1  ;;  %v12678_v34 = vld [vmem:[%s13529_s28 + $0x428] ss:$72 sps:$4 sm:$0xff]  }
 0x1d0   : > { %v10575_v56 = vadd.f32 %v10574_v40, %v10573_v47  ;;  %4861 = vmatmul.mubr.bf16.gmra.mrb[212].mxu0 %v12661_v28  ;;  %v12679_v47 = vld [vmem:[%s13529_s28 + $0x4b4] ss:$72 sps:$4 sm:$0xff]  }
 0x1d1   : > { %v14277_v57 = vadd.f32 %v10572_v46, %v4259_v5  ;;  %v4262_v49 = vadd.f32 %v10463_v48, %v14027_v25  ;;  %5022 = vmatmul.mubr.bf16.gmra.mrb[212].mxu1 %v12662_v29  ;;  %4868 = vmatprep.mubr.bf16.mxu0 %v12663_v8 }
 0x1d2   : > { %5029 = vmatprep.mubr.bf16.mxu1 %v12665_v43 }
 0x1d3   : > { %v14281_v32 = vadd.f32 %v10575_v56, %v4262_v49  ;;  %v10464_v6 = vpop.f32.mrb[108].mxu0  ;;  %v12681_v56 = vld [vmem:[%s13529_s28 + $0x4bc] ss:$72 sps:$4 sm:$0xff]  }
 0x1d4   : > { %v10576_v21 = vpop.f32.mrb[108].mxu1  ;;  %v10465_v22 = vpop.f32.mrb[109].mxu0 }
 0x1d5   : > { %v10466_v10 = vadd.f32 %v10465_v22, %v10464_v6  ;;  %v10577_v51 = vpop.f32.mrb[109].mxu1  ;;  %v10467_v38 = vpop.f32.mrb[110].mxu0  ;;  %v12683_v22 = vld [vmem:[%s13529_s28 + $0x4b0] ss:$72 sps:$4 sm:$0xff]  }
 0x1d6   : > { %v10578_v16 = vadd.f32 %v10577_v51, %v10576_v21  ;;  %v10579_v2 = vpop.f32.mrb[110].mxu1  ;;  %v10468_v25 = vpop.f32.mrb[111].mxu0 }
 0x1d7   : > { %v4267_v26 = vadd.f32 %v10466_v10, %v14033_v50  ;;  %v10469_v61 = vadd.f32 %v10468_v25, %v10467_v38  ;;  %v10580_v28 = vpop.f32.mrb[111].mxu1  ;;  %v12684_v38 = vld [vmem:[%s13529_s28 + $0x4b8] ss:$72 sps:$4 sm:$0xff]  }
 0x1d8   : > { %v10581_v29 = vadd.f32 %v10580_v28, %v10579_v2  ;;  %4869 = vmatmul.mubr.bf16.gmra.mrb[216].mxu0 %v12667_v62 }
 0x1d9   : > { %v14287_v35 = vadd.f32 %v10578_v16, %v4267_v26  ;;  %v4270_v3 = vadd.f32 %v10469_v61, %v14035_v53  ;;  %5030 = vmatmul.mubr.bf16.gmra.mrb[216].mxu1 %v12668_v4  ;;  %4876 = vmatprep.mubr.bf16.mxu0 %v12673_v7  ;;  %v12689_v16 = vld [vmem:[%s13529_s28 + $0x544] ss:$72 sps:$4 sm:$0xff]  }
 0x1da   : > { %5037 = vmatprep.mubr.bf16.mxu1 %v12675_v19 }
 0x1db   : > { %v14290_v8 = vadd.f32 %v10581_v29, %v4270_v3  ;;  %v10470_v36 = vpop.f32.mrb[112].mxu0  ;;  %v12691_v29 = vld [vmem:[%s13529_s28 + $0x54c] ss:$72 sps:$4 sm:$0xff]  }
 0x1dc   : > { %v10582_v46 = vpop.f32.mrb[112].mxu1  ;;  %v10471_v50 = vpop.f32.mrb[113].mxu0 }
 0x1dd   : > { %v10472_v0 = vadd.f32 %v10471_v50, %v10470_v36  ;;  %v10583_v43 = vpop.f32.mrb[113].mxu1  ;;  %v10473_v5 = vpop.f32.mrb[114].mxu0 }
 0x1de   : > { %v10584_v48 = vadd.f32 %v10583_v43, %v10582_v46  ;;  %v10585_v40 = vpop.f32.mrb[114].mxu1  ;;  %v10474_v53 = vpop.f32.mrb[115].mxu0 }
 0x1df   : > { %v4275_v49 = vadd.f32 %v10472_v0, %v14041_v13  ;;  %v10475_v62 = vadd.f32 %v10474_v53, %v10473_v5  ;;  %v10586_v6 = vpop.f32.mrb[115].mxu1  ;;  %v12694_v5 = vld [vmem:[%s13529_s28 + $0x548] ss:$72 sps:$4 sm:$0xff]  }
 0x1e0   : > { %v10587_v4 = vadd.f32 %v10586_v6, %v10585_v40  ;;  %4877 = vmatmul.mubr.bf16.gmra.mrb[220].mxu0 %v12677_v39 }
 0x1e1   : > { %v14297_v7 = vadd.f32 %v10584_v48, %v4275_v49  ;;  %v4278_v21 = vadd.f32 %v10475_v62, %v14043_v15  ;;  %5038 = vmatmul.mubr.bf16.gmra.mrb[220].mxu1 %v12678_v34  ;;  %4884 = vmatprep.mubr.bf16.mxu0 %v12679_v47  ;;  %v12693_v47 = vld [vmem:[%s13529_s28 + $0x540] ss:$72 sps:$4 sm:$0xff]   ;;  %v12695_v48 = vld [vmem:[%s13529_s28 + $0x5d4] ss:$72 sps:$4 sm:$0xff]  }
 0x1e2   : > { %5045 = vmatprep.mubr.bf16.mxu1 %v12681_v56 }
 0x1e3   : > { %v14301_v10 = vadd.f32 %v10587_v4, %v4278_v21  ;;  %v10476_v51 = vpop.f32.mrb[116].mxu0  ;;  %v12697_v4 = vld [vmem:[%s13529_s28 + $0x5dc] ss:$72 sps:$4 sm:$0xff]  }
 0x1e4   : > { %v10588_v2 = vpop.f32.mrb[116].mxu1  ;;  %v10477_v13 = vpop.f32.mrb[117].mxu0 }
 0x1e5   : > { %v10478_v25 = vadd.f32 %v10477_v13, %v10476_v51  ;;  %v10589_v19 = vpop.f32.mrb[117].mxu1  ;;  %v10479_v26 = vpop.f32.mrb[118].mxu0  ;;  %v12699_v13 = vld [vmem:[%s13529_s28 + $0x5d0] ss:$72 sps:$4 sm:$0xff]  }
 0x1e6   : > { %v10590_v61 = vadd.f32 %v10589_v19, %v10588_v2  ;;  %v10591_v28 = vpop.f32.mrb[118].mxu1  ;;  %v10480_v15 = vpop.f32.mrb[119].mxu0 }
 0x1e7   : > { %v4283_v3 = vadd.f32 %v10478_v25, %v14049_v42  ;;  %v10481_v36 = vadd.f32 %v10480_v15, %v10479_v26  ;;  %v10592_v39 = vpop.f32.mrb[119].mxu1  ;;  %v12700_v26 = vld [vmem:[%s13529_s28 + $0x5d8] ss:$72 sps:$4 sm:$0xff]  }
 0x1e8   : > { %v10593_v34 = vadd.f32 %v10592_v39, %v10591_v28  ;;  %4885 = vmatmul.mubr.bf16.gmra.mrb[224].mxu0 %v12683_v22 }
 0x1e9   : > { %v14307_v46 = vadd.f32 %v10590_v61, %v4283_v3  ;;  %v4286_v50 = vadd.f32 %v10481_v36, %v14051_v45  ;;  %5046 = vmatmul.mubr.bf16.gmra.mrb[224].mxu1 %v12684_v38  ;;  %4892 = vmatprep.mubr.bf16.mxu0 %v12689_v16  ;;  %v12705_v61 = vld [vmem:[%s13529_s28 + $0x664] ss:$72 sps:$4 sm:$0xff]  }
 0x1ea   : > { %5053 = vmatprep.mubr.bf16.mxu1 %v12691_v29 }
 0x1eb   : > { %v14311_v0 = vadd.f32 %v10593_v34, %v4286_v50  ;;  %v10482_v43 = vpop.f32.mrb[120].mxu0  ;;  %v12707_v34 = vld [vmem:[%s13529_s28 + $0x66c] ss:$72 sps:$4 sm:$0xff]  }
 0x1ec   : > { %v10594_v40 = vpop.f32.mrb[120].mxu1  ;;  %v10483_v42 = vpop.f32.mrb[121].mxu0 }
 0x1ed   : > { %v10484_v53 = vadd.f32 %v10483_v42, %v10482_v43  ;;  %v10595_v56 = vpop.f32.mrb[121].mxu1  ;;  %v10485_v49 = vpop.f32.mrb[122].mxu0  ;;  %v12709_v42 = vld [vmem:[%s13529_s28 + $0x660] ss:$72 sps:$4 sm:$0xff]  }
 0x1ee   : > { %v10596_v62 = vadd.f32 %v10595_v56, %v10594_v40  ;;  %v10597_v6 = vpop.f32.mrb[122].mxu1  ;;  %v10486_v45 = vpop.f32.mrb[123].mxu0 }
 0x1ef   : > { %v4291_v21 = vadd.f32 %v10484_v53, %v14057_v9  ;;  %v10487_v22 = vadd.f32 %v10486_v45, %v10485_v49  ;;  %v10598_v51 = vpop.f32.mrb[123].mxu1  ;;  %v12710_v49 = vld [vmem:[%s13529_s28 + $0x668] ss:$72 sps:$4 sm:$0xff]  }
 0x1f0   : > { %v10599_v38 = vadd.f32 %v10598_v51, %v10597_v6  ;;  %4893 = vmatmul.mubr.bf16.gmra.mrb[228].mxu0 %v12693_v47 }
 0x1f1   : > { %v14317_v16 = vadd.f32 %v10596_v62, %v4291_v21  ;;  %v4294_v2 = vadd.f32 %v10487_v22, %v14059_v11  ;;  %5054 = vmatmul.mubr.bf16.gmra.mrb[228].mxu1 %v12694_v5  ;;  %4900 = vmatprep.mubr.bf16.mxu0 %v12695_v48  ;;  %v12711_v62 = vld [vmem:[%s13529_s28 + $0x6f4] ss:$72 sps:$4 sm:$0xff]  }
 0x1f2   : > { %5061 = vmatprep.mubr.bf16.mxu1 %v12697_v4 }
 0x1f3   : > { %v14321_v25 = vadd.f32 %v10599_v38, %v4294_v2  ;;  %v10488_v19 = vpop.f32.mrb[124].mxu0  ;;  %v12713_v38 = vld [vmem:[%s13529_s28 + $0x6fc] ss:$72 sps:$4 sm:$0xff]  }
 0x1f4   : > { %v10600_v28 = vpop.f32.mrb[124].mxu1  ;;  %v10489_v9 = vpop.f32.mrb[125].mxu0 }
 0x1f5   : > { %v10490_v15 = vadd.f32 %v10489_v9, %v10488_v19  ;;  %v10601_v29 = vpop.f32.mrb[125].mxu1  ;;  %v10491_v3 = vpop.f32.mrb[126].mxu0  ;;  %v12715_v9 = vld [vmem:[%s13529_s28 + $0x6f0] ss:$72 sps:$4 sm:$0xff]  }
 0x1f6   : > { %v10602_v36 = vadd.f32 %v10601_v29, %v10600_v28  ;;  %v10603_v39 = vpop.f32.mrb[126].mxu1  ;;  %v10492_v11 = vpop.f32.mrb[127].mxu0 }
 0x1f7   : > { %v4299_v50 = vadd.f32 %v10490_v15, %v14065_v37  ;;  %v10493_v47 = vadd.f32 %v10492_v11, %v10491_v3  ;;  %v10604_v43 = vpop.f32.mrb[127].mxu1  ;;  %v12716_v3 = vld [vmem:[%s13529_s28 + $0x6f8] ss:$72 sps:$4 sm:$0xff]  }
 0x1f8   : > { %v10605_v5 = vadd.f32 %v10604_v43, %v10603_v39  ;;  %4901 = vmatmul.mubr.bf16.gmra.mrb[232].mxu0 %v12699_v13 }
 0x1f9   : > { %v14327_v48 = vadd.f32 %v10602_v36, %v4299_v50  ;;  %v4302_v40 = vadd.f32 %v10493_v47, %v14067_v44  ;;  %5062 = vmatmul.mubr.bf16.gmra.mrb[232].mxu1 %v12700_v26  ;;  %4908 = vmatprep.mubr.bf16.mxu0 %v12705_v61  ;;  %v12721_v36 = vld [vmem:[%s13529_s28 + $0x784] ss:$72 sps:$4 sm:$0xff]  }
 0x1fa   : > { %5069 = vmatprep.mubr.bf16.mxu1 %v12707_v34 }
 0x1fb   : > { %v14331_v53 = vadd.f32 %v10605_v5, %v4302_v40  ;;  %v10622_v56 = vpop.f32.mrb[128].mxu0  ;;  %v12723_v5 = vld [vmem:[%s13529_s28 + $0x78c] ss:$72 sps:$4 sm:$0xff]  }
 0x1fc   : > { %v10734_v6 = vpop.f32.mrb[128].mxu1  ;;  %v10623_v37 = vpop.f32.mrb[129].mxu0 }
 0x1fd   : > { %v10624_v45 = vadd.f32 %v10623_v37, %v10622_v56  ;;  %v10735_v4 = vpop.f32.mrb[129].mxu1  ;;  %v10625_v21 = vpop.f32.mrb[130].mxu0  ;;  %v12725_v37 = vld [vmem:[%s13529_s28 + $0x780] ss:$72 sps:$4 sm:$0xff]  }
 0x1fe   : > { %v10736_v22 = vadd.f32 %v10735_v4, %v10734_v6  ;;  %v10737_v51 = vpop.f32.mrb[130].mxu1  ;;  %v10626_v44 = vpop.f32.mrb[131].mxu0 }
 0x1ff   : > { %v4501_v2 = vadd.f32 %v10624_v45, %v14074_v14  ;;  %v10627_v13 = vadd.f32 %v10626_v44, %v10625_v21  ;;  %v10738_v19 = vpop.f32.mrb[131].mxu1  ;;  %v12726_v21 = vld [vmem:[%s13529_s28 + $0x788] ss:$72 sps:$4 sm:$0xff]  }
 0x200   : > { %v10739_v26 = vadd.f32 %v10738_v19, %v10737_v51  ;;  %4909 = vmatmul.mubr.bf16.gmra.mrb[236].mxu0 %v12709_v42 }
 0x201   : > { %v14337_v61 = vadd.f32 %v10736_v22, %v4501_v2  ;;  %v4504_v28 = vadd.f32 %v10627_v13, %v14078_v18  ;;  %5070 = vmatmul.mubr.bf16.gmra.mrb[236].mxu1 %v12710_v49  ;;  %4916 = vmatprep.mubr.bf16.mxu0 %v12711_v62  ;;  %v12727_v22 = vld [vmem:[%s13529_s28 + $0x814] ss:$72 sps:$4 sm:$0xff]  }
 0x202   : > { %5077 = vmatprep.mubr.bf16.mxu1 %v12713_v38 }
 0x203   : > { %v14341_v15 = vadd.f32 %v10739_v26, %v4504_v28  ;;  %v10628_v29 = vpop.f32.mrb[132].mxu0  ;;  %v12729_v26 = vld [vmem:[%s13529_s28 + $0x81c] ss:$72 sps:$4 sm:$0xff]  }
 0x204   : > { %v10740_v39 = vpop.f32.mrb[132].mxu1  ;;  %v10629_v14 = vpop.f32.mrb[133].mxu0 }
 0x205   : > { %v10630_v11 = vadd.f32 %v10629_v14, %v10628_v29  ;;  %v10741_v34 = vpop.f32.mrb[133].mxu1  ;;  %v10631_v50 = vpop.f32.mrb[134].mxu0  ;;  %v12731_v14 = vld [vmem:[%s13529_s28 + $0x810] ss:$72 sps:$4 sm:$0xff]  }
 0x206   : > { %v10742_v47 = vadd.f32 %v10741_v34, %v10740_v39  ;;  %v10743_v43 = vpop.f32.mrb[134].mxu1  ;;  %v10632_v18 = vpop.f32.mrb[135].mxu0 }
 0x207   : > { %v4509_v40 = vadd.f32 %v10630_v11, %v14084_v52  ;;  %v10633_v42 = vadd.f32 %v10632_v18, %v10631_v50  ;;  %v10744_v56 = vpop.f32.mrb[135].mxu1  ;;  %v12732_v50 = vld [vmem:[%s13529_s28 + $0x818] ss:$72 sps:$4 sm:$0xff]  }
 0x208   : > { %v10745_v49 = vadd.f32 %v10744_v56, %v10743_v43  ;;  %4917 = vmatmul.mubr.bf16.gmra.mrb[240].mxu0 %v12715_v9 }
 0x209   : > { %v14347_v62 = vadd.f32 %v10742_v47, %v4509_v40  ;;  %v4512_v6 = vadd.f32 %v10633_v42, %v14087_v55  ;;  %5078 = vmatmul.mubr.bf16.gmra.mrb[240].mxu1 %v12716_v3  ;;  %4924 = vmatprep.mubr.bf16.mxu0 %v12721_v36  ;;  %v12737_v47 = vld [vmem:[%s13529_s28 + $0x8a4] ss:$72 sps:$4 sm:$0xff]  }
 0x20a   : > { %5085 = vmatprep.mubr.bf16.mxu1 %v12723_v5 }
 0x20b   : > { %v14351_v45 = vadd.f32 %v10745_v49, %v4512_v6  ;;  %v10634_v4 = vpop.f32.mrb[136].mxu0  ;;  %v12739_v49 = vld [vmem:[%s13529_s28 + $0x8ac] ss:$72 sps:$4 sm:$0xff]  }
 0x20c   : > { %v10746_v51 = vpop.f32.mrb[136].mxu1  ;;  %v10635_v52 = vpop.f32.mrb[137].mxu0 }
 0x20d   : > { %v10636_v44 = vadd.f32 %v10635_v52, %v10634_v4  ;;  %v10747_v38 = vpop.f32.mrb[137].mxu1  ;;  %v10637_v2 = vpop.f32.mrb[138].mxu0  ;;  %v12741_v52 = vld [vmem:[%s13529_s28 + $0x8a0] ss:$72 sps:$4 sm:$0xff]  }
 0x20e   : > { %v10748_v13 = vadd.f32 %v10747_v38, %v10746_v51  ;;  %v10749_v19 = vpop.f32.mrb[138].mxu1  ;;  %v10638_v55 = vpop.f32.mrb[139].mxu0 }
 0x20f   : > { %v4517_v28 = vadd.f32 %v10636_v44, %v14094_v24  ;;  %v10639_v9 = vadd.f32 %v10638_v55, %v10637_v2  ;;  %v10750_v29 = vpop.f32.mrb[139].mxu1  ;;  %v12742_v2 = vld [vmem:[%s13529_s28 + $0x8a8] ss:$72 sps:$4 sm:$0xff]  }
 0x210   : > { %v10751_v3 = vadd.f32 %v10750_v29, %v10749_v19  ;;  %4925 = vmatmul.mubr.bf16.gmra.mrb[244].mxu0 %v12725_v37 }
 0x211   : > { %v14357_v36 = vadd.f32 %v10748_v13, %v4517_v28  ;;  %v4520_v39 = vadd.f32 %v10639_v9, %v14098_v27  ;;  %5086 = vmatmul.mubr.bf16.gmra.mrb[244].mxu1 %v12726_v21  ;;  %4932 = vmatprep.mubr.bf16.mxu0 %v12727_v22  ;;  %v12745_v13 = vld [vmem:[%s13529_s28 + $0x44] ss:$72 sps:$4 sm:$0xff]  }
 0x212   : > { %5093 = vmatprep.mubr.bf16.mxu1 %v12729_v26 }
 0x213   : > { %v14361_v11 = vadd.f32 %v10751_v3, %v4520_v39  ;;  %v10640_v34 = vpop.f32.mrb[140].mxu0  ;;  %v12748_v3 = vld [vmem:[%s14134_s15 + $0x4] ss:$72 sps:$4 sm:$0xff]  }
 0x214   : > { %v10752_v43 = vpop.f32.mrb[140].mxu1  ;;  %v10641_v24 = vpop.f32.mrb[141].mxu0 }
 0x215   : > { %v10642_v18 = vadd.f32 %v10641_v24, %v10640_v34  ;;  %v10753_v5 = vpop.f32.mrb[141].mxu1  ;;  %v10643_v40 = vpop.f32.mrb[142].mxu0  ;;  %v12743_v24 = vld [vmem:[%s13529_s28 + $0x40] ss:$72 sps:$4 sm:$0xff]  }
 0x216   : > { %v10754_v42 = vadd.f32 %v10753_v5, %v10752_v43  ;;  %v10755_v56 = vpop.f32.mrb[142].mxu1  ;;  %v10644_v27 = vpop.f32.mrb[143].mxu0 }
 0x217   : > { %v4525_v6 = vadd.f32 %v10642_v18, %v14104_v59  ;;  %v10645_v37 = vadd.f32 %v10644_v27, %v10643_v40  ;;  %v10756_v4 = vpop.f32.mrb[143].mxu1  ;;  %v12746_v40 = vld [vmem:[%s14134_s15] ss:$72 sps:$4 sm:$0xff]   ;;  %v12755_v27 = vld [vmem:[%s13529_s28 + $0xd4] ss:$72 sps:$4 sm:$0xff]  }
 0x218   : > { %v10757_v21 = vadd.f32 %v10756_v4, %v10755_v56  ;;  %4933 = vmatmul.mubr.bf16.gmra.mrb[248].mxu0 %v12731_v14 }
 0x219   : > { %v14367_v22 = vadd.f32 %v10754_v42, %v4525_v6  ;;  %v4528_v51 = vadd.f32 %v10645_v37, %v14107_v60  ;;  %5094 = vmatmul.mubr.bf16.gmra.mrb[248].mxu1 %v12732_v50  ;;  %4940 = vmatprep.mubr.bf16.mxu0 %v12737_v47 }
 0x21a   : > { %5101 = vmatprep.mubr.bf16.mxu1 %v12739_v49 }
 0x21b   : > { %v14371_v44 = vadd.f32 %v10757_v21, %v4528_v51  ;;  %v10646_v38 = vpop.f32.mrb[144].mxu0  ;;  %v12752_v51 = vld [vmem:[%s15778_s1 + $0x100] sm:$0xff]  }
 0x21c   : > { %v10758_v19 = vpop.f32.mrb[144].mxu1  ;;  %v10647_v59 = vpop.f32.mrb[145].mxu0 }
 0x21d   : > { %v10648_v55 = vadd.f32 %v10647_v59, %v10646_v38  ;;  %v10759_v26 = vpop.f32.mrb[145].mxu1  ;;  %v10649_v28 = vpop.f32.mrb[146].mxu0  ;;  %v12765_v38 = vld [vmem:[%s15778_s1 + $0xc8] sm:$0xff]  }
 0x21e   : > { %v10760_v9 = vadd.f32 %v10759_v26, %v10758_v19  ;;  %v10761_v29 = vpop.f32.mrb[146].mxu1  ;;  %v10650_v60 = vpop.f32.mrb[147].mxu0  ;;  %v12766_v59 = vld [vmem:[%s15778_s1 + $0x88] sm:$0xff]  }
 0x21f   : > { %v4533_v39 = vadd.f32 %v10648_v55, %v14114_v30  ;;  %v10651_v14 = vadd.f32 %v10650_v60, %v10649_v28  ;;  %v10762_v34 = vpop.f32.mrb[147].mxu1  ;;  %v12750_v30 = vld [vmem:[%s15778_s1 + $0x80] sm:$0xff]   ;;  %v12767_v55 = vld [vmem:[%s15778_s1 + $0x148] sm:$0xff]   ;;  %v12753_v60 = vld [vmem:[%s13529_s28 + $0xd0] ss:$72 sps:$4 sm:$0xff]  }
 0x220   : > { %v10763_v50 = vadd.f32 %v10762_v34, %v10761_v29  ;;  %4941 = vmatmul.mubr.bf16.gmra.mrb[252].mxu0 %v12741_v52  ;;  %v12758_v52 = vld [vmem:[%s14134_s15 + $0x94] ss:$72 sps:$4 sm:$0xff]   ;;  %v12768_v28 = vld [vmem:[%s15778_s1 + $0x108] sm:$0xff]  }
 0x221   : > { %v14377_v47 = vadd.f32 %v10760_v9, %v4533_v39  ;;  %v4536_v43 = vadd.f32 %v10651_v14, %v14118_v33  ;;  %5102 = vmatmul.mubr.bf16.gmra.mrb[252].mxu1 %v12742_v2  ;;  %5142 = vmatprep.mubr.bf16.mxu0 %v12745_v13  ;;  %v12756_v14 = vld [vmem:[%s14134_s15 + $0x90] ss:$72 sps:$4 sm:$0xff]   ;;  %v12761_v34 = vld [vmem:[%s13529_s28 + $0x164] ss:$72 sps:$4 sm:$0xff]  }
 0x222   : > { %7607 = vmatprep.mubr.bf16.mxu1 %v12748_v3 }
 0x223   : > { %v14381_v18 = vadd.f32 %v10763_v50, %v4536_v43  ;;  %v10652_v5 = vpop.f32.mrb[148].mxu0  ;;  %v12783_v50 = vld [vmem:[%s15778_s1 + $0x150] sm:$0xff]  }
 0x224   : > { %v10764_v42 = vpop.f32.mrb[148].mxu1  ;;  %v10653_v56 = vpop.f32.mrb[149].mxu0 }
 0x225   : > { %v10654_v49 = vadd.f32 %v10653_v56, %v10652_v5  ;;  %v10765_v6 = vpop.f32.mrb[149].mxu1  ;;  %v10655_v37 = vpop.f32.mrb[150].mxu0 }
 0x226   : > { %v10766_v33 = vadd.f32 %v10765_v6, %v10764_v42  ;;  %v10767_v4 = vpop.f32.mrb[150].mxu1  ;;  %v10656_v21 = vpop.f32.mrb[151].mxu0  ;;  %v12784_v6 = vld [vmem:[%s15778_s1 + $0x110] sm:$0xff]  }
 0x227   : > { %v4541_v2 = vadd.f32 %v10654_v49, %v14152_v17  ;;  %v10657_v13 = vadd.f32 %v10656_v21, %v10655_v37  ;;  %v10768_v19 = vpop.f32.mrb[151].mxu1  ;;  %v12781_v17 = vld [vmem:[%s15778_s1 + $0xd0] sm:$0xff]   ;;  %v12797_v21 = vld [vmem:[%s15778_s1 + $0xd8] sm:$0xff]  }
 0x228   : > { %v10769_v26 = vadd.f32 %v10768_v19, %v10767_v4  ;;  %5143 = vmatmul.mubr.bf16.vlgmr.msra.gmra.mrb[0].mxu0 %v12743_v24  ;;  %v12782_v49 = vld [vmem:[%s15778_s1 + $0x90] sm:$0xff]   ;;  %v12813_v19 = vld [vmem:[%s15778_s1 + $0xe0] sm:$0xff]  }
 0x229   : > { %v14408_v9 = vadd.f32 %v10766_v33, %v4541_v2  ;;  %v4544_v29 = vadd.f32 %v10657_v13, %v14155_v23  ;;  %7608 = vmatmul.mubr.bf16.vlgmr.msra.gmra.mrb[0].mxu1 %v12746_v40  ;;  %11279 = vmatpush3.bf16.msra.mxu0 %v12750_v30  ;;  %v12800_v13 = vld [vmem:[%s15778_s1 + $0x118] sm:$0xff]  }
 0x22a   : > { %11391 = vmatpush3.bf16.msra.mxu1 %v12752_v51  ;;  %5150 = vmatprep.mubr.bf16.mxu0 %v12755_v27  ;;  %v12764_v27 = vld [vmem:[%s14134_s15 + $0x124] ss:$72 sps:$4 sm:$0xff]   ;;  %v12799_v51 = vld [vmem:[%s15778_s1 + $0x158] sm:$0xff]  }
 0x22b   : > { %v14412_v3 = vadd.f32 %v10769_v26, %v4544_v29  ;;  %v10658_v39 = vpop.f32.mrb[152].mxu0  ;;  %7615 = vmatprep.mubr.bf16.mxu1 %v12758_v52  ;;  %11280 = vmatprep.subr.bf16.mxu0 %v12765_v38  ;;  %v12798_v38 = vld [vmem:[%s15778_s1 + $0x98] sm:$0xff]  }
 0x22c   : > { %v10770_v43 = vpop.f32.mrb[152].mxu1  ;;  %v10659_v24 = vpop.f32.mrb[153].mxu0  ;;  %11392 = vmatprep.subr.bf16.mxu1 %v12767_v55  ;;  %v12815_v55 = vld [vmem:[%s15778_s1 + $0x160] sm:$0xff]  }
 0x22d   : > { %v10660_v23 = vadd.f32 %v10659_v24, %v10658_v39  ;;  %v10771_v5 = vpop.f32.mrb[153].mxu1  ;;  %v10661_v40 = vpop.f32.mrb[154].mxu0  ;;  %11281 = vmatpush3.bf16.msra.mxu0 %v12766_v59  ;;  %v12759_v59 = vld [vmem:[%s13529_s28 + $0x160] ss:$72 sps:$4 sm:$0xff]  }
 0x22e   : > { %v10772_v30 = vadd.f32 %v10771_v5, %v10770_v43  ;;  %v10773_v42 = vpop.f32.mrb[154].mxu1  ;;  %v10662_v56 = vpop.f32.mrb[155].mxu0  ;;  %11393 = vmatpush3.bf16.msra.mxu1 %v12768_v28  ;;  %11282 = vmatprep.subr.bf16.mxu0 %v12781_v17  ;;  %v12762_v28 = vld [vmem:[%s14134_s15 + $0x120] ss:$72 sps:$4 sm:$0xff]   ;;  %v12771_v17 = vld [vmem:[%s13529_s28 + $0x1f4] ss:$72 sps:$4 sm:$0xff]  }
 0x22f   : > { %v4549_v37 = vadd.f32 %v10660_v23, %v14180_v1  ;;  %v10663_v33 = vadd.f32 %v10662_v56, %v10661_v40  ;;  %v10774_v4 = vpop.f32.mrb[155].mxu1  ;;  %11394 = vmatprep.subr.bf16.mxu1 %v12783_v50  ;;  %v12774_v23 = vld [vmem:[%s14134_s15 + $0x1b4] ss:$72 sps:$4 sm:$0xff]   ;;  %v12814_v5 = vld [vmem:[%s15778_s1 + $0xa0] sm:$0xff]  }
 0x230   : > { %v10775_v52 = vadd.f32 %v10774_v4, %v10773_v42  ;;  %5151 = vmatmul.mubr.bf16.gmra.mrb[4].mxu0 %v12753_v60  ;;  %v12816_v40 = vld [vmem:[%s15778_s1 + $0x120] sm:$0xff]   ;;  %v12769_v4 = vld [vmem:[%s13529_s28 + $0x1f0] ss:$72 sps:$4 sm:$0xff]  }
 0x231   : > { %v14436_v1 = vadd.f32 %v10772_v30, %v4549_v37  ;;  %v4552_v2 = vadd.f32 %v10663_v33, %v14193_v12  ;;  %7616 = vmatmul.mubr.bf16.gmra.mrb[4].mxu1 %v12756_v14  ;;  %5158 = vmatprep.mubr.bf16.mxu0 %v12761_v34 }
 0x232   : > { %7623 = vmatprep.mubr.bf16.mxu1 %v12764_v27  ;;  %11283 = vmatpush3.bf16.msra.mxu0 %v12782_v49  ;;  %v12829_v27 = vld [vmem:[%s15778_s1 + $0xe8] sm:$0xff]  }
 0x233   : > { %v14449_v26 = vadd.f32 %v10775_v52, %v4552_v2  ;;  %v10664_v12 = vpop.f32.mrb[156].mxu0  ;;  %11395 = vmatpush3.bf16.msra.mxu1 %v12784_v6  ;;  %11284 = vmatprep.subr.bf16.mxu0 %v12797_v21  ;;  %v12831_v49 = vld [vmem:[%s15778_s1 + $0x168] sm:$0xff]   ;;  %v12772_v52 = vld [vmem:[%s14134_s15 + $0x1b0] ss:$72 sps:$4 sm:$0xff]  }
 0x234   : > { %v10776_v29 = vpop.f32.mrb[156].mxu1  ;;  %v10665_v60 = vpop.f32.mrb[157].mxu0  ;;  %11396 = vmatprep.subr.bf16.mxu1 %v12799_v51  ;;  %v12832_v2 = vld [vmem:[%s15778_s1 + $0x128] sm:$0xff]  }
 0x235   : > { %v10666_v39 = vadd.f32 %v10665_v60, %v10664_v12  ;;  %v10777_v14 = vpop.f32.mrb[157].mxu1  ;;  %v10667_v34 = vpop.f32.mrb[158].mxu0 }
 0x236   : > { %v10778_v50 = vadd.f32 %v10777_v14, %v10776_v29  ;;  %v10779_v43 = vpop.f32.mrb[158].mxu1  ;;  %v10668_v24 = vpop.f32.mrb[159].mxu0  ;;  %11285 = vmatpush3.bf16.msra.mxu0 %v12798_v38  ;;  %v12777_v38 = vld [vmem:[%s13529_s28 + $0x284] ss:$72 sps:$4 sm:$0xff]   ;;  %v12846_v14 = vld [vmem:[%s15778_s1 + $0xb0] sm:$0xff]  }
 0x237   : > { %v4557_v30 = vadd.f32 %v10666_v39, %v14214_v54  ;;  %v10669_v42 = vadd.f32 %v10668_v24, %v10667_v34  ;;  %v10780_v56 = vpop.f32.mrb[159].mxu1  ;;  %11397 = vmatpush3.bf16.msra.mxu1 %v12800_v13  ;;  %11286 = vmatprep.subr.bf16.mxu0 %v12813_v19  ;;  %v12830_v54 = vld [vmem:[%s15778_s1 + $0xa8] sm:$0xff]   ;;  %v12848_v34 = vld [vmem:[%s15778_s1 + $0x130] sm:$0xff]  }
 0x238   : > { %v10781_v6 = vadd.f32 %v10780_v56, %v10779_v43  ;;  %5159 = vmatmul.mubr.bf16.gmra.mrb[8].mxu0 %v12759_v59  ;;  %11398 = vmatprep.subr.bf16.mxu1 %v12815_v55  ;;  %v12847_v59 = vld [vmem:[%s15778_s1 + $0x170] sm:$0xff]   ;;  %v12780_v39 = vld [vmem:[%s14134_s15 + $0x244] ss:$72 sps:$4 sm:$0xff]   ;;  %v12864_v56 = vld [vmem:[%s15778_s1 + $0x138] sm:$0xff]  }
 0x239   : > { %v14470_v37 = vadd.f32 %v10778_v50, %v4557_v30  ;;  %v4560_v33 = vadd.f32 %v10669_v42, %v14218_v58  ;;  %7624 = vmatmul.mubr.bf16.gmra.mrb[8].mxu1 %v12762_v28  ;;  %5166 = vmatprep.mubr.bf16.mxu0 %v12771_v17  ;;  %v12845_v58 = vld [vmem:[%s15778_s1 + $0xf0] sm:$0xff]  }
 0x23a   : > { %7631 = vmatprep.mubr.bf16.mxu1 %v12774_v23  ;;  %11287 = vmatpush3.bf16.msra.mxu0 %v12814_v5  ;;  %v12861_v23 = vld [vmem:[%s15778_s1 + $0xf8] sm:$0xff]  }
 0x23b   : > { %v14474_v21 = vadd.f32 %v10781_v6, %v4560_v33  ;;  %v10670_v51 = vpop.f32.mrb[160].mxu0  ;;  %11399 = vmatpush3.bf16.msra.mxu1 %v12816_v40  ;;  %11288 = vmatprep.subr.bf16.mxu0 %v12829_v27  ;;  %v12863_v5 = vld [vmem:[%s15778_s1 + $0x178] sm:$0xff]   ;;  %v12877_v27 = vld [vmem:[%s15778_s1 + $0x1c0] sm:$0xff]  }
 0x23c   : > { %v10782_v13 = vpop.f32.mrb[160].mxu1  ;;  %v10671_v19 = vpop.f32.mrb[161].mxu0  ;;  %11400 = vmatprep.subr.bf16.mxu1 %v12831_v49  ;;  %v12775_v49 = vld [vmem:[%s13529_s28 + $0x280] ss:$72 sps:$4 sm:$0xff]  }
 0x23d   : > { %v10672_v55 = vadd.f32 %v10671_v19, %v10670_v51  ;;  %v10783_v12 = vpop.f32.mrb[161].mxu1  ;;  %v10673_v28 = vpop.f32.mrb[162].mxu0  ;;  %v12879_v6 = vld [vmem:[%s15778_s1 + $0x240] sm:$0xff]  }
 0x23e   : > { %v10784_v17 = vadd.f32 %v10783_v12, %v10782_v13  ;;  %v10785_v29 = vpop.f32.mrb[162].mxu1  ;;  %v10674_v60 = vpop.f32.mrb[163].mxu0  ;;  %11289 = vmatpush3.bf16.msra.mxu0 %v12830_v54  ;;  %v12778_v33 = vld [vmem:[%s14134_s15 + $0x240] ss:$72 sps:$4 sm:$0xff]  }
 0x23f   : > { %v4565_v50 = vadd.f32 %v10672_v55, %v14248_v41  ;;  %v10675_v43 = vadd.f32 %v10674_v60, %v10673_v28  ;;  %v10786_v24 = vpop.f32.mrb[163].mxu1  ;;  %11401 = vmatpush3.bf16.msra.mxu1 %v12832_v2  ;;  %11290 = vmatprep.subr.bf16.mxu0 %v12845_v58  ;;  %v12862_v41 = vld [vmem:[%s15778_s1 + $0xb8] sm:$0xff]  }
 0x240   : > { %v10787_v40 = vadd.f32 %v10786_v24, %v10785_v29  ;;  %5167 = vmatmul.mubr.bf16.gmra.mrb[12].mxu0 %v12769_v4  ;;  %11402 = vmatprep.subr.bf16.mxu1 %v12847_v59  ;;  %v12787_v4 = vld [vmem:[%s13529_s28 + $0x314] ss:$72 sps:$4 sm:$0xff]  }
 0x241   : > { %v14504_v30 = vadd.f32 %v10784_v17, %v4565_v50  ;;  %v4568_v42 = vadd.f32 %v10675_v43, %v14261_v63  ;;  %7632 = vmatmul.mubr.bf16.gmra.mrb[12].mxu1 %v12772_v52  ;;  %5174 = vmatprep.mubr.bf16.mxu0 %v12777_v38  ;;  %v12790_v55 = vld [vmem:[%s14134_s15 + $0x2d4] ss:$72 sps:$4 sm:$0xff]   ;;  %v12788_v50 = vld [vmem:[%s14134_s15 + $0x2d0] ss:$72 sps:$4 sm:$0xff]  }
 0x242   : > { %7639 = vmatprep.mubr.bf16.mxu1 %v12780_v39  ;;  %11291 = vmatpush3.bf16.msra.mxu0 %v12846_v14 }
 0x243   : > { %v14517_v54 = vadd.f32 %v10787_v40, %v4568_v42  ;;  %v10676_v63 = vpop.f32.mrb[164].mxu0  ;;  %11403 = vmatpush3.bf16.msra.mxu1 %v12848_v34  ;;  %11292 = vmatprep.subr.bf16.mxu0 %v12861_v23  ;;  %v12785_v34 = vld [vmem:[%s13529_s28 + $0x310] ss:$72 sps:$4 sm:$0xff]   ;;  %v12793_v23 = vld [vmem:[%s13529_s28 + $0x3a4] ss:$72 sps:$4 sm:$0xff]  }
 0x244   : > { %v10788_v51 = vpop.f32.mrb[164].mxu1  ;;  %v10677_v52 = vpop.f32.mrb[165].mxu0  ;;  %11404 = vmatprep.subr.bf16.mxu1 %v12863_v5 }
 0x245   : > { %v10678_v38 = vadd.f32 %v10677_v52, %v10676_v63  ;;  %v10789_v2 = vpop.f32.mrb[165].mxu1  ;;  %v10679_v58 = vpop.f32.mrb[166].mxu0  ;;  %v12791_v52 = vld [vmem:[%s13529_s28 + $0x3a0] ss:$72 sps:$4 sm:$0xff]  }
 0x246   : > { %v10790_v13 = vadd.f32 %v10789_v2, %v10788_v51  ;;  %v10791_v19 = vpop.f32.mrb[166].mxu1  ;;  %v10680_v59 = vpop.f32.mrb[167].mxu0  ;;  %11293 = vmatpush3.bf16.msra.mxu0 %v12862_v41 }
 0x247   : > { %v4573_v12 = vadd.f32 %v10678_v38, %v14267_v20  ;;  %v10681_v28 = vadd.f32 %v10680_v59, %v10679_v58  ;;  %v10792_v17 = vpop.f32.mrb[167].mxu1  ;;  %11405 = vmatpush3.bf16.msra.mxu1 %v12864_v56  ;;  %11502 = vmatprep.subr.bf16.mxu0 %v12877_v27  ;;  %v12796_v27 = vld [vmem:[%s14134_s15 + $0x364] ss:$72 sps:$4 sm:$0xff]   ;;  %v12794_v58 = vld [vmem:[%s14134_s15 + $0x360] ss:$72 sps:$4 sm:$0xff]  }
 0x248   : > { %v10793_v29 = vadd.f32 %v10792_v17, %v10791_v19  ;;  %5175 = vmatmul.mubr.bf16.gmra.mrb[16].mxu0 %v12775_v49  ;;  %11614 = vmatprep.subr.bf16.mxu1 %v12879_v6 }
 0x249   : > { %v14523_v60 = vadd.f32 %v10790_v13, %v4573_v12  ;;  %v4576_v39 = vadd.f32 %v10681_v28, %v14270_v31  ;;  %7640 = vmatmul.mubr.bf16.gmra.mrb[16].mxu1 %v12778_v33  ;;  %5182 = vmatprep.mubr.bf16.mxu0 %v12787_v4  ;;  %v12803_v13 = vld [vmem:[%s13529_s28 + $0x434] ss:$72 sps:$4 sm:$0xff]  }
 0x24a   : > { %7647 = vmatprep.mubr.bf16.mxu1 %v12790_v55 }
 0x24b   : > { %v14526_v14 = vadd.f32 %v10793_v29, %v4576_v39  ;;  %v10682_v20 = vpop.f32.mrb[168].mxu0  ;;  %v12806_v29 = vld [vmem:[%s14134_s15 + $0x3f4] ss:$72 sps:$4 sm:$0xff]  }
 0x24c   : > { %v10794_v43 = vpop.f32.mrb[168].mxu1  ;;  %v10683_v24 = vpop.f32.mrb[169].mxu0 }
 0x24d   : > { %v10684_v5 = vadd.f32 %v10683_v24, %v10682_v20  ;;  %v10795_v40 = vpop.f32.mrb[169].mxu1  ;;  %v10685_v41 = vpop.f32.mrb[170].mxu0 }
 0x24e   : > { %v10796_v42 = vadd.f32 %v10795_v40, %v10794_v43  ;;  %v10797_v56 = vpop.f32.mrb[170].mxu1  ;;  %v10686_v31 = vpop.f32.mrb[171].mxu0  ;;  %v12801_v40 = vld [vmem:[%s13529_s28 + $0x430] ss:$72 sps:$4 sm:$0xff]  }
 0x24f   : > { %v4581_v49 = vadd.f32 %v10684_v5, %v14277_v57  ;;  %v10687_v6 = vadd.f32 %v10686_v31, %v10685_v41  ;;  %v10798_v63 = vpop.f32.mrb[171].mxu1  ;;  %v12804_v41 = vld [vmem:[%s14134_s15 + $0x3f0] ss:$72 sps:$4 sm:$0xff]  }
 0x250   : > { %v10799_v33 = vadd.f32 %v10798_v63, %v10797_v56  ;;  %5183 = vmatmul.mubr.bf16.gmra.mrb[20].mxu0 %v12785_v34  ;;  %v12809_v56 = vld [vmem:[%s13529_s28 + $0x4c4] ss:$72 sps:$4 sm:$0xff]  }
 0x251   : > { %v14533_v4 = vadd.f32 %v10796_v42, %v4581_v49  ;;  %v4584_v51 = vadd.f32 %v10687_v6, %v14281_v32  ;;  %7648 = vmatmul.mubr.bf16.gmra.mrb[20].mxu1 %v12788_v50  ;;  %5190 = vmatprep.mubr.bf16.mxu0 %v12793_v23 }
 0x252   : > { %7655 = vmatprep.mubr.bf16.mxu1 %v12796_v27 }
 0x253   : > { %v14537_v38 = vadd.f32 %v10799_v33, %v4584_v51  ;;  %v10688_v2 = vpop.f32.mrb[172].mxu0 }
 0x254   : > { %v10800_v19 = vpop.f32.mrb[172].mxu1  ;;  %v10689_v57 = vpop.f32.mrb[173].mxu0 }
 0x255   : > { %v10690_v59 = vadd.f32 %v10689_v57, %v10688_v2  ;;  %v10801_v55 = vpop.f32.mrb[173].mxu1  ;;  %v10691_v12 = vpop.f32.mrb[174].mxu0 }
 0x256   : > { %v10802_v28 = vadd.f32 %v10801_v55, %v10800_v19  ;;  %v10803_v17 = vpop.f32.mrb[174].mxu1  ;;  %v10692_v32 = vpop.f32.mrb[175].mxu0 }
 0x257   : > { %v4589_v39 = vadd.f32 %v10690_v59, %v14287_v35  ;;  %v10693_v20 = vadd.f32 %v10692_v32, %v10691_v12  ;;  %v10804_v34 = vpop.f32.mrb[175].mxu1 }
 0x258   : > { %v10805_v50 = vadd.f32 %v10804_v34, %v10803_v17  ;;  %5191 = vmatmul.mubr.bf16.gmra.mrb[24].mxu0 %v12791_v52 }
 0x259   : > { %v14543_v43 = vadd.f32 %v10802_v28, %v4589_v39  ;;  %v4592_v24 = vadd.f32 %v10693_v20, %v14290_v8  ;;  %7656 = vmatmul.mubr.bf16.gmra.mrb[24].mxu1 %v12794_v58  ;;  %5198 = vmatprep.mubr.bf16.mxu0 %v12803_v13  ;;  %v12812_v8 = vld [vmem:[%s14134_s15 + $0x484] ss:$72 sps:$4 sm:$0xff]   ;;  %v12819_v39 = vld [vmem:[%s13529_s28 + $0x554] ss:$72 sps:$4 sm:$0xff]  }
 0x25a   : > { %7663 = vmatprep.mubr.bf16.mxu1 %v12806_v29  ;;  %v12810_v29 = vld [vmem:[%s14134_s15 + $0x480] ss:$72 sps:$4 sm:$0xff]  }
 0x25b   : > { %v14546_v23 = vadd.f32 %v10805_v50, %v4592_v24  ;;  %v10694_v5 = vpop.f32.mrb[176].mxu0 }
 0x25c   : > { %v10806_v42 = vpop.f32.mrb[176].mxu1  ;;  %v10695_v35 = vpop.f32.mrb[177].mxu0 }
 0x25d   : > { %v10696_v31 = vadd.f32 %v10695_v35, %v10694_v5  ;;  %v10807_v27 = vpop.f32.mrb[177].mxu1  ;;  %v10697_v49 = vpop.f32.mrb[178].mxu0 }
 0x25e   : > { %v10808_v6 = vadd.f32 %v10807_v27, %v10806_v42  ;;  %v10809_v63 = vpop.f32.mrb[178].mxu1  ;;  %v10698_v33 = vpop.f32.mrb[179].mxu0 }
 0x25f   : > { %v4597_v51 = vadd.f32 %v10696_v31, %v14297_v7  ;;  %v10699_v52 = vadd.f32 %v10698_v33, %v10697_v49  ;;  %v10810_v2 = vpop.f32.mrb[179].mxu1  ;;  %v12807_v7 = vld [vmem:[%s13529_s28 + $0x4c0] ss:$72 sps:$4 sm:$0xff]  }
 0x260   : > { %v10811_v58 = vadd.f32 %v10810_v2, %v10809_v63  ;;  %5199 = vmatmul.mubr.bf16.gmra.mrb[28].mxu0 %v12801_v40 }
 0x261   : > { %v14553_v13 = vadd.f32 %v10808_v6, %v4597_v51  ;;  %v4600_v19 = vadd.f32 %v10699_v52, %v14301_v10  ;;  %7664 = vmatmul.mubr.bf16.gmra.mrb[28].mxu1 %v12804_v41  ;;  %5206 = vmatprep.mubr.bf16.mxu0 %v12809_v56  ;;  %v12822_v10 = vld [vmem:[%s14134_s15 + $0x514] ss:$72 sps:$4 sm:$0xff]   ;;  %v12825_v51 = vld [vmem:[%s13529_s28 + $0x5e4] ss:$72 sps:$4 sm:$0xff]  }
 0x262   : > { %7671 = vmatprep.mubr.bf16.mxu1 %v12812_v8  ;;  %v12820_v8 = vld [vmem:[%s14134_s15 + $0x510] ss:$72 sps:$4 sm:$0xff]  }
 0x263   : > { %v14556_v57 = vadd.f32 %v10811_v58, %v4600_v19  ;;  %v10700_v59 = vpop.f32.mrb[180].mxu0 }
 0x264   : > { %v10812_v55 = vpop.f32.mrb[180].mxu1  ;;  %v10701_v12 = vpop.f32.mrb[181].mxu0 }
 0x265   : > { %v10702_v28 = vadd.f32 %v10701_v12, %v10700_v59  ;;  %v10813_v17 = vpop.f32.mrb[181].mxu1  ;;  %v10703_v32 = vpop.f32.mrb[182].mxu0 }
 0x266   : > { %v10814_v20 = vadd.f32 %v10813_v17, %v10812_v55  ;;  %v10815_v34 = vpop.f32.mrb[182].mxu1  ;;  %v10704_v50 = vpop.f32.mrb[183].mxu0 }
 0x267   : > { %v4605_v24 = vadd.f32 %v10702_v28, %v14307_v46  ;;  %v10705_v5 = vadd.f32 %v10704_v50, %v10703_v32  ;;  %v10816_v40 = vpop.f32.mrb[183].mxu1  ;;  %v12817_v46 = vld [vmem:[%s13529_s28 + $0x550] ss:$72 sps:$4 sm:$0xff]  }
 0x268   : > { %v10817_v41 = vadd.f32 %v10816_v40, %v10815_v34  ;;  %5207 = vmatmul.mubr.bf16.gmra.mrb[32].mxu0 %v12807_v7 }
 0x269   : > { %v14563_v42 = vadd.f32 %v10814_v20, %v4605_v24  ;;  %v4608_v35 = vadd.f32 %v10705_v5, %v14311_v0  ;;  %7672 = vmatmul.mubr.bf16.gmra.mrb[32].mxu1 %v12810_v29  ;;  %5214 = vmatprep.mubr.bf16.mxu0 %v12819_v39  ;;  %v12828_v0 = vld [vmem:[%s14134_s15 + $0x5a4] ss:$72 sps:$4 sm:$0xff]   ;;  %v12835_v24 = vld [vmem:[%s13529_s28 + $0x674] ss:$72 sps:$4 sm:$0xff]  }
 0x26a   : > { %7679 = vmatprep.mubr.bf16.mxu1 %v12822_v10  ;;  %v12826_v10 = vld [vmem:[%s14134_s15 + $0x5a0] ss:$72 sps:$4 sm:$0xff]  }
 0x26b   : > { %v14566_v56 = vadd.f32 %v10817_v41, %v4608_v35  ;;  %v10706_v31 = vpop.f32.mrb[184].mxu0 }
 0x26c   : > { %v10818_v27 = vpop.f32.mrb[184].mxu1  ;;  %v10707_v49 = vpop.f32.mrb[185].mxu0 }
 0x26d   : > { %v10708_v6 = vadd.f32 %v10707_v49, %v10706_v31  ;;  %v10819_v63 = vpop.f32.mrb[185].mxu1  ;;  %v10709_v33 = vpop.f32.mrb[186].mxu0 }
 0x26e   : > { %v10820_v52 = vadd.f32 %v10819_v63, %v10818_v27  ;;  %v10821_v2 = vpop.f32.mrb[186].mxu1  ;;  %v10710_v58 = vpop.f32.mrb[187].mxu0 }
 0x26f   : > { %v4613_v19 = vadd.f32 %v10708_v6, %v14317_v16  ;;  %v10711_v59 = vadd.f32 %v10710_v58, %v10709_v33  ;;  %v10822_v55 = vpop.f32.mrb[187].mxu1  ;;  %v12823_v16 = vld [vmem:[%s13529_s28 + $0x5e0] ss:$72 sps:$4 sm:$0xff]  }
 0x270   : > { %v10823_v12 = vadd.f32 %v10822_v55, %v10821_v2  ;;  %5215 = vmatmul.mubr.bf16.gmra.mrb[36].mxu0 %v12817_v46 }
 0x271   : > { %v14573_v7 = vadd.f32 %v10820_v52, %v4613_v19  ;;  %v4616_v28 = vadd.f32 %v10711_v59, %v14321_v25  ;;  %7680 = vmatmul.mubr.bf16.gmra.mrb[36].mxu1 %v12820_v8  ;;  %5222 = vmatprep.mubr.bf16.mxu0 %v12825_v51  ;;  %v12838_v25 = vld [vmem:[%s14134_s15 + $0x634] ss:$72 sps:$4 sm:$0xff]   ;;  %v12841_v19 = vld [vmem:[%s13529_s28 + $0x704] ss:$72 sps:$4 sm:$0xff]  }
 0x272   : > { %7687 = vmatprep.mubr.bf16.mxu1 %v12828_v0  ;;  %v12836_v0 = vld [vmem:[%s14134_s15 + $0x630] ss:$72 sps:$4 sm:$0xff]  }
 0x273   : > { %v14576_v17 = vadd.f32 %v10823_v12, %v4616_v28  ;;  %v10712_v32 = vpop.f32.mrb[188].mxu0 }
 0x274   : > { %v10824_v29 = vpop.f32.mrb[188].mxu1  ;;  %v10713_v39 = vpop.f32.mrb[189].mxu0 }
 0x275   : > { %v10714_v20 = vadd.f32 %v10713_v39, %v10712_v32  ;;  %v10825_v34 = vpop.f32.mrb[189].mxu1  ;;  %v10715_v50 = vpop.f32.mrb[190].mxu0 }
 0x276   : > { %v10826_v5 = vadd.f32 %v10825_v34, %v10824_v29  ;;  %v10827_v40 = vpop.f32.mrb[190].mxu1  ;;  %v10716_v41 = vpop.f32.mrb[191].mxu0 }
 0x277   : > { %v4621_v35 = vadd.f32 %v10714_v20, %v14327_v48  ;;  %v10717_v31 = vadd.f32 %v10716_v41, %v10715_v50  ;;  %v10828_v27 = vpop.f32.mrb[191].mxu1  ;;  %v12833_v48 = vld [vmem:[%s13529_s28 + $0x670] ss:$72 sps:$4 sm:$0xff]  }
 0x278   : > { %v10829_v49 = vadd.f32 %v10828_v27, %v10827_v40  ;;  %5223 = vmatmul.mubr.bf16.gmra.mrb[40].mxu0 %v12823_v16 }
 0x279   : > { %v14583_v46 = vadd.f32 %v10826_v5, %v4621_v35  ;;  %v4624_v6 = vadd.f32 %v10717_v31, %v14331_v53  ;;  %7688 = vmatmul.mubr.bf16.gmra.mrb[40].mxu1 %v12826_v10  ;;  %5230 = vmatprep.mubr.bf16.mxu0 %v12835_v24  ;;  %v12844_v53 = vld [vmem:[%s14134_s15 + $0x6c4] ss:$72 sps:$4 sm:$0xff]   ;;  %v12851_v35 = vld [vmem:[%s13529_s28 + $0x794] ss:$72 sps:$4 sm:$0xff]  }
 0x27a   : > { %7695 = vmatprep.mubr.bf16.mxu1 %v12838_v25  ;;  %v12842_v25 = vld [vmem:[%s14134_s15 + $0x6c0] ss:$72 sps:$4 sm:$0xff]  }
 0x27b   : > { %v14586_v63 = vadd.f32 %v10829_v49, %v4624_v6  ;;  %v10846_v33 = vpop.f32.mrb[192].mxu0 }
 0x27c   : > { %v10958_v8 = vpop.f32.mrb[192].mxu1  ;;  %v10847_v51 = vpop.f32.mrb[193].mxu0 }
 0x27d   : > { %v10848_v52 = vadd.f32 %v10847_v51, %v10846_v33  ;;  %v10959_v2 = vpop.f32.mrb[193].mxu1  ;;  %v10849_v58 = vpop.f32.mrb[194].mxu0 }
 0x27e   : > { %v10960_v59 = vadd.f32 %v10959_v2, %v10958_v8  ;;  %v10961_v55 = vpop.f32.mrb[194].mxu1  ;;  %v10850_v12 = vpop.f32.mrb[195].mxu0 }
 0x27f   : > { %v4823_v28 = vadd.f32 %v10848_v52, %v14337_v61  ;;  %v10851_v32 = vadd.f32 %v10850_v12, %v10849_v58  ;;  %v10962_v29 = vpop.f32.mrb[195].mxu1  ;;  %v12839_v61 = vld [vmem:[%s13529_s28 + $0x700] ss:$72 sps:$4 sm:$0xff]  }
 0x280   : > { %v10963_v39 = vadd.f32 %v10962_v29, %v10961_v55  ;;  %5231 = vmatmul.mubr.bf16.gmra.mrb[44].mxu0 %v12833_v48 }
 0x281   : > { %v14593_v16 = vadd.f32 %v10960_v59, %v4823_v28  ;;  %v4826_v20 = vadd.f32 %v10851_v32, %v14341_v15  ;;  %7696 = vmatmul.mubr.bf16.gmra.mrb[44].mxu1 %v12836_v0  ;;  %5238 = vmatprep.mubr.bf16.mxu0 %v12841_v19  ;;  %v12854_v15 = vld [vmem:[%s14134_s15 + $0x754] ss:$72 sps:$4 sm:$0xff]   ;;  %v12857_v28 = vld [vmem:[%s13529_s28 + $0x824] ss:$72 sps:$4 sm:$0xff]  }
 0x282   : > { %7703 = vmatprep.mubr.bf16.mxu1 %v12844_v53  ;;  %v12852_v53 = vld [vmem:[%s14134_s15 + $0x750] ss:$72 sps:$4 sm:$0xff]  }
 0x283   : > { %v14596_v34 = vadd.f32 %v10963_v39, %v4826_v20  ;;  %v10852_v50 = vpop.f32.mrb[196].mxu0 }
 0x284   : > { %v10964_v10 = vpop.f32.mrb[196].mxu1  ;;  %v10853_v24 = vpop.f32.mrb[197].mxu0 }
 0x285   : > { %v10854_v5 = vadd.f32 %v10853_v24, %v10852_v50  ;;  %v10965_v40 = vpop.f32.mrb[197].mxu1  ;;  %v10855_v41 = vpop.f32.mrb[198].mxu0 }
 0x286   : > { %v10966_v31 = vadd.f32 %v10965_v40, %v10964_v10  ;;  %v10967_v27 = vpop.f32.mrb[198].mxu1  ;;  %v10856_v49 = vpop.f32.mrb[199].mxu0 }
 0x287   : > { %v4831_v6 = vadd.f32 %v10854_v5, %v14347_v62  ;;  %v10857_v33 = vadd.f32 %v10856_v49, %v10855_v41  ;;  %v10968_v8 = vpop.f32.mrb[199].mxu1  ;;  %v12849_v62 = vld [vmem:[%s13529_s28 + $0x790] ss:$72 sps:$4 sm:$0xff]  }
 0x288   : > { %v10969_v51 = vadd.f32 %v10968_v8, %v10967_v27  ;;  %5239 = vmatmul.mubr.bf16.gmra.mrb[48].mxu0 %v12839_v61 }
 0x289   : > { %v14603_v48 = vadd.f32 %v10966_v31, %v4831_v6  ;;  %v4834_v52 = vadd.f32 %v10857_v33, %v14351_v45  ;;  %7704 = vmatmul.mubr.bf16.gmra.mrb[48].mxu1 %v12842_v25  ;;  %5246 = vmatprep.mubr.bf16.mxu0 %v12851_v35  ;;  %v12860_v45 = vld [vmem:[%s14134_s15 + $0x7e4] ss:$72 sps:$4 sm:$0xff]   ;;  %v12867_v6 = vld [vmem:[%s13529_s28 + $0x8b4] ss:$72 sps:$4 sm:$0xff]  }
 0x28a   : > { %7711 = vmatprep.mubr.bf16.mxu1 %v12854_v15  ;;  %v12858_v15 = vld [vmem:[%s14134_s15 + $0x7e0] ss:$72 sps:$4 sm:$0xff]  }
 0x28b   : > { %v14606_v2 = vadd.f32 %v10969_v51, %v4834_v52  ;;  %v10858_v58 = vpop.f32.mrb[200].mxu0 }
 0x28c   : > { %v10970_v0 = vpop.f32.mrb[200].mxu1  ;;  %v10859_v19 = vpop.f32.mrb[201].mxu0 }
 0x28d   : > { %v10860_v59 = vadd.f32 %v10859_v19, %v10858_v58  ;;  %v10971_v55 = vpop.f32.mrb[201].mxu1  ;;  %v10861_v12 = vpop.f32.mrb[202].mxu0 }
 0x28e   : > { %v10972_v32 = vadd.f32 %v10971_v55, %v10970_v0  ;;  %v10973_v29 = vpop.f32.mrb[202].mxu1  ;;  %v10862_v39 = vpop.f32.mrb[203].mxu0 }
 0x28f   : > { %v4839_v20 = vadd.f32 %v10860_v59, %v14357_v36  ;;  %v10863_v50 = vadd.f32 %v10862_v39, %v10861_v12  ;;  %v10974_v10 = vpop.f32.mrb[203].mxu1  ;;  %v12855_v36 = vld [vmem:[%s13529_s28 + $0x820] ss:$72 sps:$4 sm:$0xff]  }
 0x290   : > { %v10975_v24 = vadd.f32 %v10974_v10, %v10973_v29  ;;  %5247 = vmatmul.mubr.bf16.gmra.mrb[52].mxu0 %v12849_v62 }
 0x291   : > { %v14613_v61 = vadd.f32 %v10972_v32, %v4839_v20  ;;  %v4842_v5 = vadd.f32 %v10863_v50, %v14361_v11  ;;  %7712 = vmatmul.mubr.bf16.gmra.mrb[52].mxu1 %v12852_v53  ;;  %5254 = vmatprep.mubr.bf16.mxu0 %v12857_v28  ;;  %v12870_v11 = vld [vmem:[%s14134_s15 + $0x874] ss:$72 sps:$4 sm:$0xff]  }
 0x292   : > { %7719 = vmatprep.mubr.bf16.mxu1 %v12860_v45  ;;  %v12868_v45 = vld [vmem:[%s14134_s15 + $0x870] ss:$72 sps:$4 sm:$0xff]   ;;  %v12873_v20 = vld [vmem:[%s14134_s15 + $0xc] ss:$72 sps:$4 sm:$0xff]  }
 0x293   : > { %v14616_v40 = vadd.f32 %v10975_v24, %v4842_v5  ;;  %v10864_v41 = vpop.f32.mrb[204].mxu0 }
 0x294   : > { %v10976_v25 = vpop.f32.mrb[204].mxu1  ;;  %v10865_v35 = vpop.f32.mrb[205].mxu0 }
 0x295   : > { %v10866_v31 = vadd.f32 %v10865_v35, %v10864_v41  ;;  %v10977_v27 = vpop.f32.mrb[205].mxu1  ;;  %v10867_v49 = vpop.f32.mrb[206].mxu0 }
 0x296   : > { %v10978_v33 = vadd.f32 %v10977_v27, %v10976_v25  ;;  %v10979_v8 = vpop.f32.mrb[206].mxu1  ;;  %v10868_v51 = vpop.f32.mrb[207].mxu0 }
 0x297   : > { %v4847_v52 = vadd.f32 %v10866_v31, %v14367_v22  ;;  %v10869_v58 = vadd.f32 %v10868_v51, %v10867_v49  ;;  %v10980_v0 = vpop.f32.mrb[207].mxu1  ;;  %v12865_v22 = vld [vmem:[%s13529_s28 + $0x8b0] ss:$72 sps:$4 sm:$0xff]  }
 0x298   : > { %v10981_v19 = vadd.f32 %v10980_v0, %v10979_v8  ;;  %5255 = vmatmul.mubr.bf16.gmra.mrb[56].mxu0 %v12855_v36 }
 0x299   : > { %v14623_v62 = vadd.f32 %v10978_v33, %v4847_v52  ;;  %v4850_v59 = vadd.f32 %v10869_v58, %v14371_v44  ;;  %7720 = vmatmul.mubr.bf16.gmra.mrb[56].mxu1 %v12858_v15  ;;  %5262 = vmatprep.mubr.bf16.mxu0 %v12867_v6  ;;  %v12876_v44 = vld [vmem:[%s14134_s15 + $0x14] ss:$72 sps:$4 sm:$0xff]   ;;  %v12878_v52 = vld [vmem:[%s15778_s1 + $0x180] sm:$0xff]  }
 0x29a   : > { %7727 = vmatprep.mubr.bf16.mxu1 %v12870_v11  ;;  %v12874_v11 = vld [vmem:[%s14134_s15 + $0x10] ss:$72 sps:$4 sm:$0xff]  }
 0x29b   : > { %v14626_v55 = vadd.f32 %v10981_v19, %v4850_v59  ;;  %v10870_v12 = vpop.f32.mrb[208].mxu0  ;;  %v12880_v19 = vld [vmem:[%s15778_s1 + $0x200] sm:$0xff]  }
 0x29c   : > { %v10982_v53 = vpop.f32.mrb[208].mxu1  ;;  %v10871_v28 = vpop.f32.mrb[209].mxu0  ;;  %v12883_v59 = vld [vmem:[%s14134_s15 + $0x9c] ss:$72 sps:$4 sm:$0xff]  }
 0x29d   : > { %v10872_v32 = vadd.f32 %v10871_v28, %v10870_v12  ;;  %v10983_v29 = vpop.f32.mrb[209].mxu1  ;;  %v10873_v39 = vpop.f32.mrb[210].mxu0 }
 0x29e   : > { %v10984_v50 = vadd.f32 %v10983_v29, %v10982_v53  ;;  %v10985_v10 = vpop.f32.mrb[210].mxu1  ;;  %v10874_v24 = vpop.f32.mrb[211].mxu0 }
 0x29f   : > { %v4855_v5 = vadd.f32 %v10872_v32, %v14377_v47  ;;  %v10875_v41 = vadd.f32 %v10874_v24, %v10873_v39  ;;  %v10986_v25 = vpop.f32.mrb[211].mxu1  ;;  %v12871_v47 = vld [vmem:[%s14134_s15 + $0x8] ss:$72 sps:$4 sm:$0xff]  }
 0x2a0   : > { %v10987_v35 = vadd.f32 %v10986_v25, %v10985_v10  ;;  %5263 = vmatmul.mubr.bf16.gmra.mrb[60].mxu0 %v12865_v22  ;;  %v12886_v22 = vld [vmem:[%s14134_s15 + $0xa4] ss:$72 sps:$4 sm:$0xff]   ;;  %v12909_v10 = vld [vmem:[%s15778_s1 + $0x1d0] sm:$0xff]   ;;  %v12881_v25 = vld [vmem:[%s14134_s15 + $0x98] ss:$72 sps:$4 sm:$0xff]  }
 0x2a1   : > { %v14633_v36 = vadd.f32 %v10984_v50, %v4855_v5  ;;  %v4858_v31 = vadd.f32 %v10875_v41, %v14381_v18  ;;  %7728 = vmatmul.mubr.bf16.gmra.mrb[60].mxu1 %v12868_v45  ;;  %7768 = vmatprep.mubr.bf16.mxu0 %v12873_v20  ;;  %v12893_v32 = vld [vmem:[%s15778_s1 + $0x1c8] sm:$0xff]  }
 0x2a2   : > { %7929 = vmatprep.mubr.bf16.mxu1 %v12876_v44  ;;  %v12895_v39 = vld [vmem:[%s15778_s1 + $0x248] sm:$0xff]   ;;  %v12911_v44 = vld [vmem:[%s15778_s1 + $0x250] sm:$0xff]  }
 0x2a3   : > { %v14636_v27 = vadd.f32 %v10987_v35, %v4858_v31  ;;  %v10876_v49 = vpop.f32.mrb[212].mxu0  ;;  %v12896_v50 = vld [vmem:[%s15778_s1 + $0x208] sm:$0xff]  }
 0x2a4   : > { %v10988_v15 = vpop.f32.mrb[212].mxu1  ;;  %v10877_v6 = vpop.f32.mrb[213].mxu0 }
 0x2a5   : > { %v10878_v33 = vadd.f32 %v10877_v6, %v10876_v49  ;;  %v10989_v8 = vpop.f32.mrb[213].mxu1  ;;  %v10879_v51 = vpop.f32.mrb[214].mxu0  ;;  %v12889_v6 = vld [vmem:[%s14134_s15 + $0x12c] ss:$72 sps:$4 sm:$0xff]  }
 0x2a6   : > { %v10990_v18 = vadd.f32 %v10989_v8, %v10988_v15  ;;  %v10991_v58 = vpop.f32.mrb[214].mxu1  ;;  %v10880_v0 = vpop.f32.mrb[215].mxu0  ;;  %v12884_v15 = vld [vmem:[%s14134_s15 + $0xa0] ss:$72 sps:$4 sm:$0xff]  }
 0x2a7   : > { %v4863_v12 = vadd.f32 %v10878_v33, %v14408_v9  ;;  %v10881_v53 = vadd.f32 %v10880_v0, %v10879_v51  ;;  %v10992_v28 = vpop.f32.mrb[215].mxu1  ;;  %v12894_v9 = vld [vmem:[%s15778_s1 + $0x188] sm:$0xff]   ;;  %v12892_v51 = vld [vmem:[%s14134_s15 + $0x134] ss:$72 sps:$4 sm:$0xff]  }
 0x2a8   : > { %v10993_v29 = vadd.f32 %v10992_v28, %v10991_v58  ;;  %7769 = vmatmul.mubr.bf16.vlgmr.msra.gmra.mrb[64].mxu0 %v12871_v47  ;;  %v12912_v0 = vld [vmem:[%s15778_s1 + $0x210] sm:$0xff]   ;;  %v12926_v28 = vld [vmem:[%s15778_s1 + $0x198] sm:$0xff]  }
 0x2a9   : > { %v14655_v45 = vadd.f32 %v10990_v18, %v4863_v12  ;;  %v4866_v20 = vadd.f32 %v10881_v53, %v14412_v3  ;;  %7930 = vmatmul.mubr.bf16.vlgmr.msra.gmra.mrb[64].mxu1 %v12874_v11  ;;  %11503 = vmatpush3.bf16.msra.mxu0 %v12878_v52  ;;  %v12910_v11 = vld [vmem:[%s15778_s1 + $0x190] sm:$0xff]   ;;  %v12927_v12 = vld [vmem:[%s15778_s1 + $0x258] sm:$0xff]  }
 0x2aa   : > { %11615 = vmatpush3.bf16.msra.mxu1 %v12880_v19  ;;  %7776 = vmatprep.mubr.bf16.mxu0 %v12883_v59  ;;  %v12925_v19 = vld [vmem:[%s15778_s1 + $0x1d8] sm:$0xff]  }
 0x2ab   : > { %v14667_v24 = vadd.f32 %v10993_v29, %v4866_v20  ;;  %v10882_v3 = vpop.f32.mrb[216].mxu0  ;;  %7937 = vmatprep.mubr.bf16.mxu1 %v12886_v22  ;;  %11504 = vmatprep.subr.bf16.mxu0 %v12893_v32  ;;  %v12941_v29 = vld [vmem:[%s15778_s1 + $0x1e0] sm:$0xff]  }
 0x2ac   : > { %v10994_v5 = vpop.f32.mrb[216].mxu1  ;;  %v10883_v41 = vpop.f32.mrb[217].mxu0  ;;  %11616 = vmatprep.subr.bf16.mxu1 %v12895_v39 }
 0x2ad   : > { %v10884_v35 = vadd.f32 %v10883_v41, %v10882_v3  ;;  %v10995_v31 = vpop.f32.mrb[217].mxu1  ;;  %v10885_v49 = vpop.f32.mrb[218].mxu0  ;;  %11505 = vmatpush3.bf16.msra.mxu0 %v12894_v9  ;;  %v12887_v9 = vld [vmem:[%s14134_s15 + $0x128] ss:$72 sps:$4 sm:$0xff]   ;;  %v12899_v41 = vld [vmem:[%s14134_s15 + $0x1bc] ss:$72 sps:$4 sm:$0xff]  }
 0x2ae   : > { %v10996_v47 = vadd.f32 %v10995_v31, %v10994_v5  ;;  %v10997_v33 = vpop.f32.mrb[218].mxu1  ;;  %v10886_v8 = vpop.f32.mrb[219].mxu0  ;;  %11617 = vmatpush3.bf16.msra.mxu1 %v12896_v50  ;;  %11506 = vmatprep.subr.bf16.mxu0 %v12909_v10  ;;  %v12943_v50 = vld [vmem:[%s15778_s1 + $0x260] sm:$0xff]   ;;  %v12890_v5 = vld [vmem:[%s14134_s15 + $0x130] ss:$72 sps:$4 sm:$0xff]  }
 0x2af   : > { %v4871_v52 = vadd.f32 %v10884_v35, %v14436_v1  ;;  %v10887_v18 = vadd.f32 %v10886_v8, %v10885_v49  ;;  %v10998_v58 = vpop.f32.mrb[219].mxu1  ;;  %11618 = vmatprep.subr.bf16.mxu1 %v12911_v44  ;;  %v12902_v49 = vld [vmem:[%s14134_s15 + $0x1c4] ss:$72 sps:$4 sm:$0xff]  }
 0x2b0   : > { %v10999_v59 = vadd.f32 %v10998_v58, %v10997_v33  ;;  %7777 = vmatmul.mubr.bf16.gmra.mrb[68].mxu0 %v12881_v25  ;;  %v12944_v8 = vld [vmem:[%s15778_s1 + $0x220] sm:$0xff]   ;;  %v12958_v58 = vld [vmem:[%s15778_s1 + $0x1a8] sm:$0xff]  }
 0x2b1   : > { %v14689_v53 = vadd.f32 %v10996_v47, %v4871_v52  ;;  %v4874_v1 = vadd.f32 %v10887_v18, %v14449_v26  ;;  %7938 = vmatmul.mubr.bf16.gmra.mrb[68].mxu1 %v12884_v15  ;;  %7784 = vmatprep.mubr.bf16.mxu0 %v12889_v6  ;;  %v12928_v26 = vld [vmem:[%s15778_s1 + $0x218] sm:$0xff]   ;;  %v12942_v15 = vld [vmem:[%s15778_s1 + $0x1a0] sm:$0xff]   ;;  %v12959_v52 = vld [vmem:[%s15778_s1 + $0x268] sm:$0xff]  }
 0x2b2   : > { %7945 = vmatprep.mubr.bf16.mxu1 %v12892_v51  ;;  %11507 = vmatpush3.bf16.msra.mxu0 %v12910_v11  ;;  %v12957_v51 = vld [vmem:[%s15778_s1 + $0x1e8] sm:$0xff]  }
 0x2b3   : > { %v14695_v22 = vadd.f32 %v10999_v59, %v4874_v1  ;;  %v10888_v32 = vpop.f32.mrb[220].mxu0  ;;  %11619 = vmatpush3.bf16.msra.mxu1 %v12912_v0  ;;  %11508 = vmatprep.subr.bf16.mxu0 %v12925_v19  ;;  %v12973_v59 = vld [vmem:[%s15778_s1 + $0x1f0] sm:$0xff]  }
 0x2b4   : > { %v11000_v39 = vpop.f32.mrb[220].mxu1  ;;  %v10889_v20 = vpop.f32.mrb[221].mxu0  ;;  %11620 = vmatprep.subr.bf16.mxu1 %v12927_v12 }
 0x2b5   : > { %v10890_v10 = vadd.f32 %v10889_v20, %v10888_v32  ;;  %v11001_v3 = vpop.f32.mrb[221].mxu1  ;;  %v10891_v44 = vpop.f32.mrb[222].mxu0  ;;  %v12975_v32 = vld [vmem:[%s15778_s1 + $0x270] sm:$0xff]   ;;  %v12900_v20 = vld [vmem:[%s14134_s15 + $0x1c0] ss:$72 sps:$4 sm:$0xff]  }
 0x2b6   : > { %v11002_v25 = vadd.f32 %v11001_v3, %v11000_v39  ;;  %v11003_v35 = vpop.f32.mrb[222].mxu1  ;;  %v10892_v31 = vpop.f32.mrb[223].mxu0  ;;  %11509 = vmatpush3.bf16.msra.mxu0 %v12926_v28  ;;  %v12897_v28 = vld [vmem:[%s14134_s15 + $0x1b8] ss:$72 sps:$4 sm:$0xff]  }
 0x2b7   : > { %v4879_v6 = vadd.f32 %v10890_v10, %v14470_v37  ;;  %v10893_v47 = vadd.f32 %v10892_v31, %v10891_v44  ;;  %v11004_v33 = vpop.f32.mrb[223].mxu1  ;;  %11621 = vmatpush3.bf16.msra.mxu1 %v12928_v26  ;;  %11510 = vmatprep.subr.bf16.mxu0 %v12941_v29  ;;  %v12908_v44 = vld [vmem:[%s14134_s15 + $0x254] ss:$72 sps:$4 sm:$0xff]  }
 0x2b8   : > { %v11005_v11 = vadd.f32 %v11004_v33, %v11003_v35  ;;  %7785 = vmatmul.mubr.bf16.gmra.mrb[72].mxu0 %v12887_v9  ;;  %11622 = vmatprep.subr.bf16.mxu1 %v12943_v50  ;;  %v12905_v9 = vld [vmem:[%s14134_s15 + $0x24c] ss:$72 sps:$4 sm:$0xff]   ;;  %v12990_v33 = vld [vmem:[%s15778_s1 + $0x1b8] sm:$0xff]  }
 0x2b9   : > { %v14723_v37 = vadd.f32 %v11002_v25, %v4879_v6  ;;  %v4882_v18 = vadd.f32 %v10893_v47, %v14474_v21  ;;  %7946 = vmatmul.mubr.bf16.gmra.mrb[72].mxu1 %v12890_v5  ;;  %7792 = vmatprep.mubr.bf16.mxu0 %v12899_v41  ;;  %v12960_v21 = vld [vmem:[%s15778_s1 + $0x228] sm:$0xff]   ;;  %v12974_v5 = vld [vmem:[%s15778_s1 + $0x1b0] sm:$0xff]   ;;  %v12991_v6 = vld [vmem:[%s15778_s1 + $0x278] sm:$0xff]  }
 0x2ba   : > { %7953 = vmatprep.mubr.bf16.mxu1 %v12902_v49  ;;  %11511 = vmatpush3.bf16.msra.mxu0 %v12942_v15  ;;  %v12976_v31 = vld [vmem:[%s15778_s1 + $0x230] sm:$0xff]   ;;  %v12989_v49 = vld [vmem:[%s15778_s1 + $0x1f8] sm:$0xff]  }
 0x2bb   : > { %v14729_v0 = vadd.f32 %v11005_v11, %v4882_v18  ;;  %v10894_v19 = vpop.f32.mrb[224].mxu0  ;;  %11623 = vmatpush3.bf16.msra.mxu1 %v12944_v8  ;;  %11512 = vmatprep.subr.bf16.mxu0 %v12957_v51  ;;  %v13005_v11 = vld [vmem:[%s15778_s1 + $0x2c0] sm:$0xff]  }
 0x2bc   : > { %v11006_v12 = vpop.f32.mrb[224].mxu1  ;;  %v10895_v1 = vpop.f32.mrb[225].mxu0  ;;  %11624 = vmatprep.subr.bf16.mxu1 %v12959_v52 }
 0x2bd   : > { %v10896_v26 = vadd.f32 %v10895_v1, %v10894_v19  ;;  %v11007_v29 = vpop.f32.mrb[225].mxu1  ;;  %v10897_v39 = vpop.f32.mrb[226].mxu0  ;;  %v13007_v19 = vld [vmem:[%s15778_s1 + $0x340] sm:$0xff]   ;;  %v12906_v1 = vld [vmem:[%s14134_s15 + $0x250] ss:$72 sps:$4 sm:$0xff]  }
 0x2be   : > { %v11008_v50 = vadd.f32 %v11007_v29, %v11006_v12  ;;  %v11009_v10 = vpop.f32.mrb[226].mxu1  ;;  %v10898_v3 = vpop.f32.mrb[227].mxu0  ;;  %11513 = vmatpush3.bf16.msra.mxu0 %v12958_v58  ;;  %v12903_v58 = vld [vmem:[%s14134_s15 + $0x248] ss:$72 sps:$4 sm:$0xff]  }
 0x2bf   : > { %v4887_v41 = vadd.f32 %v10896_v26, %v14504_v30  ;;  %v10899_v25 = vadd.f32 %v10898_v3, %v10897_v39  ;;  %v11010_v35 = vpop.f32.mrb[227].mxu1  ;;  %11625 = vmatpush3.bf16.msra.mxu1 %v12960_v21  ;;  %11514 = vmatprep.subr.bf16.mxu0 %v12973_v59  ;;  %v12918_v39 = vld [vmem:[%s14134_s15 + $0x2e4] ss:$72 sps:$4 sm:$0xff]  }
 0x2c0   : > { %v11011_v15 = vadd.f32 %v11010_v35, %v11009_v10  ;;  %7793 = vmatmul.mubr.bf16.gmra.mrb[76].mxu0 %v12897_v28  ;;  %11626 = vmatprep.subr.bf16.mxu1 %v12975_v32  ;;  %v12915_v28 = vld [vmem:[%s14134_s15 + $0x2dc] ss:$72 sps:$4 sm:$0xff]   ;;  %v12913_v35 = vld [vmem:[%s14134_s15 + $0x2d8] ss:$72 sps:$4 sm:$0xff]  }
 0x2c1   : > { %v14757_v30 = vadd.f32 %v11008_v50, %v4887_v41  ;;  %v4890_v47 = vadd.f32 %v10899_v25, %v14517_v54  ;;  %7954 = vmatmul.mubr.bf16.gmra.mrb[76].mxu1 %v12900_v20  ;;  %7800 = vmatprep.mubr.bf16.mxu0 %v12905_v9  ;;  %v12992_v54 = vld [vmem:[%s15778_s1 + $0x238] sm:$0xff]  }
 0x2c2   : > { %7961 = vmatprep.mubr.bf16.mxu1 %v12908_v44  ;;  %11515 = vmatpush3.bf16.msra.mxu0 %v12974_v5 }
 0x2c3   : > { %v14763_v8 = vadd.f32 %v11011_v15, %v4890_v47  ;;  %v10900_v51 = vpop.f32.mrb[228].mxu0  ;;  %11627 = vmatpush3.bf16.msra.mxu1 %v12976_v31  ;;  %11516 = vmatprep.subr.bf16.mxu0 %v12989_v49  ;;  %v12921_v47 = vld [vmem:[%s14134_s15 + $0x36c] ss:$72 sps:$4 sm:$0xff]  }
 0x2c4   : > { %v11012_v52 = vpop.f32.mrb[228].mxu1  ;;  %v10901_v18 = vpop.f32.mrb[229].mxu0  ;;  %11628 = vmatprep.subr.bf16.mxu1 %v12991_v6  ;;  %v12916_v6 = vld [vmem:[%s14134_s15 + $0x2e0] ss:$72 sps:$4 sm:$0xff]  }
 0x2c5   : > { %v10902_v21 = vadd.f32 %v10901_v18, %v10900_v51  ;;  %v11013_v59 = vpop.f32.mrb[229].mxu1  ;;  %v10903_v12 = vpop.f32.mrb[230].mxu0 }
 0x2c6   : > { %v11014_v32 = vadd.f32 %v11013_v59, %v11012_v52  ;;  %v11015_v26 = vpop.f32.mrb[230].mxu1  ;;  %v10904_v29 = vpop.f32.mrb[231].mxu0  ;;  %11517 = vmatpush3.bf16.msra.mxu0 %v12990_v33 }
 0x2c7   : > { %v4895_v20 = vadd.f32 %v10902_v21, %v14523_v60  ;;  %v10905_v9 = vadd.f32 %v10904_v29, %v10903_v12  ;;  %v11016_v50 = vpop.f32.mrb[231].mxu1  ;;  %11629 = vmatpush3.bf16.msra.mxu1 %v12992_v54  ;;  %11726 = vmatprep.subr.bf16.mxu0 %v13005_v11 }
 0x2c8   : > { %v11017_v10 = vadd.f32 %v11016_v50, %v11015_v26  ;;  %7801 = vmatmul.mubr.bf16.gmra.mrb[80].mxu0 %v12903_v58  ;;  %11838 = vmatprep.subr.bf16.mxu1 %v13007_v19 }
 0x2c9   : > { %v14779_v3 = vadd.f32 %v11014_v32, %v4895_v20  ;;  %v4898_v44 = vadd.f32 %v10905_v9, %v14526_v14  ;;  %7962 = vmatmul.mubr.bf16.gmra.mrb[80].mxu1 %v12906_v1  ;;  %7808 = vmatprep.mubr.bf16.mxu0 %v12915_v28  ;;  %v12924_v14 = vld [vmem:[%s14134_s15 + $0x374] ss:$72 sps:$4 sm:$0xff]  }
 0x2ca   : > { %7969 = vmatprep.mubr.bf16.mxu1 %v12918_v39  ;;  %v12922_v39 = vld [vmem:[%s14134_s15 + $0x370] ss:$72 sps:$4 sm:$0xff]   ;;  %v12931_v20 = vld [vmem:[%s14134_s15 + $0x3fc] ss:$72 sps:$4 sm:$0xff]  }
 0x2cb   : > { %v14782_v5 = vadd.f32 %v11017_v10, %v4898_v44  ;;  %v10906_v60 = vpop.f32.mrb[232].mxu0 }
 0x2cc   : > { %v11018_v41 = vpop.f32.mrb[232].mxu1  ;;  %v10907_v25 = vpop.f32.mrb[233].mxu0 }
 0x2cd   : > { %v10908_v31 = vadd.f32 %v10907_v25, %v10906_v60  ;;  %v11019_v49 = vpop.f32.mrb[233].mxu1  ;;  %v10909_v15 = vpop.f32.mrb[234].mxu0 }
 0x2ce   : > { %v11020_v33 = vadd.f32 %v11019_v49, %v11018_v41  ;;  %v11021_v51 = vpop.f32.mrb[234].mxu1  ;;  %v10910_v54 = vpop.f32.mrb[235].mxu0 }
 0x2cf   : > { %v4903_v11 = vadd.f32 %v10908_v31, %v14533_v4  ;;  %v10911_v52 = vadd.f32 %v10910_v54, %v10909_v15  ;;  %v11022_v18 = vpop.f32.mrb[235].mxu1  ;;  %v12919_v4 = vld [vmem:[%s14134_s15 + $0x368] ss:$72 sps:$4 sm:$0xff]  }
 0x2d0   : > { %v11023_v58 = vadd.f32 %v11022_v18, %v11021_v51  ;;  %7809 = vmatmul.mubr.bf16.gmra.mrb[84].mxu0 %v12913_v35 }
 0x2d1   : > { %v14789_v19 = vadd.f32 %v11020_v33, %v4903_v11  ;;  %v4906_v21 = vadd.f32 %v10911_v52, %v14537_v38  ;;  %7970 = vmatmul.mubr.bf16.gmra.mrb[84].mxu1 %v12916_v6  ;;  %7816 = vmatprep.mubr.bf16.mxu0 %v12921_v47  ;;  %v12934_v38 = vld [vmem:[%s14134_s15 + $0x404] ss:$72 sps:$4 sm:$0xff]  }
 0x2d2   : > { %7977 = vmatprep.mubr.bf16.mxu1 %v12924_v14  ;;  %v12932_v14 = vld [vmem:[%s14134_s15 + $0x400] ss:$72 sps:$4 sm:$0xff]   ;;  %v12937_v11 = vld [vmem:[%s14134_s15 + $0x48c] ss:$72 sps:$4 sm:$0xff]  }
 0x2d3   : > { %v14792_v59 = vadd.f32 %v11023_v58, %v4906_v21  ;;  %v10912_v12 = vpop.f32.mrb[236].mxu0 }
 0x2d4   : > { %v11024_v1 = vpop.f32.mrb[236].mxu1  ;;  %v10913_v28 = vpop.f32.mrb[237].mxu0 }
 0x2d5   : > { %v10914_v32 = vadd.f32 %v10913_v28, %v10912_v12  ;;  %v11025_v26 = vpop.f32.mrb[237].mxu1  ;;  %v10915_v29 = vpop.f32.mrb[238].mxu0 }
 0x2d6   : > { %v11026_v9 = vadd.f32 %v11025_v26, %v11024_v1  ;;  %v11027_v50 = vpop.f32.mrb[238].mxu1  ;;  %v10916_v10 = vpop.f32.mrb[239].mxu0 }
 0x2d7   : > { %v4911_v44 = vadd.f32 %v10914_v32, %v14543_v43  ;;  %v10917_v60 = vadd.f32 %v10916_v10, %v10915_v29  ;;  %v11028_v41 = vpop.f32.mrb[239].mxu1  ;;  %v12929_v43 = vld [vmem:[%s14134_s15 + $0x3f8] ss:$72 sps:$4 sm:$0xff]  }
 0x2d8   : > { %v11029_v25 = vadd.f32 %v11028_v41, %v11027_v50  ;;  %7817 = vmatmul.mubr.bf16.gmra.mrb[88].mxu0 %v12919_v4 }
 0x2d9   : > { %v14799_v35 = vadd.f32 %v11026_v9, %v4911_v44  ;;  %v4914_v31 = vadd.f32 %v10917_v60, %v14546_v23  ;;  %7978 = vmatmul.mubr.bf16.gmra.mrb[88].mxu1 %v12922_v39  ;;  %7824 = vmatprep.mubr.bf16.mxu0 %v12931_v20  ;;  %v12940_v23 = vld [vmem:[%s14134_s15 + $0x494] ss:$72 sps:$4 sm:$0xff]  }
 0x2da   : > { %7985 = vmatprep.mubr.bf16.mxu1 %v12934_v38  ;;  %v12938_v38 = vld [vmem:[%s14134_s15 + $0x490] ss:$72 sps:$4 sm:$0xff]   ;;  %v12947_v44 = vld [vmem:[%s14134_s15 + $0x51c] ss:$72 sps:$4 sm:$0xff]  }
 0x2db   : > { %v14802_v49 = vadd.f32 %v11029_v25, %v4914_v31  ;;  %v10918_v15 = vpop.f32.mrb[240].mxu0 }
 0x2dc   : > { %v11030_v6 = vpop.f32.mrb[240].mxu1  ;;  %v10919_v47 = vpop.f32.mrb[241].mxu0 }
 0x2dd   : > { %v10920_v33 = vadd.f32 %v10919_v47, %v10918_v15  ;;  %v11031_v51 = vpop.f32.mrb[241].mxu1  ;;  %v10921_v54 = vpop.f32.mrb[242].mxu0 }
 0x2de   : > { %v11032_v52 = vadd.f32 %v11031_v51, %v11030_v6  ;;  %v11033_v18 = vpop.f32.mrb[242].mxu1  ;;  %v10922_v58 = vpop.f32.mrb[243].mxu0 }
 0x2df   : > { %v4919_v21 = vadd.f32 %v10920_v33, %v14553_v13  ;;  %v10923_v12 = vadd.f32 %v10922_v58, %v10921_v54  ;;  %v11034_v1 = vpop.f32.mrb[243].mxu1  ;;  %v12935_v13 = vld [vmem:[%s14134_s15 + $0x488] ss:$72 sps:$4 sm:$0xff]  }
 0x2e0   : > { %v11035_v28 = vadd.f32 %v11034_v1, %v11033_v18  ;;  %7825 = vmatmul.mubr.bf16.gmra.mrb[92].mxu0 %v12929_v43 }
 0x2e1   : > { %v14809_v4 = vadd.f32 %v11032_v52, %v4919_v21  ;;  %v4922_v32 = vadd.f32 %v10923_v12, %v14556_v57  ;;  %7986 = vmatmul.mubr.bf16.gmra.mrb[92].mxu1 %v12932_v14  ;;  %7832 = vmatprep.mubr.bf16.mxu0 %v12937_v11  ;;  %v12950_v57 = vld [vmem:[%s14134_s15 + $0x524] ss:$72 sps:$4 sm:$0xff]  }
 0x2e2   : > { %7993 = vmatprep.mubr.bf16.mxu1 %v12940_v23  ;;  %v12948_v23 = vld [vmem:[%s14134_s15 + $0x520] ss:$72 sps:$4 sm:$0xff]   ;;  %v12953_v21 = vld [vmem:[%s14134_s15 + $0x5ac] ss:$72 sps:$4 sm:$0xff]  }
 0x2e3   : > { %v14812_v26 = vadd.f32 %v11035_v28, %v4922_v32  ;;  %v10924_v29 = vpop.f32.mrb[244].mxu0 }
 0x2e4   : > { %v11036_v39 = vpop.f32.mrb[244].mxu1  ;;  %v10925_v20 = vpop.f32.mrb[245].mxu0 }
 0x2e5   : > { %v10926_v9 = vadd.f32 %v10925_v20, %v10924_v29  ;;  %v11037_v50 = vpop.f32.mrb[245].mxu1  ;;  %v10927_v10 = vpop.f32.mrb[246].mxu0 }
 0x2e6   : > { %v11038_v60 = vadd.f32 %v11037_v50, %v11036_v39  ;;  %v11039_v41 = vpop.f32.mrb[246].mxu1  ;;  %v10928_v25 = vpop.f32.mrb[247].mxu0 }
 0x2e7   : > { %v4927_v31 = vadd.f32 %v10926_v9, %v14563_v42  ;;  %v10929_v15 = vadd.f32 %v10928_v25, %v10927_v10  ;;  %v11040_v6 = vpop.f32.mrb[247].mxu1  ;;  %v12945_v42 = vld [vmem:[%s14134_s15 + $0x518] ss:$72 sps:$4 sm:$0xff]  }
 0x2e8   : > { %v11041_v47 = vadd.f32 %v11040_v6, %v11039_v41  ;;  %7833 = vmatmul.mubr.bf16.gmra.mrb[96].mxu0 %v12935_v13 }
 0x2e9   : > { %v14819_v43 = vadd.f32 %v11038_v60, %v4927_v31  ;;  %v4930_v33 = vadd.f32 %v10929_v15, %v14566_v56  ;;  %7994 = vmatmul.mubr.bf16.gmra.mrb[96].mxu1 %v12938_v38  ;;  %7840 = vmatprep.mubr.bf16.mxu0 %v12947_v44  ;;  %v12956_v56 = vld [vmem:[%s14134_s15 + $0x5b4] ss:$72 sps:$4 sm:$0xff]  }
 0x2ea   : > { %8001 = vmatprep.mubr.bf16.mxu1 %v12950_v57  ;;  %v12954_v57 = vld [vmem:[%s14134_s15 + $0x5b0] ss:$72 sps:$4 sm:$0xff]   ;;  %v12963_v31 = vld [vmem:[%s14134_s15 + $0x63c] ss:$72 sps:$4 sm:$0xff]  }
 0x2eb   : > { %v14822_v51 = vadd.f32 %v11041_v47, %v4930_v33  ;;  %v10930_v54 = vpop.f32.mrb[248].mxu0 }
 0x2ec   : > { %v11042_v14 = vpop.f32.mrb[248].mxu1  ;;  %v10931_v11 = vpop.f32.mrb[249].mxu0 }
 0x2ed   : > { %v10932_v52 = vadd.f32 %v10931_v11, %v10930_v54  ;;  %v11043_v18 = vpop.f32.mrb[249].mxu1  ;;  %v10933_v58 = vpop.f32.mrb[250].mxu0 }
 0x2ee   : > { %v11044_v12 = vadd.f32 %v11043_v18, %v11042_v14  ;;  %v11045_v1 = vpop.f32.mrb[250].mxu1  ;;  %v10934_v28 = vpop.f32.mrb[251].mxu0 }
 0x2ef   : > { %v4935_v32 = vadd.f32 %v10932_v52, %v14573_v7  ;;  %v10935_v29 = vadd.f32 %v10934_v28, %v10933_v58  ;;  %v11046_v39 = vpop.f32.mrb[251].mxu1  ;;  %v12951_v7 = vld [vmem:[%s14134_s15 + $0x5a8] ss:$72 sps:$4 sm:$0xff]  }
 0x2f0   : > { %v11047_v20 = vadd.f32 %v11046_v39, %v11045_v1  ;;  %7841 = vmatmul.mubr.bf16.gmra.mrb[100].mxu0 %v12945_v42 }
 0x2f1   : > { %v14829_v13 = vadd.f32 %v11044_v12, %v4935_v32  ;;  %v4938_v9 = vadd.f32 %v10935_v29, %v14576_v17  ;;  %8002 = vmatmul.mubr.bf16.gmra.mrb[100].mxu1 %v12948_v23  ;;  %7848 = vmatprep.mubr.bf16.mxu0 %v12953_v21  ;;  %v12966_v17 = vld [vmem:[%s14134_s15 + $0x644] ss:$72 sps:$4 sm:$0xff]  }
 0x2f2   : > { %8009 = vmatprep.mubr.bf16.mxu1 %v12956_v56  ;;  %v12964_v56 = vld [vmem:[%s14134_s15 + $0x640] ss:$72 sps:$4 sm:$0xff]   ;;  %v12969_v32 = vld [vmem:[%s14134_s15 + $0x6cc] ss:$72 sps:$4 sm:$0xff]  }
 0x2f3   : > { %v14832_v50 = vadd.f32 %v11047_v20, %v4938_v9  ;;  %v10936_v10 = vpop.f32.mrb[252].mxu0 }
 0x2f4   : > { %v11048_v38 = vpop.f32.mrb[252].mxu1  ;;  %v10937_v44 = vpop.f32.mrb[253].mxu0 }
 0x2f5   : > { %v10938_v60 = vadd.f32 %v10937_v44, %v10936_v10  ;;  %v11049_v41 = vpop.f32.mrb[253].mxu1  ;;  %v10939_v25 = vpop.f32.mrb[254].mxu0 }
 0x2f6   : > { %v11050_v15 = vadd.f32 %v11049_v41, %v11048_v38  ;;  %v11051_v6 = vpop.f32.mrb[254].mxu1  ;;  %v10940_v47 = vpop.f32.mrb[255].mxu0 }
 0x2f7   : > { %v4943_v33 = vadd.f32 %v10938_v60, %v14583_v46  ;;  %v10941_v54 = vadd.f32 %v10940_v47, %v10939_v25  ;;  %v11052_v14 = vpop.f32.mrb[255].mxu1  ;;  %v12961_v46 = vld [vmem:[%s14134_s15 + $0x638] ss:$72 sps:$4 sm:$0xff]  }
 0x2f8   : > { %v11053_v11 = vadd.f32 %v11052_v14, %v11051_v6  ;;  %7849 = vmatmul.mubr.bf16.gmra.mrb[104].mxu0 %v12951_v7 }
 0x2f9   : > { %v14839_v42 = vadd.f32 %v11050_v15, %v4943_v33  ;;  %v4946_v52 = vadd.f32 %v10941_v54, %v14586_v63  ;;  %8010 = vmatmul.mubr.bf16.gmra.mrb[104].mxu1 %v12954_v57  ;;  %7856 = vmatprep.mubr.bf16.mxu0 %v12963_v31  ;;  %v12972_v63 = vld [vmem:[%s14134_s15 + $0x6d4] ss:$72 sps:$4 sm:$0xff]  }
 0x2fa   : > { %8017 = vmatprep.mubr.bf16.mxu1 %v12966_v17  ;;  %v12970_v17 = vld [vmem:[%s14134_s15 + $0x6d0] ss:$72 sps:$4 sm:$0xff]   ;;  %v12979_v33 = vld [vmem:[%s14134_s15 + $0x75c] ss:$72 sps:$4 sm:$0xff]  }
 0x2fb   : > { %v14842_v18 = vadd.f32 %v11053_v11, %v4946_v52  ;;  %v11070_v58 = vpop.f32.mrb[0].mxu0  ;;  %v12982_v11 = vld [vmem:[%s14134_s15 + $0x764] ss:$72 sps:$4 sm:$0xff]  }
 0x2fc   : > { %v11182_v23 = vpop.f32.mrb[0].mxu1  ;;  %v11071_v21 = vpop.f32.mrb[1].mxu0 }
 0x2fd   : > { %v11072_v12 = vadd.f32 %v11071_v21, %v11070_v58  ;;  %v11183_v1 = vpop.f32.mrb[1].mxu1  ;;  %v11073_v28 = vpop.f32.mrb[2].mxu0 }
 0x2fe   : > { %v11184_v29 = vadd.f32 %v11183_v1, %v11182_v23  ;;  %v11185_v39 = vpop.f32.mrb[2].mxu1  ;;  %v11074_v20 = vpop.f32.mrb[3].mxu0 }
 0x2ff   : > { %v5145_v9 = vadd.f32 %v11072_v12, %v14593_v16  ;;  %v11075_v10 = vadd.f32 %v11074_v20, %v11073_v28  ;;  %v11186_v38 = vpop.f32.mrb[3].mxu1  ;;  %v12967_v16 = vld [vmem:[%s14134_s15 + $0x6c8] ss:$72 sps:$4 sm:$0xff]  }
 0x300   : > { %v11187_v44 = vadd.f32 %v11186_v38, %v11185_v39  ;;  %7857 = vmatmul.mubr.bf16.gmra.mrb[108].mxu0 %v12961_v46 }
 0x301   : > { %v5148_v7 = vadd.f32 %v11075_v10, %v14596_v34  ;;  %8018 = vmatmul.mubr.bf16.gmra.mrb[108].mxu1 %v12964_v56  ;;  %7864 = vmatprep.mubr.bf16.mxu0 %v12969_v32  ;;  %v14850_v60 = vadd.f32 %v11184_v29, %v5145_v9  ;;  %v12985_v9 = vld [vmem:[%s14134_s15 + $0x7ec] ss:$72 sps:$4 sm:$0xff]  }
 0x302   : > { %8025 = vmatprep.mubr.bf16.mxu1 %v12972_v63  ;;  %v12980_v63 = vld [vmem:[%s14134_s15 + $0x760] ss:$72 sps:$4 sm:$0xff]  }
 0x303   : > { %v11076_v41 = vpop.f32.mrb[4].mxu0  ;;  %v14852_v25 = vadd.f32 %v11187_v44, %v5148_v7  ;;  %v12988_v44 = vld [vmem:[%s14134_s15 + $0x7f4] ss:$72 sps:$4 sm:$0xff]  }
 0x304   : > { %v11188_v57 = vpop.f32.mrb[4].mxu1  ;;  %v11077_v31 = vpop.f32.mrb[5].mxu0 }
 0x305   : > { %v11078_v15 = vadd.f32 %v11077_v31, %v11076_v41  ;;  %v11189_v6 = vpop.f32.mrb[5].mxu1  ;;  %v11079_v47 = vpop.f32.mrb[6].mxu0 }
 0x306   : > { %v11190_v54 = vadd.f32 %v11189_v6, %v11188_v57  ;;  %v11191_v14 = vpop.f32.mrb[6].mxu1  ;;  %v11080_v34 = vpop.f32.mrb[7].mxu0 }
 0x307   : > { %v5153_v52 = vadd.f32 %v11078_v15, %v14603_v48  ;;  %v11081_v58 = vadd.f32 %v11080_v34, %v11079_v47  ;;  %v11192_v23 = vpop.f32.mrb[7].mxu1  ;;  %v12977_v48 = vld [vmem:[%s14134_s15 + $0x758] ss:$72 sps:$4 sm:$0xff]  }
 0x308   : > { %v11193_v21 = vadd.f32 %v11192_v23, %v11191_v14  ;;  %7865 = vmatmul.mubr.bf16.gmra.mrb[112].mxu0 %v12967_v16 }
 0x309   : > { %v5156_v46 = vadd.f32 %v11081_v58, %v14606_v2  ;;  %8026 = vmatmul.mubr.bf16.gmra.mrb[112].mxu1 %v12970_v17  ;;  %7872 = vmatprep.mubr.bf16.mxu0 %v12979_v33  ;;  %v14860_v12 = vadd.f32 %v11190_v54, %v5153_v52  ;;  %v12995_v52 = vld [vmem:[%s14134_s15 + $0x87c] ss:$72 sps:$4 sm:$0xff]  }
 0x30a   : > { %8033 = vmatprep.mubr.bf16.mxu1 %v12982_v11  ;;  %v12986_v11 = vld [vmem:[%s14134_s15 + $0x7f0] ss:$72 sps:$4 sm:$0xff]  }
 0x30b   : > { %v11082_v1 = vpop.f32.mrb[8].mxu0  ;;  %v14862_v28 = vadd.f32 %v11193_v21, %v5156_v46  ;;  %v12998_v21 = vld [vmem:[%s14134_s15 + $0x884] ss:$72 sps:$4 sm:$0xff]  }
 0x30c   : > { %v11194_v56 = vpop.f32.mrb[8].mxu1  ;;  %v11083_v32 = vpop.f32.mrb[9].mxu0 }
 0x30d   : > { %v11084_v29 = vadd.f32 %v11083_v32, %v11082_v1  ;;  %v11195_v39 = vpop.f32.mrb[9].mxu1  ;;  %v11085_v20 = vpop.f32.mrb[10].mxu0 }
 0x30e   : > { %v11196_v10 = vadd.f32 %v11195_v39, %v11194_v56  ;;  %v11197_v38 = vpop.f32.mrb[10].mxu1  ;;  %v11086_v2 = vpop.f32.mrb[11].mxu0 }
 0x30f   : > { %v5161_v7 = vadd.f32 %v11084_v29, %v14613_v61  ;;  %v11087_v41 = vadd.f32 %v11086_v2, %v11085_v20  ;;  %v11198_v57 = vpop.f32.mrb[11].mxu1  ;;  %v12983_v61 = vld [vmem:[%s14134_s15 + $0x7e8] ss:$72 sps:$4 sm:$0xff]  }
 0x310   : > { %v11199_v31 = vadd.f32 %v11198_v57, %v11197_v38  ;;  %7873 = vmatmul.mubr.bf16.gmra.mrb[116].mxu0 %v12977_v48 }
 0x311   : > { %v5164_v16 = vadd.f32 %v11087_v41, %v14616_v40  ;;  %8034 = vmatmul.mubr.bf16.gmra.mrb[116].mxu1 %v12980_v63  ;;  %7880 = vmatprep.mubr.bf16.mxu0 %v12985_v9  ;;  %v14870_v15 = vadd.f32 %v11196_v10, %v5161_v7  ;;  %v13001_v7 = vld [vmem:[%s14134_s15 + $0x1c] ss:$72 sps:$4 sm:$0xff]  }
 0x312   : > { %8041 = vmatprep.mubr.bf16.mxu1 %v12988_v44  ;;  %v12996_v44 = vld [vmem:[%s14134_s15 + $0x880] ss:$72 sps:$4 sm:$0xff]  }
 0x313   : > { %v11088_v6 = vpop.f32.mrb[12].mxu0  ;;  %v14872_v47 = vadd.f32 %v11199_v31, %v5164_v16  ;;  %v13004_v31 = vld [vmem:[%s14134_s15 + $0x24] ss:$72 sps:$4 sm:$0xff]  }
 0x314   : > { %v11200_v17 = vpop.f32.mrb[12].mxu1  ;;  %v11089_v33 = vpop.f32.mrb[13].mxu0 }
 0x315   : > { %v11090_v54 = vadd.f32 %v11089_v33, %v11088_v6  ;;  %v11201_v14 = vpop.f32.mrb[13].mxu1  ;;  %v11091_v34 = vpop.f32.mrb[14].mxu0 }
 0x316   : > { %v11202_v58 = vadd.f32 %v11201_v14, %v11200_v17  ;;  %v11203_v23 = vpop.f32.mrb[14].mxu1  ;;  %v11092_v40 = vpop.f32.mrb[15].mxu0 }
 0x317   : > { %v5169_v46 = vadd.f32 %v11090_v54, %v14623_v62  ;;  %v11093_v1 = vadd.f32 %v11092_v40, %v11091_v34  ;;  %v11204_v56 = vpop.f32.mrb[15].mxu1  ;;  %v12993_v62 = vld [vmem:[%s14134_s15 + $0x878] ss:$72 sps:$4 sm:$0xff]  }
 0x318   : > { %v11205_v32 = vadd.f32 %v11204_v56, %v11203_v23  ;;  %7881 = vmatmul.mubr.bf16.gmra.mrb[120].mxu0 %v12983_v61 }
 0x319   : > { %v5172_v48 = vadd.f32 %v11093_v1, %v14626_v55  ;;  %8042 = vmatmul.mubr.bf16.gmra.mrb[120].mxu1 %v12986_v11  ;;  %7888 = vmatprep.mubr.bf16.mxu0 %v12995_v52  ;;  %v14880_v29 = vadd.f32 %v11202_v58, %v5169_v46 }
 0x31a   : > { %8049 = vmatprep.mubr.bf16.mxu1 %v12998_v21  ;;  %v13002_v21 = vld [vmem:[%s14134_s15 + $0x20] ss:$72 sps:$4 sm:$0xff]  }
 0x31b   : > { %v11094_v39 = vpop.f32.mrb[16].mxu0  ;;  %v14882_v20 = vadd.f32 %v11205_v32, %v5172_v48  ;;  %v13008_v32 = vld [vmem:[%s15778_s1 + $0x300] sm:$0xff]   ;;  %v13011_v48 = vld [vmem:[%s14134_s15 + $0xac] ss:$72 sps:$4 sm:$0xff]  }
 0x31c   : > { %v11206_v63 = vpop.f32.mrb[16].mxu1  ;;  %v11095_v9 = vpop.f32.mrb[17].mxu0 }
 0x31d   : > { %v11096_v10 = vadd.f32 %v11095_v9, %v11094_v39  ;;  %v11207_v38 = vpop.f32.mrb[17].mxu1  ;;  %v11097_v2 = vpop.f32.mrb[18].mxu0 }
 0x31e   : > { %v11208_v41 = vadd.f32 %v11207_v38, %v11206_v63  ;;  %v11209_v57 = vpop.f32.mrb[18].mxu1  ;;  %v11098_v55 = vpop.f32.mrb[19].mxu0 }
 0x31f   : > { %v5177_v16 = vadd.f32 %v11096_v10, %v14633_v36  ;;  %v11099_v6 = vadd.f32 %v11098_v55, %v11097_v2  ;;  %v11210_v17 = vpop.f32.mrb[19].mxu1  ;;  %v12999_v36 = vld [vmem:[%s14134_s15 + $0x18] ss:$72 sps:$4 sm:$0xff]   ;;  %v13021_v10 = vld [vmem:[%s15778_s1 + $0x2c8] sm:$0xff]   ;;  %v13039_v55 = vld [vmem:[%s15778_s1 + $0x350] sm:$0xff]  }
 0x320   : > { %v11211_v33 = vadd.f32 %v11210_v17, %v11209_v57  ;;  %7889 = vmatmul.mubr.bf16.gmra.mrb[124].mxu0 %v12993_v62  ;;  %v13014_v62 = vld [vmem:[%s14134_s15 + $0xb4] ss:$72 sps:$4 sm:$0xff]   ;;  %v13023_v2 = vld [vmem:[%s15778_s1 + $0x348] sm:$0xff]  }
 0x321   : > { %v5180_v61 = vadd.f32 %v11099_v6, %v14636_v27  ;;  %8050 = vmatmul.mubr.bf16.gmra.mrb[124].mxu1 %v12996_v44  ;;  %8090 = vmatprep.mubr.bf16.mxu0 %v13001_v7  ;;  %v14890_v54 = vadd.f32 %v11208_v41, %v5177_v16  ;;  %v13006_v27 = vld [vmem:[%s15778_s1 + $0x280] sm:$0xff]   ;;  %v13024_v41 = vld [vmem:[%s15778_s1 + $0x308] sm:$0xff]  }
 0x322   : > { %8251 = vmatprep.mubr.bf16.mxu1 %v13004_v31  ;;  %v13009_v17 = vld [vmem:[%s14134_s15 + $0xa8] ss:$72 sps:$4 sm:$0xff]  }
 0x323   : > { %v11100_v14 = vpop.f32.mrb[20].mxu0  ;;  %v14892_v34 = vadd.f32 %v11211_v33, %v5180_v61 }
 0x324   : > { %v11212_v11 = vpop.f32.mrb[20].mxu1  ;;  %v11101_v52 = vpop.f32.mrb[21].mxu0 }
 0x325   : > { %v11102_v58 = vadd.f32 %v11101_v52, %v11100_v14  ;;  %v11213_v23 = vpop.f32.mrb[21].mxu1  ;;  %v11103_v40 = vpop.f32.mrb[22].mxu0  ;;  %v13017_v52 = vld [vmem:[%s14134_s15 + $0x13c] ss:$72 sps:$4 sm:$0xff]  }
 0x326   : > { %v11214_v46 = vadd.f32 %v11213_v23, %v11212_v11  ;;  %v11215_v1 = vpop.f32.mrb[22].mxu1  ;;  %v11104_v56 = vpop.f32.mrb[23].mxu0  ;;  %v13012_v11 = vld [vmem:[%s14134_s15 + $0xb0] ss:$72 sps:$4 sm:$0xff]  }
 0x327   : > { %v5185_v39 = vadd.f32 %v11102_v58, %v14655_v45  ;;  %v11105_v63 = vadd.f32 %v11104_v56, %v11103_v40  ;;  %v11216_v9 = vpop.f32.mrb[23].mxu1  ;;  %v13022_v45 = vld [vmem:[%s15778_s1 + $0x288] sm:$0xff]   ;;  %v13040_v56 = vld [vmem:[%s15778_s1 + $0x310] sm:$0xff]  }
 0x328   : > { %v11217_v38 = vadd.f32 %v11216_v9, %v11215_v1  ;;  %8091 = vmatmul.mubr.bf16.vlgmr.msra.gmra.mrb[128].mxu0 %v12999_v36  ;;  %v13020_v40 = vld [vmem:[%s14134_s15 + $0x144] ss:$72 sps:$4 sm:$0xff]   ;;  %v13054_v9 = vld [vmem:[%s15778_s1 + $0x298] sm:$0xff]  }
 0x329   : > { %v5188_v44 = vadd.f32 %v11105_v63, %v14667_v24  ;;  %8252 = vmatmul.mubr.bf16.vlgmr.msra.gmra.mrb[128].mxu1 %v13002_v21  ;;  %11727 = vmatpush3.bf16.msra.mxu0 %v13006_v27  ;;  %v14915_v7 = vadd.f32 %v11214_v46, %v5185_v39  ;;  %v13037_v24 = vld [vmem:[%s15778_s1 + $0x2d0] sm:$0xff]   ;;  %v13055_v39 = vld [vmem:[%s15778_s1 + $0x358] sm:$0xff]  }
 0x32a   : > { %11839 = vmatpush3.bf16.msra.mxu1 %v13008_v32  ;;  %8098 = vmatprep.mubr.bf16.mxu0 %v13011_v48  ;;  %v13038_v21 = vld [vmem:[%s15778_s1 + $0x290] sm:$0xff]   ;;  %v13053_v32 = vld [vmem:[%s15778_s1 + $0x2d8] sm:$0xff]  }
 0x32b   : > { %v11106_v57 = vpop.f32.mrb[24].mxu0  ;;  %8259 = vmatprep.mubr.bf16.mxu1 %v13014_v62  ;;  %11728 = vmatprep.subr.bf16.mxu0 %v13021_v10  ;;  %v14926_v31 = vadd.f32 %v11217_v38, %v5188_v44  ;;  %v13056_v10 = vld [vmem:[%s15778_s1 + $0x318] sm:$0xff]  }
 0x32c   : > { %v11218_v16 = vpop.f32.mrb[24].mxu1  ;;  %v11107_v6 = vpop.f32.mrb[25].mxu0  ;;  %11840 = vmatprep.subr.bf16.mxu1 %v13023_v2 }
 0x32d   : > { %v11108_v33 = vadd.f32 %v11107_v6, %v11106_v57  ;;  %v11219_v61 = vpop.f32.mrb[25].mxu1  ;;  %v11109_v14 = vpop.f32.mrb[26].mxu0  ;;  %11729 = vmatpush3.bf16.msra.mxu0 %v13022_v45  ;;  %v13015_v45 = vld [vmem:[%s14134_s15 + $0x138] ss:$72 sps:$4 sm:$0xff]   ;;  %v13027_v6 = vld [vmem:[%s14134_s15 + $0x1cc] ss:$72 sps:$4 sm:$0xff]  }
 0x32e   : > { %v11220_v36 = vadd.f32 %v11219_v61, %v11218_v16  ;;  %v11221_v58 = vpop.f32.mrb[26].mxu1  ;;  %v11110_v23 = vpop.f32.mrb[27].mxu0  ;;  %11841 = vmatpush3.bf16.msra.mxu1 %v13024_v41  ;;  %11730 = vmatprep.subr.bf16.mxu0 %v13037_v24  ;;  %v13071_v41 = vld [vmem:[%s15778_s1 + $0x360] sm:$0xff]  }
 0x32f   : > { %v5193_v27 = vadd.f32 %v11108_v33, %v14689_v53  ;;  %v11111_v46 = vadd.f32 %v11110_v23, %v11109_v14  ;;  %v11222_v1 = vpop.f32.mrb[27].mxu1  ;;  %11842 = vmatprep.subr.bf16.mxu1 %v13039_v55  ;;  %v13018_v16 = vld [vmem:[%s14134_s15 + $0x140] ss:$72 sps:$4 sm:$0xff]   ;;  %v13030_v14 = vld [vmem:[%s14134_s15 + $0x1d4] ss:$72 sps:$4 sm:$0xff]  }
 0x330   : > { %v11223_v48 = vadd.f32 %v11222_v1, %v11221_v58  ;;  %8099 = vmatmul.mubr.bf16.gmra.mrb[132].mxu0 %v13009_v17  ;;  %v13072_v23 = vld [vmem:[%s15778_s1 + $0x320] sm:$0xff]   ;;  %v13086_v1 = vld [vmem:[%s15778_s1 + $0x2a8] sm:$0xff]  }
 0x331   : > { %v5196_v53 = vadd.f32 %v11111_v46, %v14695_v22  ;;  %8260 = vmatmul.mubr.bf16.gmra.mrb[132].mxu1 %v13012_v11  ;;  %8106 = vmatprep.mubr.bf16.mxu0 %v13017_v52  ;;  %v14946_v63 = vadd.f32 %v11220_v36, %v5193_v27  ;;  %v13069_v22 = vld [vmem:[%s15778_s1 + $0x2e0] sm:$0xff]   ;;  %v13087_v27 = vld [vmem:[%s15778_s1 + $0x368] sm:$0xff]  }
 0x332   : > { %8267 = vmatprep.mubr.bf16.mxu1 %v13020_v40  ;;  %11731 = vmatpush3.bf16.msra.mxu0 %v13038_v21  ;;  %v13070_v11 = vld [vmem:[%s15778_s1 + $0x2a0] sm:$0xff]   ;;  %v13085_v40 = vld [vmem:[%s15778_s1 + $0x2e8] sm:$0xff]  }
 0x333   : > { %v11112_v62 = vpop.f32.mrb[28].mxu0  ;;  %11843 = vmatpush3.bf16.msra.mxu1 %v13040_v56  ;;  %11732 = vmatprep.subr.bf16.mxu0 %v13053_v32  ;;  %v14957_v38 = vadd.f32 %v11223_v48, %v5196_v53  ;;  %v13088_v32 = vld [vmem:[%s15778_s1 + $0x328] sm:$0xff]  }
 0x334   : > { %v11224_v2 = vpop.f32.mrb[28].mxu1  ;;  %v11113_v44 = vpop.f32.mrb[29].mxu0  ;;  %11844 = vmatprep.subr.bf16.mxu1 %v13055_v39 }
 0x335   : > { %v11114_v24 = vadd.f32 %v11113_v44, %v11112_v62  ;;  %v11225_v57 = vpop.f32.mrb[29].mxu1  ;;  %v11115_v55 = vpop.f32.mrb[30].mxu0  ;;  %v13103_v62 = vld [vmem:[%s15778_s1 + $0x370] sm:$0xff]  }
 0x336   : > { %v11226_v17 = vadd.f32 %v11225_v57, %v11224_v2  ;;  %v11227_v33 = vpop.f32.mrb[30].mxu1  ;;  %v11116_v61 = vpop.f32.mrb[31].mxu0  ;;  %11733 = vmatpush3.bf16.msra.mxu0 %v13054_v9  ;;  %v13025_v9 = vld [vmem:[%s14134_s15 + $0x1c8] ss:$72 sps:$4 sm:$0xff]  }
 0x337   : > { %v5201_v52 = vadd.f32 %v11114_v24, %v14723_v37  ;;  %v11117_v36 = vadd.f32 %v11116_v61, %v11115_v55  ;;  %v11228_v58 = vpop.f32.mrb[31].mxu1  ;;  %11845 = vmatpush3.bf16.msra.mxu1 %v13056_v10  ;;  %11734 = vmatprep.subr.bf16.mxu0 %v13069_v22  ;;  %v13028_v44 = vld [vmem:[%s14134_s15 + $0x1d0] ss:$72 sps:$4 sm:$0xff]   ;;  %v13036_v55 = vld [vmem:[%s14134_s15 + $0x264] ss:$72 sps:$4 sm:$0xff]  }
 0x338   : > { %v11229_v21 = vadd.f32 %v11228_v58, %v11227_v33  ;;  %8107 = vmatmul.mubr.bf16.gmra.mrb[136].mxu0 %v13015_v45  ;;  %11846 = vmatprep.subr.bf16.mxu1 %v13071_v41  ;;  %v13033_v45 = vld [vmem:[%s14134_s15 + $0x25c] ss:$72 sps:$4 sm:$0xff]   ;;  %v13104_v61 = vld [vmem:[%s15778_s1 + $0x330] sm:$0xff]  }
 0x339   : > { %v5204_v37 = vadd.f32 %v11117_v36, %v14729_v0  ;;  %8268 = vmatmul.mubr.bf16.gmra.mrb[136].mxu1 %v13018_v16  ;;  %8114 = vmatprep.mubr.bf16.mxu0 %v13027_v6  ;;  %v14980_v46 = vadd.f32 %v11226_v17, %v5201_v52  ;;  %v13101_v0 = vld [vmem:[%s15778_s1 + $0x2f0] sm:$0xff]   ;;  %v13119_v52 = vld [vmem:[%s15778_s1 + $0x378] sm:$0xff]  }
 0x33a   : > { %8275 = vmatprep.mubr.bf16.mxu1 %v13030_v14  ;;  %11735 = vmatpush3.bf16.msra.mxu0 %v13070_v11  ;;  %v13102_v16 = vld [vmem:[%s15778_s1 + $0x2b0] sm:$0xff]   ;;  %v13117_v14 = vld [vmem:[%s15778_s1 + $0x2f8] sm:$0xff]  }
 0x33b   : > { %v11118_v56 = vpop.f32.mrb[32].mxu0  ;;  %11847 = vmatpush3.bf16.msra.mxu1 %v13072_v23  ;;  %11736 = vmatprep.subr.bf16.mxu0 %v13085_v40  ;;  %v14991_v48 = vadd.f32 %v11229_v21, %v5204_v37  ;;  %v13118_v58 = vld [vmem:[%s15778_s1 + $0x2b8] sm:$0xff]  }
 0x33c   : > { %v11230_v39 = vpop.f32.mrb[32].mxu1  ;;  %v11119_v53 = vpop.f32.mrb[33].mxu0  ;;  %11848 = vmatprep.subr.bf16.mxu1 %v13087_v27  ;;  %v13120_v40 = vld [vmem:[%s15778_s1 + $0x338] sm:$0xff]  }
 0x33d   : > { %v11120_v10 = vadd.f32 %v11119_v53, %v11118_v56  ;;  %v11231_v22 = vpop.f32.mrb[33].mxu1  ;;  %v11121_v2 = vpop.f32.mrb[34].mxu0  ;;  %v13135_v56 = vld [vmem:[%s15778_s1 + $0x440] sm:$0xff]  }
 0x33e   : > { %v11232_v41 = vadd.f32 %v11231_v22, %v11230_v39  ;;  %v11233_v24 = vpop.f32.mrb[34].mxu1  ;;  %v11122_v57 = vpop.f32.mrb[35].mxu0  ;;  %11737 = vmatpush3.bf16.msra.mxu0 %v13086_v1  ;;  %v13031_v1 = vld [vmem:[%s14134_s15 + $0x258] ss:$72 sps:$4 sm:$0xff]  }
 0x33f   : > { %v5209_v6 = vadd.f32 %v11120_v10, %v14757_v30  ;;  %v11123_v17 = vadd.f32 %v11122_v57, %v11121_v2  ;;  %v11234_v33 = vpop.f32.mrb[35].mxu1  ;;  %11849 = vmatpush3.bf16.msra.mxu1 %v13088_v32  ;;  %11738 = vmatprep.subr.bf16.mxu0 %v13101_v0  ;;  %v13034_v53 = vld [vmem:[%s14134_s15 + $0x260] ss:$72 sps:$4 sm:$0xff]   ;;  %v13046_v2 = vld [vmem:[%s14134_s15 + $0x2f4] ss:$72 sps:$4 sm:$0xff]  }
 0x340   : > { %v11235_v11 = vadd.f32 %v11234_v33, %v11233_v24  ;;  %8115 = vmatmul.mubr.bf16.gmra.mrb[140].mxu0 %v13025_v9  ;;  %11850 = vmatprep.subr.bf16.mxu1 %v13103_v62  ;;  %v13043_v9 = vld [vmem:[%s14134_s15 + $0x2ec] ss:$72 sps:$4 sm:$0xff]   ;;  %v13041_v33 = vld [vmem:[%s14134_s15 + $0x2e8] ss:$72 sps:$4 sm:$0xff]  }
 0x341   : > { %v5212_v30 = vadd.f32 %v11123_v17, %v14763_v8  ;;  %8276 = vmatmul.mubr.bf16.gmra.mrb[140].mxu1 %v13028_v44  ;;  %8122 = vmatprep.mubr.bf16.mxu0 %v13033_v45  ;;  %v15014_v36 = vadd.f32 %v11232_v41, %v5209_v6  ;;  %v13133_v8 = vld [vmem:[%s15778_s1 + $0x3c0] sm:$0xff]  }
 0x342   : > { %8283 = vmatprep.mubr.bf16.mxu1 %v13036_v55  ;;  %11739 = vmatpush3.bf16.msra.mxu0 %v13102_v16 }
 0x343   : > { %v11124_v23 = vpop.f32.mrb[36].mxu0  ;;  %11851 = vmatpush3.bf16.msra.mxu1 %v13104_v61  ;;  %11740 = vmatprep.subr.bf16.mxu0 %v13117_v14  ;;  %v15025_v21 = vadd.f32 %v11235_v11, %v5212_v30  ;;  %v13049_v30 = vld [vmem:[%s14134_s15 + $0x37c] ss:$72 sps:$4 sm:$0xff]  }
 0x344   : > { %v11236_v27 = vpop.f32.mrb[36].mxu1  ;;  %v11125_v37 = vpop.f32.mrb[37].mxu0  ;;  %11852 = vmatprep.subr.bf16.mxu1 %v13119_v52  ;;  %v13044_v52 = vld [vmem:[%s14134_s15 + $0x2f0] ss:$72 sps:$4 sm:$0xff]  }
 0x345   : > { %v11126_v32 = vadd.f32 %v11125_v37, %v11124_v23  ;;  %v11237_v0 = vpop.f32.mrb[37].mxu1  ;;  %v11127_v39 = vpop.f32.mrb[38].mxu0 }
 0x346   : > { %v11238_v62 = vadd.f32 %v11237_v0, %v11236_v27  ;;  %v11239_v10 = vpop.f32.mrb[38].mxu1  ;;  %v11128_v22 = vpop.f32.mrb[39].mxu0  ;;  %11741 = vmatpush3.bf16.msra.mxu0 %v13118_v58 }
 0x347   : > { %v5217_v44 = vadd.f32 %v11126_v32, %v14779_v3  ;;  %v11129_v45 = vadd.f32 %v11128_v22, %v11127_v39  ;;  %v11240_v41 = vpop.f32.mrb[39].mxu1  ;;  %11853 = vmatpush3.bf16.msra.mxu1 %v13120_v40  ;;  %11950 = vmatprep.subr.bf16.mxu0 %v13133_v8  ;;  %v13052_v40 = vld [vmem:[%s14134_s15 + $0x384] ss:$72 sps:$4 sm:$0xff]  }
 0x348   : > { %v11241_v24 = vadd.f32 %v11240_v41, %v11239_v10  ;;  %8123 = vmatmul.mubr.bf16.gmra.mrb[144].mxu0 %v13031_v1  ;;  %12062 = vmatprep.subr.bf16.mxu1 %v13135_v56 }
 0x349   : > { %v5220_v57 = vadd.f32 %v11129_v45, %v14782_v5  ;;  %8284 = vmatmul.mubr.bf16.gmra.mrb[144].mxu1 %v13034_v53  ;;  %8130 = vmatprep.mubr.bf16.mxu0 %v13043_v9  ;;  %v15036_v55 = vadd.f32 %v11238_v62, %v5217_v44  ;;  %v13059_v44 = vld [vmem:[%s14134_s15 + $0x40c] ss:$72 sps:$4 sm:$0xff]  }
 0x34a   : > { %8291 = vmatprep.mubr.bf16.mxu1 %v13046_v2  ;;  %v13050_v2 = vld [vmem:[%s14134_s15 + $0x380] ss:$72 sps:$4 sm:$0xff]  }
 0x34b   : > { %v11130_v16 = vpop.f32.mrb[40].mxu0  ;;  %v15038_v3 = vadd.f32 %v11241_v24, %v5220_v57  ;;  %v13062_v24 = vld [vmem:[%s14134_s15 + $0x414] ss:$72 sps:$4 sm:$0xff]  }
 0x34c   : > { %v11242_v6 = vpop.f32.mrb[40].mxu1  ;;  %v11131_v17 = vpop.f32.mrb[41].mxu0 }
 0x34d   : > { %v11132_v61 = vadd.f32 %v11131_v17, %v11130_v16  ;;  %v11243_v14 = vpop.f32.mrb[41].mxu1  ;;  %v11133_v11 = vpop.f32.mrb[42].mxu0 }
 0x34e   : > { %v11244_v58 = vadd.f32 %v11243_v14, %v11242_v6  ;;  %v11245_v23 = vpop.f32.mrb[42].mxu1  ;;  %v11134_v5 = vpop.f32.mrb[43].mxu0 }
 0x34f   : > { %v5225_v8 = vadd.f32 %v11132_v61, %v14789_v19  ;;  %v11135_v27 = vadd.f32 %v11134_v5, %v11133_v11  ;;  %v11246_v37 = vpop.f32.mrb[43].mxu1  ;;  %v13047_v19 = vld [vmem:[%s14134_s15 + $0x378] ss:$72 sps:$4 sm:$0xff]  }
 0x350   : > { %v11247_v1 = vadd.f32 %v11246_v37, %v11245_v23  ;;  %8131 = vmatmul.mubr.bf16.gmra.mrb[148].mxu0 %v13041_v33 }
 0x351   : > { %v5228_v56 = vadd.f32 %v11135_v27, %v14792_v59  ;;  %8292 = vmatmul.mubr.bf16.gmra.mrb[148].mxu1 %v13044_v52  ;;  %8138 = vmatprep.mubr.bf16.mxu0 %v13049_v30  ;;  %v15046_v32 = vadd.f32 %v11244_v58, %v5225_v8  ;;  %v13065_v8 = vld [vmem:[%s14134_s15 + $0x49c] ss:$72 sps:$4 sm:$0xff]  }
 0x352   : > { %8299 = vmatprep.mubr.bf16.mxu1 %v13052_v40  ;;  %v13060_v40 = vld [vmem:[%s14134_s15 + $0x410] ss:$72 sps:$4 sm:$0xff]  }
 0x353   : > { %v11136_v0 = vpop.f32.mrb[44].mxu0  ;;  %v15048_v39 = vadd.f32 %v11247_v1, %v5228_v56  ;;  %v13068_v1 = vld [vmem:[%s14134_s15 + $0x4a4] ss:$72 sps:$4 sm:$0xff]  }
 0x354   : > { %v11248_v53 = vpop.f32.mrb[44].mxu1  ;;  %v11137_v9 = vpop.f32.mrb[45].mxu0 }
 0x355   : > { %v11138_v62 = vadd.f32 %v11137_v9, %v11136_v0  ;;  %v11249_v10 = vpop.f32.mrb[45].mxu1  ;;  %v11139_v22 = vpop.f32.mrb[46].mxu0 }
 0x356   : > { %v11250_v45 = vadd.f32 %v11249_v10, %v11248_v53  ;;  %v11251_v41 = vpop.f32.mrb[46].mxu1  ;;  %v11140_v59 = vpop.f32.mrb[47].mxu0 }
 0x357   : > { %v5233_v57 = vadd.f32 %v11138_v62, %v14799_v35  ;;  %v11141_v16 = vadd.f32 %v11140_v59, %v11139_v22  ;;  %v11252_v6 = vpop.f32.mrb[47].mxu1  ;;  %v13057_v35 = vld [vmem:[%s14134_s15 + $0x408] ss:$72 sps:$4 sm:$0xff]  }
 0x358   : > { %v11253_v17 = vadd.f32 %v11252_v6, %v11251_v41  ;;  %8139 = vmatmul.mubr.bf16.gmra.mrb[152].mxu0 %v13047_v19 }
 0x359   : > { %v5236_v33 = vadd.f32 %v11141_v16, %v14802_v49  ;;  %8300 = vmatmul.mubr.bf16.gmra.mrb[152].mxu1 %v13050_v2  ;;  %8146 = vmatprep.mubr.bf16.mxu0 %v13059_v44  ;;  %v15056_v61 = vadd.f32 %v11250_v45, %v5233_v57  ;;  %v13075_v57 = vld [vmem:[%s14134_s15 + $0x52c] ss:$72 sps:$4 sm:$0xff]  }
 0x35a   : > { %8307 = vmatprep.mubr.bf16.mxu1 %v13062_v24  ;;  %v13066_v24 = vld [vmem:[%s14134_s15 + $0x4a0] ss:$72 sps:$4 sm:$0xff]  }
 0x35b   : > { %v11142_v14 = vpop.f32.mrb[48].mxu0  ;;  %v15058_v11 = vadd.f32 %v11253_v17, %v5236_v33  ;;  %v13078_v17 = vld [vmem:[%s14134_s15 + $0x534] ss:$72 sps:$4 sm:$0xff]  }
 0x35c   : > { %v11254_v52 = vpop.f32.mrb[48].mxu1  ;;  %v11143_v30 = vpop.f32.mrb[49].mxu0 }
 0x35d   : > { %v11144_v58 = vadd.f32 %v11143_v30, %v11142_v14  ;;  %v11255_v23 = vpop.f32.mrb[49].mxu1  ;;  %v11145_v5 = vpop.f32.mrb[50].mxu0 }
 0x35e   : > { %v11256_v27 = vadd.f32 %v11255_v23, %v11254_v52  ;;  %v11257_v37 = vpop.f32.mrb[50].mxu1  ;;  %v11146_v49 = vpop.f32.mrb[51].mxu0 }
 0x35f   : > { %v5241_v56 = vadd.f32 %v11144_v58, %v14809_v4  ;;  %v11147_v0 = vadd.f32 %v11146_v49, %v11145_v5  ;;  %v11258_v53 = vpop.f32.mrb[51].mxu1  ;;  %v13063_v4 = vld [vmem:[%s14134_s15 + $0x498] ss:$72 sps:$4 sm:$0xff]  }
 0x360   : > { %v11259_v9 = vadd.f32 %v11258_v53, %v11257_v37  ;;  %8147 = vmatmul.mubr.bf16.gmra.mrb[156].mxu0 %v13057_v35 }
 0x361   : > { %v5244_v19 = vadd.f32 %v11147_v0, %v14812_v26  ;;  %8308 = vmatmul.mubr.bf16.gmra.mrb[156].mxu1 %v13060_v40  ;;  %8154 = vmatprep.mubr.bf16.mxu0 %v13065_v8  ;;  %v15066_v62 = vadd.f32 %v11256_v27, %v5241_v56  ;;  %v13081_v56 = vld [vmem:[%s14134_s15 + $0x5bc] ss:$72 sps:$4 sm:$0xff]  }
 0x362   : > { %8315 = vmatprep.mubr.bf16.mxu1 %v13068_v1  ;;  %v13076_v1 = vld [vmem:[%s14134_s15 + $0x530] ss:$72 sps:$4 sm:$0xff]  }
 0x363   : > { %v11148_v10 = vpop.f32.mrb[52].mxu0  ;;  %v15068_v22 = vadd.f32 %v11259_v9, %v5244_v19  ;;  %v13084_v9 = vld [vmem:[%s14134_s15 + $0x5c4] ss:$72 sps:$4 sm:$0xff]  }
 0x364   : > { %v11260_v2 = vpop.f32.mrb[52].mxu1  ;;  %v11149_v44 = vpop.f32.mrb[53].mxu0 }
 0x365   : > { %v11150_v45 = vadd.f32 %v11149_v44, %v11148_v10  ;;  %v11261_v41 = vpop.f32.mrb[53].mxu1  ;;  %v11151_v59 = vpop.f32.mrb[54].mxu0 }
 0x366   : > { %v11262_v16 = vadd.f32 %v11261_v41, %v11260_v2  ;;  %v11263_v6 = vpop.f32.mrb[54].mxu1  ;;  %v11152_v26 = vpop.f32.mrb[55].mxu0 }
 0x367   : > { %v5249_v33 = vadd.f32 %v11150_v45, %v14819_v43  ;;  %v11153_v14 = vadd.f32 %v11152_v26, %v11151_v59  ;;  %v11264_v52 = vpop.f32.mrb[55].mxu1  ;;  %v13073_v43 = vld [vmem:[%s14134_s15 + $0x528] ss:$72 sps:$4 sm:$0xff]  }
 0x368   : > { %v11265_v30 = vadd.f32 %v11264_v52, %v11263_v6  ;;  %8155 = vmatmul.mubr.bf16.gmra.mrb[160].mxu0 %v13063_v4 }
 0x369   : > { %v5252_v35 = vadd.f32 %v11153_v14, %v14822_v51  ;;  %8316 = vmatmul.mubr.bf16.gmra.mrb[160].mxu1 %v13066_v24  ;;  %8162 = vmatprep.mubr.bf16.mxu0 %v13075_v57  ;;  %v15076_v58 = vadd.f32 %v11262_v16, %v5249_v33  ;;  %v13091_v33 = vld [vmem:[%s14134_s15 + $0x64c] ss:$72 sps:$4 sm:$0xff]  }
 0x36a   : > { %8323 = vmatprep.mubr.bf16.mxu1 %v13078_v17  ;;  %v13082_v17 = vld [vmem:[%s14134_s15 + $0x5c0] ss:$72 sps:$4 sm:$0xff]  }
 0x36b   : > { %v11154_v23 = vpop.f32.mrb[56].mxu0  ;;  %v15078_v5 = vadd.f32 %v11265_v30, %v5252_v35  ;;  %v13094_v30 = vld [vmem:[%s14134_s15 + $0x654] ss:$72 sps:$4 sm:$0xff]  }
 0x36c   : > { %v11266_v40 = vpop.f32.mrb[56].mxu1  ;;  %v11155_v8 = vpop.f32.mrb[57].mxu0 }
 0x36d   : > { %v11156_v27 = vadd.f32 %v11155_v8, %v11154_v23  ;;  %v11267_v37 = vpop.f32.mrb[57].mxu1  ;;  %v11157_v49 = vpop.f32.mrb[58].mxu0 }
 0x36e   : > { %v11268_v0 = vadd.f32 %v11267_v37, %v11266_v40  ;;  %v11269_v53 = vpop.f32.mrb[58].mxu1  ;;  %v11158_v51 = vpop.f32.mrb[59].mxu0 }
 0x36f   : > { %v5257_v19 = vadd.f32 %v11156_v27, %v14829_v13  ;;  %v11159_v10 = vadd.f32 %v11158_v51, %v11157_v49  ;;  %v11270_v2 = vpop.f32.mrb[59].mxu1  ;;  %v13079_v13 = vld [vmem:[%s14134_s15 + $0x5b8] ss:$72 sps:$4 sm:$0xff]  }
 0x370   : > { %v11271_v44 = vadd.f32 %v11270_v2, %v11269_v53  ;;  %8163 = vmatmul.mubr.bf16.gmra.mrb[164].mxu0 %v13073_v43 }
 0x371   : > { %v5260_v4 = vadd.f32 %v11159_v10, %v14832_v50  ;;  %8324 = vmatmul.mubr.bf16.gmra.mrb[164].mxu1 %v13076_v1  ;;  %8170 = vmatprep.mubr.bf16.mxu0 %v13081_v56  ;;  %v15086_v45 = vadd.f32 %v11268_v0, %v5257_v19  ;;  %v13097_v19 = vld [vmem:[%s14134_s15 + $0x6dc] ss:$72 sps:$4 sm:$0xff]  }
 0x372   : > { %8331 = vmatprep.mubr.bf16.mxu1 %v13084_v9  ;;  %v13092_v9 = vld [vmem:[%s14134_s15 + $0x650] ss:$72 sps:$4 sm:$0xff]  }
 0x373   : > { %v11160_v41 = vpop.f32.mrb[60].mxu0  ;;  %v15088_v59 = vadd.f32 %v11271_v44, %v5260_v4  ;;  %v13100_v44 = vld [vmem:[%s14134_s15 + $0x6e4] ss:$72 sps:$4 sm:$0xff]  }
 0x374   : > { %v11272_v24 = vpop.f32.mrb[60].mxu1  ;;  %v11161_v57 = vpop.f32.mrb[61].mxu0 }
 0x375   : > { %v11162_v16 = vadd.f32 %v11161_v57, %v11160_v41  ;;  %v11273_v6 = vpop.f32.mrb[61].mxu1  ;;  %v11163_v26 = vpop.f32.mrb[62].mxu0 }
 0x376   : > { %v11274_v14 = vadd.f32 %v11273_v6, %v11272_v24  ;;  %v11275_v52 = vpop.f32.mrb[62].mxu1  ;;  %v11164_v50 = vpop.f32.mrb[63].mxu0 }
 0x377   : > { %v5265_v35 = vadd.f32 %v11162_v16, %v14839_v42  ;;  %v11165_v23 = vadd.f32 %v11164_v50, %v11163_v26  ;;  %v11276_v40 = vpop.f32.mrb[63].mxu1  ;;  %v13089_v42 = vld [vmem:[%s14134_s15 + $0x648] ss:$72 sps:$4 sm:$0xff]  }
 0x378   : > { %v11277_v8 = vadd.f32 %v11276_v40, %v11275_v52  ;;  %8171 = vmatmul.mubr.bf16.gmra.mrb[168].mxu0 %v13079_v13 }
 0x379   : > { %v5268_v43 = vadd.f32 %v11165_v23, %v14842_v18  ;;  %8332 = vmatmul.mubr.bf16.gmra.mrb[168].mxu1 %v13082_v17  ;;  %8178 = vmatprep.mubr.bf16.mxu0 %v13091_v33  ;;  %v15096_v27 = vadd.f32 %v11274_v14, %v5265_v35  ;;  %v13107_v35 = vld [vmem:[%s14134_s15 + $0x76c] ss:$72 sps:$4 sm:$0xff]  }
 0x37a   : > { %8339 = vmatprep.mubr.bf16.mxu1 %v13094_v30  ;;  %v13098_v30 = vld [vmem:[%s14134_s15 + $0x6e0] ss:$72 sps:$4 sm:$0xff]  }
 0x37b   : > { %v11294_v37 = vpop.f32.mrb[64].mxu0  ;;  %v15098_v49 = vadd.f32 %v11277_v8, %v5268_v43 }
 0x37c   : > { %v11406_v1 = vpop.f32.mrb[64].mxu1  ;;  %v11295_v56 = vpop.f32.mrb[65].mxu0 }
 0x37d   : > { %v11296_v0 = vadd.f32 %v11295_v56, %v11294_v37  ;;  %v11407_v53 = vpop.f32.mrb[65].mxu1  ;;  %v11297_v51 = vpop.f32.mrb[66].mxu0 }
 0x37e   : > { %v11408_v10 = vadd.f32 %v11407_v53, %v11406_v1  ;;  %v11409_v2 = vpop.f32.mrb[66].mxu1  ;;  %v11298_v18 = vpop.f32.mrb[67].mxu0 }
 0x37f   : > { %v7771_v4 = vadd.f32 %v11296_v0, %v14850_v60  ;;  %v11299_v41 = vadd.f32 %v11298_v18, %v11297_v51  ;;  %v11410_v24 = vpop.f32.mrb[67].mxu1  ;;  %v13095_v60 = vld [vmem:[%s14134_s15 + $0x6d8] ss:$72 sps:$4 sm:$0xff]  }
 0x380   : > { %v11411_v57 = vadd.f32 %v11410_v24, %v11409_v2  ;;  %8179 = vmatmul.mubr.bf16.gmra.mrb[172].mxu0 %v13089_v42 }
 0x381   : > { %v15105_v13 = vadd.f32 %v11408_v10, %v7771_v4  ;;  %v7774_v16 = vadd.f32 %v11299_v41, %v14852_v25  ;;  %8340 = vmatmul.mubr.bf16.gmra.mrb[172].mxu1 %v13092_v9  ;;  %8186 = vmatprep.mubr.bf16.mxu0 %v13097_v19  ;;  %v13110_v25 = vld [vmem:[%s14134_s15 + $0x774] ss:$72 sps:$4 sm:$0xff]  }
 0x382   : > { %8347 = vmatprep.mubr.bf16.mxu1 %v13100_v44  ;;  %v13108_v44 = vld [vmem:[%s14134_s15 + $0x770] ss:$72 sps:$4 sm:$0xff]   ;;  %v13113_v4 = vld [vmem:[%s14134_s15 + $0x7fc] ss:$72 sps:$4 sm:$0xff]  }
 0x383   : > { %v15108_v6 = vadd.f32 %v11411_v57, %v7774_v16  ;;  %v11300_v26 = vpop.f32.mrb[68].mxu0 }
 0x384   : > { %v11412_v17 = vpop.f32.mrb[68].mxu1  ;;  %v11301_v33 = vpop.f32.mrb[69].mxu0 }
 0x385   : > { %v11302_v14 = vadd.f32 %v11301_v33, %v11300_v26  ;;  %v11413_v52 = vpop.f32.mrb[69].mxu1  ;;  %v11303_v50 = vpop.f32.mrb[70].mxu0 }
 0x386   : > { %v11414_v23 = vadd.f32 %v11413_v52, %v11412_v17  ;;  %v11415_v40 = vpop.f32.mrb[70].mxu1  ;;  %v11304_v8 = vpop.f32.mrb[71].mxu0 }
 0x387   : > { %v7779_v43 = vadd.f32 %v11302_v14, %v14860_v12  ;;  %v11305_v37 = vadd.f32 %v11304_v8, %v11303_v50  ;;  %v11416_v1 = vpop.f32.mrb[71].mxu1  ;;  %v13105_v12 = vld [vmem:[%s14134_s15 + $0x768] ss:$72 sps:$4 sm:$0xff]  }
 0x388   : > { %v11417_v56 = vadd.f32 %v11416_v1, %v11415_v40  ;;  %8187 = vmatmul.mubr.bf16.gmra.mrb[176].mxu0 %v13095_v60 }
 0x389   : > { %v15115_v42 = vadd.f32 %v11414_v23, %v7779_v43  ;;  %v7782_v0 = vadd.f32 %v11305_v37, %v14862_v28  ;;  %8348 = vmatmul.mubr.bf16.gmra.mrb[176].mxu1 %v13098_v30  ;;  %8194 = vmatprep.mubr.bf16.mxu0 %v13107_v35  ;;  %v13116_v28 = vld [vmem:[%s14134_s15 + $0x804] ss:$72 sps:$4 sm:$0xff]  }
 0x38a   : > { %8355 = vmatprep.mubr.bf16.mxu1 %v13110_v25  ;;  %v13114_v25 = vld [vmem:[%s14134_s15 + $0x800] ss:$72 sps:$4 sm:$0xff]   ;;  %v13123_v43 = vld [vmem:[%s14134_s15 + $0x88c] ss:$72 sps:$4 sm:$0xff]  }
 0x38b   : > { %v15118_v53 = vadd.f32 %v11417_v56, %v7782_v0  ;;  %v11306_v51 = vpop.f32.mrb[72].mxu0 }
 0x38c   : > { %v11418_v9 = vpop.f32.mrb[72].mxu1  ;;  %v11307_v19 = vpop.f32.mrb[73].mxu0 }
 0x38d   : > { %v11308_v10 = vadd.f32 %v11307_v19, %v11306_v51  ;;  %v11419_v2 = vpop.f32.mrb[73].mxu1  ;;  %v11309_v18 = vpop.f32.mrb[74].mxu0 }
 0x38e   : > { %v11420_v41 = vadd.f32 %v11419_v2, %v11418_v9  ;;  %v11421_v24 = vpop.f32.mrb[74].mxu1  ;;  %v11310_v57 = vpop.f32.mrb[75].mxu0 }
 0x38f   : > { %v7787_v16 = vadd.f32 %v11308_v10, %v14870_v15  ;;  %v11311_v26 = vadd.f32 %v11310_v57, %v11309_v18  ;;  %v11422_v17 = vpop.f32.mrb[75].mxu1  ;;  %v13111_v15 = vld [vmem:[%s14134_s15 + $0x7f8] ss:$72 sps:$4 sm:$0xff]  }
 0x390   : > { %v11423_v33 = vadd.f32 %v11422_v17, %v11421_v24  ;;  %8195 = vmatmul.mubr.bf16.gmra.mrb[180].mxu0 %v13105_v12 }
 0x391   : > { %v15125_v60 = vadd.f32 %v11420_v41, %v7787_v16  ;;  %v7790_v14 = vadd.f32 %v11311_v26, %v14872_v47  ;;  %8356 = vmatmul.mubr.bf16.gmra.mrb[180].mxu1 %v13108_v44  ;;  %8202 = vmatprep.mubr.bf16.mxu0 %v13113_v4  ;;  %v13126_v47 = vld [vmem:[%s14134_s15 + $0x894] ss:$72 sps:$4 sm:$0xff]  }
 0x392   : > { %8363 = vmatprep.mubr.bf16.mxu1 %v13116_v28  ;;  %v13124_v28 = vld [vmem:[%s14134_s15 + $0x890] ss:$72 sps:$4 sm:$0xff]   ;;  %v13129_v16 = vld [vmem:[%s14134_s15 + $0x2c] ss:$72 sps:$4 sm:$0xff]  }
 0x393   : > { %v15128_v52 = vadd.f32 %v11423_v33, %v7790_v14  ;;  %v11312_v50 = vpop.f32.mrb[76].mxu0 }
 0x394   : > { %v11424_v30 = vpop.f32.mrb[76].mxu1  ;;  %v11313_v35 = vpop.f32.mrb[77].mxu0 }
 0x395   : > { %v11314_v23 = vadd.f32 %v11313_v35, %v11312_v50  ;;  %v11425_v40 = vpop.f32.mrb[77].mxu1  ;;  %v11315_v8 = vpop.f32.mrb[78].mxu0 }
 0x396   : > { %v11426_v37 = vadd.f32 %v11425_v40, %v11424_v30  ;;  %v11427_v1 = vpop.f32.mrb[78].mxu1  ;;  %v11316_v56 = vpop.f32.mrb[79].mxu0 }
 0x397   : > { %v7795_v0 = vadd.f32 %v11314_v23, %v14880_v29  ;;  %v11317_v51 = vadd.f32 %v11316_v56, %v11315_v8  ;;  %v11428_v9 = vpop.f32.mrb[79].mxu1  ;;  %v13121_v29 = vld [vmem:[%s14134_s15 + $0x888] ss:$72 sps:$4 sm:$0xff]  }
 0x398   : > { %v11429_v19 = vadd.f32 %v11428_v9, %v11427_v1  ;;  %8203 = vmatmul.mubr.bf16.gmra.mrb[184].mxu0 %v13111_v15 }
 0x399   : > { %v15135_v12 = vadd.f32 %v11426_v37, %v7795_v0  ;;  %v7798_v10 = vadd.f32 %v11317_v51, %v14882_v20  ;;  %8364 = vmatmul.mubr.bf16.gmra.mrb[184].mxu1 %v13114_v25  ;;  %8210 = vmatprep.mubr.bf16.mxu0 %v13123_v43  ;;  %v13132_v20 = vld [vmem:[%s14134_s15 + $0x34] ss:$72 sps:$4 sm:$0xff]   ;;  %v13134_v0 = vld [vmem:[%s15778_s1 + $0x380] sm:$0xff]  }
 0x39a   : > { %8371 = vmatprep.mubr.bf16.mxu1 %v13126_v47  ;;  %v13130_v47 = vld [vmem:[%s14134_s15 + $0x30] ss:$72 sps:$4 sm:$0xff]  }
 0x39b   : > { %v15138_v2 = vadd.f32 %v11429_v19, %v7798_v10  ;;  %v11318_v18 = vpop.f32.mrb[80].mxu0  ;;  %v13136_v19 = vld [vmem:[%s15778_s1 + $0x400] sm:$0xff]  }
 0x39c   : > { %v11430_v44 = vpop.f32.mrb[80].mxu1  ;;  %v11319_v4 = vpop.f32.mrb[81].mxu0  ;;  %v13139_v10 = vld [vmem:[%s14134_s15 + $0xbc] ss:$72 sps:$4 sm:$0xff]  }
 0x39d   : > { %v11320_v41 = vadd.f32 %v11319_v4, %v11318_v18  ;;  %v11431_v24 = vpop.f32.mrb[81].mxu1  ;;  %v11321_v57 = vpop.f32.mrb[82].mxu0 }
 0x39e   : > { %v11432_v26 = vadd.f32 %v11431_v24, %v11430_v44  ;;  %v11433_v17 = vpop.f32.mrb[82].mxu1  ;;  %v11322_v33 = vpop.f32.mrb[83].mxu0 }
 0x39f   : > { %v7803_v14 = vadd.f32 %v11320_v41, %v14890_v54  ;;  %v11323_v50 = vadd.f32 %v11322_v33, %v11321_v57  ;;  %v11434_v30 = vpop.f32.mrb[83].mxu1  ;;  %v13127_v54 = vld [vmem:[%s14134_s15 + $0x28] ss:$72 sps:$4 sm:$0xff]  }
 0x3a0   : > { %v11435_v35 = vadd.f32 %v11434_v30, %v11433_v17  ;;  %8211 = vmatmul.mubr.bf16.gmra.mrb[188].mxu0 %v13121_v29  ;;  %v13142_v29 = vld [vmem:[%s14134_s15 + $0xc4] ss:$72 sps:$4 sm:$0xff]   ;;  %v13165_v17 = vld [vmem:[%s15778_s1 + $0x3d0] sm:$0xff]   ;;  %v13137_v30 = vld [vmem:[%s14134_s15 + $0xb8] ss:$72 sps:$4 sm:$0xff]  }
 0x3a1   : > { %v15145_v15 = vadd.f32 %v11432_v26, %v7803_v14  ;;  %v7806_v23 = vadd.f32 %v11323_v50, %v14892_v34  ;;  %8372 = vmatmul.mubr.bf16.gmra.mrb[188].mxu1 %v13124_v28  ;;  %8412 = vmatprep.mubr.bf16.mxu0 %v13129_v16  ;;  %v13149_v41 = vld [vmem:[%s15778_s1 + $0x3c8] sm:$0xff]  }
 0x3a2   : > { %8573 = vmatprep.mubr.bf16.mxu1 %v13132_v20  ;;  %v13151_v57 = vld [vmem:[%s15778_s1 + $0x448] sm:$0xff]   ;;  %v13167_v20 = vld [vmem:[%s15778_s1 + $0x450] sm:$0xff]  }
 0x3a3   : > { %v15148_v40 = vadd.f32 %v11435_v35, %v7806_v23  ;;  %v11324_v8 = vpop.f32.mrb[84].mxu0  ;;  %v13152_v26 = vld [vmem:[%s15778_s1 + $0x408] sm:$0xff]  }
 0x3a4   : > { %v11436_v25 = vpop.f32.mrb[84].mxu1  ;;  %v11325_v43 = vpop.f32.mrb[85].mxu0 }
 0x3a5   : > { %v11326_v37 = vadd.f32 %v11325_v43, %v11324_v8  ;;  %v11437_v1 = vpop.f32.mrb[85].mxu1  ;;  %v11327_v56 = vpop.f32.mrb[86].mxu0  ;;  %v13145_v43 = vld [vmem:[%s14134_s15 + $0x14c] ss:$72 sps:$4 sm:$0xff]  }
 0x3a6   : > { %v11438_v34 = vadd.f32 %v11437_v1, %v11436_v25  ;;  %v11439_v51 = vpop.f32.mrb[86].mxu1  ;;  %v11328_v9 = vpop.f32.mrb[87].mxu0  ;;  %v13140_v25 = vld [vmem:[%s14134_s15 + $0xc0] ss:$72 sps:$4 sm:$0xff]  }
 0x3a7   : > { %v7811_v18 = vadd.f32 %v11326_v37, %v14915_v7  ;;  %v11329_v44 = vadd.f32 %v11328_v9, %v11327_v56  ;;  %v11440_v4 = vpop.f32.mrb[87].mxu1  ;;  %v13150_v7 = vld [vmem:[%s15778_s1 + $0x388] sm:$0xff]   ;;  %v13148_v56 = vld [vmem:[%s14134_s15 + $0x154] ss:$72 sps:$4 sm:$0xff]  }
 0x3a8   : > { %v11441_v24 = vadd.f32 %v11440_v4, %v11439_v51  ;;  %8413 = vmatmul.mubr.bf16.vlgmr.msra.gmra.mrb[192].mxu0 %v13127_v54  ;;  %v13168_v9 = vld [vmem:[%s15778_s1 + $0x410] sm:$0xff]   ;;  %v13182_v4 = vld [vmem:[%s15778_s1 + $0x398] sm:$0xff]  }
 0x3a9   : > { %v15167_v28 = vadd.f32 %v11438_v34, %v7811_v18  ;;  %v7814_v16 = vadd.f32 %v11329_v44, %v14926_v31  ;;  %8574 = vmatmul.mubr.bf16.vlgmr.msra.gmra.mrb[192].mxu1 %v13130_v47  ;;  %11951 = vmatpush3.bf16.msra.mxu0 %v13134_v0  ;;  %v13166_v47 = vld [vmem:[%s15778_s1 + $0x390] sm:$0xff]   ;;  %v13183_v18 = vld [vmem:[%s15778_s1 + $0x458] sm:$0xff]  }
 0x3aa   : > { %12063 = vmatpush3.bf16.msra.mxu1 %v13136_v19  ;;  %8420 = vmatprep.mubr.bf16.mxu0 %v13139_v10  ;;  %v13181_v19 = vld [vmem:[%s15778_s1 + $0x3d8] sm:$0xff]  }
 0x3ab   : > { %v15179_v33 = vadd.f32 %v11441_v24, %v7814_v16  ;;  %v11330_v31 = vpop.f32.mrb[88].mxu0  ;;  %8581 = vmatprep.mubr.bf16.mxu1 %v13142_v29  ;;  %11952 = vmatprep.subr.bf16.mxu0 %v13149_v41  ;;  %v13197_v24 = vld [vmem:[%s15778_s1 + $0x3e0] sm:$0xff]  }
 0x3ac   : > { %v11442_v14 = vpop.f32.mrb[88].mxu1  ;;  %v11331_v50 = vpop.f32.mrb[89].mxu0  ;;  %12064 = vmatprep.subr.bf16.mxu1 %v13151_v57 }
 0x3ad   : > { %v11332_v35 = vadd.f32 %v11331_v50, %v11330_v31  ;;  %v11443_v23 = vpop.f32.mrb[89].mxu1  ;;  %v11333_v8 = vpop.f32.mrb[90].mxu0  ;;  %11953 = vmatpush3.bf16.msra.mxu0 %v13150_v7  ;;  %v13143_v7 = vld [vmem:[%s14134_s15 + $0x148] ss:$72 sps:$4 sm:$0xff]   ;;  %v13155_v50 = vld [vmem:[%s14134_s15 + $0x1dc] ss:$72 sps:$4 sm:$0xff]  }
 0x3ae   : > { %v11444_v54 = vadd.f32 %v11443_v23, %v11442_v14  ;;  %v11445_v37 = vpop.f32.mrb[90].mxu1  ;;  %v11334_v1 = vpop.f32.mrb[91].mxu0  ;;  %12065 = vmatpush3.bf16.msra.mxu1 %v13152_v26  ;;  %11954 = vmatprep.subr.bf16.mxu0 %v13165_v17  ;;  %v13199_v26 = vld [vmem:[%s15778_s1 + $0x460] sm:$0xff]   ;;  %v13146_v14 = vld [vmem:[%s14134_s15 + $0x150] ss:$72 sps:$4 sm:$0xff]  }
 0x3af   : > { %v7819_v0 = vadd.f32 %v11332_v35, %v14946_v63  ;;  %v11335_v34 = vadd.f32 %v11334_v1, %v11333_v8  ;;  %v11446_v51 = vpop.f32.mrb[91].mxu1  ;;  %12066 = vmatprep.subr.bf16.mxu1 %v13167_v20  ;;  %v13158_v8 = vld [vmem:[%s14134_s15 + $0x1e4] ss:$72 sps:$4 sm:$0xff]  }
 0x3b0   : > { %v11447_v10 = vadd.f32 %v11446_v51, %v11445_v37  ;;  %8421 = vmatmul.mubr.bf16.gmra.mrb[196].mxu0 %v13137_v30  ;;  %v13200_v1 = vld [vmem:[%s15778_s1 + $0x420] sm:$0xff]   ;;  %v13214_v51 = vld [vmem:[%s15778_s1 + $0x3a8] sm:$0xff]  }
 0x3b1   : > { %v15201_v44 = vadd.f32 %v11444_v54, %v7819_v0  ;;  %v7822_v63 = vadd.f32 %v11335_v34, %v14957_v38  ;;  %8582 = vmatmul.mubr.bf16.gmra.mrb[196].mxu1 %v13140_v25  ;;  %8428 = vmatprep.mubr.bf16.mxu0 %v13145_v43  ;;  %v13184_v38 = vld [vmem:[%s15778_s1 + $0x418] sm:$0xff]   ;;  %v13198_v25 = vld [vmem:[%s15778_s1 + $0x3a0] sm:$0xff]   ;;  %v13215_v0 = vld [vmem:[%s15778_s1 + $0x468] sm:$0xff]  }
 0x3b2   : > { %8589 = vmatprep.mubr.bf16.mxu1 %v13148_v56  ;;  %11955 = vmatpush3.bf16.msra.mxu0 %v13166_v47  ;;  %v13213_v56 = vld [vmem:[%s15778_s1 + $0x3e8] sm:$0xff]  }
 0x3b3   : > { %v15207_v29 = vadd.f32 %v11447_v10, %v7822_v63  ;;  %v11336_v41 = vpop.f32.mrb[92].mxu0  ;;  %12067 = vmatpush3.bf16.msra.mxu1 %v13168_v9  ;;  %11956 = vmatprep.subr.bf16.mxu0 %v13181_v19  ;;  %v13229_v10 = vld [vmem:[%s15778_s1 + $0x3f0] sm:$0xff]  }
 0x3b4   : > { %v11448_v57 = vpop.f32.mrb[92].mxu1  ;;  %v11337_v16 = vpop.f32.mrb[93].mxu0  ;;  %12068 = vmatprep.subr.bf16.mxu1 %v13183_v18 }
 0x3b5   : > { %v11338_v17 = vadd.f32 %v11337_v16, %v11336_v41  ;;  %v11449_v31 = vpop.f32.mrb[93].mxu1  ;;  %v11339_v20 = vpop.f32.mrb[94].mxu0  ;;  %v13231_v41 = vld [vmem:[%s15778_s1 + $0x470] sm:$0xff]   ;;  %v13156_v16 = vld [vmem:[%s14134_s15 + $0x1e0] ss:$72 sps:$4 sm:$0xff]  }
 0x3b6   : > { %v11450_v30 = vadd.f32 %v11449_v31, %v11448_v57  ;;  %v11451_v35 = vpop.f32.mrb[94].mxu1  ;;  %v11340_v23 = vpop.f32.mrb[95].mxu0  ;;  %11957 = vmatpush3.bf16.msra.mxu0 %v13182_v4  ;;  %v13153_v4 = vld [vmem:[%s14134_s15 + $0x1d8] ss:$72 sps:$4 sm:$0xff]  }
 0x3b7   : > { %v7827_v43 = vadd.f32 %v11338_v17, %v14980_v46  ;;  %v11341_v54 = vadd.f32 %v11340_v23, %v11339_v20  ;;  %v11452_v37 = vpop.f32.mrb[95].mxu1  ;;  %12069 = vmatpush3.bf16.msra.mxu1 %v13184_v38  ;;  %11958 = vmatprep.subr.bf16.mxu0 %v13197_v24  ;;  %v13164_v20 = vld [vmem:[%s14134_s15 + $0x274] ss:$72 sps:$4 sm:$0xff]  }
 0x3b8   : > { %v11453_v47 = vadd.f32 %v11452_v37, %v11451_v35  ;;  %8429 = vmatmul.mubr.bf16.gmra.mrb[200].mxu0 %v13143_v7  ;;  %12070 = vmatprep.subr.bf16.mxu1 %v13199_v26  ;;  %v13161_v7 = vld [vmem:[%s14134_s15 + $0x26c] ss:$72 sps:$4 sm:$0xff]   ;;  %v13246_v37 = vld [vmem:[%s15778_s1 + $0x3b8] sm:$0xff]  }
 0x3b9   : > { %v15235_v46 = vadd.f32 %v11450_v30, %v7827_v43  ;;  %v7830_v34 = vadd.f32 %v11341_v54, %v14991_v48  ;;  %8590 = vmatmul.mubr.bf16.gmra.mrb[200].mxu1 %v13146_v14  ;;  %8436 = vmatprep.mubr.bf16.mxu0 %v13155_v50  ;;  %v13216_v48 = vld [vmem:[%s15778_s1 + $0x428] sm:$0xff]   ;;  %v13230_v14 = vld [vmem:[%s15778_s1 + $0x3b0] sm:$0xff]  }
 0x3ba   : > { %8597 = vmatprep.mubr.bf16.mxu1 %v13158_v8  ;;  %11959 = vmatpush3.bf16.msra.mxu0 %v13198_v25  ;;  %v13232_v23 = vld [vmem:[%s15778_s1 + $0x430] sm:$0xff]   ;;  %v13245_v8 = vld [vmem:[%s15778_s1 + $0x3f8] sm:$0xff]  }
 0x3bb   : > { %v15241_v9 = vadd.f32 %v11453_v47, %v7830_v34  ;;  %v11342_v19 = vpop.f32.mrb[96].mxu0  ;;  %12071 = vmatpush3.bf16.msra.mxu1 %v13200_v1  ;;  %11960 = vmatprep.subr.bf16.mxu0 %v13213_v56  ;;  %v13159_v34 = vld [vmem:[%s14134_s15 + $0x268] ss:$72 sps:$4 sm:$0xff]  }
 0x3bc   : > { %v11454_v18 = vpop.f32.mrb[96].mxu1  ;;  %v11343_v63 = vpop.f32.mrb[97].mxu0  ;;  %12072 = vmatprep.subr.bf16.mxu1 %v13215_v0 }
 0x3bd   : > { %v11344_v38 = vadd.f32 %v11343_v63, %v11342_v19  ;;  %v11455_v24 = vpop.f32.mrb[97].mxu1  ;;  %v11345_v57 = vpop.f32.mrb[98].mxu0 }
 0x3be   : > { %v11456_v26 = vadd.f32 %v11455_v24, %v11454_v18  ;;  %v11457_v17 = vpop.f32.mrb[98].mxu1  ;;  %v11346_v31 = vpop.f32.mrb[99].mxu0  ;;  %11961 = vmatpush3.bf16.msra.mxu0 %v13214_v51  ;;  %v13171_v18 = vld [vmem:[%s14134_s15 + $0x2fc] ss:$72 sps:$4 sm:$0xff]  }
 0x3bf   : > { %v7835_v50 = vadd.f32 %v11344_v38, %v15014_v36  ;;  %v11347_v30 = vadd.f32 %v11346_v31, %v11345_v57  ;;  %v11458_v35 = vpop.f32.mrb[99].mxu1  ;;  %12073 = vmatpush3.bf16.msra.mxu1 %v13216_v48  ;;  %11962 = vmatprep.subr.bf16.mxu0 %v13229_v10  ;;  %v13247_v36 = vld [vmem:[%s15778_s1 + $0x478] sm:$0xff]   ;;  %v13174_v38 = vld [vmem:[%s14134_s15 + $0x304] ss:$72 sps:$4 sm:$0xff]  }
 0x3c0   : > { %v11459_v25 = vadd.f32 %v11458_v35, %v11457_v17  ;;  %8437 = vmatmul.mubr.bf16.gmra.mrb[204].mxu0 %v13153_v4  ;;  %12074 = vmatprep.subr.bf16.mxu1 %v13231_v41  ;;  %v13162_v10 = vld [vmem:[%s14134_s15 + $0x270] ss:$72 sps:$4 sm:$0xff]  }
 0x3c1   : > { %v15269_v43 = vadd.f32 %v11456_v26, %v7835_v50  ;;  %v7838_v54 = vadd.f32 %v11347_v30, %v15025_v21  ;;  %8598 = vmatmul.mubr.bf16.gmra.mrb[204].mxu1 %v13156_v16  ;;  %8444 = vmatprep.mubr.bf16.mxu0 %v13161_v7  ;;  %v13248_v21 = vld [vmem:[%s15778_s1 + $0x438] sm:$0xff]  }
 0x3c2   : > { %8605 = vmatprep.mubr.bf16.mxu1 %v13164_v20  ;;  %11963 = vmatpush3.bf16.msra.mxu0 %v13230_v14  ;;  %v13169_v50 = vld [vmem:[%s14134_s15 + $0x2f8] ss:$72 sps:$4 sm:$0xff]  }
 0x3c3   : > { %v15275_v1 = vadd.f32 %v11459_v25, %v7838_v54  ;;  %v11348_v56 = vpop.f32.mrb[100].mxu0  ;;  %12075 = vmatpush3.bf16.msra.mxu1 %v13232_v23  ;;  %11964 = vmatprep.subr.bf16.mxu0 %v13245_v8  ;;  %v13172_v8 = vld [vmem:[%s14134_s15 + $0x300] ss:$72 sps:$4 sm:$0xff]   ;;  %v13177_v25 = vld [vmem:[%s14134_s15 + $0x38c] ss:$72 sps:$4 sm:$0xff]  }
 0x3c4   : > { %v11460_v47 = vpop.f32.mrb[100].mxu1  ;;  %v11349_v0 = vpop.f32.mrb[101].mxu0  ;;  %12076 = vmatprep.subr.bf16.mxu1 %v13247_v36 }
 0x3c5   : > { %v11350_v51 = vadd.f32 %v11349_v0, %v11348_v56  ;;  %v11461_v19 = vpop.f32.mrb[101].mxu1  ;;  %v11351_v48 = vpop.f32.mrb[102].mxu0 }
 0x3c6   : > { %v11462_v63 = vadd.f32 %v11461_v19, %v11460_v47  ;;  %v11463_v4 = vpop.f32.mrb[102].mxu1  ;;  %v11352_v41 = vpop.f32.mrb[103].mxu0  ;;  %11965 = vmatpush3.bf16.msra.mxu0 %v13246_v37 }
 0x3c7   : > { %v7843_v24 = vadd.f32 %v11350_v51, %v15036_v55  ;;  %v11353_v57 = vadd.f32 %v11352_v41, %v11351_v48  ;;  %v11464_v16 = vpop.f32.mrb[103].mxu1  ;;  %12077 = vmatpush3.bf16.msra.mxu1 %v13248_v21 }
 0x3c8   : > { %v11465_v7 = vadd.f32 %v11464_v16, %v11463_v4  ;;  %8445 = vmatmul.mubr.bf16.gmra.mrb[208].mxu0 %v13159_v34 }
 0x3c9   : > { %v15285_v26 = vadd.f32 %v11462_v63, %v7843_v24  ;;  %v7846_v17 = vadd.f32 %v11353_v57, %v15038_v3  ;;  %8606 = vmatmul.mubr.bf16.gmra.mrb[208].mxu1 %v13162_v10  ;;  %8452 = vmatprep.mubr.bf16.mxu0 %v13171_v18  ;;  %v13180_v3 = vld [vmem:[%s14134_s15 + $0x394] ss:$72 sps:$4 sm:$0xff]  }
 0x3ca   : > { %8613 = vmatprep.mubr.bf16.mxu1 %v13174_v38  ;;  %v13178_v38 = vld [vmem:[%s14134_s15 + $0x390] ss:$72 sps:$4 sm:$0xff]   ;;  %v13187_v24 = vld [vmem:[%s14134_s15 + $0x41c] ss:$72 sps:$4 sm:$0xff]  }
 0x3cb   : > { %v15288_v31 = vadd.f32 %v11465_v7, %v7846_v17  ;;  %v11354_v20 = vpop.f32.mrb[104].mxu0 }
 0x3cc   : > { %v11466_v14 = vpop.f32.mrb[104].mxu1  ;;  %v11355_v55 = vpop.f32.mrb[105].mxu0 }
 0x3cd   : > { %v11356_v30 = vadd.f32 %v11355_v55, %v11354_v20  ;;  %v11467_v35 = vpop.f32.mrb[105].mxu1  ;;  %v11357_v23 = vpop.f32.mrb[106].mxu0 }
 0x3ce   : > { %v11468_v36 = vadd.f32 %v11467_v35, %v11466_v14  ;;  %v11469_v54 = vpop.f32.mrb[106].mxu1  ;;  %v11358_v37 = vpop.f32.mrb[107].mxu0 }
 0x3cf   : > { %v7851_v56 = vadd.f32 %v11356_v30, %v15046_v32  ;;  %v11359_v21 = vadd.f32 %v11358_v37, %v11357_v23  ;;  %v11470_v47 = vpop.f32.mrb[107].mxu1  ;;  %v13175_v32 = vld [vmem:[%s14134_s15 + $0x388] ss:$72 sps:$4 sm:$0xff]  }
 0x3d0   : > { %v11471_v0 = vadd.f32 %v11470_v47, %v11469_v54  ;;  %8453 = vmatmul.mubr.bf16.gmra.mrb[212].mxu0 %v13169_v50 }
 0x3d1   : > { %v15295_v34 = vadd.f32 %v11468_v36, %v7851_v56  ;;  %v7854_v51 = vadd.f32 %v11359_v21, %v15048_v39  ;;  %8614 = vmatmul.mubr.bf16.gmra.mrb[212].mxu1 %v13172_v8  ;;  %8460 = vmatprep.mubr.bf16.mxu0 %v13177_v25  ;;  %v13190_v39 = vld [vmem:[%s14134_s15 + $0x424] ss:$72 sps:$4 sm:$0xff]  }
 0x3d2   : > { %8621 = vmatprep.mubr.bf16.mxu1 %v13180_v3  ;;  %v13188_v3 = vld [vmem:[%s14134_s15 + $0x420] ss:$72 sps:$4 sm:$0xff]   ;;  %v13193_v56 = vld [vmem:[%s14134_s15 + $0x4ac] ss:$72 sps:$4 sm:$0xff]  }
 0x3d3   : > { %v15298_v19 = vadd.f32 %v11471_v0, %v7854_v51  ;;  %v11360_v48 = vpop.f32.mrb[108].mxu0 }
 0x3d4   : > { %v11472_v10 = vpop.f32.mrb[108].mxu1  ;;  %v11361_v18 = vpop.f32.mrb[109].mxu0 }
 0x3d5   : > { %v11362_v63 = vadd.f32 %v11361_v18, %v11360_v48  ;;  %v11473_v4 = vpop.f32.mrb[109].mxu1  ;;  %v11363_v41 = vpop.f32.mrb[110].mxu0 }
 0x3d6   : > { %v11474_v57 = vadd.f32 %v11473_v4, %v11472_v10  ;;  %v11475_v16 = vpop.f32.mrb[110].mxu1  ;;  %v11364_v7 = vpop.f32.mrb[111].mxu0 }
 0x3d7   : > { %v7859_v17 = vadd.f32 %v11362_v63, %v15056_v61  ;;  %v11365_v20 = vadd.f32 %v11364_v7, %v11363_v41  ;;  %v11476_v14 = vpop.f32.mrb[111].mxu1  ;;  %v13185_v61 = vld [vmem:[%s14134_s15 + $0x418] ss:$72 sps:$4 sm:$0xff]  }
 0x3d8   : > { %v11477_v55 = vadd.f32 %v11476_v14, %v11475_v16  ;;  %8461 = vmatmul.mubr.bf16.gmra.mrb[216].mxu0 %v13175_v32 }
 0x3d9   : > { %v15305_v50 = vadd.f32 %v11474_v57, %v7859_v17  ;;  %v7862_v30 = vadd.f32 %v11365_v20, %v15058_v11  ;;  %8622 = vmatmul.mubr.bf16.gmra.mrb[216].mxu1 %v13178_v38  ;;  %8468 = vmatprep.mubr.bf16.mxu0 %v13187_v24  ;;  %v13196_v11 = vld [vmem:[%s14134_s15 + $0x4b4] ss:$72 sps:$4 sm:$0xff]  }
 0x3da   : > { %8629 = vmatprep.mubr.bf16.mxu1 %v13190_v39  ;;  %v13194_v39 = vld [vmem:[%s14134_s15 + $0x4b0] ss:$72 sps:$4 sm:$0xff]   ;;  %v13203_v17 = vld [vmem:[%s14134_s15 + $0x53c] ss:$72 sps:$4 sm:$0xff]  }
 0x3db   : > { %v15308_v35 = vadd.f32 %v11477_v55, %v7862_v30  ;;  %v11366_v23 = vpop.f32.mrb[112].mxu0 }
 0x3dc   : > { %v11478_v8 = vpop.f32.mrb[112].mxu1  ;;  %v11367_v25 = vpop.f32.mrb[113].mxu0 }
 0x3dd   : > { %v11368_v36 = vadd.f32 %v11367_v25, %v11366_v23  ;;  %v11479_v54 = vpop.f32.mrb[113].mxu1  ;;  %v11369_v37 = vpop.f32.mrb[114].mxu0 }
 0x3de   : > { %v11480_v21 = vadd.f32 %v11479_v54, %v11478_v8  ;;  %v11481_v47 = vpop.f32.mrb[114].mxu1  ;;  %v11370_v0 = vpop.f32.mrb[115].mxu0 }
 0x3df   : > { %v7867_v51 = vadd.f32 %v11368_v36, %v15066_v62  ;;  %v11371_v48 = vadd.f32 %v11370_v0, %v11369_v37  ;;  %v11482_v10 = vpop.f32.mrb[115].mxu1  ;;  %v13191_v62 = vld [vmem:[%s14134_s15 + $0x4a8] ss:$72 sps:$4 sm:$0xff]  }
 0x3e0   : > { %v11483_v18 = vadd.f32 %v11482_v10, %v11481_v47  ;;  %8469 = vmatmul.mubr.bf16.gmra.mrb[220].mxu0 %v13185_v61 }
 0x3e1   : > { %v15315_v32 = vadd.f32 %v11480_v21, %v7867_v51  ;;  %v7870_v63 = vadd.f32 %v11371_v48, %v15068_v22  ;;  %8630 = vmatmul.mubr.bf16.gmra.mrb[220].mxu1 %v13188_v3  ;;  %8476 = vmatprep.mubr.bf16.mxu0 %v13193_v56  ;;  %v13206_v22 = vld [vmem:[%s14134_s15 + $0x544] ss:$72 sps:$4 sm:$0xff]  }
 0x3e2   : > { %8637 = vmatprep.mubr.bf16.mxu1 %v13196_v11  ;;  %v13204_v11 = vld [vmem:[%s14134_s15 + $0x540] ss:$72 sps:$4 sm:$0xff]   ;;  %v13209_v51 = vld [vmem:[%s14134_s15 + $0x5cc] ss:$72 sps:$4 sm:$0xff]  }
 0x3e3   : > { %v15318_v4 = vadd.f32 %v11483_v18, %v7870_v63  ;;  %v11372_v41 = vpop.f32.mrb[116].mxu0 }
 0x3e4   : > { %v11484_v38 = vpop.f32.mrb[116].mxu1  ;;  %v11373_v24 = vpop.f32.mrb[117].mxu0 }
 0x3e5   : > { %v11374_v57 = vadd.f32 %v11373_v24, %v11372_v41  ;;  %v11485_v16 = vpop.f32.mrb[117].mxu1  ;;  %v11375_v7 = vpop.f32.mrb[118].mxu0 }
 0x3e6   : > { %v11486_v20 = vadd.f32 %v11485_v16, %v11484_v38  ;;  %v11487_v14 = vpop.f32.mrb[118].mxu1  ;;  %v11376_v55 = vpop.f32.mrb[119].mxu0 }
 0x3e7   : > { %v7875_v30 = vadd.f32 %v11374_v57, %v15076_v58  ;;  %v11377_v23 = vadd.f32 %v11376_v55, %v11375_v7  ;;  %v11488_v8 = vpop.f32.mrb[119].mxu1  ;;  %v13201_v58 = vld [vmem:[%s14134_s15 + $0x538] ss:$72 sps:$4 sm:$0xff]  }
 0x3e8   : > { %v11489_v25 = vadd.f32 %v11488_v8, %v11487_v14  ;;  %8477 = vmatmul.mubr.bf16.gmra.mrb[224].mxu0 %v13191_v62 }
 0x3e9   : > { %v15325_v61 = vadd.f32 %v11486_v20, %v7875_v30  ;;  %v7878_v36 = vadd.f32 %v11377_v23, %v15078_v5  ;;  %8638 = vmatmul.mubr.bf16.gmra.mrb[224].mxu1 %v13194_v39  ;;  %8484 = vmatprep.mubr.bf16.mxu0 %v13203_v17  ;;  %v13212_v5 = vld [vmem:[%s14134_s15 + $0x5d4] ss:$72 sps:$4 sm:$0xff]  }
 0x3ea   : > { %8645 = vmatprep.mubr.bf16.mxu1 %v13206_v22  ;;  %v13210_v22 = vld [vmem:[%s14134_s15 + $0x5d0] ss:$72 sps:$4 sm:$0xff]   ;;  %v13219_v30 = vld [vmem:[%s14134_s15 + $0x65c] ss:$72 sps:$4 sm:$0xff]  }
 0x3eb   : > { %v15328_v54 = vadd.f32 %v11489_v25, %v7878_v36  ;;  %v11378_v37 = vpop.f32.mrb[120].mxu0 }
 0x3ec   : > { %v11490_v3 = vpop.f32.mrb[120].mxu1  ;;  %v11379_v56 = vpop.f32.mrb[121].mxu0 }
 0x3ed   : > { %v11380_v21 = vadd.f32 %v11379_v56, %v11378_v37  ;;  %v11491_v47 = vpop.f32.mrb[121].mxu1  ;;  %v11381_v0 = vpop.f32.mrb[122].mxu0 }
 0x3ee   : > { %v11492_v48 = vadd.f32 %v11491_v47, %v11490_v3  ;;  %v11493_v10 = vpop.f32.mrb[122].mxu1  ;;  %v11382_v18 = vpop.f32.mrb[123].mxu0 }
 0x3ef   : > { %v7883_v63 = vadd.f32 %v11380_v21, %v15086_v45  ;;  %v11383_v41 = vadd.f32 %v11382_v18, %v11381_v0  ;;  %v11494_v38 = vpop.f32.mrb[123].mxu1  ;;  %v13207_v45 = vld [vmem:[%s14134_s15 + $0x5c8] ss:$72 sps:$4 sm:$0xff]  }
 0x3f0   : > { %v11495_v24 = vadd.f32 %v11494_v38, %v11493_v10  ;;  %8485 = vmatmul.mubr.bf16.gmra.mrb[228].mxu0 %v13201_v58 }
 0x3f1   : > { %v15335_v62 = vadd.f32 %v11492_v48, %v7883_v63  ;;  %v7886_v57 = vadd.f32 %v11383_v41, %v15088_v59  ;;  %8646 = vmatmul.mubr.bf16.gmra.mrb[228].mxu1 %v13204_v11  ;;  %8492 = vmatprep.mubr.bf16.mxu0 %v13209_v51  ;;  %v13222_v59 = vld [vmem:[%s14134_s15 + $0x664] ss:$72 sps:$4 sm:$0xff]  }
 0x3f2   : > { %8653 = vmatprep.mubr.bf16.mxu1 %v13212_v5  ;;  %v13220_v5 = vld [vmem:[%s14134_s15 + $0x660] ss:$72 sps:$4 sm:$0xff]   ;;  %v13225_v63 = vld [vmem:[%s14134_s15 + $0x6ec] ss:$72 sps:$4 sm:$0xff]  }
 0x3f3   : > { %v15338_v16 = vadd.f32 %v11495_v24, %v7886_v57  ;;  %v11384_v7 = vpop.f32.mrb[124].mxu0 }
 0x3f4   : > { %v11496_v39 = vpop.f32.mrb[124].mxu1  ;;  %v11385_v17 = vpop.f32.mrb[125].mxu0 }
 0x3f5   : > { %v11386_v20 = vadd.f32 %v11385_v17, %v11384_v7  ;;  %v11497_v14 = vpop.f32.mrb[125].mxu1  ;;  %v11387_v55 = vpop.f32.mrb[126].mxu0 }
 0x3f6   : > { %v11498_v23 = vadd.f32 %v11497_v14, %v11496_v39  ;;  %v11499_v8 = vpop.f32.mrb[126].mxu1  ;;  %v11388_v25 = vpop.f32.mrb[127].mxu0 }
 0x3f7   : > { %v7891_v36 = vadd.f32 %v11386_v20, %v15096_v27  ;;  %v11389_v37 = vadd.f32 %v11388_v25, %v11387_v55  ;;  %v11500_v3 = vpop.f32.mrb[127].mxu1  ;;  %v13217_v27 = vld [vmem:[%s14134_s15 + $0x658] ss:$72 sps:$4 sm:$0xff]  }
 0x3f8   : > { %v11501_v56 = vadd.f32 %v11500_v3, %v11499_v8  ;;  %8493 = vmatmul.mubr.bf16.gmra.mrb[232].mxu0 %v13207_v45 }
 0x3f9   : > { %v15345_v58 = vadd.f32 %v11498_v23, %v7891_v36  ;;  %v7894_v21 = vadd.f32 %v11389_v37, %v15098_v49  ;;  %8654 = vmatmul.mubr.bf16.gmra.mrb[232].mxu1 %v13210_v22  ;;  %8500 = vmatprep.mubr.bf16.mxu0 %v13219_v30  ;;  %v13228_v49 = vld [vmem:[%s14134_s15 + $0x6f4] ss:$72 sps:$4 sm:$0xff]  }
 0x3fa   : > { %8661 = vmatprep.mubr.bf16.mxu1 %v13222_v59  ;;  %v13226_v59 = vld [vmem:[%s14134_s15 + $0x6f0] ss:$72 sps:$4 sm:$0xff]   ;;  %v13235_v36 = vld [vmem:[%s14134_s15 + $0x77c] ss:$72 sps:$4 sm:$0xff]  }
 0x3fb   : > { %v15348_v47 = vadd.f32 %v11501_v56, %v7894_v21  ;;  %v11518_v0 = vpop.f32.mrb[128].mxu0 }
 0x3fc   : > { %v11630_v11 = vpop.f32.mrb[128].mxu1  ;;  %v11519_v51 = vpop.f32.mrb[129].mxu0 }
 0x3fd   : > { %v11520_v48 = vadd.f32 %v11519_v51, %v11518_v0  ;;  %v11631_v10 = vpop.f32.mrb[129].mxu1  ;;  %v11521_v18 = vpop.f32.mrb[130].mxu0 }
 0x3fe   : > { %v11632_v41 = vadd.f32 %v11631_v10, %v11630_v11  ;;  %v11633_v38 = vpop.f32.mrb[130].mxu1  ;;  %v11522_v24 = vpop.f32.mrb[131].mxu0 }
 0x3ff   : > { %v8093_v57 = vadd.f32 %v11520_v48, %v15105_v13  ;;  %v11523_v7 = vadd.f32 %v11522_v24, %v11521_v18  ;;  %v11634_v39 = vpop.f32.mrb[131].mxu1  ;;  %v13223_v13 = vld [vmem:[%s14134_s15 + $0x6e8] ss:$72 sps:$4 sm:$0xff]  }
 0x400   : > { %v11635_v17 = vadd.f32 %v11634_v39, %v11633_v38  ;;  %8501 = vmatmul.mubr.bf16.gmra.mrb[236].mxu0 %v13217_v27 }
 0x401   : > { %v15355_v45 = vadd.f32 %v11632_v41, %v8093_v57  ;;  %v8096_v20 = vadd.f32 %v11523_v7, %v15108_v6  ;;  %8662 = vmatmul.mubr.bf16.gmra.mrb[236].mxu1 %v13220_v5  ;;  %8508 = vmatprep.mubr.bf16.mxu0 %v13225_v63  ;;  %v13238_v6 = vld [vmem:[%s14134_s15 + $0x784] ss:$72 sps:$4 sm:$0xff]  }
 0x402   : > { %8669 = vmatprep.mubr.bf16.mxu1 %v13228_v49  ;;  %v13236_v49 = vld [vmem:[%s14134_s15 + $0x780] ss:$72 sps:$4 sm:$0xff]   ;;  %v13241_v57 = vld [vmem:[%s14134_s15 + $0x80c] ss:$72 sps:$4 sm:$0xff]  }
 0x403   : > { %v15358_v14 = vadd.f32 %v11635_v17, %v8096_v20  ;;  %v11524_v55 = vpop.f32.mrb[132].mxu0 }
 0x404   : > { %v11636_v22 = vpop.f32.mrb[132].mxu1  ;;  %v11525_v30 = vpop.f32.mrb[133].mxu0 }
 0x405   : > { %v11526_v23 = vadd.f32 %v11525_v30, %v11524_v55  ;;  %v11637_v8 = vpop.f32.mrb[133].mxu1  ;;  %v11527_v25 = vpop.f32.mrb[134].mxu0 }
 0x406   : > { %v11638_v37 = vadd.f32 %v11637_v8, %v11636_v22  ;;  %v11639_v3 = vpop.f32.mrb[134].mxu1  ;;  %v11528_v56 = vpop.f32.mrb[135].mxu0 }
 0x407   : > { %v8101_v21 = vadd.f32 %v11526_v23, %v15115_v42  ;;  %v11529_v0 = vadd.f32 %v11528_v56, %v11527_v25  ;;  %v11640_v11 = vpop.f32.mrb[135].mxu1  ;;  %v13233_v42 = vld [vmem:[%s14134_s15 + $0x778] ss:$72 sps:$4 sm:$0xff]  }
 0x408   : > { %v11641_v51 = vadd.f32 %v11640_v11, %v11639_v3  ;;  %8509 = vmatmul.mubr.bf16.gmra.mrb[240].mxu0 %v13223_v13 }
 0x409   : > { %v15365_v27 = vadd.f32 %v11638_v37, %v8101_v21  ;;  %v8104_v48 = vadd.f32 %v11529_v0, %v15118_v53  ;;  %8670 = vmatmul.mubr.bf16.gmra.mrb[240].mxu1 %v13226_v59  ;;  %8516 = vmatprep.mubr.bf16.mxu0 %v13235_v36  ;;  %v13244_v53 = vld [vmem:[%s14134_s15 + $0x814] ss:$72 sps:$4 sm:$0xff]  }
 0x40a   : > { %8677 = vmatprep.mubr.bf16.mxu1 %v13238_v6  ;;  %v13242_v6 = vld [vmem:[%s14134_s15 + $0x810] ss:$72 sps:$4 sm:$0xff]   ;;  %v13251_v21 = vld [vmem:[%s14134_s15 + $0x89c] ss:$72 sps:$4 sm:$0xff]  }
 0x40b   : > { %v15368_v10 = vadd.f32 %v11641_v51, %v8104_v48  ;;  %v11530_v18 = vpop.f32.mrb[136].mxu0 }
 0x40c   : > { %v11642_v5 = vpop.f32.mrb[136].mxu1  ;;  %v11531_v63 = vpop.f32.mrb[137].mxu0 }
 0x40d   : > { %v11532_v41 = vadd.f32 %v11531_v63, %v11530_v18  ;;  %v11643_v38 = vpop.f32.mrb[137].mxu1  ;;  %v11533_v24 = vpop.f32.mrb[138].mxu0 }
 0x40e   : > { %v11644_v7 = vadd.f32 %v11643_v38, %v11642_v5  ;;  %v11645_v39 = vpop.f32.mrb[138].mxu1  ;;  %v11534_v17 = vpop.f32.mrb[139].mxu0 }
 0x40f   : > { %v8109_v20 = vadd.f32 %v11532_v41, %v15125_v60  ;;  %v11535_v55 = vadd.f32 %v11534_v17, %v11533_v24  ;;  %v11646_v22 = vpop.f32.mrb[139].mxu1  ;;  %v13239_v60 = vld [vmem:[%s14134_s15 + $0x808] ss:$72 sps:$4 sm:$0xff]  }
 0x410   : > { %v11647_v30 = vadd.f32 %v11646_v22, %v11645_v39  ;;  %8517 = vmatmul.mubr.bf16.gmra.mrb[244].mxu0 %v13233_v42 }
 0x411   : > { %v15375_v13 = vadd.f32 %v11644_v7, %v8109_v20  ;;  %v8112_v23 = vadd.f32 %v11535_v55, %v15128_v52  ;;  %8678 = vmatmul.mubr.bf16.gmra.mrb[244].mxu1 %v13236_v49  ;;  %8524 = vmatprep.mubr.bf16.mxu0 %v13241_v57  ;;  %v13254_v52 = vld [vmem:[%s14134_s15 + $0x8a4] ss:$72 sps:$4 sm:$0xff]  }
 0x412   : > { %8685 = vmatprep.mubr.bf16.mxu1 %v13244_v53  ;;  %v13252_v53 = vld [vmem:[%s14134_s15 + $0x8a0] ss:$72 sps:$4 sm:$0xff]   ;;  %v13257_v20 = vld [vmem:[%s14134_s15 + $0x3c] ss:$72 sps:$4 sm:$0xff]  }
 0x413   : > { %v15378_v8 = vadd.f32 %v11647_v30, %v8112_v23  ;;  %v11536_v25 = vpop.f32.mrb[140].mxu0 }
 0x414   : > { %v11648_v59 = vpop.f32.mrb[140].mxu1  ;;  %v11537_v36 = vpop.f32.mrb[141].mxu0 }
 0x415   : > { %v11538_v37 = vadd.f32 %v11537_v36, %v11536_v25  ;;  %v11649_v3 = vpop.f32.mrb[141].mxu1  ;;  %v11539_v56 = vpop.f32.mrb[142].mxu0 }
 0x416   : > { %v11650_v0 = vadd.f32 %v11649_v3, %v11648_v59  ;;  %v11651_v11 = vpop.f32.mrb[142].mxu1  ;;  %v11540_v51 = vpop.f32.mrb[143].mxu0 }
 0x417   : > { %v8117_v48 = vadd.f32 %v11538_v37, %v15135_v12  ;;  %v11541_v18 = vadd.f32 %v11540_v51, %v11539_v56  ;;  %v11652_v5 = vpop.f32.mrb[143].mxu1  ;;  %v13249_v12 = vld [vmem:[%s14134_s15 + $0x898] ss:$72 sps:$4 sm:$0xff]  }
 0x418   : > { %v11653_v63 = vadd.f32 %v11652_v5, %v11651_v11  ;;  %8525 = vmatmul.mubr.bf16.gmra.mrb[248].mxu0 %v13239_v60 }
 0x419   : > { %v15385_v42 = vadd.f32 %v11650_v0, %v8117_v48  ;;  %v8120_v41 = vadd.f32 %v11541_v18, %v15138_v2  ;;  %8686 = vmatmul.mubr.bf16.gmra.mrb[248].mxu1 %v13242_v6  ;;  %8532 = vmatprep.mubr.bf16.mxu0 %v13251_v21  ;;  %v13260_v2 = vld [vmem:[%s14134_s15 + $0x44] ss:$72 sps:$4 sm:$0xff]  }
 0x41a   : > { %8693 = vmatprep.mubr.bf16.mxu1 %v13254_v52  ;;  %v13258_v52 = vld [vmem:[%s14134_s15 + $0x40] ss:$72 sps:$4 sm:$0xff]   ;;  %v13263_v48 = vld [vmem:[%s14134_s15 + $0xcc] ss:$72 sps:$4 sm:$0xff]  }
 0x41b   : > { %v15388_v38 = vadd.f32 %v11653_v63, %v8120_v41  ;;  %v11542_v24 = vpop.f32.mrb[144].mxu0 }
 0x41c   : > { %v11654_v49 = vpop.f32.mrb[144].mxu1  ;;  %v11543_v57 = vpop.f32.mrb[145].mxu0 }
 0x41d   : > { %v11544_v7 = vadd.f32 %v11543_v57, %v11542_v24  ;;  %v11655_v39 = vpop.f32.mrb[145].mxu1  ;;  %v11545_v17 = vpop.f32.mrb[146].mxu0 }
 0x41e   : > { %v11656_v55 = vadd.f32 %v11655_v39, %v11654_v49  ;;  %v11657_v22 = vpop.f32.mrb[146].mxu1  ;;  %v11546_v30 = vpop.f32.mrb[147].mxu0 }
 0x41f   : > { %v8125_v23 = vadd.f32 %v11544_v7, %v15145_v15  ;;  %v11547_v25 = vadd.f32 %v11546_v30, %v11545_v17  ;;  %v11658_v59 = vpop.f32.mrb[147].mxu1  ;;  %v13255_v15 = vld [vmem:[%s14134_s15 + $0x38] ss:$72 sps:$4 sm:$0xff]  }
 0x420   : > { %v11659_v36 = vadd.f32 %v11658_v59, %v11657_v22  ;;  %8533 = vmatmul.mubr.bf16.gmra.mrb[252].mxu0 %v13249_v12 }
 0x421   : > { %v15395_v60 = vadd.f32 %v11656_v55, %v8125_v23  ;;  %v8128_v37 = vadd.f32 %v11547_v25, %v15148_v40  ;;  %8694 = vmatmul.mubr.bf16.gmra.mrb[252].mxu1 %v13252_v53  ;;  %8734 = vmatprep.mubr.bf16.mxu0 %v13257_v20  ;;  %v13266_v40 = vld [vmem:[%s14134_s15 + $0xd4] ss:$72 sps:$4 sm:$0xff]  }
 0x422   : > { %8895 = vmatprep.mubr.bf16.mxu1 %v13260_v2  ;;  %v13264_v2 = vld [vmem:[%s14134_s15 + $0xd0] ss:$72 sps:$4 sm:$0xff]   ;;  %v13269_v23 = vld [vmem:[%s14134_s15 + $0x15c] ss:$72 sps:$4 sm:$0xff]  }
 0x423   : > { %v15398_v3 = vadd.f32 %v11659_v36, %v8128_v37  ;;  %v11548_v56 = vpop.f32.mrb[148].mxu0 }
 0x424   : > { %v11660_v6 = vpop.f32.mrb[148].mxu1  ;;  %v11549_v21 = vpop.f32.mrb[149].mxu0 }
 0x425   : > { %v11550_v0 = vadd.f32 %v11549_v21, %v11548_v56  ;;  %v11661_v11 = vpop.f32.mrb[149].mxu1  ;;  %v11551_v51 = vpop.f32.mrb[150].mxu0 }
 0x426   : > { %v11662_v18 = vadd.f32 %v11661_v11, %v11660_v6  ;;  %v11663_v5 = vpop.f32.mrb[150].mxu1  ;;  %v11552_v63 = vpop.f32.mrb[151].mxu0 }
 0x427   : > { %v8133_v41 = vadd.f32 %v11550_v0, %v15167_v28  ;;  %v11553_v24 = vadd.f32 %v11552_v63, %v11551_v51  ;;  %v11664_v49 = vpop.f32.mrb[151].mxu1  ;;  %v13261_v28 = vld [vmem:[%s14134_s15 + $0xc8] ss:$72 sps:$4 sm:$0xff]  }
 0x428   : > { %v11665_v57 = vadd.f32 %v11664_v49, %v11663_v5  ;;  %8735 = vmatmul.mubr.bf16.vlgmr.msra.gmra.mrb[0].mxu0 %v13255_v15 }
 0x429   : > { %v15405_v12 = vadd.f32 %v11662_v18, %v8133_v41  ;;  %v8136_v7 = vadd.f32 %v11553_v24, %v15179_v33  ;;  %8896 = vmatmul.mubr.bf16.vlgmr.msra.gmra.mrb[0].mxu1 %v13258_v52  ;;  %8742 = vmatprep.mubr.bf16.mxu0 %v13263_v48  ;;  %v13272_v33 = vld [vmem:[%s14134_s15 + $0x164] ss:$72 sps:$4 sm:$0xff]  }
 0x42a   : > { %8903 = vmatprep.mubr.bf16.mxu1 %v13266_v40  ;;  %v13270_v40 = vld [vmem:[%s14134_s15 + $0x160] ss:$72 sps:$4 sm:$0xff]   ;;  %v13275_v41 = vld [vmem:[%s14134_s15 + $0x1ec] ss:$72 sps:$4 sm:$0xff]  }
 0x42b   : > { %v15408_v39 = vadd.f32 %v11665_v57, %v8136_v7  ;;  %v11554_v17 = vpop.f32.mrb[152].mxu0 }
 0x42c   : > { %v11666_v53 = vpop.f32.mrb[152].mxu1  ;;  %v11555_v20 = vpop.f32.mrb[153].mxu0 }
 0x42d   : > { %v11556_v55 = vadd.f32 %v11555_v20, %v11554_v17  ;;  %v11667_v22 = vpop.f32.mrb[153].mxu1  ;;  %v11557_v30 = vpop.f32.mrb[154].mxu0 }
 0x42e   : > { %v11668_v25 = vadd.f32 %v11667_v22, %v11666_v53  ;;  %v11669_v59 = vpop.f32.mrb[154].mxu1  ;;  %v11558_v36 = vpop.f32.mrb[155].mxu0 }
 0x42f   : > { %v8141_v37 = vadd.f32 %v11556_v55, %v15201_v44  ;;  %v11559_v56 = vadd.f32 %v11558_v36, %v11557_v30  ;;  %v11670_v6 = vpop.f32.mrb[155].mxu1  ;;  %v13267_v44 = vld [vmem:[%s14134_s15 + $0x158] ss:$72 sps:$4 sm:$0xff]  }
 0x430   : > { %v11671_v21 = vadd.f32 %v11670_v6, %v11669_v59  ;;  %8743 = vmatmul.mubr.bf16.gmra.mrb[4].mxu0 %v13261_v28 }
 0x431   : > { %v15415_v15 = vadd.f32 %v11668_v25, %v8141_v37  ;;  %v8144_v0 = vadd.f32 %v11559_v56, %v15207_v29  ;;  %8904 = vmatmul.mubr.bf16.gmra.mrb[4].mxu1 %v13264_v2  ;;  %8750 = vmatprep.mubr.bf16.mxu0 %v13269_v23  ;;  %v13278_v29 = vld [vmem:[%s14134_s15 + $0x1f4] ss:$72 sps:$4 sm:$0xff]  }
 0x432   : > { %8911 = vmatprep.mubr.bf16.mxu1 %v13272_v33  ;;  %v13276_v33 = vld [vmem:[%s14134_s15 + $0x1f0] ss:$72 sps:$4 sm:$0xff]   ;;  %v13281_v37 = vld [vmem:[%s14134_s15 + $0x27c] ss:$72 sps:$4 sm:$0xff]  }
 0x433   : > { %v15418_v11 = vadd.f32 %v11671_v21, %v8144_v0  ;;  %v11560_v51 = vpop.f32.mrb[156].mxu0 }
 0x434   : > { %v11672_v52 = vpop.f32.mrb[156].mxu1  ;;  %v11561_v48 = vpop.f32.mrb[157].mxu0 }
 0x435   : > { %v11562_v18 = vadd.f32 %v11561_v48, %v11560_v51  ;;  %v11673_v5 = vpop.f32.mrb[157].mxu1  ;;  %v11563_v63 = vpop.f32.mrb[158].mxu0 }
 0x436   : > { %v11674_v24 = vadd.f32 %v11673_v5, %v11672_v52  ;;  %v11675_v49 = vpop.f32.mrb[158].mxu1  ;;  %v11564_v57 = vpop.f32.mrb[159].mxu0 }
 0x437   : > { %v8149_v7 = vadd.f32 %v11562_v18, %v15235_v46  ;;  %v11565_v17 = vadd.f32 %v11564_v57, %v11563_v63  ;;  %v11676_v53 = vpop.f32.mrb[159].mxu1  ;;  %v13273_v46 = vld [vmem:[%s14134_s15 + $0x1e8] ss:$72 sps:$4 sm:$0xff]  }
 0x438   : > { %v11677_v20 = vadd.f32 %v11676_v53, %v11675_v49  ;;  %8751 = vmatmul.mubr.bf16.gmra.mrb[8].mxu0 %v13267_v44 }
 0x439   : > { %v15425_v28 = vadd.f32 %v11674_v24, %v8149_v7  ;;  %v8152_v55 = vadd.f32 %v11565_v17, %v15241_v9  ;;  %8912 = vmatmul.mubr.bf16.gmra.mrb[8].mxu1 %v13270_v40  ;;  %8758 = vmatprep.mubr.bf16.mxu0 %v13275_v41  ;;  %v13284_v9 = vld [vmem:[%s14134_s15 + $0x284] ss:$72 sps:$4 sm:$0xff]  }
 0x43a   : > { %8919 = vmatprep.mubr.bf16.mxu1 %v13278_v29  ;;  %v13282_v29 = vld [vmem:[%s14134_s15 + $0x280] ss:$72 sps:$4 sm:$0xff]   ;;  %v13287_v7 = vld [vmem:[%s14134_s15 + $0x30c] ss:$72 sps:$4 sm:$0xff]  }
 0x43b   : > { %v15428_v22 = vadd.f32 %v11677_v20, %v8152_v55  ;;  %v11566_v30 = vpop.f32.mrb[160].mxu0 }
 0x43c   : > { %v11678_v2 = vpop.f32.mrb[160].mxu1  ;;  %v11567_v23 = vpop.f32.mrb[161].mxu0 }
 0x43d   : > { %v11568_v25 = vadd.f32 %v11567_v23, %v11566_v30  ;;  %v11679_v59 = vpop.f32.mrb[161].mxu1  ;;  %v11569_v36 = vpop.f32.mrb[162].mxu0 }
 0x43e   : > { %v11680_v56 = vadd.f32 %v11679_v59, %v11678_v2  ;;  %v11681_v6 = vpop.f32.mrb[162].mxu1  ;;  %v11570_v21 = vpop.f32.mrb[163].mxu0 }
 0x43f   : > { %v8157_v0 = vadd.f32 %v11568_v25, %v15269_v43  ;;  %v11571_v51 = vadd.f32 %v11570_v21, %v11569_v36  ;;  %v11682_v52 = vpop.f32.mrb[163].mxu1  ;;  %v13279_v43 = vld [vmem:[%s14134_s15 + $0x278] ss:$72 sps:$4 sm:$0xff]  }
 0x440   : > { %v11683_v48 = vadd.f32 %v11682_v52, %v11681_v6  ;;  %8759 = vmatmul.mubr.bf16.gmra.mrb[12].mxu0 %v13273_v46 }
 0x441   : > { %v15435_v44 = vadd.f32 %v11680_v56, %v8157_v0  ;;  %v8160_v18 = vadd.f32 %v11571_v51, %v15275_v1  ;;  %8920 = vmatmul.mubr.bf16.gmra.mrb[12].mxu1 %v13276_v33  ;;  %8766 = vmatprep.mubr.bf16.mxu0 %v13281_v37  ;;  %v13290_v1 = vld [vmem:[%s14134_s15 + $0x314] ss:$72 sps:$4 sm:$0xff]  }
 0x442   : > { %8927 = vmatprep.mubr.bf16.mxu1 %v13284_v9  ;;  %v13288_v9 = vld [vmem:[%s14134_s15 + $0x310] ss:$72 sps:$4 sm:$0xff]   ;;  %v13293_v0 = vld [vmem:[%s14134_s15 + $0x39c] ss:$72 sps:$4 sm:$0xff]  }
 0x443   : > { %v15438_v5 = vadd.f32 %v11683_v48, %v8160_v18  ;;  %v11572_v63 = vpop.f32.mrb[164].mxu0 }
 0x444   : > { %v11684_v40 = vpop.f32.mrb[164].mxu1  ;;  %v11573_v41 = vpop.f32.mrb[165].mxu0 }
 0x445   : > { %v11574_v24 = vadd.f32 %v11573_v41, %v11572_v63  ;;  %v11685_v49 = vpop.f32.mrb[165].mxu1  ;;  %v11575_v57 = vpop.f32.mrb[166].mxu0 }
 0x446   : > { %v11686_v17 = vadd.f32 %v11685_v49, %v11684_v40  ;;  %v11687_v53 = vpop.f32.mrb[166].mxu1  ;;  %v11576_v20 = vpop.f32.mrb[167].mxu0 }
 0x447   : > { %v8165_v55 = vadd.f32 %v11574_v24, %v15285_v26  ;;  %v11577_v30 = vadd.f32 %v11576_v20, %v11575_v57  ;;  %v11688_v2 = vpop.f32.mrb[167].mxu1  ;;  %v13285_v26 = vld [vmem:[%s14134_s15 + $0x308] ss:$72 sps:$4 sm:$0xff]  }
 0x448   : > { %v11689_v23 = vadd.f32 %v11688_v2, %v11687_v53  ;;  %8767 = vmatmul.mubr.bf16.gmra.mrb[16].mxu0 %v13279_v43 }
 0x449   : > { %v15445_v46 = vadd.f32 %v11686_v17, %v8165_v55  ;;  %v8168_v25 = vadd.f32 %v11577_v30, %v15288_v31  ;;  %8928 = vmatmul.mubr.bf16.gmra.mrb[16].mxu1 %v13282_v29  ;;  %8774 = vmatprep.mubr.bf16.mxu0 %v13287_v7  ;;  %v13296_v31 = vld [vmem:[%s14134_s15 + $0x3a4] ss:$72 sps:$4 sm:$0xff]  }
 0x44a   : > { %8935 = vmatprep.mubr.bf16.mxu1 %v13290_v1  ;;  %v13294_v1 = vld [vmem:[%s14134_s15 + $0x3a0] ss:$72 sps:$4 sm:$0xff]   ;;  %v13299_v55 = vld [vmem:[%s14134_s15 + $0x42c] ss:$72 sps:$4 sm:$0xff]  }
 0x44b   : > { %v15448_v59 = vadd.f32 %v11689_v23, %v8168_v25  ;;  %v11578_v36 = vpop.f32.mrb[168].mxu0 }
 0x44c   : > { %v11690_v33 = vpop.f32.mrb[168].mxu1  ;;  %v11579_v37 = vpop.f32.mrb[169].mxu0 }
 0x44d   : > { %v11580_v56 = vadd.f32 %v11579_v37, %v11578_v36  ;;  %v11691_v6 = vpop.f32.mrb[169].mxu1  ;;  %v11581_v21 = vpop.f32.mrb[170].mxu0 }
 0x44e   : > { %v11692_v51 = vadd.f32 %v11691_v6, %v11690_v33  ;;  %v11693_v52 = vpop.f32.mrb[170].mxu1  ;;  %v11582_v48 = vpop.f32.mrb[171].mxu0 }
 0x44f   : > { %v8173_v18 = vadd.f32 %v11580_v56, %v15295_v34  ;;  %v11583_v63 = vadd.f32 %v11582_v48, %v11581_v21  ;;  %v11694_v40 = vpop.f32.mrb[171].mxu1  ;;  %v13291_v34 = vld [vmem:[%s14134_s15 + $0x398] ss:$72 sps:$4 sm:$0xff]  }
 0x450   : > { %v11695_v41 = vadd.f32 %v11694_v40, %v11693_v52  ;;  %8775 = vmatmul.mubr.bf16.gmra.mrb[20].mxu0 %v13285_v26 }
 0x451   : > { %v15455_v43 = vadd.f32 %v11692_v51, %v8173_v18  ;;  %v8176_v24 = vadd.f32 %v11583_v63, %v15298_v19  ;;  %8936 = vmatmul.mubr.bf16.gmra.mrb[20].mxu1 %v13288_v9  ;;  %8782 = vmatprep.mubr.bf16.mxu0 %v13293_v0  ;;  %v13302_v19 = vld [vmem:[%s14134_s15 + $0x434] ss:$72 sps:$4 sm:$0xff]  }
 0x452   : > { %8943 = vmatprep.mubr.bf16.mxu1 %v13296_v31  ;;  %v13300_v31 = vld [vmem:[%s14134_s15 + $0x430] ss:$72 sps:$4 sm:$0xff]   ;;  %v13305_v18 = vld [vmem:[%s14134_s15 + $0x4bc] ss:$72 sps:$4 sm:$0xff]  }
 0x453   : > { %v15458_v49 = vadd.f32 %v11695_v41, %v8176_v24  ;;  %v11584_v57 = vpop.f32.mrb[172].mxu0 }
 0x454   : > { %v11696_v29 = vpop.f32.mrb[172].mxu1  ;;  %v11585_v7 = vpop.f32.mrb[173].mxu0 }
 0x455   : > { %v11586_v17 = vadd.f32 %v11585_v7, %v11584_v57  ;;  %v11697_v53 = vpop.f32.mrb[173].mxu1  ;;  %v11587_v20 = vpop.f32.mrb[174].mxu0 }
 0x456   : > { %v11698_v30 = vadd.f32 %v11697_v53, %v11696_v29  ;;  %v11699_v2 = vpop.f32.mrb[174].mxu1  ;;  %v11588_v23 = vpop.f32.mrb[175].mxu0 }
 0x457   : > { %v8181_v25 = vadd.f32 %v11586_v17, %v15305_v50  ;;  %v11589_v36 = vadd.f32 %v11588_v23, %v11587_v20  ;;  %v11700_v33 = vpop.f32.mrb[175].mxu1  ;;  %v13297_v50 = vld [vmem:[%s14134_s15 + $0x428] ss:$72 sps:$4 sm:$0xff]  }
 0x458   : > { %v11701_v37 = vadd.f32 %v11700_v33, %v11699_v2  ;;  %8783 = vmatmul.mubr.bf16.gmra.mrb[24].mxu0 %v13291_v34 }
 0x459   : > { %v15465_v26 = vadd.f32 %v11698_v30, %v8181_v25  ;;  %v8184_v56 = vadd.f32 %v11589_v36, %v15308_v35  ;;  %8944 = vmatmul.mubr.bf16.gmra.mrb[24].mxu1 %v13294_v1  ;;  %8790 = vmatprep.mubr.bf16.mxu0 %v13299_v55  ;;  %v13308_v35 = vld [vmem:[%s14134_s15 + $0x4c4] ss:$72 sps:$4 sm:$0xff]  }
 0x45a   : > { %8951 = vmatprep.mubr.bf16.mxu1 %v13302_v19  ;;  %v13306_v19 = vld [vmem:[%s14134_s15 + $0x4c0] ss:$72 sps:$4 sm:$0xff]   ;;  %v13311_v25 = vld [vmem:[%s14134_s15 + $0x54c] ss:$72 sps:$4 sm:$0xff]  }
 0x45b   : > { %v15468_v6 = vadd.f32 %v11701_v37, %v8184_v56  ;;  %v11590_v21 = vpop.f32.mrb[176].mxu0 }
 0x45c   : > { %v11702_v9 = vpop.f32.mrb[176].mxu1  ;;  %v11591_v0 = vpop.f32.mrb[177].mxu0 }
 0x45d   : > { %v11592_v51 = vadd.f32 %v11591_v0, %v11590_v21  ;;  %v11703_v52 = vpop.f32.mrb[177].mxu1  ;;  %v11593_v48 = vpop.f32.mrb[178].mxu0 }
 0x45e   : > { %v11704_v63 = vadd.f32 %v11703_v52, %v11702_v9  ;;  %v11705_v40 = vpop.f32.mrb[178].mxu1  ;;  %v11594_v41 = vpop.f32.mrb[179].mxu0 }
 0x45f   : > { %v8189_v24 = vadd.f32 %v11592_v51, %v15315_v32  ;;  %v11595_v57 = vadd.f32 %v11594_v41, %v11593_v48  ;;  %v11706_v29 = vpop.f32.mrb[179].mxu1  ;;  %v13303_v32 = vld [vmem:[%s14134_s15 + $0x4b8] ss:$72 sps:$4 sm:$0xff]  }
 0x460   : > { %v11707_v7 = vadd.f32 %v11706_v29, %v11705_v40  ;;  %8791 = vmatmul.mubr.bf16.gmra.mrb[28].mxu0 %v13297_v50 }
 0x461   : > { %v15475_v34 = vadd.f32 %v11704_v63, %v8189_v24  ;;  %v8192_v17 = vadd.f32 %v11595_v57, %v15318_v4  ;;  %8952 = vmatmul.mubr.bf16.gmra.mrb[28].mxu1 %v13300_v31  ;;  %8798 = vmatprep.mubr.bf16.mxu0 %v13305_v18  ;;  %v13314_v4 = vld [vmem:[%s14134_s15 + $0x554] ss:$72 sps:$4 sm:$0xff]  }
 0x462   : > { %8959 = vmatprep.mubr.bf16.mxu1 %v13308_v35  ;;  %v13312_v35 = vld [vmem:[%s14134_s15 + $0x550] ss:$72 sps:$4 sm:$0xff]   ;;  %v13317_v24 = vld [vmem:[%s14134_s15 + $0x5dc] ss:$72 sps:$4 sm:$0xff]  }
 0x463   : > { %v15478_v53 = vadd.f32 %v11707_v7, %v8192_v17  ;;  %v11596_v20 = vpop.f32.mrb[180].mxu0 }
 0x464   : > { %v11708_v1 = vpop.f32.mrb[180].mxu1  ;;  %v11597_v55 = vpop.f32.mrb[181].mxu0 }
 0x465   : > { %v11598_v30 = vadd.f32 %v11597_v55, %v11596_v20  ;;  %v11709_v2 = vpop.f32.mrb[181].mxu1  ;;  %v11599_v23 = vpop.f32.mrb[182].mxu0 }
 0x466   : > { %v11710_v36 = vadd.f32 %v11709_v2, %v11708_v1  ;;  %v11711_v33 = vpop.f32.mrb[182].mxu1  ;;  %v11600_v37 = vpop.f32.mrb[183].mxu0 }
 0x467   : > { %v8197_v56 = vadd.f32 %v11598_v30, %v15325_v61  ;;  %v11601_v21 = vadd.f32 %v11600_v37, %v11599_v23  ;;  %v11712_v9 = vpop.f32.mrb[183].mxu1  ;;  %v13309_v61 = vld [vmem:[%s14134_s15 + $0x548] ss:$72 sps:$4 sm:$0xff]  }
 0x468   : > { %v11713_v0 = vadd.f32 %v11712_v9, %v11711_v33  ;;  %8799 = vmatmul.mubr.bf16.gmra.mrb[32].mxu0 %v13303_v32 }
 0x469   : > { %v15485_v50 = vadd.f32 %v11710_v36, %v8197_v56  ;;  %v8200_v51 = vadd.f32 %v11601_v21, %v15328_v54  ;;  %8960 = vmatmul.mubr.bf16.gmra.mrb[32].mxu1 %v13306_v19  ;;  %8806 = vmatprep.mubr.bf16.mxu0 %v13311_v25  ;;  %v13320_v54 = vld [vmem:[%s14134_s15 + $0x5e4] ss:$72 sps:$4 sm:$0xff]  }
 0x46a   : > { %8967 = vmatprep.mubr.bf16.mxu1 %v13314_v4  ;;  %v13318_v4 = vld [vmem:[%s14134_s15 + $0x5e0] ss:$72 sps:$4 sm:$0xff]   ;;  %v13323_v56 = vld [vmem:[%s14134_s15 + $0x66c] ss:$72 sps:$4 sm:$0xff]  }
 0x46b   : > { %v15488_v52 = vadd.f32 %v11713_v0, %v8200_v51  ;;  %v11602_v48 = vpop.f32.mrb[184].mxu0 }
 0x46c   : > { %v11714_v31 = vpop.f32.mrb[184].mxu1  ;;  %v11603_v18 = vpop.f32.mrb[185].mxu0 }
 0x46d   : > { %v11604_v63 = vadd.f32 %v11603_v18, %v11602_v48  ;;  %v11715_v40 = vpop.f32.mrb[185].mxu1  ;;  %v11605_v41 = vpop.f32.mrb[186].mxu0 }
 0x46e   : > { %v11716_v57 = vadd.f32 %v11715_v40, %v11714_v31  ;;  %v11717_v29 = vpop.f32.mrb[186].mxu1  ;;  %v11606_v7 = vpop.f32.mrb[187].mxu0 }
 0x46f   : > { %v8205_v17 = vadd.f32 %v11604_v63, %v15335_v62  ;;  %v11607_v20 = vadd.f32 %v11606_v7, %v11605_v41  ;;  %v11718_v1 = vpop.f32.mrb[187].mxu1  ;;  %v13315_v62 = vld [vmem:[%s14134_s15 + $0x5d8] ss:$72 sps:$4 sm:$0xff]  }
 0x470   : > { %v11719_v55 = vadd.f32 %v11718_v1, %v11717_v29  ;;  %8807 = vmatmul.mubr.bf16.gmra.mrb[36].mxu0 %v13309_v61 }
 0x471   : > { %v15495_v32 = vadd.f32 %v11716_v57, %v8205_v17  ;;  %v8208_v30 = vadd.f32 %v11607_v20, %v15338_v16  ;;  %8968 = vmatmul.mubr.bf16.gmra.mrb[36].mxu1 %v13312_v35  ;;  %8814 = vmatprep.mubr.bf16.mxu0 %v13317_v24  ;;  %v13326_v16 = vld [vmem:[%s14134_s15 + $0x674] ss:$72 sps:$4 sm:$0xff]  }
 0x472   : > { %8975 = vmatprep.mubr.bf16.mxu1 %v13320_v54  ;;  %v13324_v54 = vld [vmem:[%s14134_s15 + $0x670] ss:$72 sps:$4 sm:$0xff]   ;;  %v13329_v17 = vld [vmem:[%s14134_s15 + $0x6fc] ss:$72 sps:$4 sm:$0xff]  }
 0x473   : > { %v15498_v2 = vadd.f32 %v11719_v55, %v8208_v30  ;;  %v11608_v23 = vpop.f32.mrb[188].mxu0 }
 0x474   : > { %v11720_v19 = vpop.f32.mrb[188].mxu1  ;;  %v11609_v25 = vpop.f32.mrb[189].mxu0 }
 0x475   : > { %v11610_v36 = vadd.f32 %v11609_v25, %v11608_v23  ;;  %v11721_v33 = vpop.f32.mrb[189].mxu1  ;;  %v11611_v37 = vpop.f32.mrb[190].mxu0 }
 0x476   : > { %v11722_v21 = vadd.f32 %v11721_v33, %v11720_v19  ;;  %v11723_v9 = vpop.f32.mrb[190].mxu1  ;;  %v11612_v0 = vpop.f32.mrb[191].mxu0 }
 0x477   : > { %v8213_v51 = vadd.f32 %v11610_v36, %v15345_v58  ;;  %v11613_v48 = vadd.f32 %v11612_v0, %v11611_v37  ;;  %v11724_v31 = vpop.f32.mrb[191].mxu1  ;;  %v13321_v58 = vld [vmem:[%s14134_s15 + $0x668] ss:$72 sps:$4 sm:$0xff]  }
 0x478   : > { %v11725_v18 = vadd.f32 %v11724_v31, %v11723_v9  ;;  %8815 = vmatmul.mubr.bf16.gmra.mrb[40].mxu0 %v13315_v62 }
 0x479   : > { %v15505_v61 = vadd.f32 %v11722_v21, %v8213_v51  ;;  %v8216_v63 = vadd.f32 %v11613_v48, %v15348_v47  ;;  %8976 = vmatmul.mubr.bf16.gmra.mrb[40].mxu1 %v13318_v4  ;;  %8822 = vmatprep.mubr.bf16.mxu0 %v13323_v56  ;;  %v13332_v47 = vld [vmem:[%s14134_s15 + $0x704] ss:$72 sps:$4 sm:$0xff]  }
 0x47a   : > { %8983 = vmatprep.mubr.bf16.mxu1 %v13326_v16  ;;  %v13330_v16 = vld [vmem:[%s14134_s15 + $0x700] ss:$72 sps:$4 sm:$0xff]   ;;  %v13335_v51 = vld [vmem:[%s14134_s15 + $0x78c] ss:$72 sps:$4 sm:$0xff]  }
 0x47b   : > { %v15508_v40 = vadd.f32 %v11725_v18, %v8216_v63  ;;  %v11742_v41 = vpop.f32.mrb[192].mxu0 }
 0x47c   : > { %v11854_v35 = vpop.f32.mrb[192].mxu1  ;;  %v11743_v24 = vpop.f32.mrb[193].mxu0 }
 0x47d   : > { %v11744_v57 = vadd.f32 %v11743_v24, %v11742_v41  ;;  %v11855_v29 = vpop.f32.mrb[193].mxu1  ;;  %v11745_v7 = vpop.f32.mrb[194].mxu0 }
 0x47e   : > { %v11856_v20 = vadd.f32 %v11855_v29, %v11854_v35  ;;  %v11857_v1 = vpop.f32.mrb[194].mxu1  ;;  %v11746_v55 = vpop.f32.mrb[195].mxu0 }
 0x47f   : > { %v8415_v30 = vadd.f32 %v11744_v57, %v15355_v45  ;;  %v11747_v23 = vadd.f32 %v11746_v55, %v11745_v7  ;;  %v11858_v19 = vpop.f32.mrb[195].mxu1  ;;  %v13327_v45 = vld [vmem:[%s14134_s15 + $0x6f8] ss:$72 sps:$4 sm:$0xff]  }
 0x480   : > { %v11859_v25 = vadd.f32 %v11858_v19, %v11857_v1  ;;  %8823 = vmatmul.mubr.bf16.gmra.mrb[44].mxu0 %v13321_v58 }
 0x481   : > { %v15515_v62 = vadd.f32 %v11856_v20, %v8415_v30  ;;  %v8418_v36 = vadd.f32 %v11747_v23, %v15358_v14  ;;  %8984 = vmatmul.mubr.bf16.gmra.mrb[44].mxu1 %v13324_v54  ;;  %8830 = vmatprep.mubr.bf16.mxu0 %v13329_v17  ;;  %v13338_v14 = vld [vmem:[%s14134_s15 + $0x794] ss:$72 sps:$4 sm:$0xff]  }
 0x482   : > { %8991 = vmatprep.mubr.bf16.mxu1 %v13332_v47  ;;  %v13336_v47 = vld [vmem:[%s14134_s15 + $0x790] ss:$72 sps:$4 sm:$0xff]   ;;  %v13341_v30 = vld [vmem:[%s14134_s15 + $0x81c] ss:$72 sps:$4 sm:$0xff]  }
 0x483   : > { %v15518_v33 = vadd.f32 %v11859_v25, %v8418_v36  ;;  %v11748_v37 = vpop.f32.mrb[196].mxu0 }
 0x484   : > { %v11860_v4 = vpop.f32.mrb[196].mxu1  ;;  %v11749_v56 = vpop.f32.mrb[197].mxu0 }
 0x485   : > { %v11750_v21 = vadd.f32 %v11749_v56, %v11748_v37  ;;  %v11861_v9 = vpop.f32.mrb[197].mxu1  ;;  %v11751_v0 = vpop.f32.mrb[198].mxu0 }
 0x486   : > { %v11862_v48 = vadd.f32 %v11861_v9, %v11860_v4  ;;  %v11863_v31 = vpop.f32.mrb[198].mxu1  ;;  %v11752_v18 = vpop.f32.mrb[199].mxu0 }
 0x487   : > { %v8423_v63 = vadd.f32 %v11750_v21, %v15365_v27  ;;  %v11753_v41 = vadd.f32 %v11752_v18, %v11751_v0  ;;  %v11864_v35 = vpop.f32.mrb[199].mxu1  ;;  %v13333_v27 = vld [vmem:[%s14134_s15 + $0x788] ss:$72 sps:$4 sm:$0xff]  }
 0x488   : > { %v11865_v24 = vadd.f32 %v11864_v35, %v11863_v31  ;;  %8831 = vmatmul.mubr.bf16.gmra.mrb[48].mxu0 %v13327_v45 }
 0x489   : > { %v15525_v58 = vadd.f32 %v11862_v48, %v8423_v63  ;;  %v8426_v57 = vadd.f32 %v11753_v41, %v15368_v10  ;;  %8992 = vmatmul.mubr.bf16.gmra.mrb[48].mxu1 %v13330_v16  ;;  %8838 = vmatprep.mubr.bf16.mxu0 %v13335_v51  ;;  %v13344_v10 = vld [vmem:[%s14134_s15 + $0x824] ss:$72 sps:$4 sm:$0xff]  }
 0x48a   : > { %8999 = vmatprep.mubr.bf16.mxu1 %v13338_v14  ;;  %v13342_v14 = vld [vmem:[%s14134_s15 + $0x820] ss:$72 sps:$4 sm:$0xff]   ;;  %v13347_v63 = vld [vmem:[%s14134_s15 + $0x8ac] ss:$72 sps:$4 sm:$0xff]  }
 0x48b   : > { %v15528_v29 = vadd.f32 %v11865_v24, %v8426_v57  ;;  %v11754_v7 = vpop.f32.mrb[200].mxu0 }
 0x48c   : > { %v11866_v54 = vpop.f32.mrb[200].mxu1  ;;  %v11755_v17 = vpop.f32.mrb[201].mxu0 }
 0x48d   : > { %v11756_v20 = vadd.f32 %v11755_v17, %v11754_v7  ;;  %v11867_v1 = vpop.f32.mrb[201].mxu1  ;;  %v11757_v55 = vpop.f32.mrb[202].mxu0 }
 0x48e   : > { %v11868_v23 = vadd.f32 %v11867_v1, %v11866_v54  ;;  %v11869_v19 = vpop.f32.mrb[202].mxu1  ;;  %v11758_v25 = vpop.f32.mrb[203].mxu0 }
 0x48f   : > { %v8431_v36 = vadd.f32 %v11756_v20, %v15375_v13  ;;  %v11759_v37 = vadd.f32 %v11758_v25, %v11757_v55  ;;  %v11870_v4 = vpop.f32.mrb[203].mxu1  ;;  %v13339_v13 = vld [vmem:[%s14134_s15 + $0x818] ss:$72 sps:$4 sm:$0xff]  }
 0x490   : > { %v11871_v56 = vadd.f32 %v11870_v4, %v11869_v19  ;;  %8839 = vmatmul.mubr.bf16.gmra.mrb[52].mxu0 %v13333_v27 }
 0x491   : > { %v15535_v45 = vadd.f32 %v11868_v23, %v8431_v36  ;;  %v8434_v21 = vadd.f32 %v11759_v37, %v15378_v8  ;;  %9000 = vmatmul.mubr.bf16.gmra.mrb[52].mxu1 %v13336_v47  ;;  %8846 = vmatprep.mubr.bf16.mxu0 %v13341_v30  ;;  %v13350_v8 = vld [vmem:[%s14134_s15 + $0x8b4] ss:$72 sps:$4 sm:$0xff]   ;;  %v13345_v23 = vld [vmem:[%s14134_s15 + $0x8a8] ss:$72 sps:$4 sm:$0xff]  }
 0x492   : > { %9007 = vmatprep.mubr.bf16.mxu1 %v13344_v10  ;;  %v13348_v10 = vld [vmem:[%s14134_s15 + $0x8b0] ss:$72 sps:$4 sm:$0xff]  }
 0x493   : > { %v15538_v9 = vadd.f32 %v11871_v56, %v8434_v21  ;;  %v11760_v0 = vpop.f32.mrb[204].mxu0 }
 0x494   : > { %v11872_v16 = vpop.f32.mrb[204].mxu1  ;;  %v11761_v51 = vpop.f32.mrb[205].mxu0 }
 0x495   : > { %v11762_v48 = vadd.f32 %v11761_v51, %v11760_v0  ;;  %v11873_v31 = vpop.f32.mrb[205].mxu1  ;;  %v11763_v18 = vpop.f32.mrb[206].mxu0 }
 0x496   : > { %v11874_v41 = vadd.f32 %v11873_v31, %v11872_v16  ;;  %v11875_v35 = vpop.f32.mrb[206].mxu1  ;;  %v11764_v24 = vpop.f32.mrb[207].mxu0 }
 0x497   : > { %v8439_v57 = vadd.f32 %v11762_v48, %v15385_v42  ;;  %v11765_v7 = vadd.f32 %v11764_v24, %v11763_v18  ;;  %v11876_v54 = vpop.f32.mrb[207].mxu1 }
 0x498   : > { %v11877_v17 = vadd.f32 %v11876_v54, %v11875_v35  ;;  %8847 = vmatmul.mubr.bf16.gmra.mrb[56].mxu0 %v13339_v13 }
 0x499   : > { %v15545_v27 = vadd.f32 %v11874_v41, %v8439_v57  ;;  %v8442_v20 = vadd.f32 %v11765_v7, %v15388_v38  ;;  %9008 = vmatmul.mubr.bf16.gmra.mrb[56].mxu1 %v13342_v14  ;;  %8854 = vmatprep.mubr.bf16.mxu0 %v13347_v63 }
 0x49a   : > { %9015 = vmatprep.mubr.bf16.mxu1 %v13350_v8 }
 0x49b   : > { %v15548_v1 = vadd.f32 %v11877_v17, %v8442_v20  ;;  %v11766_v55 = vpop.f32.mrb[208].mxu0 }
 0x49c   : > { %v11878_v47 = vpop.f32.mrb[208].mxu1  ;;  %v11767_v30 = vpop.f32.mrb[209].mxu0 }
 0x49d   : > { %v11768_v19 = vadd.f32 %v11767_v30, %v11766_v55  ;;  %v11879_v42 = vpop.f32.mrb[209].mxu1  ;;  %v11769_v25 = vpop.f32.mrb[210].mxu0 }
 0x49e   : > { %v11880_v36 = vadd.f32 %v11879_v42, %v11878_v47  ;;  %v11881_v37 = vpop.f32.mrb[210].mxu1  ;;  %v11770_v4 = vpop.f32.mrb[211].mxu0 }
 0x49f   : > { %v8447_v56 = vadd.f32 %v11768_v19, %v15395_v60  ;;  %v11771_v21 = vadd.f32 %v11770_v4, %v11769_v25  ;;  %v11882_v38 = vpop.f32.mrb[211].mxu1 }
 0x4a0   : > { %v11883_v0 = vadd.f32 %v11882_v38, %v11881_v37  ;;  %8855 = vmatmul.mubr.bf16.gmra.mrb[60].mxu0 %v13345_v23 }
 0x4a1   : > { %v15553_v16 = vadd.f32 %v11880_v36, %v8447_v56  ;;  %v8450_v51 = vadd.f32 %v11771_v21, %v15398_v3  ;;  %9016 = vmatmul.mubr.bf16.gmra.mrb[60].mxu1 %v13348_v10 }
 0x4a3   : > { %v15556_v13 = vadd.f32 %v11883_v0, %v8450_v51  ;;  %v11772_v48 = vpop.f32.mrb[212].mxu0 }
 0x4a4   : > { %v11884_v31 = vpop.f32.mrb[212].mxu1  ;;  %v11773_v18 = vpop.f32.mrb[213].mxu0 }
 0x4a5   : > { %v11774_v14 = vadd.f32 %v11773_v18, %v11772_v48  ;;  %v11885_v63 = vpop.f32.mrb[213].mxu1  ;;  %v11775_v41 = vpop.f32.mrb[214].mxu0 }
 0x4a6   : > { %v11886_v35 = vadd.f32 %v11885_v63, %v11884_v31  ;;  %v11887_v24 = vpop.f32.mrb[214].mxu1  ;;  %v11776_v60 = vpop.f32.mrb[215].mxu0 }
 0x4a7   : > { %v8455_v8 = vadd.f32 %v11774_v14, %v15405_v12  ;;  %v11777_v57 = vadd.f32 %v11776_v60, %v11775_v41  ;;  %v11888_v7 = vpop.f32.mrb[215].mxu1 }
 0x4a8   : > { %v11889_v54 = vadd.f32 %v11888_v7, %v11887_v24 }
 0x4a9   : > { %v15559_v17 = vadd.f32 %v11886_v35, %v8455_v8  ;;  %v8458_v3 = vadd.f32 %v11777_v57, %v15408_v39 }
 0x4ab   : > { %v15562_v20 = vadd.f32 %v11889_v54, %v8458_v3  ;;  %v11778_v55 = vpop.f32.mrb[216].mxu0 }
 0x4ac   : > { %v11890_v47 = vpop.f32.mrb[216].mxu1  ;;  %v11779_v30 = vpop.f32.mrb[217].mxu0 }
 0x4ad   : > { %v11780_v23 = vadd.f32 %v11779_v30, %v11778_v55  ;;  %v11891_v19 = vpop.f32.mrb[217].mxu1  ;;  %v11781_v42 = vpop.f32.mrb[218].mxu0 }
 0x4ae   : > { %v11892_v25 = vadd.f32 %v11891_v19, %v11890_v47  ;;  %v11893_v10 = vpop.f32.mrb[218].mxu1  ;;  %v11782_v36 = vpop.f32.mrb[219].mxu0 }
 0x4af   : > { %v8463_v12 = vadd.f32 %v11780_v23, %v15415_v15  ;;  %v11783_v37 = vadd.f32 %v11782_v36, %v11781_v42  ;;  %v11894_v4 = vpop.f32.mrb[219].mxu1 }
 0x4b0   : > { %v11895_v56 = vadd.f32 %v11894_v4, %v11893_v10 }
 0x4b1   : > { %v15565_v21 = vadd.f32 %v11892_v25, %v8463_v12  ;;  %v8466_v39 = vadd.f32 %v11783_v37, %v15418_v11 }
 0x4b3   : > { %v15568_v38 = vadd.f32 %v11895_v56, %v8466_v39  ;;  %v11784_v0 = vpop.f32.mrb[220].mxu0 }
 0x4b4   : > { %v11896_v51 = vpop.f32.mrb[220].mxu1  ;;  %v11785_v48 = vpop.f32.mrb[221].mxu0 }
 0x4b5   : > { %v11786_v31 = vadd.f32 %v11785_v48, %v11784_v0  ;;  %v11897_v18 = vpop.f32.mrb[221].mxu1  ;;  %v11787_v14 = vpop.f32.mrb[222].mxu0 }
 0x4b6   : > { %v11898_v63 = vadd.f32 %v11897_v18, %v11896_v51  ;;  %v11899_v41 = vpop.f32.mrb[222].mxu1  ;;  %v11788_v35 = vpop.f32.mrb[223].mxu0 }
 0x4b7   : > { %v8471_v15 = vadd.f32 %v11786_v31, %v15425_v28  ;;  %v11789_v24 = vadd.f32 %v11788_v35, %v11787_v14  ;;  %v11900_v60 = vpop.f32.mrb[223].mxu1 }
 0x4b8   : > { %v11901_v8 = vadd.f32 %v11900_v60, %v11899_v41 }
 0x4b9   : > { %v15571_v57 = vadd.f32 %v11898_v63, %v8471_v15  ;;  %v8474_v11 = vadd.f32 %v11789_v24, %v15428_v22 }
 0x4bb   : > { %v15574_v7 = vadd.f32 %v11901_v8, %v8474_v11  ;;  %v11790_v54 = vpop.f32.mrb[224].mxu0 }
 0x4bc   : > { %v11902_v3 = vpop.f32.mrb[224].mxu1  ;;  %v11791_v55 = vpop.f32.mrb[225].mxu0 }
 0x4bd   : > { %v11792_v47 = vadd.f32 %v11791_v55, %v11790_v54  ;;  %v11903_v30 = vpop.f32.mrb[225].mxu1  ;;  %v11793_v23 = vpop.f32.mrb[226].mxu0 }
 0x4be   : > { %v11904_v19 = vadd.f32 %v11903_v30, %v11902_v3  ;;  %v11905_v42 = vpop.f32.mrb[226].mxu1  ;;  %v11794_v25 = vpop.f32.mrb[227].mxu0 }
 0x4bf   : > { %v8479_v28 = vadd.f32 %v11792_v47, %v15435_v44  ;;  %v11795_v10 = vadd.f32 %v11794_v25, %v11793_v23  ;;  %v11906_v36 = vpop.f32.mrb[227].mxu1 }
 0x4c0   : > { %v11907_v12 = vadd.f32 %v11906_v36, %v11905_v42 }
 0x4c1   : > { %v15577_v37 = vadd.f32 %v11904_v19, %v8479_v28  ;;  %v8482_v22 = vadd.f32 %v11795_v10, %v15438_v5 }
 0x4c3   : > { %v15580_v4 = vadd.f32 %v11907_v12, %v8482_v22  ;;  %v11796_v56 = vpop.f32.mrb[228].mxu0 }
 0x4c4   : > { %v11908_v39 = vpop.f32.mrb[228].mxu1  ;;  %v11797_v0 = vpop.f32.mrb[229].mxu0 }
 0x4c5   : > { %v11798_v51 = vadd.f32 %v11797_v0, %v11796_v56  ;;  %v11909_v48 = vpop.f32.mrb[229].mxu1  ;;  %v11799_v31 = vpop.f32.mrb[230].mxu0 }
 0x4c6   : > { %v11910_v18 = vadd.f32 %v11909_v48, %v11908_v39  ;;  %v11911_v14 = vpop.f32.mrb[230].mxu1  ;;  %v11800_v63 = vpop.f32.mrb[231].mxu0 }
 0x4c7   : > { %v8487_v44 = vadd.f32 %v11798_v51, %v15445_v46  ;;  %v11801_v41 = vadd.f32 %v11800_v63, %v11799_v31  ;;  %v11912_v35 = vpop.f32.mrb[231].mxu1 }
 0x4c8   : > { %v11913_v15 = vadd.f32 %v11912_v35, %v11911_v14 }
 0x4c9   : > { %v15583_v24 = vadd.f32 %v11910_v18, %v8487_v44  ;;  %v8490_v5 = vadd.f32 %v11801_v41, %v15448_v59 }
 0x4cb   : > { %v15586_v60 = vadd.f32 %v11913_v15, %v8490_v5  ;;  %v11802_v8 = vpop.f32.mrb[232].mxu0 }
 0x4cc   : > { %v11914_v11 = vpop.f32.mrb[232].mxu1  ;;  %v11803_v54 = vpop.f32.mrb[233].mxu0 }
 0x4cd   : > { %v11804_v3 = vadd.f32 %v11803_v54, %v11802_v8  ;;  %v11915_v55 = vpop.f32.mrb[233].mxu1  ;;  %v11805_v47 = vpop.f32.mrb[234].mxu0 }
 0x4ce   : > { %v11916_v30 = vadd.f32 %v11915_v55, %v11914_v11  ;;  %v11917_v23 = vpop.f32.mrb[234].mxu1  ;;  %v11806_v19 = vpop.f32.mrb[235].mxu0 }
 0x4cf   : > { %v8495_v46 = vadd.f32 %v11804_v3, %v15455_v43  ;;  %v11807_v42 = vadd.f32 %v11806_v19, %v11805_v47  ;;  %v11918_v25 = vpop.f32.mrb[235].mxu1 }
 0x4d0   : > { %v11919_v28 = vadd.f32 %v11918_v25, %v11917_v23 }
 0x4d1   : > { %v15589_v10 = vadd.f32 %v11916_v30, %v8495_v46  ;;  %v8498_v59 = vadd.f32 %v11807_v42, %v15458_v49 }
 0x4d3   : > { %v15592_v36 = vadd.f32 %v11919_v28, %v8498_v59  ;;  %v11808_v12 = vpop.f32.mrb[236].mxu0 }
 0x4d4   : > { %v11920_v22 = vpop.f32.mrb[236].mxu1  ;;  %v11809_v56 = vpop.f32.mrb[237].mxu0 }
 0x4d5   : > { %v11810_v39 = vadd.f32 %v11809_v56, %v11808_v12  ;;  %v11921_v0 = vpop.f32.mrb[237].mxu1  ;;  %v11811_v51 = vpop.f32.mrb[238].mxu0 }
 0x4d6   : > { %v11922_v48 = vadd.f32 %v11921_v0, %v11920_v22  ;;  %v11923_v31 = vpop.f32.mrb[238].mxu1  ;;  %v11812_v18 = vpop.f32.mrb[239].mxu0 }
 0x4d7   : > { %v8503_v43 = vadd.f32 %v11810_v39, %v15465_v26  ;;  %v11813_v14 = vadd.f32 %v11812_v18, %v11811_v51  ;;  %v11924_v63 = vpop.f32.mrb[239].mxu1 }
 0x4d8   : > { %v11925_v44 = vadd.f32 %v11924_v63, %v11923_v31 }
 0x4d9   : > { %v15595_v41 = vadd.f32 %v11922_v48, %v8503_v43  ;;  %v8506_v49 = vadd.f32 %v11813_v14, %v15468_v6 }
 0x4db   : > { %v15598_v35 = vadd.f32 %v11925_v44, %v8506_v49  ;;  %v11814_v15 = vpop.f32.mrb[240].mxu0 }
 0x4dc   : > { %v11926_v5 = vpop.f32.mrb[240].mxu1  ;;  %v11815_v8 = vpop.f32.mrb[241].mxu0 }
 0x4dd   : > { %v11816_v11 = vadd.f32 %v11815_v8, %v11814_v15  ;;  %v11927_v54 = vpop.f32.mrb[241].mxu1  ;;  %v11817_v3 = vpop.f32.mrb[242].mxu0 }
 0x4de   : > { %v11928_v55 = vadd.f32 %v11927_v54, %v11926_v5  ;;  %v11929_v47 = vpop.f32.mrb[242].mxu1  ;;  %v11818_v30 = vpop.f32.mrb[243].mxu0 }
 0x4df   : > { %v8511_v26 = vadd.f32 %v11816_v11, %v15475_v34  ;;  %v11819_v23 = vadd.f32 %v11818_v30, %v11817_v3  ;;  %v11930_v19 = vpop.f32.mrb[243].mxu1 }
 0x4e0   : > { %v11931_v46 = vadd.f32 %v11930_v19, %v11929_v47 }
 0x4e1   : > { %v15601_v42 = vadd.f32 %v11928_v55, %v8511_v26  ;;  %v8514_v6 = vadd.f32 %v11819_v23, %v15478_v53 }
 0x4e3   : > { %v15604_v25 = vadd.f32 %v11931_v46, %v8514_v6  ;;  %v11820_v28 = vpop.f32.mrb[244].mxu0 }
 0x4e4   : > { %v11932_v59 = vpop.f32.mrb[244].mxu1  ;;  %v11821_v12 = vpop.f32.mrb[245].mxu0 }
 0x4e5   : > { %v11822_v22 = vadd.f32 %v11821_v12, %v11820_v28  ;;  %v11933_v56 = vpop.f32.mrb[245].mxu1  ;;  %v11823_v39 = vpop.f32.mrb[246].mxu0 }
 0x4e6   : > { %v11934_v0 = vadd.f32 %v11933_v56, %v11932_v59  ;;  %v11935_v51 = vpop.f32.mrb[246].mxu1  ;;  %v11824_v48 = vpop.f32.mrb[247].mxu0 }
 0x4e7   : > { %v8519_v34 = vadd.f32 %v11822_v22, %v15485_v50  ;;  %v11825_v31 = vadd.f32 %v11824_v48, %v11823_v39  ;;  %v11936_v18 = vpop.f32.mrb[247].mxu1 }
 0x4e8   : > { %v11937_v43 = vadd.f32 %v11936_v18, %v11935_v51 }
 0x4e9   : > { %v15607_v14 = vadd.f32 %v11934_v0, %v8519_v34  ;;  %v8522_v53 = vadd.f32 %v11825_v31, %v15488_v52 }
 0x4eb   : > { %v15610_v63 = vadd.f32 %v11937_v43, %v8522_v53  ;;  %v11826_v44 = vpop.f32.mrb[248].mxu0 }
 0x4ec   : > { %v11938_v49 = vpop.f32.mrb[248].mxu1  ;;  %v11827_v15 = vpop.f32.mrb[249].mxu0 }
 0x4ed   : > { %v11828_v5 = vadd.f32 %v11827_v15, %v11826_v44  ;;  %v11939_v8 = vpop.f32.mrb[249].mxu1  ;;  %v11829_v11 = vpop.f32.mrb[250].mxu0 }
 0x4ee   : > { %v11940_v54 = vadd.f32 %v11939_v8, %v11938_v49  ;;  %v11941_v3 = vpop.f32.mrb[250].mxu1  ;;  %v11830_v55 = vpop.f32.mrb[251].mxu0 }
 0x4ef   : > { %v8527_v50 = vadd.f32 %v11828_v5, %v15495_v32  ;;  %v11831_v47 = vadd.f32 %v11830_v55, %v11829_v11  ;;  %v11942_v30 = vpop.f32.mrb[251].mxu1 }
 0x4f0   : > { %v11943_v26 = vadd.f32 %v11942_v30, %v11941_v3 }
 0x4f1   : > { %v15613_v23 = vadd.f32 %v11940_v54, %v8527_v50  ;;  %v8530_v52 = vadd.f32 %v11831_v47, %v15498_v2 }
 0x4f3   : > { %v15616_v19 = vadd.f32 %v11943_v26, %v8530_v52  ;;  %v11832_v46 = vpop.f32.mrb[252].mxu0  ;;  %v15635_v26 = vld [vmem:[%s15782_s5] ss:$0 sm:$0xff] }
 0x4f4   : > { %v11944_v6 = vpop.f32.mrb[252].mxu1  ;;  %v11833_v28 = vpop.f32.mrb[253].mxu0 }
 0x4f5   : > { %v11834_v59 = vadd.f32 %v11833_v28, %v11832_v46  ;;  %v11945_v12 = vpop.f32.mrb[253].mxu1  ;;  %v11835_v22 = vpop.f32.mrb[254].mxu0 }
 0x4f6   : > { %v11946_v56 = vadd.f32 %v11945_v12, %v11944_v6  ;;  %v11947_v39 = vpop.f32.mrb[254].mxu1  ;;  %v11836_v0 = vpop.f32.mrb[255].mxu0 }
 0x4f7   : > { %v8535_v32 = vadd.f32 %v11834_v59, %v15505_v61  ;;  %v11837_v51 = vadd.f32 %v11836_v0, %v11835_v22  ;;  %v11948_v48 = vpop.f32.mrb[255].mxu1 }
 0x4f8   : > { %v11949_v34 = vadd.f32 %v11948_v48, %v11947_v39 }
 0x4f9   : > { %v15619_v31 = vadd.f32 %v11946_v56, %v8535_v32  ;;  %v8538_v2 = vadd.f32 %v11837_v51, %v15508_v40  ;;  %v15628_v40 = vld [vmem:[%s15781_s4] ss:$0 sm:$0xff] }
 0x4fb   : > { %v15622_v18 = vadd.f32 %v11949_v34, %v8538_v2  ;;  %v11966_v43 = vpop.f32.mrb[0].mxu0 }
 0x4fc   : > { %v12078_v53 = vpop.f32.mrb[0].mxu1  ;;  %v11967_v44 = vpop.f32.mrb[1].mxu0 }
 0x4fd   : > { %v11968_v49 = vadd.f32 %v11967_v44, %v11966_v43  ;;  %v12079_v15 = vpop.f32.mrb[1].mxu1  ;;  %v11969_v5 = vpop.f32.mrb[2].mxu0 }
 0x4fe   : > { %v12080_v8 = vadd.f32 %v12079_v15, %v12078_v53  ;;  %v12081_v11 = vpop.f32.mrb[2].mxu1  ;;  %v11970_v54 = vpop.f32.mrb[3].mxu0 }
 0x4ff   : > { %v8737_v61 = vadd.f32 %v11968_v49, %v15515_v62  ;;  %v11971_v3 = vadd.f32 %v11970_v54, %v11969_v5  ;;  %v12082_v55 = vpop.f32.mrb[3].mxu1 }
 0x500   : > { %v12083_v50 = vadd.f32 %v12082_v55, %v12081_v11 }
 0x501   : > { %v8898_v47 = vadd.f32 %v12080_v8, %v8737_v61  ;;  %v8740_v30 = vadd.f32 %v11971_v3, %v15518_v33 }
 0x503   : > { %v9031_v52 = vmul.f32 %v15628_v40, %v8898_v47  ;;  %v8901_v62 = vadd.f32 %v12083_v50, %v8740_v30  ;;  %v11972_v46 = vpop.f32.mrb[4].mxu0 }
 0x504   : > { %v12084_v6 = vpop.f32.mrb[4].mxu1  ;;  %v11973_v28 = vpop.f32.mrb[5].mxu0 }
 0x505   : > { %v9070_v33 = vadd.f32 %v15635_v26, %v9031_v52  ;;  %v9032_v59 = vmul.f32 %v15628_v40, %v8901_v62  ;;  %v11974_v12 = vadd.f32 %v11973_v28, %v11972_v46  ;;  %v12085_v22 = vpop.f32.mrb[5].mxu1  ;;  %v11975_v56 = vpop.f32.mrb[6].mxu0 }
 0x506   : > { %v12086_v39 = vadd.f32 %v12085_v22, %v12084_v6  ;;  %v12087_v0 = vpop.f32.mrb[6].mxu1  ;;  %v11976_v32 = vpop.f32.mrb[7].mxu0 }
 0x507   : > { %9102 = vst [vmem:[%s15641_s17] sm:$0xff] %v9070_v33  ;;  %v9071_v51 = vadd.f32 %v15635_v26, %v9032_v59  ;;  %v8745_v48 = vadd.f32 %v11974_v12, %v15525_v58  ;;  %v11977_v34 = vadd.f32 %v11976_v32, %v11975_v56  ;;  %v12088_v2 = vpop.f32.mrb[7].mxu1 }
 0x508   : > { %v12089_v43 = vadd.f32 %v12088_v2, %v12087_v0 }
 0x509   : > { %9103 = vst [vmem:[%s15641_s17 + $0x8] sm:$0xff] %v9071_v51  ;;  %v8906_v53 = vadd.f32 %v12086_v39, %v8745_v48  ;;  %v8748_v44 = vadd.f32 %v11977_v34, %v15528_v29 }
 0x50b   : > { %v9033_v49 = vmul.f32 %v15628_v40, %v8906_v53  ;;  %v8909_v15 = vadd.f32 %v12089_v43, %v8748_v44  ;;  %v11978_v5 = vpop.f32.mrb[8].mxu0 }
 0x50c   : > { %v12090_v8 = vpop.f32.mrb[8].mxu1  ;;  %v11979_v11 = vpop.f32.mrb[9].mxu0 }
 0x50d   : > { %v9072_v54 = vadd.f32 %v15635_v26, %v9033_v49  ;;  %v9034_v61 = vmul.f32 %v15628_v40, %v8909_v15  ;;  %v11980_v58 = vadd.f32 %v11979_v11, %v11978_v5  ;;  %v12091_v3 = vpop.f32.mrb[9].mxu1  ;;  %v11981_v55 = vpop.f32.mrb[10].mxu0 }
 0x50e   : > { %v12092_v50 = vadd.f32 %v12091_v3, %v12090_v8  ;;  %v12093_v47 = vpop.f32.mrb[10].mxu1  ;;  %v11982_v30 = vpop.f32.mrb[11].mxu0 }
 0x50f   : > { %9104 = vst [vmem:[%s15641_s17 + $0x10] sm:$0xff] %v9072_v54  ;;  %v9073_v29 = vadd.f32 %v15635_v26, %v9034_v61  ;;  %v8753_v52 = vadd.f32 %v11980_v58, %v15535_v45  ;;  %v11983_v62 = vadd.f32 %v11982_v30, %v11981_v55  ;;  %v12094_v46 = vpop.f32.mrb[11].mxu1 }
 0x510   : > { %v12095_v6 = vadd.f32 %v12094_v46, %v12093_v47 }
 0x511   : > { %9105 = vst [vmem:[%s15641_s17 + $0x18] sm:$0xff] %v9073_v29  ;;  %v8914_v28 = vadd.f32 %v12092_v50, %v8753_v52  ;;  %v8756_v33 = vadd.f32 %v11983_v62, %v15538_v9 }
 0x513   : > { %v9035_v59 = vmul.f32 %v15628_v40, %v8914_v28  ;;  %v8917_v12 = vadd.f32 %v12095_v6, %v8756_v33  ;;  %v11984_v22 = vpop.f32.mrb[12].mxu0 }
 0x514   : > { %v12096_v56 = vpop.f32.mrb[12].mxu1  ;;  %v11985_v39 = vpop.f32.mrb[13].mxu0 }
 0x515   : > { %v9074_v0 = vadd.f32 %v15635_v26, %v9035_v59  ;;  %v9036_v32 = vmul.f32 %v15628_v40, %v8917_v12  ;;  %v11986_v45 = vadd.f32 %v11985_v39, %v11984_v22  ;;  %v12097_v51 = vpop.f32.mrb[13].mxu1  ;;  %v11987_v48 = vpop.f32.mrb[14].mxu0 }
 0x516   : > { %v12098_v34 = vadd.f32 %v12097_v51, %v12096_v56  ;;  %v12099_v2 = vpop.f32.mrb[14].mxu1  ;;  %v11988_v43 = vpop.f32.mrb[15].mxu0 }
 0x517   : > { %9106 = vst [vmem:[%s15641_s17 + $0x20] sm:$0xff] %v9074_v0  ;;  %v9075_v9 = vadd.f32 %v15635_v26, %v9036_v32  ;;  %v8761_v53 = vadd.f32 %v11986_v45, %v15545_v27  ;;  %v11989_v44 = vadd.f32 %v11988_v43, %v11987_v48  ;;  %v12100_v49 = vpop.f32.mrb[15].mxu1 }
 0x518   : > { %v12101_v15 = vadd.f32 %v12100_v49, %v12099_v2 }
 0x519   : > { %9107 = vst [vmem:[%s15641_s17 + $0x28] sm:$0xff] %v9075_v9  ;;  %v8922_v5 = vadd.f32 %v12098_v34, %v8761_v53  ;;  %v8764_v8 = vadd.f32 %v11989_v44, %v15548_v1 }
 0x51b   : > { %v9037_v11 = vmul.f32 %v15628_v40, %v8922_v5  ;;  %v8925_v54 = vadd.f32 %v12101_v15, %v8764_v8  ;;  %v11990_v61 = vpop.f32.mrb[16].mxu0 }
 0x51c   : > { %v12102_v58 = vpop.f32.mrb[16].mxu1  ;;  %v11991_v3 = vpop.f32.mrb[17].mxu0 }
 0x51d   : > { %v9076_v55 = vadd.f32 %v15635_v26, %v9037_v11  ;;  %v9038_v50 = vmul.f32 %v15628_v40, %v8925_v54  ;;  %v11992_v27 = vadd.f32 %v11991_v3, %v11990_v61  ;;  %v12103_v47 = vpop.f32.mrb[17].mxu1  ;;  %v11993_v30 = vpop.f32.mrb[18].mxu0 }
 0x51e   : > { %v12104_v29 = vadd.f32 %v12103_v47, %v12102_v58  ;;  %v12105_v52 = vpop.f32.mrb[18].mxu1  ;;  %v11994_v62 = vpop.f32.mrb[19].mxu0 }
 0x51f   : > { %9108 = vst [vmem:[%s15641_s17 + $0x30] sm:$0xff] %v9076_v55  ;;  %v9077_v1 = vadd.f32 %v15635_v26, %v9038_v50  ;;  %v8769_v46 = vadd.f32 %v11992_v27, %v15553_v16  ;;  %v11995_v6 = vadd.f32 %v11994_v62, %v11993_v30  ;;  %v12106_v28 = vpop.f32.mrb[19].mxu1 }
 0x520   : > { %v12107_v33 = vadd.f32 %v12106_v28, %v12105_v52 }
 0x521   : > { %9109 = vst [vmem:[%s15641_s17 + $0x38] sm:$0xff] %v9077_v1  ;;  %v8930_v59 = vadd.f32 %v12104_v29, %v8769_v46  ;;  %v8772_v12 = vadd.f32 %v11995_v6, %v15556_v13 }
 0x523   : > { %v9039_v22 = vmul.f32 %v15628_v40, %v8930_v59  ;;  %v8933_v56 = vadd.f32 %v12107_v33, %v8772_v12  ;;  %v11996_v39 = vpop.f32.mrb[20].mxu0 }
 0x524   : > { %v12108_v0 = vpop.f32.mrb[20].mxu1  ;;  %v11997_v32 = vpop.f32.mrb[21].mxu0 }
 0x525   : > { %v9078_v45 = vadd.f32 %v15635_v26, %v9039_v22  ;;  %v9040_v51 = vmul.f32 %v15628_v40, %v8933_v56  ;;  %v11998_v16 = vadd.f32 %v11997_v32, %v11996_v39  ;;  %v12109_v48 = vpop.f32.mrb[21].mxu1  ;;  %v11999_v34 = vpop.f32.mrb[22].mxu0 }
 0x526   : > { %v12110_v2 = vadd.f32 %v12109_v48, %v12108_v0  ;;  %v12111_v43 = vpop.f32.mrb[22].mxu1  ;;  %v12000_v9 = vpop.f32.mrb[23].mxu0 }
 0x527   : > { %9110 = vst [vmem:[%s15641_s17 + $0x40] sm:$0xff] %v9078_v45  ;;  %v9079_v13 = vadd.f32 %v15635_v26, %v9040_v51  ;;  %v8777_v53 = vadd.f32 %v11998_v16, %v15559_v17  ;;  %v12001_v44 = vadd.f32 %v12000_v9, %v11999_v34  ;;  %v12112_v49 = vpop.f32.mrb[23].mxu1 }
 0x528   : > { %v12113_v15 = vadd.f32 %v12112_v49, %v12111_v43 }
 0x529   : > { %9111 = vst [vmem:[%s15641_s17 + $0x48] sm:$0xff] %v9079_v13  ;;  %v8938_v5 = vadd.f32 %v12110_v2, %v8777_v53  ;;  %v8780_v8 = vadd.f32 %v12001_v44, %v15562_v20 }
 0x52b   : > { %v9041_v11 = vmul.f32 %v15628_v40, %v8938_v5  ;;  %v8941_v54 = vadd.f32 %v12113_v15, %v8780_v8  ;;  %v12002_v61 = vpop.f32.mrb[24].mxu0 }
 0x52c   : > { %v12114_v58 = vpop.f32.mrb[24].mxu1  ;;  %v12003_v3 = vpop.f32.mrb[25].mxu0 }
 0x52d   : > { %v9080_v55 = vadd.f32 %v15635_v26, %v9041_v11  ;;  %v9042_v50 = vmul.f32 %v15628_v40, %v8941_v54  ;;  %v12004_v17 = vadd.f32 %v12003_v3, %v12002_v61  ;;  %v12115_v27 = vpop.f32.mrb[25].mxu1  ;;  %v12005_v47 = vpop.f32.mrb[26].mxu0 }
 0x52e   : > { %v12116_v30 = vadd.f32 %v12115_v27, %v12114_v58  ;;  %v12117_v29 = vpop.f32.mrb[26].mxu1  ;;  %v12006_v52 = vpop.f32.mrb[27].mxu0 }
 0x52f   : > { %9112 = vst [vmem:[%s15641_s17 + $0x50] sm:$0xff] %v9080_v55  ;;  %v9081_v20 = vadd.f32 %v15635_v26, %v9042_v50  ;;  %v8785_v62 = vadd.f32 %v12004_v17, %v15565_v21  ;;  %v12007_v1 = vadd.f32 %v12006_v52, %v12005_v47  ;;  %v12118_v46 = vpop.f32.mrb[27].mxu1 }
 0x530   : > { %v12119_v6 = vadd.f32 %v12118_v46, %v12117_v29 }
 0x531   : > { %9113 = vst [vmem:[%s15641_s17 + $0x58] sm:$0xff] %v9081_v20  ;;  %v8946_v28 = vadd.f32 %v12116_v30, %v8785_v62  ;;  %v8788_v33 = vadd.f32 %v12007_v1, %v15568_v38 }
 0x533   : > { %v9043_v59 = vmul.f32 %v15628_v40, %v8946_v28  ;;  %v8949_v12 = vadd.f32 %v12119_v6, %v8788_v33  ;;  %v12008_v22 = vpop.f32.mrb[28].mxu0 }
 0x534   : > { %v12120_v56 = vpop.f32.mrb[28].mxu1  ;;  %v12009_v39 = vpop.f32.mrb[29].mxu0 }
 0x535   : > { %v9082_v0 = vadd.f32 %v15635_v26, %v9043_v59  ;;  %v9044_v32 = vmul.f32 %v15628_v40, %v8949_v12  ;;  %v12010_v21 = vadd.f32 %v12009_v39, %v12008_v22  ;;  %v12121_v45 = vpop.f32.mrb[29].mxu1  ;;  %v12011_v51 = vpop.f32.mrb[30].mxu0 }
 0x536   : > { %v12122_v16 = vadd.f32 %v12121_v45, %v12120_v56  ;;  %v12123_v48 = vpop.f32.mrb[30].mxu1  ;;  %v12012_v34 = vpop.f32.mrb[31].mxu0 }
 0x537   : > { %9114 = vst [vmem:[%s15641_s17 + $0x60] sm:$0xff] %v9082_v0  ;;  %v9083_v38 = vadd.f32 %v15635_v26, %v9044_v32  ;;  %v8793_v2 = vadd.f32 %v12010_v21, %v15571_v57  ;;  %v12013_v43 = vadd.f32 %v12012_v34, %v12011_v51  ;;  %v12124_v9 = vpop.f32.mrb[31].mxu1 }
 0x538   : > { %v12125_v13 = vadd.f32 %v12124_v9, %v12123_v48 }
 0x539   : > { %9115 = vst [vmem:[%s15641_s17 + $0x68] sm:$0xff] %v9083_v38  ;;  %v8954_v53 = vadd.f32 %v12122_v16, %v8793_v2  ;;  %v8796_v44 = vadd.f32 %v12013_v43, %v15574_v7 }
 0x53b   : > { %v9045_v49 = vmul.f32 %v15628_v40, %v8954_v53  ;;  %v8957_v15 = vadd.f32 %v12125_v13, %v8796_v44  ;;  %v12014_v5 = vpop.f32.mrb[32].mxu0 }
 0x53c   : > { %v12126_v8 = vpop.f32.mrb[32].mxu1  ;;  %v12015_v11 = vpop.f32.mrb[33].mxu0 }
 0x53d   : > { %v9084_v54 = vadd.f32 %v15635_v26, %v9045_v49  ;;  %v9046_v61 = vmul.f32 %v15628_v40, %v8957_v15  ;;  %v12016_v57 = vadd.f32 %v12015_v11, %v12014_v5  ;;  %v12127_v58 = vpop.f32.mrb[33].mxu1  ;;  %v12017_v3 = vpop.f32.mrb[34].mxu0 }
 0x53e   : > { %v12128_v55 = vadd.f32 %v12127_v58, %v12126_v8  ;;  %v12129_v50 = vpop.f32.mrb[34].mxu1  ;;  %v12018_v17 = vpop.f32.mrb[35].mxu0 }
 0x53f   : > { %9116 = vst [vmem:[%s15641_s17 + $0x70] sm:$0xff] %v9084_v54  ;;  %v9085_v7 = vadd.f32 %v15635_v26, %v9046_v61  ;;  %v8801_v27 = vadd.f32 %v12016_v57, %v15577_v37  ;;  %v12019_v47 = vadd.f32 %v12018_v17, %v12017_v3  ;;  %v12130_v30 = vpop.f32.mrb[35].mxu1 }
 0x540   : > { %v12131_v29 = vadd.f32 %v12130_v30, %v12129_v50 }
 0x541   : > { %9117 = vst [vmem:[%s15641_s17 + $0x78] sm:$0xff] %v9085_v7  ;;  %v8962_v52 = vadd.f32 %v12128_v55, %v8801_v27  ;;  %v8804_v20 = vadd.f32 %v12019_v47, %v15580_v4 }
 0x543   : > { %v9047_v62 = vmul.f32 %v15628_v40, %v8962_v52  ;;  %v8965_v1 = vadd.f32 %v12131_v29, %v8804_v20  ;;  %v12020_v46 = vpop.f32.mrb[36].mxu0 }
 0x544   : > { %v12132_v6 = vpop.f32.mrb[36].mxu1  ;;  %v12021_v28 = vpop.f32.mrb[37].mxu0 }
 0x545   : > { %v9086_v33 = vadd.f32 %v15635_v26, %v9047_v62  ;;  %v9048_v59 = vmul.f32 %v15628_v40, %v8965_v1  ;;  %v12022_v37 = vadd.f32 %v12021_v28, %v12020_v46  ;;  %v12133_v12 = vpop.f32.mrb[37].mxu1  ;;  %v12023_v22 = vpop.f32.mrb[38].mxu0 }
 0x546   : > { %v12134_v56 = vadd.f32 %v12133_v12, %v12132_v6  ;;  %v12135_v39 = vpop.f32.mrb[38].mxu1  ;;  %v12024_v0 = vpop.f32.mrb[39].mxu0 }
 0x547   : > { %9118 = vst [vmem:[%s15641_s17 + $0x80] sm:$0xff] %v9086_v33  ;;  %v9087_v4 = vadd.f32 %v15635_v26, %v9048_v59  ;;  %v8809_v32 = vadd.f32 %v12022_v37, %v15583_v24  ;;  %v12025_v21 = vadd.f32 %v12024_v0, %v12023_v22  ;;  %v12136_v45 = vpop.f32.mrb[39].mxu1 }
 0x548   : > { %v12137_v51 = vadd.f32 %v12136_v45, %v12135_v39 }
 0x549   : > { %9119 = vst [vmem:[%s15641_s17 + $0x88] sm:$0xff] %v9087_v4  ;;  %v8970_v16 = vadd.f32 %v12134_v56, %v8809_v32  ;;  %v8812_v48 = vadd.f32 %v12025_v21, %v15586_v60 }
 0x54b   : > { %v9049_v34 = vmul.f32 %v15628_v40, %v8970_v16  ;;  %v8973_v38 = vadd.f32 %v12137_v51, %v8812_v48  ;;  %v12026_v2 = vpop.f32.mrb[40].mxu0 }
 0x54c   : > { %v12138_v43 = vpop.f32.mrb[40].mxu1  ;;  %v12027_v9 = vpop.f32.mrb[41].mxu0 }
 0x54d   : > { %v9088_v13 = vadd.f32 %v15635_v26, %v9049_v34  ;;  %v9050_v53 = vmul.f32 %v15628_v40, %v8973_v38  ;;  %v12028_v24 = vadd.f32 %v12027_v9, %v12026_v2  ;;  %v12139_v44 = vpop.f32.mrb[41].mxu1  ;;  %v12029_v49 = vpop.f32.mrb[42].mxu0 }
 0x54e   : > { %v12140_v15 = vadd.f32 %v12139_v44, %v12138_v43  ;;  %v12141_v5 = vpop.f32.mrb[42].mxu1  ;;  %v12030_v8 = vpop.f32.mrb[43].mxu0 }
 0x54f   : > { %9120 = vst [vmem:[%s15641_s17 + $0x90] sm:$0xff] %v9088_v13  ;;  %v9089_v60 = vadd.f32 %v15635_v26, %v9050_v53  ;;  %v8817_v11 = vadd.f32 %v12028_v24, %v15589_v10  ;;  %v12031_v54 = vadd.f32 %v12030_v8, %v12029_v49  ;;  %v12142_v61 = vpop.f32.mrb[43].mxu1 }
 0x550   : > { %v12143_v57 = vadd.f32 %v12142_v61, %v12141_v5 }
 0x551   : > { %9121 = vst [vmem:[%s15641_s17 + $0x98] sm:$0xff] %v9089_v60  ;;  %v8978_v58 = vadd.f32 %v12140_v15, %v8817_v11  ;;  %v8820_v3 = vadd.f32 %v12031_v54, %v15592_v36 }
 0x553   : > { %v9051_v55 = vmul.f32 %v15628_v40, %v8978_v58  ;;  %v8981_v50 = vadd.f32 %v12143_v57, %v8820_v3  ;;  %v12032_v17 = vpop.f32.mrb[44].mxu0 }
 0x554   : > { %v12144_v7 = vpop.f32.mrb[44].mxu1  ;;  %v12033_v27 = vpop.f32.mrb[45].mxu0 }
 0x555   : > { %v9090_v47 = vadd.f32 %v15635_v26, %v9051_v55  ;;  %v9052_v30 = vmul.f32 %v15628_v40, %v8981_v50  ;;  %v12034_v10 = vadd.f32 %v12033_v27, %v12032_v17  ;;  %v12145_v29 = vpop.f32.mrb[45].mxu1  ;;  %v12035_v52 = vpop.f32.mrb[46].mxu0 }
 0x556   : > { %v12146_v20 = vadd.f32 %v12145_v29, %v12144_v7  ;;  %v12147_v62 = vpop.f32.mrb[46].mxu1  ;;  %v12036_v1 = vpop.f32.mrb[47].mxu0 }
 0x557   : > { %9122 = vst [vmem:[%s15641_s17 + $0xa0] sm:$0xff] %v9090_v47  ;;  %v9091_v36 = vadd.f32 %v15635_v26, %v9052_v30  ;;  %v8825_v46 = vadd.f32 %v12034_v10, %v15595_v41  ;;  %v12037_v6 = vadd.f32 %v12036_v1, %v12035_v52  ;;  %v12148_v28 = vpop.f32.mrb[47].mxu1 }
 0x558   : > { %v12149_v33 = vadd.f32 %v12148_v28, %v12147_v62 }
 0x559   : > { %9123 = vst [vmem:[%s15641_s17 + $0xa8] sm:$0xff] %v9091_v36  ;;  %v8986_v59 = vadd.f32 %v12146_v20, %v8825_v46  ;;  %v8828_v37 = vadd.f32 %v12037_v6, %v15598_v35 }
 0x55b   : > { %v9053_v12 = vmul.f32 %v15628_v40, %v8986_v59  ;;  %v8989_v22 = vadd.f32 %v12149_v33, %v8828_v37  ;;  %v12038_v56 = vpop.f32.mrb[48].mxu0 }
 0x55c   : > { %v12150_v39 = vpop.f32.mrb[48].mxu1  ;;  %v12039_v0 = vpop.f32.mrb[49].mxu0 }
 0x55d   : > { %v9092_v4 = vadd.f32 %v15635_v26, %v9053_v12  ;;  %v9054_v32 = vmul.f32 %v15628_v40, %v8989_v22  ;;  %v12040_v41 = vadd.f32 %v12039_v0, %v12038_v56  ;;  %v12151_v21 = vpop.f32.mrb[49].mxu1  ;;  %v12041_v45 = vpop.f32.mrb[50].mxu0 }
 0x55e   : > { %v12152_v51 = vadd.f32 %v12151_v21, %v12150_v39  ;;  %v12153_v16 = vpop.f32.mrb[50].mxu1  ;;  %v12042_v48 = vpop.f32.mrb[51].mxu0 }
 0x55f   : > { %9124 = vst [vmem:[%s15641_s17 + $0xb0] sm:$0xff] %v9092_v4  ;;  %v9093_v35 = vadd.f32 %v15635_v26, %v9054_v32  ;;  %v8833_v34 = vadd.f32 %v12040_v41, %v15601_v42  ;;  %v12043_v38 = vadd.f32 %v12042_v48, %v12041_v45  ;;  %v12154_v2 = vpop.f32.mrb[51].mxu1 }
 0x560   : > { %v12155_v43 = vadd.f32 %v12154_v2, %v12153_v16 }
 0x561   : > { %9125 = vst [vmem:[%s15641_s17 + $0xb8] sm:$0xff] %v9093_v35  ;;  %v8994_v9 = vadd.f32 %v12152_v51, %v8833_v34  ;;  %v8836_v13 = vadd.f32 %v12043_v38, %v15604_v25 }
 0x563   : > { %v9055_v53 = vmul.f32 %v15628_v40, %v8994_v9  ;;  %v8997_v24 = vadd.f32 %v12155_v43, %v8836_v13  ;;  %v12044_v44 = vpop.f32.mrb[52].mxu0 }
 0x564   : > { %v12156_v49 = vpop.f32.mrb[52].mxu1  ;;  %v12045_v15 = vpop.f32.mrb[53].mxu0 }
 0x565   : > { %v9094_v5 = vadd.f32 %v15635_v26, %v9055_v53  ;;  %v9056_v8 = vmul.f32 %v15628_v40, %v8997_v24  ;;  %v12046_v42 = vadd.f32 %v12045_v15, %v12044_v44  ;;  %v12157_v60 = vpop.f32.mrb[53].mxu1  ;;  %v12047_v11 = vpop.f32.mrb[54].mxu0 }
 0x566   : > { %v12158_v54 = vadd.f32 %v12157_v60, %v12156_v49  ;;  %v12159_v61 = vpop.f32.mrb[54].mxu1  ;;  %v12048_v57 = vpop.f32.mrb[55].mxu0 }
 0x567   : > { %9126 = vst [vmem:[%s15641_s17 + $0xc0] sm:$0xff] %v9094_v5  ;;  %v9095_v25 = vadd.f32 %v15635_v26, %v9056_v8  ;;  %v8841_v58 = vadd.f32 %v12046_v42, %v15607_v14  ;;  %v12049_v3 = vadd.f32 %v12048_v57, %v12047_v11  ;;  %v12160_v55 = vpop.f32.mrb[55].mxu1 }
 0x568   : > { %v12161_v50 = vadd.f32 %v12160_v55, %v12159_v61 }
 0x569   : > { %9127 = vst [vmem:[%s15641_s17 + $0xc8] sm:$0xff] %v9095_v25  ;;  %v9002_v17 = vadd.f32 %v12158_v54, %v8841_v58  ;;  %v8844_v7 = vadd.f32 %v12049_v3, %v15610_v63 }
 0x56b   : > { %v9057_v27 = vmul.f32 %v15628_v40, %v9002_v17  ;;  %v9005_v47 = vadd.f32 %v12161_v50, %v8844_v7  ;;  %v12050_v30 = vpop.f32.mrb[56].mxu0 }
 0x56c   : > { %v12162_v10 = vpop.f32.mrb[56].mxu1  ;;  %v12051_v29 = vpop.f32.mrb[57].mxu0 }
 0x56d   : > { %v9096_v52 = vadd.f32 %v15635_v26, %v9057_v27  ;;  %v9058_v20 = vmul.f32 %v15628_v40, %v9005_v47  ;;  %v12052_v14 = vadd.f32 %v12051_v29, %v12050_v30  ;;  %v12163_v62 = vpop.f32.mrb[57].mxu1  ;;  %v12053_v1 = vpop.f32.mrb[58].mxu0 }
 0x56e   : > { %v12164_v36 = vadd.f32 %v12163_v62, %v12162_v10  ;;  %v12165_v46 = vpop.f32.mrb[58].mxu1  ;;  %v12054_v6 = vpop.f32.mrb[59].mxu0 }
 0x56f   : > { %9128 = vst [vmem:[%s15641_s17 + $0xd0] sm:$0xff] %v9096_v52  ;;  %v9097_v63 = vadd.f32 %v15635_v26, %v9058_v20  ;;  %v8849_v28 = vadd.f32 %v12052_v14, %v15613_v23  ;;  %v12055_v33 = vadd.f32 %v12054_v6, %v12053_v1  ;;  %v12166_v59 = vpop.f32.mrb[59].mxu1 }
 0x570   : > { %v12167_v37 = vadd.f32 %v12166_v59, %v12165_v46 }
 0x571   : > { %9129 = vst [vmem:[%s15641_s17 + $0xd8] sm:$0xff] %v9097_v63  ;;  %v9010_v12 = vadd.f32 %v12164_v36, %v8849_v28  ;;  %v8852_v22 = vadd.f32 %v12055_v33, %v15616_v19 }
 0x573   : > { %v9059_v56 = vmul.f32 %v15628_v40, %v9010_v12  ;;  %v9013_v39 = vadd.f32 %v12167_v37, %v8852_v22  ;;  %v12056_v0 = vpop.f32.mrb[60].mxu0 }
 0x574   : > { %v12168_v4 = vpop.f32.mrb[60].mxu1  ;;  %v12057_v32 = vpop.f32.mrb[61].mxu0 }
 0x575   : > { %v9098_v41 = vadd.f32 %v15635_v26, %v9059_v56  ;;  %v9060_v21 = vmul.f32 %v15628_v40, %v9013_v39  ;;  %v12058_v23 = vadd.f32 %v12057_v32, %v12056_v0  ;;  %v12169_v45 = vpop.f32.mrb[61].mxu1  ;;  %v12059_v51 = vpop.f32.mrb[62].mxu0 }
 0x576   : > { %v12170_v16 = vadd.f32 %v12169_v45, %v12168_v4  ;;  %v12171_v48 = vpop.f32.mrb[62].mxu1  ;;  %v12060_v35 = vpop.f32.mrb[63].mxu0 }
 0x577   : > { %9130 = vst [vmem:[%s15641_s17 + $0xe0] sm:$0xff] %v9098_v41  ;;  %v9099_v19 = vadd.f32 %v15635_v26, %v9060_v21  ;;  %v8857_v34 = vadd.f32 %v12058_v23, %v15619_v31  ;;  %v12061_v38 = vadd.f32 %v12060_v35, %v12059_v51  ;;  %v12172_v2 = vpop.f32.mrb[63].mxu1 }
 0x578   : > { %v12173_v43 = vadd.f32 %v12172_v2, %v12171_v48 }
 0x579   : > { %9131 = vst [vmem:[%s15641_s17 + $0xe8] sm:$0xff] %v9099_v19  ;;  %v9018_v9 = vadd.f32 %v12170_v16, %v8857_v34  ;;  %v8860_v13 = vadd.f32 %v12061_v38, %v15622_v18 }
 0x57b   : > { %v9061_v53 = vmul.f32 %v15628_v40, %v9018_v9  ;;  %v9021_v24 = vadd.f32 %v12173_v43, %v8860_v13 }
 0x57d   : > { %v9100_v44 = vadd.f32 %v15635_v26, %v9061_v53  ;;  %v9062_v49 = vmul.f32 %v15628_v40, %v9021_v24 }
 0x57f   : > { %9132 = vst [vmem:[%s15641_s17 + $0xf0] sm:$0xff] %v9100_v44  ;;  %v9101_v15 = vadd.f32 %v15635_v26, %v9062_v49 }
 0x581   : > { %9133 = vst [vmem:[%s15641_s17 + $0xf8] sm:$0xff] %v9101_v15 }
 0x582 PF: > { %s16_s23 = sadd.s32 1, %s13373_s23   ;;  %s15784_s21 = smov %s13369_s22 }
 0x583   : > { %p13_p5 = scmp.ge.s32.totalorder %s16_s23, 4   ;;  %s15785_s22 = smov %s15787_s24 }
 0x585   :  { %15 = sbr.rel (!%p13_p5) target bundleno = 2 (0x2), region = 89 }

</bundles_post_ra>
